<compile_context>
chip_gen: v5e
topology: v5e:2x2
jax: 0.10.0
libtpu: 0.0.40
codegen_flags: <defaults>
</compile_context>

<pallas_src>
from functools import partial

import jax
import jax.numpy as jnp
from jax.experimental import pallas as pl
from jax.experimental.pallas import tpu as pltpu

BN_EPS = 1e-5
_PAD = 6                       # max dilation padding among the ASPP branches (conv4: d=6)
_VMEM_LIMIT = 64 * 1024 * 1024


def _prelu(x, a):
    return jnp.maximum(x, 0.0) + a * jnp.minimum(x, 0.0)


def _bn_affine(sum_, sq_, count, gamma, beta):
    """Per-channel (scale, shift) from accumulated sum / sum-of-squares (biased var)."""
    mean = sum_ / count
    var = jnp.maximum(sq_ / count - mean * mean, 0.0)
    scale = gamma * jax.lax.rsqrt(var + BN_EPS)
    shift = beta - mean * scale
    return scale, shift


def _const_spec(shape):
    nd = len(shape)
    return pl.BlockSpec(tuple(shape), lambda *_: (0,) * nd)


def _cparams(sem):
    return pltpu.CompilerParams(dimension_semantics=sem, vmem_limit_bytes=_VMEM_LIMIT)


def _pick_band(extent, inner_rows, max_rows=1024):
    """Band height dividing `extent`: >=2 grid steps when possible, (band*inner_rows)
    a multiple of 8, bounded row footprint.  Falls back to the full extent."""
    for d in range(extent, 0, -1):
        if extent % d:
            continue
        rows = d * inner_rows
        if rows % 8 == 0 and rows <= max_rows and extent // d >= 2:
            return d
    return extent


def _pick_tile(m, bytes_per_row, budget=6 * 1024 * 1024):
    """Largest row tile dividing m that fits a (double-buffered) VMEM budget."""
    cap = max(8, budget // max(bytes_per_row, 1))
    for t in (2048, 1024, 512, 256, 128, 64, 32, 16, 8):
        if t <= cap and m % t == 0:
            return t
    return m


# ---------------------------------------------------------------------------
# Kernel 1: down_conv  3x3 pad-1 conv + bias (in-VMEM padding, row-band tiled)
#           + per-batch BN-stat partials.  Output is pre-BN, bf16.
# ---------------------------------------------------------------------------
def _down_conv_kernel(x_ref, w_ref, b_ref, z_ref, sum_ref, sq_ref,
                      pad_ref, acc_sum, acc_sq, *, bh):
    b = pl.program_id(1)
    nb = pl.num_programs(1)
    _, H, W, Cin = x_ref.shape
    Cout = w_ref.shape[2]

    @pl.when(b == 0)
    def _():
        # Once per image: zero (border stays zero), copy interior, reset stat scratch.
        pad_ref[...] = jnp.zeros_like(pad_ref)
        pad_ref[1:1 + H, 1:1 + W, :] = x_ref[0].astype(pad_ref.dtype)
        acc_sum[...] = jnp.zeros_like(acc_sum)
        acc_sq[...] = jnp.zeros_like(acc_sq)

    h0 = b * bh
    acc = jnp.zeros((bh * W, Cout), jnp.float32)
    for kh in range(3):
        for kw in range(3):
            patch = pad_ref[pl.ds(h0 + kh, bh), pl.ds(kw, W), :].reshape(bh * W, Cin)
            acc = acc + jnp.dot(patch.astype(jnp.bfloat16), w_ref[kh * 3 + kw],
                                preferred_element_type=jnp.float32)
    z = acc + b_ref[...]
    z_ref[0] = z.astype(z_ref.dtype)

    acc_sum[...] += jnp.sum(z, axis=0, keepdims=True)
    acc_sq[...] += jnp.sum(z * z, axis=0, keepdims=True)

    @pl.when(b == nb - 1)
    def _():
        sum_ref[0] = acc_sum[...]
        sq_ref[0] = acc_sq[...]


def down_conv_stats(x, w, b):
    """x: (N,H,W,Cin) bf16; returns pre-BN z0 (N, H*W, Cout) bf16 + per-batch stats."""
    N, H, W, Cin = x.shape
    Cout = w.shape[0]
    bh = _pick_band(H, W)
    nb = H // bh
    wt = jnp.transpose(w, (2, 3, 1, 0)).reshape(9, Cin, Cout).astype(jnp.bfloat16)
    return pl.pallas_call(
        partial(_down_conv_kernel, bh=bh),
        out_shape=(jax.ShapeDtypeStruct((N, H * W, Cout), jnp.bfloat16),
                   jax.ShapeDtypeStruct((N, 1, Cout), jnp.float32),
                   jax.ShapeDtypeStruct((N, 1, Cout), jnp.float32)),
        grid=(N, nb),
        in_specs=[pl.BlockSpec((1, H, W, Cin), lambda n, i: (n, 0, 0, 0)),
                  _const_spec((9, Cin, Cout)),
                  _const_spec((1, Cout))],
        out_specs=(pl.BlockSpec((1, bh * W, Cout), lambda n, i: (n, i, 0)),
                   pl.BlockSpec((1, 1, Cout), lambda n, i: (n, 0, 0)),
                   pl.BlockSpec((1, 1, Cout), lambda n, i: (n, 0, 0))),
        scratch_shapes=[pltpu.VMEM((H + 2, W + 2, Cin), jnp.float32),
                        pltpu.VMEM((1, Cout), jnp.float32),
                        pltpu.VMEM((1, Cout), jnp.float32)],
        compiler_params=_cparams(("parallel", "arbitrary")),
    )(x, wt, b.reshape(1, Cout).astype(jnp.float32))


# ---------------------------------------------------------------------------
# Kernel 2: ASPP branches conv1 (1x1), conv2 (d=1), conv3 (d=4), conv4 (d=6),
#           row-band tiled.  Deferred down_conv BN+PReLU applied once per image into a
#           VMEM pad scratch; sliced stores (no concat); per-batch BN-stat partials and
#           the conv5 pooled spatial sum are extra tiny outputs.
# ---------------------------------------------------------------------------
def _aspp_kernel(x_ref, scale_ref, shift_ref, alpha_ref,
                 w1_ref, b1_ref, w2_ref, b2_ref, w3_ref, b3_ref, w4_ref, b4_ref,
                 o_ref, sum_ref, sq_ref, pool_ref,
                 pad_ref, acc_sum, acc_sq, pool_scr, *, bh):
    b = pl.program_id(1)
    nb = pl.num_programs(1)
    _, Hs, Ws, C = x_ref.shape
    dd = w1_ref.shape[1]
    M = bh * Ws

    @pl.when(b == 0)
    def _():
        # Once per image (not per band): zero pad scratch (border must be zero), apply
        # the deferred down_conv BN + PReLU, stash activation, take conv5 spatial sum.
        pad_ref[...] = jnp.zeros_like(pad_ref)
        a = (x_ref[0].astype(jnp.float32) * scale_ref[...].reshape(1, 1, C)
             + shift_ref[...].reshape(1, 1, C))
        act = _prelu(a, alpha_ref[...].reshape(1, 1, C))
        pad_ref[_PAD:_PAD + Hs, _PAD:_PAD + Ws, :] = act
        pool_scr[...] = jnp.sum(act, axis=(0, 1), keepdims=True).reshape(1, C)
        acc_sum[...] = jnp.zeros_like(acc_sum)
        acc_sq[...] = jnp.zeros_like(acc_sq)

    r0 = b * bh

    def emit(f, col):  # sliced store + per-branch stat accumulation (no concatenate)
        o_ref[0, :, col:col + dd] = f.astype(o_ref.dtype)
        acc_sum[:, col:col + dd] += jnp.sum(f, axis=0, keepdims=True)
        acc_sq[:, col:col + dd] += jnp.sum(f * f, axis=0, keepdims=True)

    x1 = pad_ref[pl.ds(_PAD + r0, bh), pl.ds(_PAD, Ws), :].reshape(M, C)
    f1 = jnp.dot(x1.astype(jnp.bfloat16), w1_ref[...],
                 preferred_element_type=jnp.float32) + b1_ref[...]
    emit(f1, 0)

    def dilated(w_ref_, b_ref_, d, col):
        acc = jnp.zeros((M, dd), jnp.float32)
        for kh in range(3):
            for kw in range(3):
                oh = _PAD + r0 - d + kh * d
                ow = _PAD - d + kw * d
                patch = pad_ref[pl.ds(oh, bh), pl.ds(ow, Ws), :].reshape(M, C)
                acc = acc + jnp.dot(patch.astype(jnp.bfloat16), w_ref_[kh * 3 + kw],
                                    preferred_element_type=jnp.float32)
        emit(acc + b_ref_[...], col)

    dilated(w2_ref, b2_ref, 1, dd)        # conv2: k=3, d=1, p=1
    dilated(w3_ref, b3_ref, 4, 2 * dd)    # conv3: k=3, d=4, p=4
    dilated(w4_ref, b4_ref, 6, 3 * dd)    # conv4: k=3, d=6, p=6

    @pl.when(b == nb - 1)
    def _():
        sum_ref[0] = acc_sum[...]
        sq_ref[0] = acc_sq[...]
        pool_ref[0] = pool_scr[...]


def aspp_branches(z0u, scale0u, shift0u, alpha0u, p1, p2, p3, p4):
    N, Hs, Ws, C = z0u.shape
    dd = p1[0].shape[0]
    bh = _pick_band(Hs, Ws)
    nb = Hs // bh
    w1 = p1[0][:, :, 0, 0].T.astype(jnp.bfloat16)                                 # (C, dd)
    w2 = jnp.transpose(p2[0], (2, 3, 1, 0)).reshape(9, C, dd).astype(jnp.bfloat16)
    w3 = jnp.transpose(p3[0], (2, 3, 1, 0)).reshape(9, C, dd).astype(jnp.bfloat16)
    w4 = jnp.transpose(p4[0], (2, 3, 1, 0)).reshape(9, C, dd).astype(jnp.bfloat16)
    b1, b2, b3, b4 = (p[1].reshape(1, dd).astype(jnp.float32) for p in (p1, p2, p3, p4))
    return pl.pallas_call(
        partial(_aspp_kernel, bh=bh),
        out_shape=(jax.ShapeDtypeStruct((N, Hs * Ws, 4 * dd), jnp.bfloat16),
                   jax.ShapeDtypeStruct((N, 1, 4 * dd), jnp.float32),
                   jax.ShapeDtypeStruct((N, 1, 4 * dd), jnp.float32),
                   jax.ShapeDtypeStruct((N, 1, C), jnp.float32)),
        grid=(N, nb),
        in_specs=[pl.BlockSpec((1, Hs, Ws, C), lambda n, i: (n, 0, 0, 0)),
                  _const_spec((1, C)), _const_spec((1, C)), _const_spec((1, C)),
                  _const_spec((C, dd)), _const_spec((1, dd)),
                  _const_spec((9, C, dd)), _const_spec((1, dd)),
                  _const_spec((9, C, dd)), _const_spec((1, dd)),
                  _const_spec((9, C, dd)), _const_spec((1, dd))],
        out_specs=(pl.BlockSpec((1, bh * Ws, 4 * dd), lambda n, i: (n, i, 0)),
                   pl.BlockSpec((1, 1, 4 * dd), lambda n, i: (n, 0, 0)),
                   pl.BlockSpec((1, 1, 4 * dd), lambda n, i: (n, 0, 0)),
                   pl.BlockSpec((1, 1, C), lambda n, i: (n, 0, 0))),
        scratch_shapes=[pltpu.VMEM((Hs + 2 * _PAD, Ws + 2 * _PAD, C), jnp.float32),
                        pltpu.VMEM((1, 4 * dd), jnp.float32),
                        pltpu.VMEM((1, 4 * dd), jnp.float32),
                        pltpu.VMEM((1, C), jnp.float32)],
        compiler_params=_cparams(("parallel", "arbitrary")),
    )(z0u, scale0u, shift0u, alpha0u, w1, b1, w2, b2, w3, b3, w4, b4)


# ---------------------------------------------------------------------------
# Kernel 3: fuse 1x1 — branch BN + PReLU fused in, per-batch f5 contribution as a bias,
#           per-batch BN-stat partials, row-tiled within each batch.
# ---------------------------------------------------------------------------
def _fuse_kernel(x_ref, scale_ref, shift_ref, alpha_ref, w_ref, bias_ref,
                 z_ref, sum_ref, sq_ref, acc_sum, acc_sq):
    t = pl.program_id(1)
    nt = pl.num_programs(1)

    @pl.when(t == 0)
    def _():
        acc_sum[...] = jnp.zeros_like(acc_sum)
        acc_sq[...] = jnp.zeros_like(acc_sq)

    a = x_ref[0].astype(jnp.float32) * scale_ref[...] + shift_ref[...]
    a = _prelu(a, alpha_ref[...])
    z = jnp.dot(a.astype(jnp.bfloat16), w_ref[...],
                preferred_element_type=jnp.float32) + bias_ref[0]
    z_ref[0] = z.astype(z_ref.dtype)

    acc_sum[...] += jnp.sum(z, axis=0, keepdims=True)
    acc_sq[...] += jnp.sum(z * z, axis=0, keepdims=True)

    @pl.when(t == nt - 1)
    def _():
        sum_ref[0] = acc_sum[...]
        sq_ref[0] = acc_sq[...]


def fuse_matmul(cat4, scale_b, shift_b, alpha_b, wf4, bias5):
    N, M, K = cat4.shape
    Cout = wf4.shape[1]
    tm = _pick_tile(M, bytes_per_row=4 * (K + Cout) + 8 * (K + Cout))
    nt = M // tm
    return pl.pallas_call(
        _fuse_kernel,
        out_shape=(jax.ShapeDtypeStruct((N, M, Cout), jnp.bfloat16),
                   jax.ShapeDtypeStruct((N, 1, Cout), jnp.float32),
                   jax.ShapeDtypeStruct((N, 1, Cout), jnp.float32)),
        grid=(N, nt),
        in_specs=[pl.BlockSpec((1, tm, K), lambda n, t: (n, t, 0)),
                  _const_spec((1, K)), _const_spec((1, K)), _const_spec((1, K)),
                  _const_spec((K, Cout)),
                  pl.BlockSpec((1, 1, Cout), lambda n, t: (n, 0, 0))],
        out_specs=(pl.BlockSpec((1, tm, Cout), lambda n, t: (n, t, 0)),
                   pl.BlockSpec((1, 1, Cout), lambda n, t: (n, 0, 0)),
                   pl.BlockSpec((1, 1, Cout), lambda n, t: (n, 0, 0))),
        scratch_shapes=[pltpu.VMEM((1, Cout), jnp.float32),
                        pltpu.VMEM((1, Cout), jnp.float32)],
        compiler_params=_cparams(("parallel", "arbitrary")),
    )(cat4, scale_b, shift_b, alpha_b, wf4.astype(jnp.bfloat16), bias5)


# ---------------------------------------------------------------------------
# Kernel 4: fuse BN + PReLU, then up_conv (1x1) in the unfolded domain.  Because the
#           fuse output channels are fold-position-major (j, c), this is 4 dense
#           (Cout x Cout) matmuls — no block-diagonal kron weight.
# ---------------------------------------------------------------------------
def _up_conv_kernel(x_ref, scale_ref, shift_ref, alpha_ref, w_ref, b_ref, o_ref, *, cout):
    a = x_ref[...].astype(jnp.float32) * scale_ref[...] + shift_ref[...]
    a = _prelu(a, alpha_ref[...]).astype(jnp.bfloat16)
    for j in range(4):
        aj = a[:, j * cout:(j + 1) * cout]
        yj = jnp.dot(aj, w_ref[...], preferred_element_type=jnp.float32) + b_ref[...]
        o_ref[:, j * cout:(j + 1) * cout] = yj.astype(o_ref.dtype)


def up_conv(zf2d, scaleF, shiftF, alphaF, w_up, b_up):
    M, fold_C = zf2d.shape
    Cout = w_up.shape[1]
    tm = _pick_tile(M, bytes_per_row=8 * fold_C + 8 * fold_C)
    return pl.pallas_call(
        partial(_up_conv_kernel, cout=Cout),
        out_shape=jax.ShapeDtypeStruct((M, fold_C), jnp.bfloat16),
        grid=(M // tm,),
        in_specs=[pl.BlockSpec((tm, fold_C), lambda i: (i, 0)),
                  _const_spec((1, fold_C)), _const_spec((1, fold_C)), _const_spec((1, fold_C)),
                  _const_spec((Cout, Cout)), _const_spec((1, Cout))],
        out_specs=pl.BlockSpec((tm, fold_C), lambda i: (i, 0)),
        compiler_params=_cparams(("parallel",)),
    )(zf2d, scaleF, shiftF, alphaF, w_up.astype(jnp.bfloat16),
      b_up.reshape(1, Cout).astype(jnp.float32))


# ---------------------------------------------------------------------------
# Plain-JAX relayouts (pure permutations — commute with per-channel BN / PReLU)
# ---------------------------------------------------------------------------
def _unfold_win2(x):
    """nn.Unfold(kernel=2, stride=2) + view: (N,H,W,C) -> (N,Hs,Ws,C*4);
    fold-channel index = c*4 + kh*2 + kw (PyTorch Unfold ordering)."""
    N, H, W, C = x.shape
    Hs, Ws = H // 2, W // 2
    x = x.reshape(N, Hs, 2, Ws, 2, C)
    x = jnp.transpose(x, (0, 1, 3, 5, 2, 4))      # (N, Hs, Ws, C, kh, kw)
    return x.reshape(N, Hs, Ws, C * 4)


def _fold_win2_jc(x, C):
    """F.fold(k=2, s=2) for fold-position-major channel order j*C + c, j = kh*2 + kw."""
    N, Hs, Ws, _ = x.shape
    x = x.reshape(N, Hs, Ws, 2, 2, C)
    x = jnp.transpose(x, (0, 1, 3, 2, 4, 5))      # (N, Hs, kh, Ws, kw, C)
    return x.reshape(N, Hs * 2, Ws * 2, C)


# ---------------------------------------------------------------------------
# Forward pass
# ---------------------------------------------------------------------------
def fold_conv_aspp_forward(x_nchw, params):
    x = jnp.transpose(x_nchw, (0, 2, 3, 1)).astype(jnp.bfloat16)     # NCHW -> NHWC, bf16
    N, H, W, _ = x.shape

    # --- down_conv: 3x3 pad-1 conv + bias, in-VMEM pad, per-batch BN-stat partials ---
    w0, b0, g0, be0, a0 = params['down_conv']
    Cout = w0.shape[0]
    z0, s0, q0 = down_conv_stats(x, w0, b0)
    sum0 = jnp.sum(s0, axis=(0, 1)).reshape(1, Cout)
    sq0 = jnp.sum(q0, axis=(0, 1)).reshape(1, Cout)
    scale0, shift0 = _bn_affine(sum0, sq0, N * H * W, g0.reshape(1, -1), be0.reshape(1, -1))

    # --- unfold(2,2): relayout of the pre-BN bf16 output; BN/PReLU deferred into kernel 2.
    # TODO(synk): fuse this relayout into kernel 1/2 (stride-2 ref loads) to remove the pass.
    Hs, Ws, fold_C = H // 2, W // 2, 4 * Cout
    z0u = _unfold_win2(z0.reshape(N, H, W, Cout))
    scale0u = jnp.repeat(scale0, 4, axis=1)
    shift0u = jnp.repeat(shift0, 4, axis=1)
    alpha0u = jnp.full((1, fold_C), a0, jnp.float32)

    # --- conv1..conv4 fused + per-batch stats + conv5 pooled sums (no HBM re-read) ---
    dd = params['conv1'][0].shape[0]
    cat4, sb, qb, pool_sum = aspp_branches(z0u, scale0u, shift0u, alpha0u,
                                           params['conv1'], params['conv2'],
                                           params['conv3'], params['conv4'])
    g_cat = jnp.concatenate([params[k][2] for k in ('conv1', 'conv2', 'conv3', 'conv4')]).reshape(1, -1)
    be_cat = jnp.concatenate([params[k][3] for k in ('conv1', 'conv2', 'conv3', 'conv4')]).reshape(1, -1)
    scale_b, shift_b = _bn_affine(jnp.sum(sb, axis=(0, 1)).reshape(1, -1),
                                  jnp.sum(qb, axis=(0, 1)).reshape(1, -1),
                                  N * Hs * Ws, g_cat, be_cat)
    alpha_b = jnp.concatenate([jnp.full((dd,), params[k][4], jnp.float32)
                               for k in ('conv1', 'conv2', 'conv3', 'conv4')]).reshape(1, -1)

    # --- conv5 branch (tiny, plain JAX) from the kernel-side pooled spatial sums ---
    w5, b5, g5, be5, a5 = params['conv5']
    pooled = pool_sum.reshape(N, fold_C) / float(Hs * Ws)
    z5 = pooled @ w5[:, :, 0, 0].T + b5.reshape(1, dd)
    mu5 = jnp.mean(z5, axis=0, keepdims=True)
    var5 = jnp.mean((z5 - mu5) ** 2, axis=0, keepdims=True)
    f5 = _prelu(g5.reshape(1, dd) * (z5 - mu5) * jax.lax.rsqrt(var5 + BN_EPS)
                + be5.reshape(1, dd), a5)                              # (N, dd), fully activated

    # --- fuse 1x1: branch BN+PReLU fused in; f5 (constant over space) folded into a
    #     per-batch bias; output channels permuted to fold-position-major (j, c). ---
    wf, bf, gf, bef, af = params['fuse']
    wf2d = wf[:, :, 0, 0]                                              # (fold_C, 5*dd)
    perm = jnp.arange(fold_C).reshape(Cout, 4).T.reshape(-1)           # (j,c)-order -> (c,j)-index
    wf4 = wf2d[:, :4 * dd].T[:, perm]                                  # (4*dd, fold_C) permuted
    bias5 = (f5 @ wf2d[:, 4 * dd:].T + bf.reshape(1, fold_C))[:, perm]  # (N, fold_C)
    zF, sF, qF = fuse_matmul(cat4, scale_b, shift_b, alpha_b, wf4,
                             bias5.reshape(N, 1, fold_C))
    scaleF, shiftF = _bn_affine(jnp.sum(sF, axis=(0, 1)).reshape(1, -1),
                                jnp.sum(qF, axis=(0, 1)).reshape(1, -1),
                                N * Hs * Ws, gf[perm].reshape(1, -1), bef[perm].reshape(1, -1))
    alphaF = jnp.full((1, fold_C), af, jnp.float32)

    # --- fuse-BN+PReLU + up_conv (4 dense matmuls in the unfolded domain) ---
    wu, bu = params['up_conv']
    yu = up_conv(zF.reshape(N * Hs * Ws, fold_C), scaleF, shiftF, alphaF,
                 wu[:, :, 0, 0].T, bu)                                 # (M, fold_C) bf16

    # --- F.fold(2,2) + NHWC->NCHW: one fused XLA copy pass on the final tensor.
    # TODO(synk): fuse into kernel 4's output stores (strided stores / out_spec arithmetic).
    y = _fold_win2_jc(yu.reshape(N, Hs, Ws, fold_C), Cout)
    return jnp.transpose(y, (0, 3, 1, 2)).astype(jnp.float32)          # NHWC -> NCHW


# ---------------------------------------------------------------------------
# Deterministic synthetic parameters (shapes from FoldConv_aspp.__init__)
# ---------------------------------------------------------------------------
def init_params(key, in_channel, out_channel, win_size=2):
    fold_C = out_channel * win_size * win_size
    down_dim = fold_C // 2
    keys = iter(jax.random.split(key, 40))

    def conv_block(cin, cout, k):
        w = 0.1 * jax.random.normal(next(keys), (cout, cin, k, k), jnp.float32)
        b = 0.05 * jax.random.normal(next(keys), (cout,), jnp.float32)
        gamma = 1.0 + 0.1 * jax.random.normal(next(keys), (cout,), jnp.float32)
        beta = 0.05 * jax.random.normal(next(keys), (cout,), jnp.float32)
        alpha = jnp.float32(0.25)                       # nn.PReLU() default init
        return (w, b, gamma, beta, alpha)

    return {
        'down_conv': conv_block(in_channel, out_channel, 3),
        'conv1': conv_block(fold_C, down_dim, 1),
        'conv2': conv_block(fold_C, down_dim, 3),
        'conv3': conv_block(fold_C, down_dim, 3),
        'conv4': conv_block(fold_C, down_dim, 3),
        'conv5': conv_block(fold_C, down_dim, 1),
        'fuse': conv_block(5 * down_dim, fold_C, 1),
        'up_conv': (0.1 * jax.random.normal(next(keys), (out_channel, out_channel, 1, 1), jnp.float32),
                    0.05 * jax.random.normal(next(keys), (out_channel,), jnp.float32)),
    }


if __name__ == "__main__":
    key = jax.random.PRNGKey(0)
    k_x, k_p = jax.random.split(key)

    N, Cin, H, W = 2, 4, 16, 16          # H == W, divisible by win_size=2
    out_channel = 4

    x = jax.random.normal(k_x, (N, Cin, H, W), jnp.float32)
    params = init_params(k_p, Cin, out_channel, win_size=2)

    fwd = jax.jit(fold_conv_aspp_forward)
    y = fwd(x, params)
    jax.block_until_ready(y)

    assert y.shape == (N, out_channel, H, W), y.shape
    assert jnp.all(jnp.isfinite(y))
    print("KERNEL_OK")
</pallas_src>

<mosaic_0001>
module attributes {stable_mosaic.version = 11 : i64} {
  func.func @_down_conv_kernel(%arg0: i32, %arg1: i32, %arg2: memref<1x16x16x4xbf16, #tpu.memory_space<vmem>>, %arg3: memref<9x4x4xbf16, #tpu.memory_space<vmem>>, %arg4: memref<1x4xf32, #tpu.memory_space<vmem>>, %arg5: memref<1x128x4xbf16, #tpu.memory_space<vmem>>, %arg6: memref<1x1x4xf32, #tpu.memory_space<vmem>>, %arg7: memref<1x1x4xf32, #tpu.memory_space<vmem>>, %arg8: memref<18x18x4xf32, #tpu.memory_space<vmem>>, %arg9: memref<1x4xf32, #tpu.memory_space<vmem>>, %arg10: memref<1x4xf32, #tpu.memory_space<vmem>>) attributes {dimension_semantics = [#tpu.dimension_semantics<parallel>, #tpu.dimension_semantics<arbitrary>], iteration_bounds = array<i64: 2, 2>, scalar_prefetch = 0 : i64, scratch_operands = 3 : i64, tpu.core_type = #tpu.core_type<tc>, window_params = [{transform_indices = @transform_0, window_bounds = array<i64: 1, 16, 16, 4>}, {pipeline_mode = #tpu.pipeline_mode<synchronous>, transform_indices = @transform_1, window_bounds = array<i64: 9, 4, 4>}, {pipeline_mode = #tpu.pipeline_mode<synchronous>, transform_indices = @transform_2, window_bounds = array<i64: 1, 4>}, {transform_indices = @transform_3, window_bounds = array<i64: 1, 128, 4>}, {transform_indices = @transform_4, window_bounds = array<i64: 1, 1, 4>}, {transform_indices = @transform_5, window_bounds = array<i64: 1, 1, 4>}]} {
    %c0_i32 = arith.constant 0 : i32
    %0 = arith.cmpi eq, %arg1, %c0_i32 : i32
    %1 = arith.extui %0 : i1 to i32
    %c0_i32_0 = arith.constant 0 : i32
    %2 = arith.cmpi ne, %1, %c0_i32_0 : i32
    scf.if %2 {
      %cst_70 = arith.constant 0.000000e+00 : f32
      %107 = vector.broadcast %cst_70 : f32 to vector<18x18x4xf32>
      %c0_71 = arith.constant 0 : index
      %c0_72 = arith.constant 0 : index
      %c0_73 = arith.constant 0 : index
      %108 = vector.load %arg8[%c0_71, %c0_72, %c0_73] : memref<18x18x4xf32, #tpu.memory_space<vmem>>, vector<18x18x4xf32>
      tpu.vector_store %arg8[%c0_71, %c0_72, %c0_73], %107 {strides = array<i32>} : memref<18x18x4xf32, #tpu.memory_space<vmem>>, vector<18x18x4xf32>,
      %c0_74 = arith.constant 0 : index
      %c0_75 = arith.constant 0 : index
      %c0_76 = arith.constant 0 : index
      %c0_77 = arith.constant 0 : index
      %109 = vector.load %arg2[%c0_74, %c0_75, %c0_76, %c0_77] : memref<1x16x16x4xbf16, #tpu.memory_space<vmem>>, vector<1x16x16x4xbf16>
      %110 = vector.shape_cast %109 : vector<1x16x16x4xbf16> to vector<16x16x4xbf16>
      %111 = arith.extf %110 : vector<16x16x4xbf16> to vector<16x16x4xf32>
      %c1_78 = arith.constant 1 : index
      %c1_79 = arith.constant 1 : index
      %c0_80 = arith.constant 0 : index
      %112 = vector.load %arg8[%c1_78, %c1_79, %c0_80] : memref<18x18x4xf32, #tpu.memory_space<vmem>>, vector<16x16x4xf32>
      tpu.vector_store %arg8[%c1_78, %c1_79, %c0_80], %111 {strides = array<i32>} : memref<18x18x4xf32, #tpu.memory_space<vmem>>, vector<16x16x4xf32>,
      %cst_81 = arith.constant 0.000000e+00 : f32
      %113 = vector.broadcast %cst_81 : f32 to vector<1x4xf32>
      %c0_82 = arith.constant 0 : index
      %c0_83 = arith.constant 0 : index
      %114 = vector.load %arg9[%c0_82, %c0_83] : memref<1x4xf32, #tpu.memory_space<vmem>>, vector<1x4xf32>
      tpu.vector_store %arg9[%c0_82, %c0_83], %113 {strides = array<i32>} : memref<1x4xf32, #tpu.memory_space<vmem>>, vector<1x4xf32>,
      %cst_84 = arith.constant 0.000000e+00 : f32
      %115 = vector.broadcast %cst_84 : f32 to vector<1x4xf32>
      %c0_85 = arith.constant 0 : index
      %c0_86 = arith.constant 0 : index
      %116 = vector.load %arg10[%c0_85, %c0_86] : memref<1x4xf32, #tpu.memory_space<vmem>>, vector<1x4xf32>
      tpu.vector_store %arg10[%c0_85, %c0_86], %115 {strides = array<i32>} : memref<1x4xf32, #tpu.memory_space<vmem>>, vector<1x4xf32>,
    } else {
    }
    %c8_i32 = arith.constant 8 : i32
    %3 = arith.muli %arg1, %c8_i32 : i32
    %cst = arith.constant 0.000000e+00 : f32
    %4 = vector.broadcast %cst : f32 to vector<128x4xf32>
    %c0_i32_1 = arith.constant 0 : i32
    %5 = arith.addi %3, %c0_i32_1 : i32
    %6 = arith.index_cast %5 : i32 to index
    %c0 = arith.constant 0 : index
    %c0_2 = arith.constant 0 : index
    %7 = vector.load %arg8[%6, %c0, %c0_2] : memref<18x18x4xf32, #tpu.memory_space<vmem>>, vector<8x16x4xf32>
    %8 = vector.shape_cast %7 : vector<8x16x4xf32> to vector<128x4xf32>
    %9 = arith.truncf %8 : vector<128x4xf32> to vector<128x4xbf16>
    %c0_3 = arith.constant 0 : index
    %c0_4 = arith.constant 0 : index
    %c0_5 = arith.constant 0 : index
    %10 = vector.load %arg3[%c0_3, %c0_4, %c0_5] : memref<9x4x4xbf16, #tpu.memory_space<vmem>>, vector<1x4x4xbf16>
    %11 = vector.shape_cast %10 : vector<1x4x4xbf16> to vector<4x4xbf16>
    %cst_6 = arith.constant dense<0.000000e+00> : vector<128x4xf32>
    %12 = tpu.matmul %9, %11, %cst_6 {dimension_numbers = #tpu.dot_dimension_numbers<[1], [0], [0], [1], [0, 0, 1, 1], [], []>} : vector<128x4xbf16>, vector<4x4xbf16>, vector<128x4xf32> -> vector<128x4xf32>
    %13 = arith.addf %4, %12 : vector<128x4xf32>
    %c0_i32_7 = arith.constant 0 : i32
    %14 = arith.addi %3, %c0_i32_7 : i32
    %15 = arith.index_cast %14 : i32 to index
    %c1 = arith.constant 1 : index
    %c0_8 = arith.constant 0 : index
    %16 = vector.load %arg8[%15, %c1, %c0_8] : memref<18x18x4xf32, #tpu.memory_space<vmem>>, vector<8x16x4xf32>
    %17 = vector.shape_cast %16 : vector<8x16x4xf32> to vector<128x4xf32>
    %18 = arith.truncf %17 : vector<128x4xf32> to vector<128x4xbf16>
    %c1_9 = arith.constant 1 : index
    %c0_10 = arith.constant 0 : index
    %c0_11 = arith.constant 0 : index
    %19 = vector.load %arg3[%c1_9, %c0_10, %c0_11] : memref<9x4x4xbf16, #tpu.memory_space<vmem>>, vector<1x4x4xbf16>
    %20 = vector.shape_cast %19 : vector<1x4x4xbf16> to vector<4x4xbf16>
    %cst_12 = arith.constant dense<0.000000e+00> : vector<128x4xf32>
    %21 = tpu.matmul %18, %20, %cst_12 {dimension_numbers = #tpu.dot_dimension_numbers<[1], [0], [0], [1], [0, 0, 1, 1], [], []>} : vector<128x4xbf16>, vector<4x4xbf16>, vector<128x4xf32> -> vector<128x4xf32>
    %22 = arith.addf %13, %21 : vector<128x4xf32>
    %c0_i32_13 = arith.constant 0 : i32
    %23 = arith.addi %3, %c0_i32_13 : i32
    %24 = arith.index_cast %23 : i32 to index
    %c2 = arith.constant 2 : index
    %c0_14 = arith.constant 0 : index
    %25 = vector.load %arg8[%24, %c2, %c0_14] : memref<18x18x4xf32, #tpu.memory_space<vmem>>, vector<8x16x4xf32>
    %26 = vector.shape_cast %25 : vector<8x16x4xf32> to vector<128x4xf32>
    %27 = arith.truncf %26 : vector<128x4xf32> to vector<128x4xbf16>
    %c2_15 = arith.constant 2 : index
    %c0_16 = arith.constant 0 : index
    %c0_17 = arith.constant 0 : index
    %28 = vector.load %arg3[%c2_15, %c0_16, %c0_17] : memref<9x4x4xbf16, #tpu.memory_space<vmem>>, vector<1x4x4xbf16>
    %29 = vector.shape_cast %28 : vector<1x4x4xbf16> to vector<4x4xbf16>
    %cst_18 = arith.constant dense<0.000000e+00> : vector<128x4xf32>
    %30 = tpu.matmul %27, %29, %cst_18 {dimension_numbers = #tpu.dot_dimension_numbers<[1], [0], [0], [1], [0, 0, 1, 1], [], []>} : vector<128x4xbf16>, vector<4x4xbf16>, vector<128x4xf32> -> vector<128x4xf32>
    %31 = arith.addf %22, %30 : vector<128x4xf32>
    %c1_i32 = arith.constant 1 : i32
    %32 = arith.addi %3, %c1_i32 : i32
    %33 = arith.index_cast %32 : i32 to index
    %c0_19 = arith.constant 0 : index
    %c0_20 = arith.constant 0 : index
    %34 = vector.load %arg8[%33, %c0_19, %c0_20] : memref<18x18x4xf32, #tpu.memory_space<vmem>>, vector<8x16x4xf32>
    %35 = vector.shape_cast %34 : vector<8x16x4xf32> to vector<128x4xf32>
    %36 = arith.truncf %35 : vector<128x4xf32> to vector<128x4xbf16>
    %c3 = arith.constant 3 : index
    %c0_21 = arith.constant 0 : index
    %c0_22 = arith.constant 0 : index
    %37 = vector.load %arg3[%c3, %c0_21, %c0_22] : memref<9x4x4xbf16, #tpu.memory_space<vmem>>, vector<1x4x4xbf16>
    %38 = vector.shape_cast %37 : vector<1x4x4xbf16> to vector<4x4xbf16>
    %cst_23 = arith.constant dense<0.000000e+00> : vector<128x4xf32>
    %39 = tpu.matmul %36, %38, %cst_23 {dimension_numbers = #tpu.dot_dimension_numbers<[1], [0], [0], [1], [0, 0, 1, 1], [], []>} : vector<128x4xbf16>, vector<4x4xbf16>, vector<128x4xf32> -> vector<128x4xf32>
    %40 = arith.addf %31, %39 : vector<128x4xf32>
    %c1_i32_24 = arith.constant 1 : i32
    %41 = arith.addi %3, %c1_i32_24 : i32
    %42 = arith.index_cast %41 : i32 to index
    %c1_25 = arith.constant 1 : index
    %c0_26 = arith.constant 0 : index
    %43 = vector.load %arg8[%42, %c1_25, %c0_26] : memref<18x18x4xf32, #tpu.memory_space<vmem>>, vector<8x16x4xf32>
    %44 = vector.shape_cast %43 : vector<8x16x4xf32> to vector<128x4xf32>
    %45 = arith.truncf %44 : vector<128x4xf32> to vector<128x4xbf16>
    %c4 = arith.constant 4 : index
    %c0_27 = arith.constant 0 : index
    %c0_28 = arith.constant 0 : index
    %46 = vector.load %arg3[%c4, %c0_27, %c0_28] : memref<9x4x4xbf16, #tpu.memory_space<vmem>>, vector<1x4x4xbf16>
    %47 = vector.shape_cast %46 : vector<1x4x4xbf16> to vector<4x4xbf16>
    %cst_29 = arith.constant dense<0.000000e+00> : vector<128x4xf32>
    %48 = tpu.matmul %45, %47, %cst_29 {dimension_numbers = #tpu.dot_dimension_numbers<[1], [0], [0], [1], [0, 0, 1, 1], [], []>} : vector<128x4xbf16>, vector<4x4xbf16>, vector<128x4xf32> -> vector<128x4xf32>
    %49 = arith.addf %40, %48 : vector<128x4xf32>
    %c1_i32_30 = arith.constant 1 : i32
    %50 = arith.addi %3, %c1_i32_30 : i32
    %51 = arith.index_cast %50 : i32 to index
    %c2_31 = arith.constant 2 : index
    %c0_32 = arith.constant 0 : index
    %52 = vector.load %arg8[%51, %c2_31, %c0_32] : memref<18x18x4xf32, #tpu.memory_space<vmem>>, vector<8x16x4xf32>
    %53 = vector.shape_cast %52 : vector<8x16x4xf32> to vector<128x4xf32>
    %54 = arith.truncf %53 : vector<128x4xf32> to vector<128x4xbf16>
    %c5 = arith.constant 5 : index
    %c0_33 = arith.constant 0 : index
    %c0_34 = arith.constant 0 : index
    %55 = vector.load %arg3[%c5, %c0_33, %c0_34] : memref<9x4x4xbf16, #tpu.memory_space<vmem>>, vector<1x4x4xbf16>
    %56 = vector.shape_cast %55 : vector<1x4x4xbf16> to vector<4x4xbf16>
    %cst_35 = arith.constant dense<0.000000e+00> : vector<128x4xf32>
    %57 = tpu.matmul %54, %56, %cst_35 {dimension_numbers = #tpu.dot_dimension_numbers<[1], [0], [0], [1], [0, 0, 1, 1], [], []>} : vector<128x4xbf16>, vector<4x4xbf16>, vector<128x4xf32> -> vector<128x4xf32>
    %58 = arith.addf %49, %57 : vector<128x4xf32>
    %c2_i32 = arith.constant 2 : i32
    %59 = arith.addi %3, %c2_i32 : i32
    %60 = arith.index_cast %59 : i32 to index
    %c0_36 = arith.constant 0 : index
    %c0_37 = arith.constant 0 : index
    %61 = vector.load %arg8[%60, %c0_36, %c0_37] : memref<18x18x4xf32, #tpu.memory_space<vmem>>, vector<8x16x4xf32>
    %62 = vector.shape_cast %61 : vector<8x16x4xf32> to vector<128x4xf32>
    %63 = arith.truncf %62 : vector<128x4xf32> to vector<128x4xbf16>
    %c6 = arith.constant 6 : index
    %c0_38 = arith.constant 0 : index
    %c0_39 = arith.constant 0 : index
    %64 = vector.load %arg3[%c6, %c0_38, %c0_39] : memref<9x4x4xbf16, #tpu.memory_space<vmem>>, vector<1x4x4xbf16>
    %65 = vector.shape_cast %64 : vector<1x4x4xbf16> to vector<4x4xbf16>
    %cst_40 = arith.constant dense<0.000000e+00> : vector<128x4xf32>
    %66 = tpu.matmul %63, %65, %cst_40 {dimension_numbers = #tpu.dot_dimension_numbers<[1], [0], [0], [1], [0, 0, 1, 1], [], []>} : vector<128x4xbf16>, vector<4x4xbf16>, vector<128x4xf32> -> vector<128x4xf32>
    %67 = arith.addf %58, %66 : vector<128x4xf32>
    %c2_i32_41 = arith.constant 2 : i32
    %68 = arith.addi %3, %c2_i32_41 : i32
    %69 = arith.index_cast %68 : i32 to index
    %c1_42 = arith.constant 1 : index
    %c0_43 = arith.constant 0 : index
    %70 = vector.load %arg8[%69, %c1_42, %c0_43] : memref<18x18x4xf32, #tpu.memory_space<vmem>>, vector<8x16x4xf32>
    %71 = vector.shape_cast %70 : vector<8x16x4xf32> to vector<128x4xf32>
    %72 = arith.truncf %71 : vector<128x4xf32> to vector<128x4xbf16>
    %c7 = arith.constant 7 : index
    %c0_44 = arith.constant 0 : index
    %c0_45 = arith.constant 0 : index
    %73 = vector.load %arg3[%c7, %c0_44, %c0_45] : memref<9x4x4xbf16, #tpu.memory_space<vmem>>, vector<1x4x4xbf16>
    %74 = vector.shape_cast %73 : vector<1x4x4xbf16> to vector<4x4xbf16>
    %cst_46 = arith.constant dense<0.000000e+00> : vector<128x4xf32>
    %75 = tpu.matmul %72, %74, %cst_46 {dimension_numbers = #tpu.dot_dimension_numbers<[1], [0], [0], [1], [0, 0, 1, 1], [], []>} : vector<128x4xbf16>, vector<4x4xbf16>, vector<128x4xf32> -> vector<128x4xf32>
    %76 = arith.addf %67, %75 : vector<128x4xf32>
    %c2_i32_47 = arith.constant 2 : i32
    %77 = arith.addi %3, %c2_i32_47 : i32
    %78 = arith.index_cast %77 : i32 to index
    %c2_48 = arith.constant 2 : index
    %c0_49 = arith.constant 0 : index
    %79 = vector.load %arg8[%78, %c2_48, %c0_49] : memref<18x18x4xf32, #tpu.memory_space<vmem>>, vector<8x16x4xf32>
    %80 = vector.shape_cast %79 : vector<8x16x4xf32> to vector<128x4xf32>
    %81 = arith.truncf %80 : vector<128x4xf32> to vector<128x4xbf16>
    %c8 = arith.constant 8 : index
    %c0_50 = arith.constant 0 : index
    %c0_51 = arith.constant 0 : index
    %82 = vector.load %arg3[%c8, %c0_50, %c0_51] : memref<9x4x4xbf16, #tpu.memory_space<vmem>>, vector<1x4x4xbf16>
    %83 = vector.shape_cast %82 : vector<1x4x4xbf16> to vector<4x4xbf16>
    %cst_52 = arith.constant dense<0.000000e+00> : vector<128x4xf32>
    %84 = tpu.matmul %81, %83, %cst_52 {dimension_numbers = #tpu.dot_dimension_numbers<[1], [0], [0], [1], [0, 0, 1, 1], [], []>} : vector<128x4xbf16>, vector<4x4xbf16>, vector<128x4xf32> -> vector<128x4xf32>
    %85 = arith.addf %76, %84 : vector<128x4xf32>
    %c0_53 = arith.constant 0 : index
    %c0_54 = arith.constant 0 : index
    %86 = vector.load %arg4[%c0_53, %c0_54] : memref<1x4xf32, #tpu.memory_space<vmem>>, vector<1x4xf32>
    %87 = vector.broadcast %86 : vector<1x4xf32> to vector<128x4xf32>
    %88 = arith.addf %85, %87 : vector<128x4xf32>
    %89 = arith.truncf %88 : vector<128x4xf32> to vector<128x4xbf16>
    %c0_55 = arith.constant 0 : index
    %c0_56 = arith.constant 0 : index
    %c0_57 = arith.constant 0 : index
    %90 = vector.load %arg5[%c0_55, %c0_56, %c0_57] : memref<1x128x4xbf16, #tpu.memory_space<vmem>>, vector<1x128x4xbf16>
    %91 = vector.shape_cast %90 : vector<1x128x4xbf16> to vector<128x4xbf16>
    %92 = vector.shape_cast %89 : vector<128x4xbf16> to vector<1x128x4xbf16>
    tpu.vector_store %arg5[%c0_55, %c0_56, %c0_57], %92 {strides = array<i32>} : memref<1x128x4xbf16, #tpu.memory_space<vmem>>, vector<1x128x4xbf16>,
    %c0_58 = arith.constant 0 : index
    %c0_59 = arith.constant 0 : index
    %93 = vector.load %arg9[%c0_58, %c0_59] : memref<1x4xf32, #tpu.memory_space<vmem>>, vector<1x4xf32>
    %cst_60 = arith.constant dense<0.000000e+00> : vector<4xf32>
    %94 = vector.multi_reduction <add>, %88, %cst_60 [0] : vector<128x4xf32> to vector<4xf32>
    %95 = vector.shape_cast %94 : vector<4xf32> to vector<1x4xf32>
    %96 = arith.addf %93, %95 : vector<1x4xf32>
    %c0_61 = arith.constant 0 : index
    %c0_62 = arith.constant 0 : index
    %97 = vector.load %arg9[%c0_61, %c0_62] : memref<1x4xf32, #tpu.memory_space<vmem>>, vector<1x4xf32>
    tpu.vector_store %arg9[%c0_61, %c0_62], %96 {strides = array<i32>} : memref<1x4xf32, #tpu.memory_space<vmem>>, vector<1x4xf32>,
    %c0_63 = arith.constant 0 : index
    %c0_64 = arith.constant 0 : index
    %98 = vector.load %arg10[%c0_63, %c0_64] : memref<1x4xf32, #tpu.memory_space<vmem>>, vector<1x4xf32>
    %99 = arith.mulf %88, %88 : vector<128x4xf32>
    %cst_65 = arith.constant dense<0.000000e+00> : vector<4xf32>
    %100 = vector.multi_reduction <add>, %99, %cst_65 [0] : vector<128x4xf32> to vector<4xf32>
    %101 = vector.shape_cast %100 : vector<4xf32> to vector<1x4xf32>
    %102 = arith.addf %98, %101 : vector<1x4xf32>
    %c0_66 = arith.constant 0 : index
    %c0_67 = arith.constant 0 : index
    %103 = vector.load %arg10[%c0_66, %c0_67] : memref<1x4xf32, #tpu.memory_space<vmem>>, vector<1x4xf32>
    tpu.vector_store %arg10[%c0_66, %c0_67], %102 {strides = array<i32>} : memref<1x4xf32, #tpu.memory_space<vmem>>, vector<1x4xf32>,
    %c1_i32_68 = arith.constant 1 : i32
    %104 = arith.cmpi eq, %arg1, %c1_i32_68 : i32
    %105 = arith.extui %104 : i1 to i32
    %c0_i32_69 = arith.constant 0 : i32
    %106 = arith.cmpi ne, %105, %c0_i32_69 : i32
    scf.if %106 {
      %c0_70 = arith.constant 0 : index
      %c0_71 = arith.constant 0 : index
      %107 = vector.load %arg9[%c0_70, %c0_71] : memref<1x4xf32, #tpu.memory_space<vmem>>, vector<1x4xf32>
      %c0_72 = arith.constant 0 : index
      %c0_73 = arith.constant 0 : index
      %c0_74 = arith.constant 0 : index
      %108 = vector.load %arg6[%c0_72, %c0_73, %c0_74] : memref<1x1x4xf32, #tpu.memory_space<vmem>>, vector<1x1x4xf32>
      %109 = vector.shape_cast %108 : vector<1x1x4xf32> to vector<1x4xf32>
      %110 = vector.shape_cast %107 : vector<1x4xf32> to vector<1x1x4xf32>
      tpu.vector_store %arg6[%c0_72, %c0_73, %c0_74], %110 {strides = array<i32>} : memref<1x1x4xf32, #tpu.memory_space<vmem>>, vector<1x1x4xf32>,
      %c0_75 = arith.constant 0 : index
      %c0_76 = arith.constant 0 : index
      %111 = vector.load %arg10[%c0_75, %c0_76] : memref<1x4xf32, #tpu.memory_space<vmem>>, vector<1x4xf32>
      %c0_77 = arith.constant 0 : index
      %c0_78 = arith.constant 0 : index
      %c0_79 = arith.constant 0 : index
      %112 = vector.load %arg7[%c0_77, %c0_78, %c0_79] : memref<1x1x4xf32, #tpu.memory_space<vmem>>, vector<1x1x4xf32>
      %113 = vector.shape_cast %112 : vector<1x1x4xf32> to vector<1x4xf32>
      %114 = vector.shape_cast %111 : vector<1x4xf32> to vector<1x1x4xf32>
      tpu.vector_store %arg7[%c0_77, %c0_78, %c0_79], %114 {strides = array<i32>} : memref<1x1x4xf32, #tpu.memory_space<vmem>>, vector<1x1x4xf32>,
    } else {
    }
    return
  }
  func.func @transform_0(%arg0: i32, %arg1: i32) -> (i32, i32, i32, i32) {
    %c0_i32 = arith.constant 0 : i32
    %c0_i32_0 = arith.constant 0 : i32
    %c0_i32_1 = arith.constant 0 : i32
    %c0_i32_2 = arith.constant 0 : i32
    return %arg0, %c0_i32, %c0_i32_0, %c0_i32_1 : i32, i32, i32, i32
  }
  func.func @transform_1(%arg0: i32, %arg1: i32) -> (i32, i32, i32) {
    %c0_i32 = arith.constant 0 : i32
    %c0_i32_0 = arith.constant 0 : i32
    %c0_i32_1 = arith.constant 0 : i32
    %c0_i32_2 = arith.constant 0 : i32
    return %c0_i32, %c0_i32_0, %c0_i32_1 : i32, i32, i32
  }
  func.func @transform_2(%arg0: i32, %arg1: i32) -> (i32, i32) {
    %c0_i32 = arith.constant 0 : i32
    %c0_i32_0 = arith.constant 0 : i32
    %c0_i32_1 = arith.constant 0 : i32
    return %c0_i32, %c0_i32_0 : i32, i32
  }
  func.func @transform_3(%arg0: i32, %arg1: i32) -> (i32, i32, i32) {
    %c0_i32 = arith.constant 0 : i32
    %c0_i32_0 = arith.constant 0 : i32
    return %arg0, %arg1, %c0_i32 : i32, i32, i32
  }
  func.func @transform_4(%arg0: i32, %arg1: i32) -> (i32, i32, i32) {
    %c0_i32 = arith.constant 0 : i32
    %c0_i32_0 = arith.constant 0 : i32
    %c0_i32_1 = arith.constant 0 : i32
    return %arg0, %c0_i32, %c0_i32_0 : i32, i32, i32
  }
  func.func @transform_5(%arg0: i32, %arg1: i32) -> (i32, i32, i32) {
    %c0_i32 = arith.constant 0 : i32
    %c0_i32_0 = arith.constant 0 : i32
    %c0_i32_1 = arith.constant 0 : i32
    return %arg0, %c0_i32, %c0_i32_0 : i32, i32, i32
  }
}

module attributes {stable_mosaic.version = 11 : i64} {
  func.func @_aspp_kernel(%arg0: i32, %arg1: i32, %arg2: memref<1x8x8x16xbf16, #tpu.memory_space<vmem>>, %arg3: memref<1x16xf32, #tpu.memory_space<vmem>>, %arg4: memref<1x16xf32, #tpu.memory_space<vmem>>, %arg5: memref<1x16xf32, #tpu.memory_space<vmem>>, %arg6: memref<16x8xbf16, #tpu.memory_space<vmem>>, %arg7: memref<1x8xf32, #tpu.memory_space<vmem>>, %arg8: memref<9x16x8xbf16, #tpu.memory_space<vmem>>, %arg9: memref<1x8xf32, #tpu.memory_space<vmem>>, %arg10: memref<9x16x8xbf16, #tpu.memory_space<vmem>>, %arg11: memref<1x8xf32, #tpu.memory_space<vmem>>, %arg12: memref<9x16x8xbf16, #tpu.memory_space<vmem>>, %arg13: memref<1x8xf32, #tpu.memory_space<vmem>>, %arg14: memref<1x32x32xbf16, #tpu.memory_space<vmem>>, %arg15: memref<1x1x32xf32, #tpu.memory_space<vmem>>, %arg16: memref<1x1x32xf32, #tpu.memory_space<vmem>>, %arg17: memref<1x1x16xf32, #tpu.memory_space<vmem>>, %arg18: memref<20x20x16xf32, #tpu.memory_space<vmem>>, %arg19: memref<1x32xf32, #tpu.memory_space<vmem>>, %arg20: memref<1x32xf32, #tpu.memory_space<vmem>>, %arg21: memref<1x16xf32, #tpu.memory_space<vmem>>) attributes {dimension_semantics = [#tpu.dimension_semantics<parallel>, #tpu.dimension_semantics<arbitrary>], iteration_bounds = array<i64: 2, 2>, scalar_prefetch = 0 : i64, scratch_operands = 4 : i64, tpu.core_type = #tpu.core_type<tc>, window_params = [{transform_indices = @transform_0, window_bounds = array<i64: 1, 8, 8, 16>}, {pipeline_mode = #tpu.pipeline_mode<synchronous>, transform_indices = @transform_1, window_bounds = array<i64: 1, 16>}, {pipeline_mode = #tpu.pipeline_mode<synchronous>, transform_indices = @transform_2, window_bounds = array<i64: 1, 16>}, {pipeline_mode = #tpu.pipeline_mode<synchronous>, transform_indices = @transform_3, window_bounds = array<i64: 1, 16>}, {pipeline_mode = #tpu.pipeline_mode<synchronous>, transform_indices = @transform_4, window_bounds = array<i64: 16, 8>}, {pipeline_mode = #tpu.pipeline_mode<synchronous>, transform_indices = @transform_5, window_bounds = array<i64: 1, 8>}, {pipeline_mode = #tpu.pipeline_mode<synchronous>, transform_indices = @transform_6, window_bounds = array<i64: 9, 16, 8>}, {pipeline_mode = #tpu.pipeline_mode<synchronous>, transform_indices = @transform_7, window_bounds = array<i64: 1, 8>}, {pipeline_mode = #tpu.pipeline_mode<synchronous>, transform_indices = @transform_8, window_bounds = array<i64: 9, 16, 8>}, {pipeline_mode = #tpu.pipeline_mode<synchronous>, transform_indices = @transform_9, window_bounds = array<i64: 1, 8>}, {pipeline_mode = #tpu.pipeline_mode<synchronous>, transform_indices = @transform_10, window_bounds = array<i64: 9, 16, 8>}, {pipeline_mode = #tpu.pipeline_mode<synchronous>, transform_indices = @transform_11, window_bounds = array<i64: 1, 8>}, {transform_indices = @transform_12, window_bounds = array<i64: 1, 32, 32>}, {transform_indices = @transform_13, window_bounds = array<i64: 1, 1, 32>}, {transform_indices = @transform_14, window_bounds = array<i64: 1, 1, 32>}, {transform_indices = @transform_15, window_bounds = array<i64: 1, 1, 16>}]} {
    %c0_i32 = arith.constant 0 : i32
    %0 = arith.cmpi eq, %arg1, %c0_i32 : i32
    %1 = arith.extui %0 : i1 to i32
    %c0_i32_0 = arith.constant 0 : i32
    %2 = arith.cmpi ne, %1, %c0_i32_0 : i32
    scf.if %2 {
      %cst_296 = arith.constant 0.000000e+00 : f32
      %386 = vector.broadcast %cst_296 : f32 to vector<20x20x16xf32>
      %c0_297 = arith.constant 0 : index
      %c0_298 = arith.constant 0 : index
      %c0_299 = arith.constant 0 : index
      %387 = vector.load %arg18[%c0_297, %c0_298, %c0_299] : memref<20x20x16xf32, #tpu.memory_space<vmem>>, vector<20x20x16xf32>
      tpu.vector_store %arg18[%c0_297, %c0_298, %c0_299], %386 {strides = array<i32>} : memref<20x20x16xf32, #tpu.memory_space<vmem>>, vector<20x20x16xf32>,
      %c0_300 = arith.constant 0 : index
      %c0_301 = arith.constant 0 : index
      %c0_302 = arith.constant 0 : index
      %c0_303 = arith.constant 0 : index
      %388 = vector.load %arg2[%c0_300, %c0_301, %c0_302, %c0_303] : memref<1x8x8x16xbf16, #tpu.memory_space<vmem>>, vector<1x8x8x16xbf16>
      %389 = vector.shape_cast %388 : vector<1x8x8x16xbf16> to vector<8x8x16xbf16>
      %390 = arith.extf %389 : vector<8x8x16xbf16> to vector<8x8x16xf32>
      %c0_304 = arith.constant 0 : index
      %c0_305 = arith.constant 0 : index
      %391 = vector.load %arg3[%c0_304, %c0_305] : memref<1x16xf32, #tpu.memory_space<vmem>>, vector<1x16xf32>
      %392 = vector.shape_cast %391 : vector<1x16xf32> to vector<1x1x16xf32>
      %393 = vector.broadcast %392 : vector<1x1x16xf32> to vector<8x8x16xf32>
      %394 = arith.mulf %390, %393 : vector<8x8x16xf32>
      %c0_306 = arith.constant 0 : index
      %c0_307 = arith.constant 0 : index
      %395 = vector.load %arg4[%c0_306, %c0_307] : memref<1x16xf32, #tpu.memory_space<vmem>>, vector<1x16xf32>
      %396 = vector.shape_cast %395 : vector<1x16xf32> to vector<1x1x16xf32>
      %397 = vector.broadcast %396 : vector<1x1x16xf32> to vector<8x8x16xf32>
      %398 = arith.addf %394, %397 : vector<8x8x16xf32>
      %c0_308 = arith.constant 0 : index
      %c0_309 = arith.constant 0 : index
      %399 = vector.load %arg5[%c0_308, %c0_309] : memref<1x16xf32, #tpu.memory_space<vmem>>, vector<1x16xf32>
      %400 = vector.shape_cast %399 : vector<1x16xf32> to vector<1x1x16xf32>
      %cst_310 = arith.constant 0.000000e+00 : f32
      %401 = vector.broadcast %cst_310 : f32 to vector<8x8x16xf32>
      %402 = arith.maximumf %398, %401 : vector<8x8x16xf32>
      %cst_311 = arith.constant 0.000000e+00 : f32
      %403 = vector.broadcast %cst_311 : f32 to vector<8x8x16xf32>
      %404 = arith.minimumf %398, %403 : vector<8x8x16xf32>
      %405 = vector.broadcast %400 : vector<1x1x16xf32> to vector<8x8x16xf32>
      %406 = arith.mulf %405, %404 : vector<8x8x16xf32>
      %407 = arith.addf %402, %406 : vector<8x8x16xf32>
      %c6_312 = arith.constant 6 : index
      %c6_313 = arith.constant 6 : index
      %c0_314 = arith.constant 0 : index
      %408 = vector.load %arg18[%c6_312, %c6_313, %c0_314] : memref<20x20x16xf32, #tpu.memory_space<vmem>>, vector<8x8x16xf32>
      tpu.vector_store %arg18[%c6_312, %c6_313, %c0_314], %407 {strides = array<i32>} : memref<20x20x16xf32, #tpu.memory_space<vmem>>, vector<8x8x16xf32>,
      %cst_315 = arith.constant dense<0.000000e+00> : vector<16xf32>
      %409 = vector.multi_reduction <add>, %407, %cst_315 [0, 1] : vector<8x8x16xf32> to vector<16xf32>
      %410 = vector.shape_cast %409 : vector<16xf32> to vector<1x1x16xf32>
      %411 = vector.shape_cast %410 : vector<1x1x16xf32> to vector<1x16xf32>
      %c0_316 = arith.constant 0 : index
      %c0_317 = arith.constant 0 : index
      %412 = vector.load %arg21[%c0_316, %c0_317] : memref<1x16xf32, #tpu.memory_space<vmem>>, vector<1x16xf32>
      tpu.vector_store %arg21[%c0_316, %c0_317], %411 {strides = array<i32>} : memref<1x16xf32, #tpu.memory_space<vmem>>, vector<1x16xf32>,
      %cst_318 = arith.constant 0.000000e+00 : f32
      %413 = vector.broadcast %cst_318 : f32 to vector<1x32xf32>
      %c0_319 = arith.constant 0 : index
      %c0_320 = arith.constant 0 : index
      %414 = vector.load %arg19[%c0_319, %c0_320] : memref<1x32xf32, #tpu.memory_space<vmem>>, vector<1x32xf32>
      tpu.vector_store %arg19[%c0_319, %c0_320], %413 {strides = array<i32>} : memref<1x32xf32, #tpu.memory_space<vmem>>, vector<1x32xf32>,
      %cst_321 = arith.constant 0.000000e+00 : f32
      %415 = vector.broadcast %cst_321 : f32 to vector<1x32xf32>
      %c0_322 = arith.constant 0 : index
      %c0_323 = arith.constant 0 : index
      %416 = vector.load %arg20[%c0_322, %c0_323] : memref<1x32xf32, #tpu.memory_space<vmem>>, vector<1x32xf32>
      tpu.vector_store %arg20[%c0_322, %c0_323], %415 {strides = array<i32>} : memref<1x32xf32, #tpu.memory_space<vmem>>, vector<1x32xf32>,
    } else {
    }
    %c4_i32 = arith.constant 4 : i32
    %3 = arith.muli %arg1, %c4_i32 : i32
    %c6_i32 = arith.constant 6 : i32
    %4 = arith.addi %c6_i32, %3 : i32
    %5 = arith.index_cast %4 : i32 to index
    %c6 = arith.constant 6 : index
    %c0 = arith.constant 0 : index
    %6 = vector.load %arg18[%5, %c6, %c0] : memref<20x20x16xf32, #tpu.memory_space<vmem>>, vector<4x8x16xf32>
    %7 = vector.shape_cast %6 : vector<4x8x16xf32> to vector<32x16xf32>
    %8 = arith.truncf %7 : vector<32x16xf32> to vector<32x16xbf16>
    %c0_1 = arith.constant 0 : index
    %c0_2 = arith.constant 0 : index
    %9 = vector.load %arg6[%c0_1, %c0_2] : memref<16x8xbf16, #tpu.memory_space<vmem>>, vector<16x8xbf16>
    %cst = arith.constant dense<0.000000e+00> : vector<32x8xf32>
    %10 = tpu.matmul %8, %9, %cst {dimension_numbers = #tpu.dot_dimension_numbers<[1], [0], [0], [1], [0, 0, 1, 1], [], []>} : vector<32x16xbf16>, vector<16x8xbf16>, vector<32x8xf32> -> vector<32x8xf32>
    %c0_3 = arith.constant 0 : index
    %c0_4 = arith.constant 0 : index
    %11 = vector.load %arg7[%c0_3, %c0_4] : memref<1x8xf32, #tpu.memory_space<vmem>>, vector<1x8xf32>
    %12 = vector.broadcast %11 : vector<1x8xf32> to vector<32x8xf32>
    %13 = arith.addf %10, %12 : vector<32x8xf32>
    %14 = arith.truncf %13 : vector<32x8xf32> to vector<32x8xbf16>
    %c0_5 = arith.constant 0 : index
    %c0_6 = arith.constant 0 : index
    %c0_7 = arith.constant 0 : index
    %15 = vector.load %arg14[%c0_5, %c0_6, %c0_7] : memref<1x32x32xbf16, #tpu.memory_space<vmem>>, vector<1x32x8xbf16>
    %16 = vector.shape_cast %15 : vector<1x32x8xbf16> to vector<32x8xbf16>
    %17 = vector.shape_cast %14 : vector<32x8xbf16> to vector<1x32x8xbf16>
    tpu.vector_store %arg14[%c0_5, %c0_6, %c0_7], %17 {strides = array<i32>} : memref<1x32x32xbf16, #tpu.memory_space<vmem>>, vector<1x32x8xbf16>,
    %c0_8 = arith.constant 0 : index
    %c0_9 = arith.constant 0 : index
    %18 = vector.load %arg19[%c0_8, %c0_9] : memref<1x32xf32, #tpu.memory_space<vmem>>, vector<1x8xf32>
    %cst_10 = arith.constant dense<0.000000e+00> : vector<8xf32>
    %19 = vector.multi_reduction <add>, %13, %cst_10 [0] : vector<32x8xf32> to vector<8xf32>
    %20 = vector.shape_cast %19 : vector<8xf32> to vector<1x8xf32>
    %21 = arith.addf %18, %20 : vector<1x8xf32>
    %c0_11 = arith.constant 0 : index
    %c0_12 = arith.constant 0 : index
    %22 = vector.load %arg19[%c0_11, %c0_12] : memref<1x32xf32, #tpu.memory_space<vmem>>, vector<1x8xf32>
    tpu.vector_store %arg19[%c0_11, %c0_12], %21 {strides = array<i32>} : memref<1x32xf32, #tpu.memory_space<vmem>>, vector<1x8xf32>,
    %c0_13 = arith.constant 0 : index
    %c0_14 = arith.constant 0 : index
    %23 = vector.load %arg20[%c0_13, %c0_14] : memref<1x32xf32, #tpu.memory_space<vmem>>, vector<1x8xf32>
    %24 = arith.mulf %13, %13 : vector<32x8xf32>
    %cst_15 = arith.constant dense<0.000000e+00> : vector<8xf32>
    %25 = vector.multi_reduction <add>, %24, %cst_15 [0] : vector<32x8xf32> to vector<8xf32>
    %26 = vector.shape_cast %25 : vector<8xf32> to vector<1x8xf32>
    %27 = arith.addf %23, %26 : vector<1x8xf32>
    %c0_16 = arith.constant 0 : index
    %c0_17 = arith.constant 0 : index
    %28 = vector.load %arg20[%c0_16, %c0_17] : memref<1x32xf32, #tpu.memory_space<vmem>>, vector<1x8xf32>
    tpu.vector_store %arg20[%c0_16, %c0_17], %27 {strides = array<i32>} : memref<1x32xf32, #tpu.memory_space<vmem>>, vector<1x8xf32>,
    %cst_18 = arith.constant 0.000000e+00 : f32
    %29 = vector.broadcast %cst_18 : f32 to vector<32x8xf32>
    %c6_i32_19 = arith.constant 6 : i32
    %30 = arith.addi %c6_i32_19, %3 : i32
    %c1_i32 = arith.constant 1 : i32
    %31 = arith.subi %30, %c1_i32 : i32
    %c0_i32_20 = arith.constant 0 : i32
    %32 = arith.addi %31, %c0_i32_20 : i32
    %33 = arith.index_cast %32 : i32 to index
    %c5 = arith.constant 5 : index
    %c0_21 = arith.constant 0 : index
    %34 = vector.load %arg18[%33, %c5, %c0_21] : memref<20x20x16xf32, #tpu.memory_space<vmem>>, vector<4x8x16xf32>
    %35 = vector.shape_cast %34 : vector<4x8x16xf32> to vector<32x16xf32>
    %36 = arith.truncf %35 : vector<32x16xf32> to vector<32x16xbf16>
    %c0_22 = arith.constant 0 : index
    %c0_23 = arith.constant 0 : index
    %c0_24 = arith.constant 0 : index
    %37 = vector.load %arg8[%c0_22, %c0_23, %c0_24] : memref<9x16x8xbf16, #tpu.memory_space<vmem>>, vector<1x16x8xbf16>
    %38 = vector.shape_cast %37 : vector<1x16x8xbf16> to vector<16x8xbf16>
    %cst_25 = arith.constant dense<0.000000e+00> : vector<32x8xf32>
    %39 = tpu.matmul %36, %38, %cst_25 {dimension_numbers = #tpu.dot_dimension_numbers<[1], [0], [0], [1], [0, 0, 1, 1], [], []>} : vector<32x16xbf16>, vector<16x8xbf16>, vector<32x8xf32> -> vector<32x8xf32>
    %40 = arith.addf %29, %39 : vector<32x8xf32>
    %c6_i32_26 = arith.constant 6 : i32
    %41 = arith.addi %c6_i32_26, %3 : i32
    %c1_i32_27 = arith.constant 1 : i32
    %42 = arith.subi %41, %c1_i32_27 : i32
    %c0_i32_28 = arith.constant 0 : i32
    %43 = arith.addi %42, %c0_i32_28 : i32
    %44 = arith.index_cast %43 : i32 to index
    %c6_29 = arith.constant 6 : index
    %c0_30 = arith.constant 0 : index
    %45 = vector.load %arg18[%44, %c6_29, %c0_30] : memref<20x20x16xf32, #tpu.memory_space<vmem>>, vector<4x8x16xf32>
    %46 = vector.shape_cast %45 : vector<4x8x16xf32> to vector<32x16xf32>
    %47 = arith.truncf %46 : vector<32x16xf32> to vector<32x16xbf16>
    %c1 = arith.constant 1 : index
    %c0_31 = arith.constant 0 : index
    %c0_32 = arith.constant 0 : index
    %48 = vector.load %arg8[%c1, %c0_31, %c0_32] : memref<9x16x8xbf16, #tpu.memory_space<vmem>>, vector<1x16x8xbf16>
    %49 = vector.shape_cast %48 : vector<1x16x8xbf16> to vector<16x8xbf16>
    %cst_33 = arith.constant dense<0.000000e+00> : vector<32x8xf32>
    %50 = tpu.matmul %47, %49, %cst_33 {dimension_numbers = #tpu.dot_dimension_numbers<[1], [0], [0], [1], [0, 0, 1, 1], [], []>} : vector<32x16xbf16>, vector<16x8xbf16>, vector<32x8xf32> -> vector<32x8xf32>
    %51 = arith.addf %40, %50 : vector<32x8xf32>
    %c6_i32_34 = arith.constant 6 : i32
    %52 = arith.addi %c6_i32_34, %3 : i32
    %c1_i32_35 = arith.constant 1 : i32
    %53 = arith.subi %52, %c1_i32_35 : i32
    %c0_i32_36 = arith.constant 0 : i32
    %54 = arith.addi %53, %c0_i32_36 : i32
    %55 = arith.index_cast %54 : i32 to index
    %c7 = arith.constant 7 : index
    %c0_37 = arith.constant 0 : index
    %56 = vector.load %arg18[%55, %c7, %c0_37] : memref<20x20x16xf32, #tpu.memory_space<vmem>>, vector<4x8x16xf32>
    %57 = vector.shape_cast %56 : vector<4x8x16xf32> to vector<32x16xf32>
    %58 = arith.truncf %57 : vector<32x16xf32> to vector<32x16xbf16>
    %c2 = arith.constant 2 : index
    %c0_38 = arith.constant 0 : index
    %c0_39 = arith.constant 0 : index
    %59 = vector.load %arg8[%c2, %c0_38, %c0_39] : memref<9x16x8xbf16, #tpu.memory_space<vmem>>, vector<1x16x8xbf16>
    %60 = vector.shape_cast %59 : vector<1x16x8xbf16> to vector<16x8xbf16>
    %cst_40 = arith.constant dense<0.000000e+00> : vector<32x8xf32>
    %61 = tpu.matmul %58, %60, %cst_40 {dimension_numbers = #tpu.dot_dimension_numbers<[1], [0], [0], [1], [0, 0, 1, 1], [], []>} : vector<32x16xbf16>, vector<16x8xbf16>, vector<32x8xf32> -> vector<32x8xf32>
    %62 = arith.addf %51, %61 : vector<32x8xf32>
    %c6_i32_41 = arith.constant 6 : i32
    %63 = arith.addi %c6_i32_41, %3 : i32
    %c1_i32_42 = arith.constant 1 : i32
    %64 = arith.subi %63, %c1_i32_42 : i32
    %c1_i32_43 = arith.constant 1 : i32
    %65 = arith.addi %64, %c1_i32_43 : i32
    %66 = arith.index_cast %65 : i32 to index
    %c5_44 = arith.constant 5 : index
    %c0_45 = arith.constant 0 : index
    %67 = vector.load %arg18[%66, %c5_44, %c0_45] : memref<20x20x16xf32, #tpu.memory_space<vmem>>, vector<4x8x16xf32>
    %68 = vector.shape_cast %67 : vector<4x8x16xf32> to vector<32x16xf32>
    %69 = arith.truncf %68 : vector<32x16xf32> to vector<32x16xbf16>
    %c3 = arith.constant 3 : index
    %c0_46 = arith.constant 0 : index
    %c0_47 = arith.constant 0 : index
    %70 = vector.load %arg8[%c3, %c0_46, %c0_47] : memref<9x16x8xbf16, #tpu.memory_space<vmem>>, vector<1x16x8xbf16>
    %71 = vector.shape_cast %70 : vector<1x16x8xbf16> to vector<16x8xbf16>
    %cst_48 = arith.constant dense<0.000000e+00> : vector<32x8xf32>
    %72 = tpu.matmul %69, %71, %cst_48 {dimension_numbers = #tpu.dot_dimension_numbers<[1], [0], [0], [1], [0, 0, 1, 1], [], []>} : vector<32x16xbf16>, vector<16x8xbf16>, vector<32x8xf32> -> vector<32x8xf32>
    %73 = arith.addf %62, %72 : vector<32x8xf32>
    %c6_i32_49 = arith.constant 6 : i32
    %74 = arith.addi %c6_i32_49, %3 : i32
    %c1_i32_50 = arith.constant 1 : i32
    %75 = arith.subi %74, %c1_i32_50 : i32
    %c1_i32_51 = arith.constant 1 : i32
    %76 = arith.addi %75, %c1_i32_51 : i32
    %77 = arith.index_cast %76 : i32 to index
    %c6_52 = arith.constant 6 : index
    %c0_53 = arith.constant 0 : index
    %78 = vector.load %arg18[%77, %c6_52, %c0_53] : memref<20x20x16xf32, #tpu.memory_space<vmem>>, vector<4x8x16xf32>
    %79 = vector.shape_cast %78 : vector<4x8x16xf32> to vector<32x16xf32>
    %80 = arith.truncf %79 : vector<32x16xf32> to vector<32x16xbf16>
    %c4 = arith.constant 4 : index
    %c0_54 = arith.constant 0 : index
    %c0_55 = arith.constant 0 : index
    %81 = vector.load %arg8[%c4, %c0_54, %c0_55] : memref<9x16x8xbf16, #tpu.memory_space<vmem>>, vector<1x16x8xbf16>
    %82 = vector.shape_cast %81 : vector<1x16x8xbf16> to vector<16x8xbf16>
    %cst_56 = arith.constant dense<0.000000e+00> : vector<32x8xf32>
    %83 = tpu.matmul %80, %82, %cst_56 {dimension_numbers = #tpu.dot_dimension_numbers<[1], [0], [0], [1], [0, 0, 1, 1], [], []>} : vector<32x16xbf16>, vector<16x8xbf16>, vector<32x8xf32> -> vector<32x8xf32>
    %84 = arith.addf %73, %83 : vector<32x8xf32>
    %c6_i32_57 = arith.constant 6 : i32
    %85 = arith.addi %c6_i32_57, %3 : i32
    %c1_i32_58 = arith.constant 1 : i32
    %86 = arith.subi %85, %c1_i32_58 : i32
    %c1_i32_59 = arith.constant 1 : i32
    %87 = arith.addi %86, %c1_i32_59 : i32
    %88 = arith.index_cast %87 : i32 to index
    %c7_60 = arith.constant 7 : index
    %c0_61 = arith.constant 0 : index
    %89 = vector.load %arg18[%88, %c7_60, %c0_61] : memref<20x20x16xf32, #tpu.memory_space<vmem>>, vector<4x8x16xf32>
    %90 = vector.shape_cast %89 : vector<4x8x16xf32> to vector<32x16xf32>
    %91 = arith.truncf %90 : vector<32x16xf32> to vector<32x16xbf16>
    %c5_62 = arith.constant 5 : index
    %c0_63 = arith.constant 0 : index
    %c0_64 = arith.constant 0 : index
    %92 = vector.load %arg8[%c5_62, %c0_63, %c0_64] : memref<9x16x8xbf16, #tpu.memory_space<vmem>>, vector<1x16x8xbf16>
    %93 = vector.shape_cast %92 : vector<1x16x8xbf16> to vector<16x8xbf16>
    %cst_65 = arith.constant dense<0.000000e+00> : vector<32x8xf32>
    %94 = tpu.matmul %91, %93, %cst_65 {dimension_numbers = #tpu.dot_dimension_numbers<[1], [0], [0], [1], [0, 0, 1, 1], [], []>} : vector<32x16xbf16>, vector<16x8xbf16>, vector<32x8xf32> -> vector<32x8xf32>
    %95 = arith.addf %84, %94 : vector<32x8xf32>
    %c6_i32_66 = arith.constant 6 : i32
    %96 = arith.addi %c6_i32_66, %3 : i32
    %c1_i32_67 = arith.constant 1 : i32
    %97 = arith.subi %96, %c1_i32_67 : i32
    %c2_i32 = arith.constant 2 : i32
    %98 = arith.addi %97, %c2_i32 : i32
    %99 = arith.index_cast %98 : i32 to index
    %c5_68 = arith.constant 5 : index
    %c0_69 = arith.constant 0 : index
    %100 = vector.load %arg18[%99, %c5_68, %c0_69] : memref<20x20x16xf32, #tpu.memory_space<vmem>>, vector<4x8x16xf32>
    %101 = vector.shape_cast %100 : vector<4x8x16xf32> to vector<32x16xf32>
    %102 = arith.truncf %101 : vector<32x16xf32> to vector<32x16xbf16>
    %c6_70 = arith.constant 6 : index
    %c0_71 = arith.constant 0 : index
    %c0_72 = arith.constant 0 : index
    %103 = vector.load %arg8[%c6_70, %c0_71, %c0_72] : memref<9x16x8xbf16, #tpu.memory_space<vmem>>, vector<1x16x8xbf16>
    %104 = vector.shape_cast %103 : vector<1x16x8xbf16> to vector<16x8xbf16>
    %cst_73 = arith.constant dense<0.000000e+00> : vector<32x8xf32>
    %105 = tpu.matmul %102, %104, %cst_73 {dimension_numbers = #tpu.dot_dimension_numbers<[1], [0], [0], [1], [0, 0, 1, 1], [], []>} : vector<32x16xbf16>, vector<16x8xbf16>, vector<32x8xf32> -> vector<32x8xf32>
    %106 = arith.addf %95, %105 : vector<32x8xf32>
    %c6_i32_74 = arith.constant 6 : i32
    %107 = arith.addi %c6_i32_74, %3 : i32
    %c1_i32_75 = arith.constant 1 : i32
    %108 = arith.subi %107, %c1_i32_75 : i32
    %c2_i32_76 = arith.constant 2 : i32
    %109 = arith.addi %108, %c2_i32_76 : i32
    %110 = arith.index_cast %109 : i32 to index
    %c6_77 = arith.constant 6 : index
    %c0_78 = arith.constant 0 : index
    %111 = vector.load %arg18[%110, %c6_77, %c0_78] : memref<20x20x16xf32, #tpu.memory_space<vmem>>, vector<4x8x16xf32>
    %112 = vector.shape_cast %111 : vector<4x8x16xf32> to vector<32x16xf32>
    %113 = arith.truncf %112 : vector<32x16xf32> to vector<32x16xbf16>
    %c7_79 = arith.constant 7 : index
    %c0_80 = arith.constant 0 : index
    %c0_81 = arith.constant 0 : index
    %114 = vector.load %arg8[%c7_79, %c0_80, %c0_81] : memref<9x16x8xbf16, #tpu.memory_space<vmem>>, vector<1x16x8xbf16>
    %115 = vector.shape_cast %114 : vector<1x16x8xbf16> to vector<16x8xbf16>
    %cst_82 = arith.constant dense<0.000000e+00> : vector<32x8xf32>
    %116 = tpu.matmul %113, %115, %cst_82 {dimension_numbers = #tpu.dot_dimension_numbers<[1], [0], [0], [1], [0, 0, 1, 1], [], []>} : vector<32x16xbf16>, vector<16x8xbf16>, vector<32x8xf32> -> vector<32x8xf32>
    %117 = arith.addf %106, %116 : vector<32x8xf32>
    %c6_i32_83 = arith.constant 6 : i32
    %118 = arith.addi %c6_i32_83, %3 : i32
    %c1_i32_84 = arith.constant 1 : i32
    %119 = arith.subi %118, %c1_i32_84 : i32
    %c2_i32_85 = arith.constant 2 : i32
    %120 = arith.addi %119, %c2_i32_85 : i32
    %121 = arith.index_cast %120 : i32 to index
    %c7_86 = arith.constant 7 : index
    %c0_87 = arith.constant 0 : index
    %122 = vector.load %arg18[%121, %c7_86, %c0_87] : memref<20x20x16xf32, #tpu.memory_space<vmem>>, vector<4x8x16xf32>
    %123 = vector.shape_cast %122 : vector<4x8x16xf32> to vector<32x16xf32>
    %124 = arith.truncf %123 : vector<32x16xf32> to vector<32x16xbf16>
    %c8 = arith.constant 8 : index
    %c0_88 = arith.constant 0 : index
    %c0_89 = arith.constant 0 : index
    %125 = vector.load %arg8[%c8, %c0_88, %c0_89] : memref<9x16x8xbf16, #tpu.memory_space<vmem>>, vector<1x16x8xbf16>
    %126 = vector.shape_cast %125 : vector<1x16x8xbf16> to vector<16x8xbf16>
    %cst_90 = arith.constant dense<0.000000e+00> : vector<32x8xf32>
    %127 = tpu.matmul %124, %126, %cst_90 {dimension_numbers = #tpu.dot_dimension_numbers<[1], [0], [0], [1], [0, 0, 1, 1], [], []>} : vector<32x16xbf16>, vector<16x8xbf16>, vector<32x8xf32> -> vector<32x8xf32>
    %128 = arith.addf %117, %127 : vector<32x8xf32>
    %c0_91 = arith.constant 0 : index
    %c0_92 = arith.constant 0 : index
    %129 = vector.load %arg9[%c0_91, %c0_92] : memref<1x8xf32, #tpu.memory_space<vmem>>, vector<1x8xf32>
    %130 = vector.broadcast %129 : vector<1x8xf32> to vector<32x8xf32>
    %131 = arith.addf %128, %130 : vector<32x8xf32>
    %132 = arith.truncf %131 : vector<32x8xf32> to vector<32x8xbf16>
    %c0_93 = arith.constant 0 : index
    %c0_94 = arith.constant 0 : index
    %c8_95 = arith.constant 8 : index
    %133 = vector.load %arg14[%c0_93, %c0_94, %c8_95] : memref<1x32x32xbf16, #tpu.memory_space<vmem>>, vector<1x32x8xbf16>
    %134 = vector.shape_cast %133 : vector<1x32x8xbf16> to vector<32x8xbf16>
    %135 = vector.shape_cast %132 : vector<32x8xbf16> to vector<1x32x8xbf16>
    tpu.vector_store %arg14[%c0_93, %c0_94, %c8_95], %135 {strides = array<i32>} : memref<1x32x32xbf16, #tpu.memory_space<vmem>>, vector<1x32x8xbf16>,
    %c0_96 = arith.constant 0 : index
    %c8_97 = arith.constant 8 : index
    %136 = vector.load %arg19[%c0_96, %c8_97] : memref<1x32xf32, #tpu.memory_space<vmem>>, vector<1x8xf32>
    %cst_98 = arith.constant dense<0.000000e+00> : vector<8xf32>
    %137 = vector.multi_reduction <add>, %131, %cst_98 [0] : vector<32x8xf32> to vector<8xf32>
    %138 = vector.shape_cast %137 : vector<8xf32> to vector<1x8xf32>
    %139 = arith.addf %136, %138 : vector<1x8xf32>
    %c0_99 = arith.constant 0 : index
    %c8_100 = arith.constant 8 : index
    %140 = vector.load %arg19[%c0_99, %c8_100] : memref<1x32xf32, #tpu.memory_space<vmem>>, vector<1x8xf32>
    tpu.vector_store %arg19[%c0_99, %c8_100], %139 {strides = array<i32>} : memref<1x32xf32, #tpu.memory_space<vmem>>, vector<1x8xf32>,
    %c0_101 = arith.constant 0 : index
    %c8_102 = arith.constant 8 : index
    %141 = vector.load %arg20[%c0_101, %c8_102] : memref<1x32xf32, #tpu.memory_space<vmem>>, vector<1x8xf32>
    %142 = arith.mulf %131, %131 : vector<32x8xf32>
    %cst_103 = arith.constant dense<0.000000e+00> : vector<8xf32>
    %143 = vector.multi_reduction <add>, %142, %cst_103 [0] : vector<32x8xf32> to vector<8xf32>
    %144 = vector.shape_cast %143 : vector<8xf32> to vector<1x8xf32>
    %145 = arith.addf %141, %144 : vector<1x8xf32>
    %c0_104 = arith.constant 0 : index
    %c8_105 = arith.constant 8 : index
    %146 = vector.load %arg20[%c0_104, %c8_105] : memref<1x32xf32, #tpu.memory_space<vmem>>, vector<1x8xf32>
    tpu.vector_store %arg20[%c0_104, %c8_105], %145 {strides = array<i32>} : memref<1x32xf32, #tpu.memory_space<vmem>>, vector<1x8xf32>,
    %cst_106 = arith.constant 0.000000e+00 : f32
    %147 = vector.broadcast %cst_106 : f32 to vector<32x8xf32>
    %c6_i32_107 = arith.constant 6 : i32
    %148 = arith.addi %c6_i32_107, %3 : i32
    %c4_i32_108 = arith.constant 4 : i32
    %149 = arith.subi %148, %c4_i32_108 : i32
    %c0_i32_109 = arith.constant 0 : i32
    %150 = arith.addi %149, %c0_i32_109 : i32
    %151 = arith.index_cast %150 : i32 to index
    %c2_110 = arith.constant 2 : index
    %c0_111 = arith.constant 0 : index
    %152 = vector.load %arg18[%151, %c2_110, %c0_111] : memref<20x20x16xf32, #tpu.memory_space<vmem>>, vector<4x8x16xf32>
    %153 = vector.shape_cast %152 : vector<4x8x16xf32> to vector<32x16xf32>
    %154 = arith.truncf %153 : vector<32x16xf32> to vector<32x16xbf16>
    %c0_112 = arith.constant 0 : index
    %c0_113 = arith.constant 0 : index
    %c0_114 = arith.constant 0 : index
    %155 = vector.load %arg10[%c0_112, %c0_113, %c0_114] : memref<9x16x8xbf16, #tpu.memory_space<vmem>>, vector<1x16x8xbf16>
    %156 = vector.shape_cast %155 : vector<1x16x8xbf16> to vector<16x8xbf16>
    %cst_115 = arith.constant dense<0.000000e+00> : vector<32x8xf32>
    %157 = tpu.matmul %154, %156, %cst_115 {dimension_numbers = #tpu.dot_dimension_numbers<[1], [0], [0], [1], [0, 0, 1, 1], [], []>} : vector<32x16xbf16>, vector<16x8xbf16>, vector<32x8xf32> -> vector<32x8xf32>
    %158 = arith.addf %147, %157 : vector<32x8xf32>
    %c6_i32_116 = arith.constant 6 : i32
    %159 = arith.addi %c6_i32_116, %3 : i32
    %c4_i32_117 = arith.constant 4 : i32
    %160 = arith.subi %159, %c4_i32_117 : i32
    %c0_i32_118 = arith.constant 0 : i32
    %161 = arith.addi %160, %c0_i32_118 : i32
    %162 = arith.index_cast %161 : i32 to index
    %c6_119 = arith.constant 6 : index
    %c0_120 = arith.constant 0 : index
    %163 = vector.load %arg18[%162, %c6_119, %c0_120] : memref<20x20x16xf32, #tpu.memory_space<vmem>>, vector<4x8x16xf32>
    %164 = vector.shape_cast %163 : vector<4x8x16xf32> to vector<32x16xf32>
    %165 = arith.truncf %164 : vector<32x16xf32> to vector<32x16xbf16>
    %c1_121 = arith.constant 1 : index
    %c0_122 = arith.constant 0 : index
    %c0_123 = arith.constant 0 : index
    %166 = vector.load %arg10[%c1_121, %c0_122, %c0_123] : memref<9x16x8xbf16, #tpu.memory_space<vmem>>, vector<1x16x8xbf16>
    %167 = vector.shape_cast %166 : vector<1x16x8xbf16> to vector<16x8xbf16>
    %cst_124 = arith.constant dense<0.000000e+00> : vector<32x8xf32>
    %168 = tpu.matmul %165, %167, %cst_124 {dimension_numbers = #tpu.dot_dimension_numbers<[1], [0], [0], [1], [0, 0, 1, 1], [], []>} : vector<32x16xbf16>, vector<16x8xbf16>, vector<32x8xf32> -> vector<32x8xf32>
    %169 = arith.addf %158, %168 : vector<32x8xf32>
    %c6_i32_125 = arith.constant 6 : i32
    %170 = arith.addi %c6_i32_125, %3 : i32
    %c4_i32_126 = arith.constant 4 : i32
    %171 = arith.subi %170, %c4_i32_126 : i32
    %c0_i32_127 = arith.constant 0 : i32
    %172 = arith.addi %171, %c0_i32_127 : i32
    %173 = arith.index_cast %172 : i32 to index
    %c10 = arith.constant 10 : index
    %c0_128 = arith.constant 0 : index
    %174 = vector.load %arg18[%173, %c10, %c0_128] : memref<20x20x16xf32, #tpu.memory_space<vmem>>, vector<4x8x16xf32>
    %175 = vector.shape_cast %174 : vector<4x8x16xf32> to vector<32x16xf32>
    %176 = arith.truncf %175 : vector<32x16xf32> to vector<32x16xbf16>
    %c2_129 = arith.constant 2 : index
    %c0_130 = arith.constant 0 : index
    %c0_131 = arith.constant 0 : index
    %177 = vector.load %arg10[%c2_129, %c0_130, %c0_131] : memref<9x16x8xbf16, #tpu.memory_space<vmem>>, vector<1x16x8xbf16>
    %178 = vector.shape_cast %177 : vector<1x16x8xbf16> to vector<16x8xbf16>
    %cst_132 = arith.constant dense<0.000000e+00> : vector<32x8xf32>
    %179 = tpu.matmul %176, %178, %cst_132 {dimension_numbers = #tpu.dot_dimension_numbers<[1], [0], [0], [1], [0, 0, 1, 1], [], []>} : vector<32x16xbf16>, vector<16x8xbf16>, vector<32x8xf32> -> vector<32x8xf32>
    %180 = arith.addf %169, %179 : vector<32x8xf32>
    %c6_i32_133 = arith.constant 6 : i32
    %181 = arith.addi %c6_i32_133, %3 : i32
    %c4_i32_134 = arith.constant 4 : i32
    %182 = arith.subi %181, %c4_i32_134 : i32
    %c4_i32_135 = arith.constant 4 : i32
    %183 = arith.addi %182, %c4_i32_135 : i32
    %184 = arith.index_cast %183 : i32 to index
    %c2_136 = arith.constant 2 : index
    %c0_137 = arith.constant 0 : index
    %185 = vector.load %arg18[%184, %c2_136, %c0_137] : memref<20x20x16xf32, #tpu.memory_space<vmem>>, vector<4x8x16xf32>
    %186 = vector.shape_cast %185 : vector<4x8x16xf32> to vector<32x16xf32>
    %187 = arith.truncf %186 : vector<32x16xf32> to vector<32x16xbf16>
    %c3_138 = arith.constant 3 : index
    %c0_139 = arith.constant 0 : index
    %c0_140 = arith.constant 0 : index
    %188 = vector.load %arg10[%c3_138, %c0_139, %c0_140] : memref<9x16x8xbf16, #tpu.memory_space<vmem>>, vector<1x16x8xbf16>
    %189 = vector.shape_cast %188 : vector<1x16x8xbf16> to vector<16x8xbf16>
    %cst_141 = arith.constant dense<0.000000e+00> : vector<32x8xf32>
    %190 = tpu.matmul %187, %189, %cst_141 {dimension_numbers = #tpu.dot_dimension_numbers<[1], [0], [0], [1], [0, 0, 1, 1], [], []>} : vector<32x16xbf16>, vector<16x8xbf16>, vector<32x8xf32> -> vector<32x8xf32>
    %191 = arith.addf %180, %190 : vector<32x8xf32>
    %c6_i32_142 = arith.constant 6 : i32
    %192 = arith.addi %c6_i32_142, %3 : i32
    %c4_i32_143 = arith.constant 4 : i32
    %193 = arith.subi %192, %c4_i32_143 : i32
    %c4_i32_144 = arith.constant 4 : i32
    %194 = arith.addi %193, %c4_i32_144 : i32
    %195 = arith.index_cast %194 : i32 to index
    %c6_145 = arith.constant 6 : index
    %c0_146 = arith.constant 0 : index
    %196 = vector.load %arg18[%195, %c6_145, %c0_146] : memref<20x20x16xf32, #tpu.memory_space<vmem>>, vector<4x8x16xf32>
    %197 = vector.shape_cast %196 : vector<4x8x16xf32> to vector<32x16xf32>
    %198 = arith.truncf %197 : vector<32x16xf32> to vector<32x16xbf16>
    %c4_147 = arith.constant 4 : index
    %c0_148 = arith.constant 0 : index
    %c0_149 = arith.constant 0 : index
    %199 = vector.load %arg10[%c4_147, %c0_148, %c0_149] : memref<9x16x8xbf16, #tpu.memory_space<vmem>>, vector<1x16x8xbf16>
    %200 = vector.shape_cast %199 : vector<1x16x8xbf16> to vector<16x8xbf16>
    %cst_150 = arith.constant dense<0.000000e+00> : vector<32x8xf32>
    %201 = tpu.matmul %198, %200, %cst_150 {dimension_numbers = #tpu.dot_dimension_numbers<[1], [0], [0], [1], [0, 0, 1, 1], [], []>} : vector<32x16xbf16>, vector<16x8xbf16>, vector<32x8xf32> -> vector<32x8xf32>
    %202 = arith.addf %191, %201 : vector<32x8xf32>
    %c6_i32_151 = arith.constant 6 : i32
    %203 = arith.addi %c6_i32_151, %3 : i32
    %c4_i32_152 = arith.constant 4 : i32
    %204 = arith.subi %203, %c4_i32_152 : i32
    %c4_i32_153 = arith.constant 4 : i32
    %205 = arith.addi %204, %c4_i32_153 : i32
    %206 = arith.index_cast %205 : i32 to index
    %c10_154 = arith.constant 10 : index
    %c0_155 = arith.constant 0 : index
    %207 = vector.load %arg18[%206, %c10_154, %c0_155] : memref<20x20x16xf32, #tpu.memory_space<vmem>>, vector<4x8x16xf32>
    %208 = vector.shape_cast %207 : vector<4x8x16xf32> to vector<32x16xf32>
    %209 = arith.truncf %208 : vector<32x16xf32> to vector<32x16xbf16>
    %c5_156 = arith.constant 5 : index
    %c0_157 = arith.constant 0 : index
    %c0_158 = arith.constant 0 : index
    %210 = vector.load %arg10[%c5_156, %c0_157, %c0_158] : memref<9x16x8xbf16, #tpu.memory_space<vmem>>, vector<1x16x8xbf16>
    %211 = vector.shape_cast %210 : vector<1x16x8xbf16> to vector<16x8xbf16>
    %cst_159 = arith.constant dense<0.000000e+00> : vector<32x8xf32>
    %212 = tpu.matmul %209, %211, %cst_159 {dimension_numbers = #tpu.dot_dimension_numbers<[1], [0], [0], [1], [0, 0, 1, 1], [], []>} : vector<32x16xbf16>, vector<16x8xbf16>, vector<32x8xf32> -> vector<32x8xf32>
    %213 = arith.addf %202, %212 : vector<32x8xf32>
    %c6_i32_160 = arith.constant 6 : i32
    %214 = arith.addi %c6_i32_160, %3 : i32
    %c4_i32_161 = arith.constant 4 : i32
    %215 = arith.subi %214, %c4_i32_161 : i32
    %c8_i32 = arith.constant 8 : i32
    %216 = arith.addi %215, %c8_i32 : i32
    %217 = arith.index_cast %216 : i32 to index
    %c2_162 = arith.constant 2 : index
    %c0_163 = arith.constant 0 : index
    %218 = vector.load %arg18[%217, %c2_162, %c0_163] : memref<20x20x16xf32, #tpu.memory_space<vmem>>, vector<4x8x16xf32>
    %219 = vector.shape_cast %218 : vector<4x8x16xf32> to vector<32x16xf32>
    %220 = arith.truncf %219 : vector<32x16xf32> to vector<32x16xbf16>
    %c6_164 = arith.constant 6 : index
    %c0_165 = arith.constant 0 : index
    %c0_166 = arith.constant 0 : index
    %221 = vector.load %arg10[%c6_164, %c0_165, %c0_166] : memref<9x16x8xbf16, #tpu.memory_space<vmem>>, vector<1x16x8xbf16>
    %222 = vector.shape_cast %221 : vector<1x16x8xbf16> to vector<16x8xbf16>
    %cst_167 = arith.constant dense<0.000000e+00> : vector<32x8xf32>
    %223 = tpu.matmul %220, %222, %cst_167 {dimension_numbers = #tpu.dot_dimension_numbers<[1], [0], [0], [1], [0, 0, 1, 1], [], []>} : vector<32x16xbf16>, vector<16x8xbf16>, vector<32x8xf32> -> vector<32x8xf32>
    %224 = arith.addf %213, %223 : vector<32x8xf32>
    %c6_i32_168 = arith.constant 6 : i32
    %225 = arith.addi %c6_i32_168, %3 : i32
    %c4_i32_169 = arith.constant 4 : i32
    %226 = arith.subi %225, %c4_i32_169 : i32
    %c8_i32_170 = arith.constant 8 : i32
    %227 = arith.addi %226, %c8_i32_170 : i32
    %228 = arith.index_cast %227 : i32 to index
    %c6_171 = arith.constant 6 : index
    %c0_172 = arith.constant 0 : index
    %229 = vector.load %arg18[%228, %c6_171, %c0_172] : memref<20x20x16xf32, #tpu.memory_space<vmem>>, vector<4x8x16xf32>
    %230 = vector.shape_cast %229 : vector<4x8x16xf32> to vector<32x16xf32>
    %231 = arith.truncf %230 : vector<32x16xf32> to vector<32x16xbf16>
    %c7_173 = arith.constant 7 : index
    %c0_174 = arith.constant 0 : index
    %c0_175 = arith.constant 0 : index
    %232 = vector.load %arg10[%c7_173, %c0_174, %c0_175] : memref<9x16x8xbf16, #tpu.memory_space<vmem>>, vector<1x16x8xbf16>
    %233 = vector.shape_cast %232 : vector<1x16x8xbf16> to vector<16x8xbf16>
    %cst_176 = arith.constant dense<0.000000e+00> : vector<32x8xf32>
    %234 = tpu.matmul %231, %233, %cst_176 {dimension_numbers = #tpu.dot_dimension_numbers<[1], [0], [0], [1], [0, 0, 1, 1], [], []>} : vector<32x16xbf16>, vector<16x8xbf16>, vector<32x8xf32> -> vector<32x8xf32>
    %235 = arith.addf %224, %234 : vector<32x8xf32>
    %c6_i32_177 = arith.constant 6 : i32
    %236 = arith.addi %c6_i32_177, %3 : i32
    %c4_i32_178 = arith.constant 4 : i32
    %237 = arith.subi %236, %c4_i32_178 : i32
    %c8_i32_179 = arith.constant 8 : i32
    %238 = arith.addi %237, %c8_i32_179 : i32
    %239 = arith.index_cast %238 : i32 to index
    %c10_180 = arith.constant 10 : index
    %c0_181 = arith.constant 0 : index
    %240 = vector.load %arg18[%239, %c10_180, %c0_181] : memref<20x20x16xf32, #tpu.memory_space<vmem>>, vector<4x8x16xf32>
    %241 = vector.shape_cast %240 : vector<4x8x16xf32> to vector<32x16xf32>
    %242 = arith.truncf %241 : vector<32x16xf32> to vector<32x16xbf16>
    %c8_182 = arith.constant 8 : index
    %c0_183 = arith.constant 0 : index
    %c0_184 = arith.constant 0 : index
    %243 = vector.load %arg10[%c8_182, %c0_183, %c0_184] : memref<9x16x8xbf16, #tpu.memory_space<vmem>>, vector<1x16x8xbf16>
    %244 = vector.shape_cast %243 : vector<1x16x8xbf16> to vector<16x8xbf16>
    %cst_185 = arith.constant dense<0.000000e+00> : vector<32x8xf32>
    %245 = tpu.matmul %242, %244, %cst_185 {dimension_numbers = #tpu.dot_dimension_numbers<[1], [0], [0], [1], [0, 0, 1, 1], [], []>} : vector<32x16xbf16>, vector<16x8xbf16>, vector<32x8xf32> -> vector<32x8xf32>
    %246 = arith.addf %235, %245 : vector<32x8xf32>
    %c0_186 = arith.constant 0 : index
    %c0_187 = arith.constant 0 : index
    %247 = vector.load %arg11[%c0_186, %c0_187] : memref<1x8xf32, #tpu.memory_space<vmem>>, vector<1x8xf32>
    %248 = vector.broadcast %247 : vector<1x8xf32> to vector<32x8xf32>
    %249 = arith.addf %246, %248 : vector<32x8xf32>
    %250 = arith.truncf %249 : vector<32x8xf32> to vector<32x8xbf16>
    %c0_188 = arith.constant 0 : index
    %c0_189 = arith.constant 0 : index
    %c16 = arith.constant 16 : index
    %251 = vector.load %arg14[%c0_188, %c0_189, %c16] : memref<1x32x32xbf16, #tpu.memory_space<vmem>>, vector<1x32x8xbf16>
    %252 = vector.shape_cast %251 : vector<1x32x8xbf16> to vector<32x8xbf16>
    %253 = vector.shape_cast %250 : vector<32x8xbf16> to vector<1x32x8xbf16>
    tpu.vector_store %arg14[%c0_188, %c0_189, %c16], %253 {strides = array<i32>} : memref<1x32x32xbf16, #tpu.memory_space<vmem>>, vector<1x32x8xbf16>,
    %c0_190 = arith.constant 0 : index
    %c16_191 = arith.constant 16 : index
    %254 = vector.load %arg19[%c0_190, %c16_191] : memref<1x32xf32, #tpu.memory_space<vmem>>, vector<1x8xf32>
    %cst_192 = arith.constant dense<0.000000e+00> : vector<8xf32>
    %255 = vector.multi_reduction <add>, %249, %cst_192 [0] : vector<32x8xf32> to vector<8xf32>
    %256 = vector.shape_cast %255 : vector<8xf32> to vector<1x8xf32>
    %257 = arith.addf %254, %256 : vector<1x8xf32>
    %c0_193 = arith.constant 0 : index
    %c16_194 = arith.constant 16 : index
    %258 = vector.load %arg19[%c0_193, %c16_194] : memref<1x32xf32, #tpu.memory_space<vmem>>, vector<1x8xf32>
    tpu.vector_store %arg19[%c0_193, %c16_194], %257 {strides = array<i32>} : memref<1x32xf32, #tpu.memory_space<vmem>>, vector<1x8xf32>,
    %c0_195 = arith.constant 0 : index
    %c16_196 = arith.constant 16 : index
    %259 = vector.load %arg20[%c0_195, %c16_196] : memref<1x32xf32, #tpu.memory_space<vmem>>, vector<1x8xf32>
    %260 = arith.mulf %249, %249 : vector<32x8xf32>
    %cst_197 = arith.constant dense<0.000000e+00> : vector<8xf32>
    %261 = vector.multi_reduction <add>, %260, %cst_197 [0] : vector<32x8xf32> to vector<8xf32>
    %262 = vector.shape_cast %261 : vector<8xf32> to vector<1x8xf32>
    %263 = arith.addf %259, %262 : vector<1x8xf32>
    %c0_198 = arith.constant 0 : index
    %c16_199 = arith.constant 16 : index
    %264 = vector.load %arg20[%c0_198, %c16_199] : memref<1x32xf32, #tpu.memory_space<vmem>>, vector<1x8xf32>
    tpu.vector_store %arg20[%c0_198, %c16_199], %263 {strides = array<i32>} : memref<1x32xf32, #tpu.memory_space<vmem>>, vector<1x8xf32>,
    %cst_200 = arith.constant 0.000000e+00 : f32
    %265 = vector.broadcast %cst_200 : f32 to vector<32x8xf32>
    %c6_i32_201 = arith.constant 6 : i32
    %266 = arith.addi %c6_i32_201, %3 : i32
    %c6_i32_202 = arith.constant 6 : i32
    %267 = arith.subi %266, %c6_i32_202 : i32
    %c0_i32_203 = arith.constant 0 : i32
    %268 = arith.addi %267, %c0_i32_203 : i32
    %269 = arith.index_cast %268 : i32 to index
    %c0_204 = arith.constant 0 : index
    %c0_205 = arith.constant 0 : index
    %270 = vector.load %arg18[%269, %c0_204, %c0_205] : memref<20x20x16xf32, #tpu.memory_space<vmem>>, vector<4x8x16xf32>
    %271 = vector.shape_cast %270 : vector<4x8x16xf32> to vector<32x16xf32>
    %272 = arith.truncf %271 : vector<32x16xf32> to vector<32x16xbf16>
    %c0_206 = arith.constant 0 : index
    %c0_207 = arith.constant 0 : index
    %c0_208 = arith.constant 0 : index
    %273 = vector.load %arg12[%c0_206, %c0_207, %c0_208] : memref<9x16x8xbf16, #tpu.memory_space<vmem>>, vector<1x16x8xbf16>
    %274 = vector.shape_cast %273 : vector<1x16x8xbf16> to vector<16x8xbf16>
    %cst_209 = arith.constant dense<0.000000e+00> : vector<32x8xf32>
    %275 = tpu.matmul %272, %274, %cst_209 {dimension_numbers = #tpu.dot_dimension_numbers<[1], [0], [0], [1], [0, 0, 1, 1], [], []>} : vector<32x16xbf16>, vector<16x8xbf16>, vector<32x8xf32> -> vector<32x8xf32>
    %276 = arith.addf %265, %275 : vector<32x8xf32>
    %c6_i32_210 = arith.constant 6 : i32
    %277 = arith.addi %c6_i32_210, %3 : i32
    %c6_i32_211 = arith.constant 6 : i32
    %278 = arith.subi %277, %c6_i32_211 : i32
    %c0_i32_212 = arith.constant 0 : i32
    %279 = arith.addi %278, %c0_i32_212 : i32
    %280 = arith.index_cast %279 : i32 to index
    %c6_213 = arith.constant 6 : index
    %c0_214 = arith.constant 0 : index
    %281 = vector.load %arg18[%280, %c6_213, %c0_214] : memref<20x20x16xf32, #tpu.memory_space<vmem>>, vector<4x8x16xf32>
    %282 = vector.shape_cast %281 : vector<4x8x16xf32> to vector<32x16xf32>
    %283 = arith.truncf %282 : vector<32x16xf32> to vector<32x16xbf16>
    %c1_215 = arith.constant 1 : index
    %c0_216 = arith.constant 0 : index
    %c0_217 = arith.constant 0 : index
    %284 = vector.load %arg12[%c1_215, %c0_216, %c0_217] : memref<9x16x8xbf16, #tpu.memory_space<vmem>>, vector<1x16x8xbf16>
    %285 = vector.shape_cast %284 : vector<1x16x8xbf16> to vector<16x8xbf16>
    %cst_218 = arith.constant dense<0.000000e+00> : vector<32x8xf32>
    %286 = tpu.matmul %283, %285, %cst_218 {dimension_numbers = #tpu.dot_dimension_numbers<[1], [0], [0], [1], [0, 0, 1, 1], [], []>} : vector<32x16xbf16>, vector<16x8xbf16>, vector<32x8xf32> -> vector<32x8xf32>
    %287 = arith.addf %276, %286 : vector<32x8xf32>
    %c6_i32_219 = arith.constant 6 : i32
    %288 = arith.addi %c6_i32_219, %3 : i32
    %c6_i32_220 = arith.constant 6 : i32
    %289 = arith.subi %288, %c6_i32_220 : i32
    %c0_i32_221 = arith.constant 0 : i32
    %290 = arith.addi %289, %c0_i32_221 : i32
    %291 = arith.index_cast %290 : i32 to index
    %c12 = arith.constant 12 : index
    %c0_222 = arith.constant 0 : index
    %292 = vector.load %arg18[%291, %c12, %c0_222] : memref<20x20x16xf32, #tpu.memory_space<vmem>>, vector<4x8x16xf32>
    %293 = vector.shape_cast %292 : vector<4x8x16xf32> to vector<32x16xf32>
    %294 = arith.truncf %293 : vector<32x16xf32> to vector<32x16xbf16>
    %c2_223 = arith.constant 2 : index
    %c0_224 = arith.constant 0 : index
    %c0_225 = arith.constant 0 : index
    %295 = vector.load %arg12[%c2_223, %c0_224, %c0_225] : memref<9x16x8xbf16, #tpu.memory_space<vmem>>, vector<1x16x8xbf16>
    %296 = vector.shape_cast %295 : vector<1x16x8xbf16> to vector<16x8xbf16>
    %cst_226 = arith.constant dense<0.000000e+00> : vector<32x8xf32>
    %297 = tpu.matmul %294, %296, %cst_226 {dimension_numbers = #tpu.dot_dimension_numbers<[1], [0], [0], [1], [0, 0, 1, 1], [], []>} : vector<32x16xbf16>, vector<16x8xbf16>, vector<32x8xf32> -> vector<32x8xf32>
    %298 = arith.addf %287, %297 : vector<32x8xf32>
    %c6_i32_227 = arith.constant 6 : i32
    %299 = arith.addi %c6_i32_227, %3 : i32
    %c6_i32_228 = arith.constant 6 : i32
    %300 = arith.subi %299, %c6_i32_228 : i32
    %c6_i32_229 = arith.constant 6 : i32
    %301 = arith.addi %300, %c6_i32_229 : i32
    %302 = arith.index_cast %301 : i32 to index
    %c0_230 = arith.constant 0 : index
    %c0_231 = arith.constant 0 : index
    %303 = vector.load %arg18[%302, %c0_230, %c0_231] : memref<20x20x16xf32, #tpu.memory_space<vmem>>, vector<4x8x16xf32>
    %304 = vector.shape_cast %303 : vector<4x8x16xf32> to vector<32x16xf32>
    %305 = arith.truncf %304 : vector<32x16xf32> to vector<32x16xbf16>
    %c3_232 = arith.constant 3 : index
    %c0_233 = arith.constant 0 : index
    %c0_234 = arith.constant 0 : index
    %306 = vector.load %arg12[%c3_232, %c0_233, %c0_234] : memref<9x16x8xbf16, #tpu.memory_space<vmem>>, vector<1x16x8xbf16>
    %307 = vector.shape_cast %306 : vector<1x16x8xbf16> to vector<16x8xbf16>
    %cst_235 = arith.constant dense<0.000000e+00> : vector<32x8xf32>
    %308 = tpu.matmul %305, %307, %cst_235 {dimension_numbers = #tpu.dot_dimension_numbers<[1], [0], [0], [1], [0, 0, 1, 1], [], []>} : vector<32x16xbf16>, vector<16x8xbf16>, vector<32x8xf32> -> vector<32x8xf32>
    %309 = arith.addf %298, %308 : vector<32x8xf32>
    %c6_i32_236 = arith.constant 6 : i32
    %310 = arith.addi %c6_i32_236, %3 : i32
    %c6_i32_237 = arith.constant 6 : i32
    %311 = arith.subi %310, %c6_i32_237 : i32
    %c6_i32_238 = arith.constant 6 : i32
    %312 = arith.addi %311, %c6_i32_238 : i32
    %313 = arith.index_cast %312 : i32 to index
    %c6_239 = arith.constant 6 : index
    %c0_240 = arith.constant 0 : index
    %314 = vector.load %arg18[%313, %c6_239, %c0_240] : memref<20x20x16xf32, #tpu.memory_space<vmem>>, vector<4x8x16xf32>
    %315 = vector.shape_cast %314 : vector<4x8x16xf32> to vector<32x16xf32>
    %316 = arith.truncf %315 : vector<32x16xf32> to vector<32x16xbf16>
    %c4_241 = arith.constant 4 : index
    %c0_242 = arith.constant 0 : index
    %c0_243 = arith.constant 0 : index
    %317 = vector.load %arg12[%c4_241, %c0_242, %c0_243] : memref<9x16x8xbf16, #tpu.memory_space<vmem>>, vector<1x16x8xbf16>
    %318 = vector.shape_cast %317 : vector<1x16x8xbf16> to vector<16x8xbf16>
    %cst_244 = arith.constant dense<0.000000e+00> : vector<32x8xf32>
    %319 = tpu.matmul %316, %318, %cst_244 {dimension_numbers = #tpu.dot_dimension_numbers<[1], [0], [0], [1], [0, 0, 1, 1], [], []>} : vector<32x16xbf16>, vector<16x8xbf16>, vector<32x8xf32> -> vector<32x8xf32>
    %320 = arith.addf %309, %319 : vector<32x8xf32>
    %c6_i32_245 = arith.constant 6 : i32
    %321 = arith.addi %c6_i32_245, %3 : i32
    %c6_i32_246 = arith.constant 6 : i32
    %322 = arith.subi %321, %c6_i32_246 : i32
    %c6_i32_247 = arith.constant 6 : i32
    %323 = arith.addi %322, %c6_i32_247 : i32
    %324 = arith.index_cast %323 : i32 to index
    %c12_248 = arith.constant 12 : index
    %c0_249 = arith.constant 0 : index
    %325 = vector.load %arg18[%324, %c12_248, %c0_249] : memref<20x20x16xf32, #tpu.memory_space<vmem>>, vector<4x8x16xf32>
    %326 = vector.shape_cast %325 : vector<4x8x16xf32> to vector<32x16xf32>
    %327 = arith.truncf %326 : vector<32x16xf32> to vector<32x16xbf16>
    %c5_250 = arith.constant 5 : index
    %c0_251 = arith.constant 0 : index
    %c0_252 = arith.constant 0 : index
    %328 = vector.load %arg12[%c5_250, %c0_251, %c0_252] : memref<9x16x8xbf16, #tpu.memory_space<vmem>>, vector<1x16x8xbf16>
    %329 = vector.shape_cast %328 : vector<1x16x8xbf16> to vector<16x8xbf16>
    %cst_253 = arith.constant dense<0.000000e+00> : vector<32x8xf32>
    %330 = tpu.matmul %327, %329, %cst_253 {dimension_numbers = #tpu.dot_dimension_numbers<[1], [0], [0], [1], [0, 0, 1, 1], [], []>} : vector<32x16xbf16>, vector<16x8xbf16>, vector<32x8xf32> -> vector<32x8xf32>
    %331 = arith.addf %320, %330 : vector<32x8xf32>
    %c6_i32_254 = arith.constant 6 : i32
    %332 = arith.addi %c6_i32_254, %3 : i32
    %c6_i32_255 = arith.constant 6 : i32
    %333 = arith.subi %332, %c6_i32_255 : i32
    %c12_i32 = arith.constant 12 : i32
    %334 = arith.addi %333, %c12_i32 : i32
    %335 = arith.index_cast %334 : i32 to index
    %c0_256 = arith.constant 0 : index
    %c0_257 = arith.constant 0 : index
    %336 = vector.load %arg18[%335, %c0_256, %c0_257] : memref<20x20x16xf32, #tpu.memory_space<vmem>>, vector<4x8x16xf32>
    %337 = vector.shape_cast %336 : vector<4x8x16xf32> to vector<32x16xf32>
    %338 = arith.truncf %337 : vector<32x16xf32> to vector<32x16xbf16>
    %c6_258 = arith.constant 6 : index
    %c0_259 = arith.constant 0 : index
    %c0_260 = arith.constant 0 : index
    %339 = vector.load %arg12[%c6_258, %c0_259, %c0_260] : memref<9x16x8xbf16, #tpu.memory_space<vmem>>, vector<1x16x8xbf16>
    %340 = vector.shape_cast %339 : vector<1x16x8xbf16> to vector<16x8xbf16>
    %cst_261 = arith.constant dense<0.000000e+00> : vector<32x8xf32>
    %341 = tpu.matmul %338, %340, %cst_261 {dimension_numbers = #tpu.dot_dimension_numbers<[1], [0], [0], [1], [0, 0, 1, 1], [], []>} : vector<32x16xbf16>, vector<16x8xbf16>, vector<32x8xf32> -> vector<32x8xf32>
    %342 = arith.addf %331, %341 : vector<32x8xf32>
    %c6_i32_262 = arith.constant 6 : i32
    %343 = arith.addi %c6_i32_262, %3 : i32
    %c6_i32_263 = arith.constant 6 : i32
    %344 = arith.subi %343, %c6_i32_263 : i32
    %c12_i32_264 = arith.constant 12 : i32
    %345 = arith.addi %344, %c12_i32_264 : i32
    %346 = arith.index_cast %345 : i32 to index
    %c6_265 = arith.constant 6 : index
    %c0_266 = arith.constant 0 : index
    %347 = vector.load %arg18[%346, %c6_265, %c0_266] : memref<20x20x16xf32, #tpu.memory_space<vmem>>, vector<4x8x16xf32>
    %348 = vector.shape_cast %347 : vector<4x8x16xf32> to vector<32x16xf32>
    %349 = arith.truncf %348 : vector<32x16xf32> to vector<32x16xbf16>
    %c7_267 = arith.constant 7 : index
    %c0_268 = arith.constant 0 : index
    %c0_269 = arith.constant 0 : index
    %350 = vector.load %arg12[%c7_267, %c0_268, %c0_269] : memref<9x16x8xbf16, #tpu.memory_space<vmem>>, vector<1x16x8xbf16>
    %351 = vector.shape_cast %350 : vector<1x16x8xbf16> to vector<16x8xbf16>
    %cst_270 = arith.constant dense<0.000000e+00> : vector<32x8xf32>
    %352 = tpu.matmul %349, %351, %cst_270 {dimension_numbers = #tpu.dot_dimension_numbers<[1], [0], [0], [1], [0, 0, 1, 1], [], []>} : vector<32x16xbf16>, vector<16x8xbf16>, vector<32x8xf32> -> vector<32x8xf32>
    %353 = arith.addf %342, %352 : vector<32x8xf32>
    %c6_i32_271 = arith.constant 6 : i32
    %354 = arith.addi %c6_i32_271, %3 : i32
    %c6_i32_272 = arith.constant 6 : i32
    %355 = arith.subi %354, %c6_i32_272 : i32
    %c12_i32_273 = arith.constant 12 : i32
    %356 = arith.addi %355, %c12_i32_273 : i32
    %357 = arith.index_cast %356 : i32 to index
    %c12_274 = arith.constant 12 : index
    %c0_275 = arith.constant 0 : index
    %358 = vector.load %arg18[%357, %c12_274, %c0_275] : memref<20x20x16xf32, #tpu.memory_space<vmem>>, vector<4x8x16xf32>
    %359 = vector.shape_cast %358 : vector<4x8x16xf32> to vector<32x16xf32>
    %360 = arith.truncf %359 : vector<32x16xf32> to vector<32x16xbf16>
    %c8_276 = arith.constant 8 : index
    %c0_277 = arith.constant 0 : index
    %c0_278 = arith.constant 0 : index
    %361 = vector.load %arg12[%c8_276, %c0_277, %c0_278] : memref<9x16x8xbf16, #tpu.memory_space<vmem>>, vector<1x16x8xbf16>
    %362 = vector.shape_cast %361 : vector<1x16x8xbf16> to vector<16x8xbf16>
    %cst_279 = arith.constant dense<0.000000e+00> : vector<32x8xf32>
    %363 = tpu.matmul %360, %362, %cst_279 {dimension_numbers = #tpu.dot_dimension_numbers<[1], [0], [0], [1], [0, 0, 1, 1], [], []>} : vector<32x16xbf16>, vector<16x8xbf16>, vector<32x8xf32> -> vector<32x8xf32>
    %364 = arith.addf %353, %363 : vector<32x8xf32>
    %c0_280 = arith.constant 0 : index
    %c0_281 = arith.constant 0 : index
    %365 = vector.load %arg13[%c0_280, %c0_281] : memref<1x8xf32, #tpu.memory_space<vmem>>, vector<1x8xf32>
    %366 = vector.broadcast %365 : vector<1x8xf32> to vector<32x8xf32>
    %367 = arith.addf %364, %366 : vector<32x8xf32>
    %368 = arith.truncf %367 : vector<32x8xf32> to vector<32x8xbf16>
    %c0_282 = arith.constant 0 : index
    %c0_283 = arith.constant 0 : index
    %c24 = arith.constant 24 : index
    %369 = vector.load %arg14[%c0_282, %c0_283, %c24] : memref<1x32x32xbf16, #tpu.memory_space<vmem>>, vector<1x32x8xbf16>
    %370 = vector.shape_cast %369 : vector<1x32x8xbf16> to vector<32x8xbf16>
    %371 = vector.shape_cast %368 : vector<32x8xbf16> to vector<1x32x8xbf16>
    tpu.vector_store %arg14[%c0_282, %c0_283, %c24], %371 {strides = array<i32>} : memref<1x32x32xbf16, #tpu.memory_space<vmem>>, vector<1x32x8xbf16>,
    %c0_284 = arith.constant 0 : index
    %c24_285 = arith.constant 24 : index
    %372 = vector.load %arg19[%c0_284, %c24_285] : memref<1x32xf32, #tpu.memory_space<vmem>>, vector<1x8xf32>
    %cst_286 = arith.constant dense<0.000000e+00> : vector<8xf32>
    %373 = vector.multi_reduction <add>, %367, %cst_286 [0] : vector<32x8xf32> to vector<8xf32>
    %374 = vector.shape_cast %373 : vector<8xf32> to vector<1x8xf32>
    %375 = arith.addf %372, %374 : vector<1x8xf32>
    %c0_287 = arith.constant 0 : index
    %c24_288 = arith.constant 24 : index
    %376 = vector.load %arg19[%c0_287, %c24_288] : memref<1x32xf32, #tpu.memory_space<vmem>>, vector<1x8xf32>
    tpu.vector_store %arg19[%c0_287, %c24_288], %375 {strides = array<i32>} : memref<1x32xf32, #tpu.memory_space<vmem>>, vector<1x8xf32>,
    %c0_289 = arith.constant 0 : index
    %c24_290 = arith.constant 24 : index
    %377 = vector.load %arg20[%c0_289, %c24_290] : memref<1x32xf32, #tpu.memory_space<vmem>>, vector<1x8xf32>
    %378 = arith.mulf %367, %367 : vector<32x8xf32>
    %cst_291 = arith.constant dense<0.000000e+00> : vector<8xf32>
    %379 = vector.multi_reduction <add>, %378, %cst_291 [0] : vector<32x8xf32> to vector<8xf32>
    %380 = vector.shape_cast %379 : vector<8xf32> to vector<1x8xf32>
    %381 = arith.addf %377, %380 : vector<1x8xf32>
    %c0_292 = arith.constant 0 : index
    %c24_293 = arith.constant 24 : index
    %382 = vector.load %arg20[%c0_292, %c24_293] : memref<1x32xf32, #tpu.memory_space<vmem>>, vector<1x8xf32>
    tpu.vector_store %arg20[%c0_292, %c24_293], %381 {strides = array<i32>} : memref<1x32xf32, #tpu.memory_space<vmem>>, vector<1x8xf32>,
    %c1_i32_294 = arith.constant 1 : i32
    %383 = arith.cmpi eq, %arg1, %c1_i32_294 : i32
    %384 = arith.extui %383 : i1 to i32
    %c0_i32_295 = arith.constant 0 : i32
    %385 = arith.cmpi ne, %384, %c0_i32_295 : i32
    scf.if %385 {
      %c0_296 = arith.constant 0 : index
      %c0_297 = arith.constant 0 : index
      %386 = vector.load %arg19[%c0_296, %c0_297] : memref<1x32xf32, #tpu.memory_space<vmem>>, vector<1x32xf32>
      %c0_298 = arith.constant 0 : index
      %c0_299 = arith.constant 0 : index
      %c0_300 = arith.constant 0 : index
      %387 = vector.load %arg15[%c0_298, %c0_299, %c0_300] : memref<1x1x32xf32, #tpu.memory_space<vmem>>, vector<1x1x32xf32>
      %388 = vector.shape_cast %387 : vector<1x1x32xf32> to vector<1x32xf32>
      %389 = vector.shape_cast %386 : vector<1x32xf32> to vector<1x1x32xf32>
      tpu.vector_store %arg15[%c0_298, %c0_299, %c0_300], %389 {strides = array<i32>} : memref<1x1x32xf32, #tpu.memory_space<vmem>>, vector<1x1x32xf32>,
      %c0_301 = arith.constant 0 : index
      %c0_302 = arith.constant 0 : index
      %390 = vector.load %arg20[%c0_301, %c0_302] : memref<1x32xf32, #tpu.memory_space<vmem>>, vector<1x32xf32>
      %c0_303 = arith.constant 0 : index
      %c0_304 = arith.constant 0 : index
      %c0_305 = arith.constant 0 : index
      %391 = vector.load %arg16[%c0_303, %c0_304, %c0_305] : memref<1x1x32xf32, #tpu.memory_space<vmem>>, vector<1x1x32xf32>
      %392 = vector.shape_cast %391 : vector<1x1x32xf32> to vector<1x32xf32>
      %393 = vector.shape_cast %390 : vector<1x32xf32> to vector<1x1x32xf32>
      tpu.vector_store %arg16[%c0_303, %c0_304, %c0_305], %393 {strides = array<i32>} : memref<1x1x32xf32, #tpu.memory_space<vmem>>, vector<1x1x32xf32>,
      %c0_306 = arith.constant 0 : index
      %c0_307 = arith.constant 0 : index
      %394 = vector.load %arg21[%c0_306, %c0_307] : memref<1x16xf32, #tpu.memory_space<vmem>>, vector<1x16xf32>
      %c0_308 = arith.constant 0 : index
      %c0_309 = arith.constant 0 : index
      %c0_310 = arith.constant 0 : index
      %395 = vector.load %arg17[%c0_308, %c0_309, %c0_310] : memref<1x1x16xf32, #tpu.memory_space<vmem>>, vector<1x1x16xf32>
      %396 = vector.shape_cast %395 : vector<1x1x16xf32> to vector<1x16xf32>
      %397 = vector.shape_cast %394 : vector<1x16xf32> to vector<1x1x16xf32>
      tpu.vector_store %arg17[%c0_308, %c0_309, %c0_310], %397 {strides = array<i32>} : memref<1x1x16xf32, #tpu.memory_space<vmem>>, vector<1x1x16xf32>,
    } else {
    }
    return
  }
  func.func @transform_0(%arg0: i32, %arg1: i32) -> (i32, i32, i32, i32) {
    %c0_i32 = arith.constant 0 : i32
    %c0_i32_0 = arith.constant 0 : i32
    %c0_i32_1 = arith.constant 0 : i32
    %c0_i32_2 = arith.constant 0 : i32
    return %arg0, %c0_i32, %c0_i32_0, %c0_i32_1 : i32, i32, i32, i32
  }
  func.func @transform_1(%arg0: i32, %arg1: i32) -> (i32, i32) {
    %c0_i32 = arith.constant 0 : i32
    %c0_i32_0 = arith.constant 0 : i32
    %c0_i32_1 = arith.constant 0 : i32
    return %c0_i32, %c0_i32_0 : i32, i32
  }
  func.func @transform_2(%arg0: i32, %arg1: i32) -> (i32, i32) {
    %c0_i32 = arith.constant 0 : i32
    %c0_i32_0 = arith.constant 0 : i32
    %c0_i32_1 = arith.constant 0 : i32
    return %c0_i32, %c0_i32_0 : i32, i32
  }
  func.func @transform_3(%arg0: i32, %arg1: i32) -> (i32, i32) {
    %c0_i32 = arith.constant 0 : i32
    %c0_i32_0 = arith.constant 0 : i32
    %c0_i32_1 = arith.constant 0 : i32
    return %c0_i32, %c0_i32_0 : i32, i32
  }
  func.func @transform_4(%arg0: i32, %arg1: i32) -> (i32, i32) {
    %c0_i32 = arith.constant 0 : i32
    %c0_i32_0 = arith.constant 0 : i32
    %c0_i32_1 = arith.constant 0 : i32
    return %c0_i32, %c0_i32_0 : i32, i32
  }
  func.func @transform_5(%arg0: i32, %arg1: i32) -> (i32, i32) {
    %c0_i32 = arith.constant 0 : i32
    %c0_i32_0 = arith.constant 0 : i32
    %c0_i32_1 = arith.constant 0 : i32
    return %c0_i32, %c0_i32_0 : i32, i32
  }
  func.func @transform_6(%arg0: i32, %arg1: i32) -> (i32, i32, i32) {
    %c0_i32 = arith.constant 0 : i32
    %c0_i32_0 = arith.constant 0 : i32
    %c0_i32_1 = arith.constant 0 : i32
    %c0_i32_2 = arith.constant 0 : i32
    return %c0_i32, %c0_i32_0, %c0_i32_1 : i32, i32, i32
  }
  func.func @transform_7(%arg0: i32, %arg1: i32) -> (i32, i32) {
    %c0_i32 = arith.constant 0 : i32
    %c0_i32_0 = arith.constant 0 : i32
    %c0_i32_1 = arith.constant 0 : i32
    return %c0_i32, %c0_i32_0 : i32, i32
  }
  func.func @transform_8(%arg0: i32, %arg1: i32) -> (i32, i32, i32) {
    %c0_i32 = arith.constant 0 : i32
    %c0_i32_0 = arith.constant 0 : i32
    %c0_i32_1 = arith.constant 0 : i32
    %c0_i32_2 = arith.constant 0 : i32
    return %c0_i32, %c0_i32_0, %c0_i32_1 : i32, i32, i32
  }
  func.func @transform_9(%arg0: i32, %arg1: i32) -> (i32, i32) {
    %c0_i32 = arith.constant 0 : i32
    %c0_i32_0 = arith.constant 0 : i32
    %c0_i32_1 = arith.constant 0 : i32
    return %c0_i32, %c0_i32_0 : i32, i32
  }
  func.func @transform_10(%arg0: i32, %arg1: i32) -> (i32, i32, i32) {
    %c0_i32 = arith.constant 0 : i32
    %c0_i32_0 = arith.constant 0 : i32
    %c0_i32_1 = arith.constant 0 : i32
    %c0_i32_2 = arith.constant 0 : i32
    return %c0_i32, %c0_i32_0, %c0_i32_1 : i32, i32, i32
  }
  func.func @transform_11(%arg0: i32, %arg1: i32) -> (i32, i32) {
    %c0_i32 = arith.constant 0 : i32
    %c0_i32_0 = arith.constant 0 : i32
    %c0_i32_1 = arith.constant 0 : i32
    return %c0_i32, %c0_i32_0 : i32, i32
  }
  func.func @transform_12(%arg0: i32, %arg1: i32) -> (i32, i32, i32) {
    %c0_i32 = arith.constant 0 : i32
    %c0_i32_0 = arith.constant 0 : i32
    return %arg0, %arg1, %c0_i32 : i32, i32, i32
  }
  func.func @transform_13(%arg0: i32, %arg1: i32) -> (i32, i32, i32) {
    %c0_i32 = arith.constant 0 : i32
    %c0_i32_0 = arith.constant 0 : i32
    %c0_i32_1 = arith.constant 0 : i32
    return %arg0, %c0_i32, %c0_i32_0 : i32, i32, i32
  }
  func.func @transform_14(%arg0: i32, %arg1: i32) -> (i32, i32, i32) {
    %c0_i32 = arith.constant 0 : i32
    %c0_i32_0 = arith.constant 0 : i32
    %c0_i32_1 = arith.constant 0 : i32
    return %arg0, %c0_i32, %c0_i32_0 : i32, i32, i32
  }
  func.func @transform_15(%arg0: i32, %arg1: i32) -> (i32, i32, i32) {
    %c0_i32 = arith.constant 0 : i32
    %c0_i32_0 = arith.constant 0 : i32
    %c0_i32_1 = arith.constant 0 : i32
    return %arg0, %c0_i32, %c0_i32_0 : i32, i32, i32
  }
}

module attributes {stable_mosaic.version = 11 : i64} {
  func.func @_fuse_kernel(%arg0: i32, %arg1: i32, %arg2: memref<1x64x32xbf16, #tpu.memory_space<vmem>>, %arg3: memref<1x32xf32, #tpu.memory_space<vmem>>, %arg4: memref<1x32xf32, #tpu.memory_space<vmem>>, %arg5: memref<1x32xf32, #tpu.memory_space<vmem>>, %arg6: memref<32x16xbf16, #tpu.memory_space<vmem>>, %arg7: memref<1x1x16xf32, #tpu.memory_space<vmem>>, %arg8: memref<1x64x16xbf16, #tpu.memory_space<vmem>>, %arg9: memref<1x1x16xf32, #tpu.memory_space<vmem>>, %arg10: memref<1x1x16xf32, #tpu.memory_space<vmem>>, %arg11: memref<1x16xf32, #tpu.memory_space<vmem>>, %arg12: memref<1x16xf32, #tpu.memory_space<vmem>>) attributes {dimension_semantics = [#tpu.dimension_semantics<parallel>, #tpu.dimension_semantics<arbitrary>], iteration_bounds = array<i64: 2, 1>, scalar_prefetch = 0 : i64, scratch_operands = 2 : i64, tpu.core_type = #tpu.core_type<tc>, window_params = [{transform_indices = @transform_0, window_bounds = array<i64: 1, 64, 32>}, {pipeline_mode = #tpu.pipeline_mode<synchronous>, transform_indices = @transform_1, window_bounds = array<i64: 1, 32>}, {pipeline_mode = #tpu.pipeline_mode<synchronous>, transform_indices = @transform_2, window_bounds = array<i64: 1, 32>}, {pipeline_mode = #tpu.pipeline_mode<synchronous>, transform_indices = @transform_3, window_bounds = array<i64: 1, 32>}, {pipeline_mode = #tpu.pipeline_mode<synchronous>, transform_indices = @transform_4, window_bounds = array<i64: 32, 16>}, {transform_indices = @transform_5, window_bounds = array<i64: 1, 1, 16>}, {transform_indices = @transform_6, window_bounds = array<i64: 1, 64, 16>}, {transform_indices = @transform_7, window_bounds = array<i64: 1, 1, 16>}, {transform_indices = @transform_8, window_bounds = array<i64: 1, 1, 16>}]} {
    %c0_i32 = arith.constant 0 : i32
    %0 = arith.cmpi eq, %arg1, %c0_i32 : i32
    %1 = arith.extui %0 : i1 to i32
    %c0_i32_0 = arith.constant 0 : i32
    %2 = arith.cmpi ne, %1, %c0_i32_0 : i32
    scf.if %2 {
      %cst_31 = arith.constant 0.000000e+00 : f32
      %45 = vector.broadcast %cst_31 : f32 to vector<1x16xf32>
      %c0_32 = arith.constant 0 : index
      %c0_33 = arith.constant 0 : index
      %46 = vector.load %arg11[%c0_32, %c0_33] : memref<1x16xf32, #tpu.memory_space<vmem>>, vector<1x16xf32>
      tpu.vector_store %arg11[%c0_32, %c0_33], %45 {strides = array<i32>} : memref<1x16xf32, #tpu.memory_space<vmem>>, vector<1x16xf32>,
      %cst_34 = arith.constant 0.000000e+00 : f32
      %47 = vector.broadcast %cst_34 : f32 to vector<1x16xf32>
      %c0_35 = arith.constant 0 : index
      %c0_36 = arith.constant 0 : index
      %48 = vector.load %arg12[%c0_35, %c0_36] : memref<1x16xf32, #tpu.memory_space<vmem>>, vector<1x16xf32>
      tpu.vector_store %arg12[%c0_35, %c0_36], %47 {strides = array<i32>} : memref<1x16xf32, #tpu.memory_space<vmem>>, vector<1x16xf32>,
    } else {
    }
    %c0 = arith.constant 0 : index
    %c0_1 = arith.constant 0 : index
    %c0_2 = arith.constant 0 : index
    %3 = vector.load %arg2[%c0, %c0_1, %c0_2] : memref<1x64x32xbf16, #tpu.memory_space<vmem>>, vector<1x64x32xbf16>
    %4 = vector.shape_cast %3 : vector<1x64x32xbf16> to vector<64x32xbf16>
    %5 = arith.extf %4 : vector<64x32xbf16> to vector<64x32xf32>
    %c0_3 = arith.constant 0 : index
    %c0_4 = arith.constant 0 : index
    %6 = vector.load %arg3[%c0_3, %c0_4] : memref<1x32xf32, #tpu.memory_space<vmem>>, vector<1x32xf32>
    %7 = vector.broadcast %6 : vector<1x32xf32> to vector<64x32xf32>
    %8 = arith.mulf %5, %7 : vector<64x32xf32>
    %c0_5 = arith.constant 0 : index
    %c0_6 = arith.constant 0 : index
    %9 = vector.load %arg4[%c0_5, %c0_6] : memref<1x32xf32, #tpu.memory_space<vmem>>, vector<1x32xf32>
    %10 = vector.broadcast %9 : vector<1x32xf32> to vector<64x32xf32>
    %11 = arith.addf %8, %10 : vector<64x32xf32>
    %c0_7 = arith.constant 0 : index
    %c0_8 = arith.constant 0 : index
    %12 = vector.load %arg5[%c0_7, %c0_8] : memref<1x32xf32, #tpu.memory_space<vmem>>, vector<1x32xf32>
    %cst = arith.constant 0.000000e+00 : f32
    %13 = vector.broadcast %cst : f32 to vector<64x32xf32>
    %14 = arith.maximumf %11, %13 : vector<64x32xf32>
    %cst_9 = arith.constant 0.000000e+00 : f32
    %15 = vector.broadcast %cst_9 : f32 to vector<64x32xf32>
    %16 = arith.minimumf %11, %15 : vector<64x32xf32>
    %17 = vector.broadcast %12 : vector<1x32xf32> to vector<64x32xf32>
    %18 = arith.mulf %17, %16 : vector<64x32xf32>
    %19 = arith.addf %14, %18 : vector<64x32xf32>
    %20 = arith.truncf %19 : vector<64x32xf32> to vector<64x32xbf16>
    %c0_10 = arith.constant 0 : index
    %c0_11 = arith.constant 0 : index
    %21 = vector.load %arg6[%c0_10, %c0_11] : memref<32x16xbf16, #tpu.memory_space<vmem>>, vector<32x16xbf16>
    %cst_12 = arith.constant dense<0.000000e+00> : vector<64x16xf32>
    %22 = tpu.matmul %20, %21, %cst_12 {dimension_numbers = #tpu.dot_dimension_numbers<[1], [0], [0], [1], [0, 0, 1, 1], [], []>} : vector<64x32xbf16>, vector<32x16xbf16>, vector<64x16xf32> -> vector<64x16xf32>
    %c0_13 = arith.constant 0 : index
    %c0_14 = arith.constant 0 : index
    %c0_15 = arith.constant 0 : index
    %23 = vector.load %arg7[%c0_13, %c0_14, %c0_15] : memref<1x1x16xf32, #tpu.memory_space<vmem>>, vector<1x1x16xf32>
    %24 = vector.shape_cast %23 : vector<1x1x16xf32> to vector<1x16xf32>
    %25 = vector.broadcast %24 : vector<1x16xf32> to vector<64x16xf32>
    %26 = arith.addf %22, %25 : vector<64x16xf32>
    %27 = arith.truncf %26 : vector<64x16xf32> to vector<64x16xbf16>
    %c0_16 = arith.constant 0 : index
    %c0_17 = arith.constant 0 : index
    %c0_18 = arith.constant 0 : index
    %28 = vector.load %arg8[%c0_16, %c0_17, %c0_18] : memref<1x64x16xbf16, #tpu.memory_space<vmem>>, vector<1x64x16xbf16>
    %29 = vector.shape_cast %28 : vector<1x64x16xbf16> to vector<64x16xbf16>
    %30 = vector.shape_cast %27 : vector<64x16xbf16> to vector<1x64x16xbf16>
    tpu.vector_store %arg8[%c0_16, %c0_17, %c0_18], %30 {strides = array<i32>} : memref<1x64x16xbf16, #tpu.memory_space<vmem>>, vector<1x64x16xbf16>,
    %c0_19 = arith.constant 0 : index
    %c0_20 = arith.constant 0 : index
    %31 = vector.load %arg11[%c0_19, %c0_20] : memref<1x16xf32, #tpu.memory_space<vmem>>, vector<1x16xf32>
    %cst_21 = arith.constant dense<0.000000e+00> : vector<16xf32>
    %32 = vector.multi_reduction <add>, %26, %cst_21 [0] : vector<64x16xf32> to vector<16xf32>
    %33 = vector.shape_cast %32 : vector<16xf32> to vector<1x16xf32>
    %34 = arith.addf %31, %33 : vector<1x16xf32>
    %c0_22 = arith.constant 0 : index
    %c0_23 = arith.constant 0 : index
    %35 = vector.load %arg11[%c0_22, %c0_23] : memref<1x16xf32, #tpu.memory_space<vmem>>, vector<1x16xf32>
    tpu.vector_store %arg11[%c0_22, %c0_23], %34 {strides = array<i32>} : memref<1x16xf32, #tpu.memory_space<vmem>>, vector<1x16xf32>,
    %c0_24 = arith.constant 0 : index
    %c0_25 = arith.constant 0 : index
    %36 = vector.load %arg12[%c0_24, %c0_25] : memref<1x16xf32, #tpu.memory_space<vmem>>, vector<1x16xf32>
    %37 = arith.mulf %26, %26 : vector<64x16xf32>
    %cst_26 = arith.constant dense<0.000000e+00> : vector<16xf32>
    %38 = vector.multi_reduction <add>, %37, %cst_26 [0] : vector<64x16xf32> to vector<16xf32>
    %39 = vector.shape_cast %38 : vector<16xf32> to vector<1x16xf32>
    %40 = arith.addf %36, %39 : vector<1x16xf32>
    %c0_27 = arith.constant 0 : index
    %c0_28 = arith.constant 0 : index
    %41 = vector.load %arg12[%c0_27, %c0_28] : memref<1x16xf32, #tpu.memory_space<vmem>>, vector<1x16xf32>
    tpu.vector_store %arg12[%c0_27, %c0_28], %40 {strides = array<i32>} : memref<1x16xf32, #tpu.memory_space<vmem>>, vector<1x16xf32>,
    %c0_i32_29 = arith.constant 0 : i32
    %42 = arith.cmpi eq, %arg1, %c0_i32_29 : i32
    %43 = arith.extui %42 : i1 to i32
    %c0_i32_30 = arith.constant 0 : i32
    %44 = arith.cmpi ne, %43, %c0_i32_30 : i32
    scf.if %44 {
      %c0_31 = arith.constant 0 : index
      %c0_32 = arith.constant 0 : index
      %45 = vector.load %arg11[%c0_31, %c0_32] : memref<1x16xf32, #tpu.memory_space<vmem>>, vector<1x16xf32>
      %c0_33 = arith.constant 0 : index
      %c0_34 = arith.constant 0 : index
      %c0_35 = arith.constant 0 : index
      %46 = vector.load %arg9[%c0_33, %c0_34, %c0_35] : memref<1x1x16xf32, #tpu.memory_space<vmem>>, vector<1x1x16xf32>
      %47 = vector.shape_cast %46 : vector<1x1x16xf32> to vector<1x16xf32>
      %48 = vector.shape_cast %45 : vector<1x16xf32> to vector<1x1x16xf32>
      tpu.vector_store %arg9[%c0_33, %c0_34, %c0_35], %48 {strides = array<i32>} : memref<1x1x16xf32, #tpu.memory_space<vmem>>, vector<1x1x16xf32>,
      %c0_36 = arith.constant 0 : index
      %c0_37 = arith.constant 0 : index
      %49 = vector.load %arg12[%c0_36, %c0_37] : memref<1x16xf32, #tpu.memory_space<vmem>>, vector<1x16xf32>
      %c0_38 = arith.constant 0 : index
      %c0_39 = arith.constant 0 : index
      %c0_40 = arith.constant 0 : index
      %50 = vector.load %arg10[%c0_38, %c0_39, %c0_40] : memref<1x1x16xf32, #tpu.memory_space<vmem>>, vector<1x1x16xf32>
      %51 = vector.shape_cast %50 : vector<1x1x16xf32> to vector<1x16xf32>
      %52 = vector.shape_cast %49 : vector<1x16xf32> to vector<1x1x16xf32>
      tpu.vector_store %arg10[%c0_38, %c0_39, %c0_40], %52 {strides = array<i32>} : memref<1x1x16xf32, #tpu.memory_space<vmem>>, vector<1x1x16xf32>,
    } else {
    }
    return
  }
  func.func @transform_0(%arg0: i32, %arg1: i32) -> (i32, i32, i32) {
    %c0_i32 = arith.constant 0 : i32
    %c0_i32_0 = arith.constant 0 : i32
    return %arg0, %arg1, %c0_i32 : i32, i32, i32
  }
  func.func @transform_1(%arg0: i32, %arg1: i32) -> (i32, i32) {
    %c0_i32 = arith.constant 0 : i32
    %c0_i32_0 = arith.constant 0 : i32
    %c0_i32_1 = arith.constant 0 : i32
    return %c0_i32, %c0_i32_0 : i32, i32
  }
  func.func @transform_2(%arg0: i32, %arg1: i32) -> (i32, i32) {
    %c0_i32 = arith.constant 0 : i32
    %c0_i32_0 = arith.constant 0 : i32
    %c0_i32_1 = arith.constant 0 : i32
    return %c0_i32, %c0_i32_0 : i32, i32
  }
  func.func @transform_3(%arg0: i32, %arg1: i32) -> (i32, i32) {
    %c0_i32 = arith.constant 0 : i32
    %c0_i32_0 = arith.constant 0 : i32
    %c0_i32_1 = arith.constant 0 : i32
    return %c0_i32, %c0_i32_0 : i32, i32
  }
  func.func @transform_4(%arg0: i32, %arg1: i32) -> (i32, i32) {
    %c0_i32 = arith.constant 0 : i32
    %c0_i32_0 = arith.constant 0 : i32
    %c0_i32_1 = arith.constant 0 : i32
    return %c0_i32, %c0_i32_0 : i32, i32
  }
  func.func @transform_5(%arg0: i32, %arg1: i32) -> (i32, i32, i32) {
    %c0_i32 = arith.constant 0 : i32
    %c0_i32_0 = arith.constant 0 : i32
    %c0_i32_1 = arith.constant 0 : i32
    return %arg0, %c0_i32, %c0_i32_0 : i32, i32, i32
  }
  func.func @transform_6(%arg0: i32, %arg1: i32) -> (i32, i32, i32) {
    %c0_i32 = arith.constant 0 : i32
    %c0_i32_0 = arith.constant 0 : i32
    return %arg0, %arg1, %c0_i32 : i32, i32, i32
  }
  func.func @transform_7(%arg0: i32, %arg1: i32) -> (i32, i32, i32) {
    %c0_i32 = arith.constant 0 : i32
    %c0_i32_0 = arith.constant 0 : i32
    %c0_i32_1 = arith.constant 0 : i32
    return %arg0, %c0_i32, %c0_i32_0 : i32, i32, i32
  }
  func.func @transform_8(%arg0: i32, %arg1: i32) -> (i32, i32, i32) {
    %c0_i32 = arith.constant 0 : i32
    %c0_i32_0 = arith.constant 0 : i32
    %c0_i32_1 = arith.constant 0 : i32
    return %arg0, %c0_i32, %c0_i32_0 : i32, i32, i32
  }
}

module attributes {stable_mosaic.version = 11 : i64} {
  func.func @_up_conv_kernel(%arg0: i32, %arg1: memref<128x16xbf16, #tpu.memory_space<vmem>>, %arg2: memref<1x16xf32, #tpu.memory_space<vmem>>, %arg3: memref<1x16xf32, #tpu.memory_space<vmem>>, %arg4: memref<1x16xf32, #tpu.memory_space<vmem>>, %arg5: memref<4x4xbf16, #tpu.memory_space<vmem>>, %arg6: memref<1x4xf32, #tpu.memory_space<vmem>>, %arg7: memref<128x16xbf16, #tpu.memory_space<vmem>>) attributes {dimension_semantics = [#tpu.dimension_semantics<parallel>], iteration_bounds = array<i64: 1>, scalar_prefetch = 0 : i64, scratch_operands = 0 : i64, tpu.core_type = #tpu.core_type<tc>, window_params = [{transform_indices = @transform_0, window_bounds = array<i64: 128, 16>}, {pipeline_mode = #tpu.pipeline_mode<synchronous>, transform_indices = @transform_1, window_bounds = array<i64: 1, 16>}, {pipeline_mode = #tpu.pipeline_mode<synchronous>, transform_indices = @transform_2, window_bounds = array<i64: 1, 16>}, {pipeline_mode = #tpu.pipeline_mode<synchronous>, transform_indices = @transform_3, window_bounds = array<i64: 1, 16>}, {pipeline_mode = #tpu.pipeline_mode<synchronous>, transform_indices = @transform_4, window_bounds = array<i64: 4, 4>}, {pipeline_mode = #tpu.pipeline_mode<synchronous>, transform_indices = @transform_5, window_bounds = array<i64: 1, 4>}, {transform_indices = @transform_6, window_bounds = array<i64: 128, 16>}]} {
    %c0 = arith.constant 0 : index
    %c0_0 = arith.constant 0 : index
    %0 = vector.load %arg1[%c0, %c0_0] : memref<128x16xbf16, #tpu.memory_space<vmem>>, vector<128x16xbf16>
    %1 = arith.extf %0 : vector<128x16xbf16> to vector<128x16xf32>
    %c0_1 = arith.constant 0 : index
    %c0_2 = arith.constant 0 : index
    %2 = vector.load %arg2[%c0_1, %c0_2] : memref<1x16xf32, #tpu.memory_space<vmem>>, vector<1x16xf32>
    %3 = vector.broadcast %2 : vector<1x16xf32> to vector<128x16xf32>
    %4 = arith.mulf %1, %3 : vector<128x16xf32>
    %c0_3 = arith.constant 0 : index
    %c0_4 = arith.constant 0 : index
    %5 = vector.load %arg3[%c0_3, %c0_4] : memref<1x16xf32, #tpu.memory_space<vmem>>, vector<1x16xf32>
    %6 = vector.broadcast %5 : vector<1x16xf32> to vector<128x16xf32>
    %7 = arith.addf %4, %6 : vector<128x16xf32>
    %c0_5 = arith.constant 0 : index
    %c0_6 = arith.constant 0 : index
    %8 = vector.load %arg4[%c0_5, %c0_6] : memref<1x16xf32, #tpu.memory_space<vmem>>, vector<1x16xf32>
    %cst = arith.constant 0.000000e+00 : f32
    %9 = vector.broadcast %cst : f32 to vector<128x16xf32>
    %10 = arith.maximumf %7, %9 : vector<128x16xf32>
    %cst_7 = arith.constant 0.000000e+00 : f32
    %11 = vector.broadcast %cst_7 : f32 to vector<128x16xf32>
    %12 = arith.minimumf %7, %11 : vector<128x16xf32>
    %13 = vector.broadcast %8 : vector<1x16xf32> to vector<128x16xf32>
    %14 = arith.mulf %13, %12 : vector<128x16xf32>
    %15 = arith.addf %10, %14 : vector<128x16xf32>
    %16 = arith.truncf %15 : vector<128x16xf32> to vector<128x16xbf16>
    %17 = vector.extract_strided_slice %16 {offsets = [0, 0], sizes = [128, 4], strides = [1, 1]} : vector<128x16xbf16> to vector<128x4xbf16>
    %c0_8 = arith.constant 0 : index
    %c0_9 = arith.constant 0 : index
    %18 = vector.load %arg5[%c0_8, %c0_9] : memref<4x4xbf16, #tpu.memory_space<vmem>>, vector<4x4xbf16>
    %cst_10 = arith.constant dense<0.000000e+00> : vector<128x4xf32>
    %19 = tpu.matmul %17, %18, %cst_10 {dimension_numbers = #tpu.dot_dimension_numbers<[1], [0], [0], [1], [0, 0, 1, 1], [], []>} : vector<128x4xbf16>, vector<4x4xbf16>, vector<128x4xf32> -> vector<128x4xf32>
    %c0_11 = arith.constant 0 : index
    %c0_12 = arith.constant 0 : index
    %20 = vector.load %arg6[%c0_11, %c0_12] : memref<1x4xf32, #tpu.memory_space<vmem>>, vector<1x4xf32>
    %21 = vector.broadcast %20 : vector<1x4xf32> to vector<128x4xf32>
    %22 = arith.addf %19, %21 : vector<128x4xf32>
    %23 = arith.truncf %22 : vector<128x4xf32> to vector<128x4xbf16>
    %c0_13 = arith.constant 0 : index
    %c0_14 = arith.constant 0 : index
    %24 = vector.load %arg7[%c0_13, %c0_14] : memref<128x16xbf16, #tpu.memory_space<vmem>>, vector<128x4xbf16>
    tpu.vector_store %arg7[%c0_13, %c0_14], %23 {strides = array<i32>} : memref<128x16xbf16, #tpu.memory_space<vmem>>, vector<128x4xbf16>,
    %25 = vector.extract_strided_slice %16 {offsets = [0, 4], sizes = [128, 4], strides = [1, 1]} : vector<128x16xbf16> to vector<128x4xbf16>
    %c0_15 = arith.constant 0 : index
    %c0_16 = arith.constant 0 : index
    %26 = vector.load %arg5[%c0_15, %c0_16] : memref<4x4xbf16, #tpu.memory_space<vmem>>, vector<4x4xbf16>
    %cst_17 = arith.constant dense<0.000000e+00> : vector<128x4xf32>
    %27 = tpu.matmul %25, %26, %cst_17 {dimension_numbers = #tpu.dot_dimension_numbers<[1], [0], [0], [1], [0, 0, 1, 1], [], []>} : vector<128x4xbf16>, vector<4x4xbf16>, vector<128x4xf32> -> vector<128x4xf32>
    %c0_18 = arith.constant 0 : index
    %c0_19 = arith.constant 0 : index
    %28 = vector.load %arg6[%c0_18, %c0_19] : memref<1x4xf32, #tpu.memory_space<vmem>>, vector<1x4xf32>
    %29 = vector.broadcast %28 : vector<1x4xf32> to vector<128x4xf32>
    %30 = arith.addf %27, %29 : vector<128x4xf32>
    %31 = arith.truncf %30 : vector<128x4xf32> to vector<128x4xbf16>
    %c0_20 = arith.constant 0 : index
    %c4 = arith.constant 4 : index
    %32 = vector.load %arg7[%c0_20, %c4] : memref<128x16xbf16, #tpu.memory_space<vmem>>, vector<128x4xbf16>
    tpu.vector_store %arg7[%c0_20, %c4], %31 {strides = array<i32>} : memref<128x16xbf16, #tpu.memory_space<vmem>>, vector<128x4xbf16>,
    %33 = vector.extract_strided_slice %16 {offsets = [0, 8], sizes = [128, 4], strides = [1, 1]} : vector<128x16xbf16> to vector<128x4xbf16>
    %c0_21 = arith.constant 0 : index
    %c0_22 = arith.constant 0 : index
    %34 = vector.load %arg5[%c0_21, %c0_22] : memref<4x4xbf16, #tpu.memory_space<vmem>>, vector<4x4xbf16>
    %cst_23 = arith.constant dense<0.000000e+00> : vector<128x4xf32>
    %35 = tpu.matmul %33, %34, %cst_23 {dimension_numbers = #tpu.dot_dimension_numbers<[1], [0], [0], [1], [0, 0, 1, 1], [], []>} : vector<128x4xbf16>, vector<4x4xbf16>, vector<128x4xf32> -> vector<128x4xf32>
    %c0_24 = arith.constant 0 : index
    %c0_25 = arith.constant 0 : index
    %36 = vector.load %arg6[%c0_24, %c0_25] : memref<1x4xf32, #tpu.memory_space<vmem>>, vector<1x4xf32>
    %37 = vector.broadcast %36 : vector<1x4xf32> to vector<128x4xf32>
    %38 = arith.addf %35, %37 : vector<128x4xf32>
    %39 = arith.truncf %38 : vector<128x4xf32> to vector<128x4xbf16>
    %c0_26 = arith.constant 0 : index
    %c8 = arith.constant 8 : index
    %40 = vector.load %arg7[%c0_26, %c8] : memref<128x16xbf16, #tpu.memory_space<vmem>>, vector<128x4xbf16>
    tpu.vector_store %arg7[%c0_26, %c8], %39 {strides = array<i32>} : memref<128x16xbf16, #tpu.memory_space<vmem>>, vector<128x4xbf16>,
    %41 = vector.extract_strided_slice %16 {offsets = [0, 12], sizes = [128, 4], strides = [1, 1]} : vector<128x16xbf16> to vector<128x4xbf16>
    %c0_27 = arith.constant 0 : index
    %c0_28 = arith.constant 0 : index
    %42 = vector.load %arg5[%c0_27, %c0_28] : memref<4x4xbf16, #tpu.memory_space<vmem>>, vector<4x4xbf16>
    %cst_29 = arith.constant dense<0.000000e+00> : vector<128x4xf32>
    %43 = tpu.matmul %41, %42, %cst_29 {dimension_numbers = #tpu.dot_dimension_numbers<[1], [0], [0], [1], [0, 0, 1, 1], [], []>} : vector<128x4xbf16>, vector<4x4xbf16>, vector<128x4xf32> -> vector<128x4xf32>
    %c0_30 = arith.constant 0 : index
    %c0_31 = arith.constant 0 : index
    %44 = vector.load %arg6[%c0_30, %c0_31] : memref<1x4xf32, #tpu.memory_space<vmem>>, vector<1x4xf32>
    %45 = vector.broadcast %44 : vector<1x4xf32> to vector<128x4xf32>
    %46 = arith.addf %43, %45 : vector<128x4xf32>
    %47 = arith.truncf %46 : vector<128x4xf32> to vector<128x4xbf16>
    %c0_32 = arith.constant 0 : index
    %c12 = arith.constant 12 : index
    %48 = vector.load %arg7[%c0_32, %c12] : memref<128x16xbf16, #tpu.memory_space<vmem>>, vector<128x4xbf16>
    tpu.vector_store %arg7[%c0_32, %c12], %47 {strides = array<i32>} : memref<128x16xbf16, #tpu.memory_space<vmem>>, vector<128x4xbf16>,
    return
  }
  func.func @transform_0(%arg0: i32) -> (i32, i32) {
    %c0_i32 = arith.constant 0 : i32
    %c0_i32_0 = arith.constant 0 : i32
    return %arg0, %c0_i32 : i32, i32
  }
  func.func @transform_1(%arg0: i32) -> (i32, i32) {
    %c0_i32 = arith.constant 0 : i32
    %c0_i32_0 = arith.constant 0 : i32
    %c0_i32_1 = arith.constant 0 : i32
    return %c0_i32, %c0_i32_0 : i32, i32
  }
  func.func @transform_2(%arg0: i32) -> (i32, i32) {
    %c0_i32 = arith.constant 0 : i32
    %c0_i32_0 = arith.constant 0 : i32
    %c0_i32_1 = arith.constant 0 : i32
    return %c0_i32, %c0_i32_0 : i32, i32
  }
  func.func @transform_3(%arg0: i32) -> (i32, i32) {
    %c0_i32 = arith.constant 0 : i32
    %c0_i32_0 = arith.constant 0 : i32
    %c0_i32_1 = arith.constant 0 : i32
    return %c0_i32, %c0_i32_0 : i32, i32
  }
  func.func @transform_4(%arg0: i32) -> (i32, i32) {
    %c0_i32 = arith.constant 0 : i32
    %c0_i32_0 = arith.constant 0 : i32
    %c0_i32_1 = arith.constant 0 : i32
    return %c0_i32, %c0_i32_0 : i32, i32
  }
  func.func @transform_5(%arg0: i32) -> (i32, i32) {
    %c0_i32 = arith.constant 0 : i32
    %c0_i32_0 = arith.constant 0 : i32
    %c0_i32_1 = arith.constant 0 : i32
    return %c0_i32, %c0_i32_0 : i32, i32
  }
  func.func @transform_6(%arg0: i32) -> (i32, i32) {
    %c0_i32 = arith.constant 0 : i32
    %c0_i32_0 = arith.constant 0 : i32
    return %arg0, %c0_i32 : i32, i32
  }
}

</mosaic_0001>

<bundles_post_ra>
// kernel: fold_conv_aspp_forward.4
= control target key start
LH: loop header
LB: loop body
LE: loop exit
PB: predicated region body
PF: predicated region fallthrough
CT: control target
= control target key end

     0   :  { %s2160_s18 = smov 0   ;;  %s2162_s19 = smov 0   ;;  %s2842_s0 = inlined_call_operand.vmem [shape: bf16[2,16,16,4], index: 0, kind: input, shape index: {}]   ;;  %s2843_s1 = inlined_call_operand.vmem [shape: bf16[9,4,4], index: 1, kind: input, shape index: {}]   ;;  %s2844_s2 = inlined_call_operand.vmem [shape: f32[1,4], index: 2, kind: input, shape index: {}]   ;;  %s2845_s3 = inlined_call_operand.vmem [shape: bf16[2,256,4], index: 3, kind: output, shape index: {0}]   ;;  %s2846_s4 = inlined_call_operand.vmem [shape: f32[2,1,4], index: 4, kind: output, shape index: {1}]   ;;  %s2847_s5 = inlined_call_operand.vmem [shape: f32[2,1,4], index: 5, kind: output, shape index: {2}]  }
   0x1   :  { %s2164_s20 = smov 0   ;;  %s2166_s21 = smov 0  }
   0x2   :  { %s2168_s22 = smov 0  }
   0x3 LB: > { %s25_s23 = sadd.s32 1, %s2119_s20  ;;  %s28_s24 = sadd.s32 1, %s2123_s21  ;;  %s2127_s22 = sphi %s2168_s22, %s16_s22   ;;  %s2123_s21 = sphi %s2166_s21, %s2851_s21   ;;  %s2119_s20 = sphi %s2164_s20, %s2850_s20   ;;  %s2115_s19 = sphi %s2162_s19, %s2849_s19   ;;  %s2111_s18 = sphi %s2160_s18, %s2848_s18  }
   0x4   : > { %p26_p0 = scmp.ge.s32.totalorder %s25_s23, 2  ;;  %p1772_p1 = scmp.ge.s32.totalorder %s2127_s22, 1 }
   0x5   : > { %p206_p2 = scmp.lt.s32.totalorder %s2127_s22, 5 }
   0x6   : > { %s2853_s23 = smov (%p26_p0, %s25_s23), 0  ;;  %s2855_s24 = smov (!%p26_p0, %s28_s24), %s2123_s21 }
   0x7   : > { %p207_p3 = pnand %p1772_p1, %p206_p2  ;;  %p30_p4 = scmp.ge.s32.totalorder %s2855_s24, 2 }
   0x8   : > { %p244_p5 = scmp.lt.s32.totalorder (!%p207_p3), %s2115_s19, 1  ;;  %s1775_s25 = sshll.u32 (!%p207_p3), %s2111_s18, 4 }
   0x9   : > { %s2857_s24 = smov (%p30_p4, %s2855_s24), 0  ;;  %210 = sbr.rel (%p207_p3) target bundleno = 569 (0x239), region = 32 }
   0xa   : > { %p252_p6 = scmp.lt.s32.totalorder (!%p207_p3), %s1775_s25, 31  ;;  %p1778_p7 = scmp.ne.s32.totalorder (!%p207_p3), %s2111_s18, 0 }
   0xe   : > { %s2859_s19 = smov (!%p244_p5, %s2115_s19), 1  ;;  %s2861_s25 = smov (!%p252_p6, %s1775_s25), 31 }
   0xf   : > { %s1964_s26 = sshll.u32 %s2859_s19, 7  ;;  %s1776_s27 = sshll.u32 %s2859_s19, 5 }
  0x10   : > { %s2200_s30 = scalar_lea.vmem %s2842_s0, %s1964_s26  ;;  %s255_s6 = sadd.s32 %s1776_s27, %s2861_s25 }
  0x11   : > { %s1777_s7 = sshll.u32 %s255_s6, 2  ;;  %s261_s10 = scalar_lea.vmem %s2846_s4, %s2859_s19 }
  0x12   : > { %s2209_s13 = scalar_lea.vmem %s2845_s3, %s1777_s7  ;;  %s264_s16 = scalar_lea.vmem %s2847_s5, %s2859_s19 }
  0x13   : > { %269 = sbr.rel (%p1778_p7) target bundleno = 113 (0x71), region = 36 }
  0x18   : > { %vm270_vm0 = vcmask 31744   ;;  %v2129_v0 = vmov 0.0   ;;  %vm273_vm1 = vcmask 25600   ;;  %v1966_v1 = vld [vmem:[%s2200_s30] sm:$0xff]   ;;  %v2029_v2 = vld [vmem:[%s2200_s30 + $0x8] sm:$0xff]   ;;  %v2030_v5 = vld [vmem:[%s2200_s30 + $0x10] sm:$0xff]  }
  0x19   : > { %275 = vst.msk [vmem:[#allocation2 + $0x18] sm:$0xff] %vm270_vm0, %v2129_v0  ;;  %v1967_v3 = vunpack.c.l.bf16 %v1966_v1  ;;  %v1968_v4 = vunpack.c.h.bf16 %v1966_v1  ;;  %v1971_v6 = vunpack.c.l.bf16 %v2029_v2  ;;  %v1972_v7 = vunpack.c.h.bf16 %v2029_v2  ;;  %v2031_v8 = vld [vmem:[%s2200_s30 + $0x18] sm:$0xff]   ;;  %v2032_v11 = vld [vmem:[%s2200_s30 + $0x20] sm:$0xff]   ;;  %v2033_v14 = vld [vmem:[%s2200_s30 + $0x28] sm:$0xff]  }
  0x1a   : > { %271 = vst.msk [vmem:[#allocation2] sm:$0xff] %vm270_vm0, %v2129_v0  ;;  %v1975_v9 = vunpack.c.l.bf16 %v2030_v5  ;;  %v1976_v10 = vunpack.c.h.bf16 %v2030_v5  ;;  %v1979_v12 = vunpack.c.l.bf16 %v2031_v8  ;;  %v1980_v13 = vunpack.c.h.bf16 %v2031_v8  ;;  %v2034_v17 = vld [vmem:[%s2200_s30 + $0x30] sm:$0xff]   ;;  %v2035_v20 = vld [vmem:[%s2200_s30 + $0x38] sm:$0xff]   ;;  %v2036_v23 = vld [vmem:[%s2200_s30 + $0x40] sm:$0xff]  }
  0x1b   : > { %272 = vst.msk [vmem:[#allocation2 + $0x8] sm:$0xff] %vm270_vm0, %v2129_v0  ;;  %v1983_v15 = vunpack.c.l.bf16 %v2032_v11  ;;  %v1984_v16 = vunpack.c.h.bf16 %v2032_v11  ;;  %v1987_v18 = vunpack.c.l.bf16 %v2033_v14  ;;  %v1988_v19 = vunpack.c.h.bf16 %v2033_v14  ;;  %v2037_v26 = vld [vmem:[%s2200_s30 + $0x48] sm:$0xff]   ;;  %v2038_v29 = vld [vmem:[%s2200_s30 + $0x50] sm:$0xff]   ;;  %v2039_v32 = vld [vmem:[%s2200_s30 + $0x58] sm:$0xff]  }
  0x1c   : > { %276 = vst.msk [vmem:[#allocation2 + $0x20] sm:$0xff] %vm270_vm0, %v2129_v0  ;;  %v1991_v21 = vunpack.c.l.bf16 %v2034_v17  ;;  %v1992_v22 = vunpack.c.h.bf16 %v2034_v17  ;;  %v1995_v24 = vunpack.c.l.bf16 %v2035_v20  ;;  %v1996_v25 = vunpack.c.h.bf16 %v2035_v20  ;;  %v2040_v35 = vld [vmem:[%s2200_s30 + $0x60] sm:$0xff]   ;;  %v2041_v38 = vld [vmem:[%s2200_s30 + $0x68] sm:$0xff]   ;;  %v2042_v41 = vld [vmem:[%s2200_s30 + $0x70] sm:$0xff]  }
  0x1d   : > { %278 = vst.msk [vmem:[#allocation2 + $0x30] sm:$0xff] %vm270_vm0, %v2129_v0  ;;  %v1999_v27 = vunpack.c.l.bf16 %v2036_v23  ;;  %v2000_v28 = vunpack.c.h.bf16 %v2036_v23  ;;  %v2003_v30 = vunpack.c.l.bf16 %v2037_v26  ;;  %v2004_v31 = vunpack.c.h.bf16 %v2037_v26  ;;  %v2043_v44 = vld [vmem:[%s2200_s30 + $0x78] sm:$0xff]  }
  0x1e   : > { %279 = vst.msk [vmem:[#allocation2 + $0x38] sm:$0xff] %vm270_vm0, %v2129_v0  ;;  %v2007_v33 = vunpack.c.l.bf16 %v2038_v29  ;;  %v2008_v34 = vunpack.c.h.bf16 %v2038_v29  ;;  %v2011_v36 = vunpack.c.l.bf16 %v2039_v32  ;;  %v2012_v37 = vunpack.c.h.bf16 %v2039_v32 }
  0x1f   : > { %281 = vst.msk [vmem:[#allocation2 + $0x48] sm:$0xff] %vm270_vm0, %v2129_v0  ;;  %v2015_v39 = vunpack.c.l.bf16 %v2040_v35  ;;  %v2016_v40 = vunpack.c.h.bf16 %v2040_v35  ;;  %v2019_v42 = vunpack.c.l.bf16 %v2041_v38  ;;  %v2020_v43 = vunpack.c.h.bf16 %v2041_v38 }
  0x20   : > { %282 = vst.msk [vmem:[#allocation2 + $0x50] sm:$0xff] %vm270_vm0, %v2129_v0  ;;  %v2023_v45 = vunpack.c.l.bf16 %v2042_v41  ;;  %v2024_v46 = vunpack.c.h.bf16 %v2042_v41  ;;  %v2027_v47 = vunpack.c.l.bf16 %v2043_v44  ;;  %v2028_v48 = vunpack.c.h.bf16 %v2043_v44 }
  0x21   : > { %284 = vst.msk [vmem:[#allocation2 + $0x60] sm:$0xff] %vm270_vm0, %v2129_v0  ;;  %vm423_vm2 = vcmask 24576  }
  0x22   : > { %285 = vst.msk [vmem:[#allocation2 + $0x68] sm:$0xff] %vm270_vm0, %v2129_v0 }
  0x23   : > { %287 = vst.msk [vmem:[#allocation2 + $0x78] sm:$0xff] %vm270_vm0, %v2129_v0 }
  0x24   : > { %288 = vst.msk [vmem:[#allocation2 + $0x80] sm:$0xff] %vm270_vm0, %v2129_v0 }
  0x25   : > { %290 = vst.msk [vmem:[#allocation2 + $0x90] sm:$0xff] %vm270_vm0, %v2129_v0 }
  0x26   : > { %291 = vst.msk [vmem:[#allocation2 + $0x98] sm:$0xff] %vm270_vm0, %v2129_v0 }
  0x27   : > { %293 = vst.msk [vmem:[#allocation2 + $0xa8] sm:$0xff] %vm270_vm0, %v2129_v0 }
  0x28   : > { %294 = vst.msk [vmem:[#allocation2 + $0xb0] sm:$0xff] %vm270_vm0, %v2129_v0 }
  0x29   : > { %296 = vst.msk [vmem:[#allocation2 + $0xc0] sm:$0xff] %vm270_vm0, %v2129_v0 }
  0x2a   : > { %297 = vst.msk [vmem:[#allocation2 + $0xc8] sm:$0xff] %vm270_vm0, %v2129_v0 }
  0x2b   : > { %299 = vst.msk [vmem:[#allocation2 + $0xd8] sm:$0xff] %vm270_vm0, %v2129_v0 }
  0x2c   : > { %300 = vst.msk [vmem:[#allocation2 + $0xe0] sm:$0xff] %vm270_vm0, %v2129_v0 }
  0x2d   : > { %302 = vst.msk [vmem:[#allocation2 + $0xf0] sm:$0xff] %vm270_vm0, %v2129_v0 }
  0x2e   : > { %303 = vst.msk [vmem:[#allocation2 + $0xf8] sm:$0xff] %vm270_vm0, %v2129_v0 }
  0x2f   : > { %305 = vst.msk [vmem:[#allocation2 + $0x108] sm:$0xff] %vm270_vm0, %v2129_v0 }
  0x30   : > { %306 = vst.msk [vmem:[#allocation2 + $0x110] sm:$0xff] %vm270_vm0, %v2129_v0 }
  0x31   : > { %308 = vst.msk [vmem:[#allocation2 + $0x120] sm:$0xff] %vm270_vm0, %v2129_v0 }
  0x32   : > { %309 = vst.msk [vmem:[#allocation2 + $0x128] sm:$0xff] %vm270_vm0, %v2129_v0 }
  0x33   : > { %311 = vst.msk [vmem:[#allocation2 + $0x138] sm:$0xff] %vm270_vm0, %v2129_v0 }
  0x34   : > { %312 = vst.msk [vmem:[#allocation2 + $0x140] sm:$0xff] %vm270_vm0, %v2129_v0 }
  0x35   : > { %314 = vst.msk [vmem:[#allocation2 + $0x150] sm:$0xff] %vm270_vm0, %v2129_v0 }
  0x36   : > { %315 = vst.msk [vmem:[#allocation2 + $0x158] sm:$0xff] %vm270_vm0, %v2129_v0 }
  0x37   : > { %317 = vst.msk [vmem:[#allocation2 + $0x168] sm:$0xff] %vm270_vm0, %v2129_v0 }
  0x38   : > { %318 = vst.msk [vmem:[#allocation2 + $0x170] sm:$0xff] %vm270_vm0, %v2129_v0 }
  0x39   : > { %320 = vst.msk [vmem:[#allocation2 + $0x180] sm:$0xff] %vm270_vm0, %v2129_v0 }
  0x3a   : > { %321 = vst.msk [vmem:[#allocation2 + $0x188] sm:$0xff] %vm270_vm0, %v2129_v0 }
  0x3b   : > { %323 = vst.msk [vmem:[#allocation2 + $0x198] sm:$0xff] %vm270_vm0, %v2129_v0 }
  0x3c   : > { %324 = vst.msk [vmem:[#allocation2 + $0x1a0] sm:$0xff] %vm270_vm0, %v2129_v0 }
  0x3d   : > { %277 = vst.msk [vmem:[#allocation2 + $0x28] sm:$0x3] %vm273_vm1, %v2129_v0 }
  0x3e   : > { %274 = vst.msk [vmem:[#allocation2 + $0x10] sm:$0x3] %vm273_vm1, %v2129_v0 }
  0x3f   : > { %280 = vst.msk [vmem:[#allocation2 + $0x40] sm:$0x3] %vm273_vm1, %v2129_v0 }
  0x40   : > { %283 = vst.msk [vmem:[#allocation2 + $0x58] sm:$0x3] %vm273_vm1, %v2129_v0 }
  0x41   : > { %286 = vst.msk [vmem:[#allocation2 + $0x70] sm:$0x3] %vm273_vm1, %v2129_v0 }
  0x42   : > { %289 = vst.msk [vmem:[#allocation2 + $0x88] sm:$0x3] %vm273_vm1, %v2129_v0 }
  0x43   : > { %292 = vst.msk [vmem:[#allocation2 + $0xa0] sm:$0x3] %vm273_vm1, %v2129_v0 }
  0x44   : > { %295 = vst.msk [vmem:[#allocation2 + $0xb8] sm:$0x3] %vm273_vm1, %v2129_v0 }
  0x45   : > { %298 = vst.msk [vmem:[#allocation2 + $0xd0] sm:$0x3] %vm273_vm1, %v2129_v0 }
  0x46   : > { %301 = vst.msk [vmem:[#allocation2 + $0xe8] sm:$0x3] %vm273_vm1, %v2129_v0 }
  0x47   : > { %304 = vst.msk [vmem:[#allocation2 + $0x100] sm:$0x3] %vm273_vm1, %v2129_v0 }
  0x48   : > { %307 = vst.msk [vmem:[#allocation2 + $0x118] sm:$0x3] %vm273_vm1, %v2129_v0 }
  0x49   : > { %310 = vst.msk [vmem:[#allocation2 + $0x130] sm:$0x3] %vm273_vm1, %v2129_v0 }
  0x4a   : > { %313 = vst.msk [vmem:[#allocation2 + $0x148] sm:$0x3] %vm273_vm1, %v2129_v0 }
  0x4b   : > { %316 = vst.msk [vmem:[#allocation2 + $0x160] sm:$0x3] %vm273_vm1, %v2129_v0 }
  0x4c   : > { %319 = vst.msk [vmem:[#allocation2 + $0x178] sm:$0x3] %vm273_vm1, %v2129_v0 }
  0x4d   : > { %322 = vst.msk [vmem:[#allocation2 + $0x190] sm:$0x3] %vm273_vm1, %v2129_v0 }
  0x4e   : > { %325 = vst.msk [vmem:[#allocation2 + $0x1a8] sm:$0x3] %vm273_vm1, %v2129_v0 }
  0x4f   : > { %391 = vst.msk [vmem:[#allocation2 + $0x19] sm:$0xff] %vm270_vm0, %v1967_v3 }
  0x50   : > { %392 = vst.msk [vmem:[#allocation2 + $0x21] sm:$0xff] %vm270_vm0, %v1968_v4 }
  0x51   : > { %393 = vst.msk [vmem:[#allocation2 + $0x31] sm:$0xff] %vm270_vm0, %v1971_v6 }
  0x52   : > { %394 = vst.msk [vmem:[#allocation2 + $0x39] sm:$0xff] %vm270_vm0, %v1972_v7 }
  0x53   : > { %395 = vst.msk [vmem:[#allocation2 + $0x49] sm:$0xff] %vm270_vm0, %v1975_v9 }
  0x54   : > { %396 = vst.msk [vmem:[#allocation2 + $0x51] sm:$0xff] %vm270_vm0, %v1976_v10 }
  0x55   : > { %397 = vst.msk [vmem:[#allocation2 + $0x61] sm:$0xff] %vm270_vm0, %v1979_v12 }
  0x56   : > { %398 = vst.msk [vmem:[#allocation2 + $0x69] sm:$0xff] %vm270_vm0, %v1980_v13 }
  0x57   : > { %399 = vst.msk [vmem:[#allocation2 + $0x79] sm:$0xff] %vm270_vm0, %v1983_v15 }
  0x58   : > { %400 = vst.msk [vmem:[#allocation2 + $0x81] sm:$0xff] %vm270_vm0, %v1984_v16 }
  0x59   : > { %401 = vst.msk [vmem:[#allocation2 + $0x91] sm:$0xff] %vm270_vm0, %v1987_v18 }
  0x5a   : > { %402 = vst.msk [vmem:[#allocation2 + $0x99] sm:$0xff] %vm270_vm0, %v1988_v19 }
  0x5b   : > { %403 = vst.msk [vmem:[#allocation2 + $0xa9] sm:$0xff] %vm270_vm0, %v1991_v21 }
  0x5c   : > { %404 = vst.msk [vmem:[#allocation2 + $0xb1] sm:$0xff] %vm270_vm0, %v1992_v22 }
  0x5d   : > { %405 = vst.msk [vmem:[#allocation2 + $0xc1] sm:$0xff] %vm270_vm0, %v1995_v24 }
  0x5e   : > { %406 = vst.msk [vmem:[#allocation2 + $0xc9] sm:$0xff] %vm270_vm0, %v1996_v25 }
  0x5f   : > { %407 = vst.msk [vmem:[#allocation2 + $0xd9] sm:$0xff] %vm270_vm0, %v1999_v27 }
  0x60   : > { %408 = vst.msk [vmem:[#allocation2 + $0xe1] sm:$0xff] %vm270_vm0, %v2000_v28 }
  0x61   : > { %409 = vst.msk [vmem:[#allocation2 + $0xf1] sm:$0xff] %vm270_vm0, %v2003_v30 }
  0x62   : > { %410 = vst.msk [vmem:[#allocation2 + $0xf9] sm:$0xff] %vm270_vm0, %v2004_v31 }
  0x63   : > { %411 = vst.msk [vmem:[#allocation2 + $0x109] sm:$0xff] %vm270_vm0, %v2007_v33 }
  0x64   : > { %412 = vst.msk [vmem:[#allocation2 + $0x111] sm:$0xff] %vm270_vm0, %v2008_v34 }
  0x65   : > { %413 = vst.msk [vmem:[#allocation2 + $0x121] sm:$0xff] %vm270_vm0, %v2011_v36 }
  0x66   : > { %414 = vst.msk [vmem:[#allocation2 + $0x129] sm:$0xff] %vm270_vm0, %v2012_v37 }
  0x67   : > { %415 = vst.msk [vmem:[#allocation2 + $0x139] sm:$0xff] %vm270_vm0, %v2015_v39 }
  0x68   : > { %416 = vst.msk [vmem:[#allocation2 + $0x141] sm:$0xff] %vm270_vm0, %v2016_v40 }
  0x69   : > { %417 = vst.msk [vmem:[#allocation2 + $0x151] sm:$0xff] %vm270_vm0, %v2019_v42 }
  0x6a   : > { %418 = vst.msk [vmem:[#allocation2 + $0x159] sm:$0xff] %vm270_vm0, %v2020_v43 }
  0x6b   : > { %419 = vst.msk [vmem:[#allocation2 + $0x169] sm:$0xff] %vm270_vm0, %v2023_v45 }
  0x6c   : > { %420 = vst.msk [vmem:[#allocation2 + $0x171] sm:$0xff] %vm270_vm0, %v2024_v46 }
  0x6d   : > { %421 = vst.msk [vmem:[#allocation2 + $0x181] sm:$0xff] %vm270_vm0, %v2027_v47 }
  0x6e   : > { %422 = vst.msk [vmem:[#allocation2 + $0x189] sm:$0xff] %vm270_vm0, %v2028_v48 }
  0x6f   : > { %424 = vst.msk [vmem:[#allocation3] sm:$0x1] %vm423_vm2, %v2129_v0 }
  0x70   : > { %425 = vst.msk [vmem:[#allocation4] sm:$0x1] %vm423_vm2, %v2129_v0 }
  0x71 PF: > { %v1781_v49 = vld [vmem:[%s2843_s1 + $0x2] sm:$0x3]  ;;  %vm505_vm3 = vcmask 1041408   ;;  %s1780_s26 = smul.u32 192, %s2111_s18  ;;  %v1798_v51 = vld [vmem:[%s2843_s1 + $0x4] sm:$0x3] }
  0x72   : > { %v507_v50 = vsel %vm505_vm3, %v1781_v49, 0  ;;  %v1825_v52 = vld [vmem:[%s2843_s1 + $0x6] sm:$0x3]  ;;  %v685_v53 = vsel %vm505_vm3, %v1798_v51, 0  ;;  %v453_v55 = vld [vmem:[%s2843_s1] sm:$0x3] }
  0x73   : > { %2044 = vmatpush.bf16.msra.mxu1 %v507_v50  ;;  %2045 = vmatpush.bf16.msra.mxu2 %v507_v50  ;;  %v806_v54 = vsel %vm505_vm3, %v1825_v52, 0  ;;  %s2390_s8 = scalar_lea.vmem [#allocation2], %s1780_s26  ;;  %vm480_vm4 = vcmask 31744   ;;  %v583_v59 = vsel %vm505_vm3, %v453_v55, 0  ;;  %v1850_v4 = vld [vmem:[%s2843_s1 + $0x8] sm:$0x3] }
  0x74   : > { %2046 = vmatpush.bf16.msra.mxu3 %v507_v50  ;;  %516 = vmatpush.bf16.msra.mxu0 %v507_v50  ;;  %v924_v6 = vsel %vm505_vm3, %v1850_v4, 0  ;;  %v1902_v7 = vld [vmem:[%s2843_s1 + $0xc] sm:$0x3]  ;;  %v1927_v9 = vld [vmem:[%s2843_s1 + $0xe] sm:$0x3]  ;;  %vm1502_vm5 = vcmask 27648  }
  0x75   : > { %v458_v56 = vld [vmem:[%s2390_s8 + $0x31] sm:$0xff]  ;;  %v459_v57 = vld [vmem:[%s2390_s8 + $0x39] sm:$0xff]  ;;  %v462_v58 = vld [vmem:[%s2390_s8 + $0x61] sm:$0xff]  ;;  %v1163_v8 = vsel %vm505_vm3, %v1902_v7, 0  ;;  %v1281_v11 = vsel %vm505_vm3, %v1927_v9, 0  ;;  %vm1558_vm6 = vcmask 24576  }
  0x76   : > { %v2396_v60 = vpack.c.bf16 %v459_v57, %v458_v56  ;;  %v463_v61 = vld [vmem:[%s2390_s8 + $0x69] sm:$0xff]  ;;  %v466_v62 = vld [vmem:[%s2390_s8 + $0x91] sm:$0xff]  ;;  %v467_v63 = vld [vmem:[%s2390_s8 + $0x99] sm:$0xff]  ;;  %p1961_p8 = scmp.ne.s32.totalorder %s2111_s18, 1 }
  0x77   : > { %694 = vmatpush.bf16.msrb.mxu2 %v685_v53  ;;  %v2401_v0 = vpack.c.bf16 %v463_v61, %v462_v58  ;;  %v2403_v1 = vpack.c.bf16 %v467_v63, %v466_v62  ;;  %v454_v2 = vld [vmem:[%s2390_s8 + $0x1] sm:$0xff]  ;;  %v455_v3 = vld [vmem:[%s2390_s8 + $0x9] sm:$0xff]  ;;  %592 = vmatpush.bf16.msrb.mxu1 %v583_v59  ;;  %v461_v16 = vld [vmem:[%s2390_s8 + $0x51] sm:$0xff] }
  0x78   : > { %815 = vmatpush.bf16.msrb.mxu3 %v806_v54  ;;  %1784 = vmatmul.msk.bf16.vlgmr.msra.gmra.mxu1 %vm480_vm4, %v2396_v60  ;;  %v470_v5 = vpack.c.bf16 %v455_v3, %v454_v2  ;;  %v1875_v10 = vld [vmem:[%s2843_s1 + $0xa] sm:$0x3]  ;;  %v1952_v13 = vld [vmem:[%s2843_s1 + $0x10] sm:$0x3]  ;;  %v464_v17 = vld [vmem:[%s2390_s8 + $0x79] sm:$0xff] }
  0x79   : > { %1786 = vmatmul.msk.bf16.vlgmr.msra.gmra.mxu2 %vm480_vm4, %v2401_v0  ;;  %1788 = vmatmul.msk.bf16.vlgmr.msra.gmra.mxu3 %vm480_vm4, %v2403_v1  ;;  %v1042_v12 = vsel %vm505_vm3, %v1875_v10, 0  ;;  %v1399_v14 = vsel %vm505_vm3, %v1952_v13, 0  ;;  %v460_v15 = vld [vmem:[%s2390_s8 + $0x49] sm:$0xff]  ;;  %v465_v18 = vld [vmem:[%s2390_s8 + $0x81] sm:$0xff]  ;;  %v469_v20 = vld [vmem:[%s2390_s8 + $0xb1] sm:$0xff] }
  0x7a   : > { %1782 = vmatmul.msk.bf16.vlgmr.msra.gmra.mxu0 %vm480_vm4, %v470_v5  ;;  %v468_v19 = vld [vmem:[%s2390_s8 + $0xa9] sm:$0xff]  ;;  %v456_v21 = vld [vmem:[%s2390_s8 + $0x19] sm:$0xff]  ;;  %v457_v22 = vld [vmem:[%s2390_s8 + $0x21] sm:$0xff]  ;;  %v2442_v23 = vpack.c.bf16 %v461_v16, %v460_v15  ;;  %v2444_v24 = vpack.c.bf16 %v465_v18, %v464_v17 }
  0x7b   : > { %933 = vmatpush.bf16.msrb.mxu0 %v924_v6  ;;  %1172 = vmatpush.bf16.msra.mxu2 %v1163_v8  ;;  %v2446_v25 = vpack.c.bf16 %v469_v20, %v468_v19  ;;  %v471_v26 = vpack.c.bf16 %v457_v22, %v456_v21  ;;  %v429_v27 = vld [vmem:[%s2390_s8] sm:$0xff]  ;;  %v430_v28 = vld [vmem:[%s2390_s8 + $0x8] sm:$0xff]  ;;  %v1809_v31 = vld [vmem:[%s2390_s8 + $0x18] sm:$0xff] }
  0x7c   : > { %1290 = vmatpush.bf16.msra.mxu3 %v1281_v11  ;;  %1051 = vmatpush.bf16.msra.mxu1 %v1042_v12  ;;  %v634_v29 = vld [vmem:[%s2390_s8 + $0x2] sm:$0xff]  ;;  %v635_v30 = vld [vmem:[%s2390_s8 + $0xa] sm:$0xff]  ;;  %v445_v33 = vpack.c.bf16 %v430_v28, %v429_v27  ;;  %v636_v36 = vld [vmem:[%s2390_s8 + $0x1a] sm:$0xff] }
  0x7d   : > { %v1810_v32 = vld [vmem:[%s2390_s8 + $0x20] sm:$0xff]  ;;  %v650_v34 = vpack.c.bf16 %v635_v30, %v634_v29  ;;  %v1811_v38 = vld [vmem:[%s2390_s8 + $0x30] sm:$0xff]  ;;  %v1812_v39 = vld [vmem:[%s2390_s8 + $0x38] sm:$0xff] }
  0x7e   : > { %v771_v35 = vpack.c.bf16 %v1810_v32, %v1809_v31  ;;  %v637_v37 = vld [vmem:[%s2390_s8 + $0x22] sm:$0xff]  ;;  %v2471_v41 = vpack.c.bf16 %v1812_v39, %v1811_v38  ;;  %v638_v42 = vld [vmem:[%s2390_s8 + $0x32] sm:$0xff]  ;;  %v639_v43 = vld [vmem:[%s2390_s8 + $0x3a] sm:$0xff] }
  0x7f   : > { %1408 = vmatpush.bf16.msra.mxu0 %v1399_v14  ;;  %v2469_v40 = vpack.c.bf16 %v637_v37, %v636_v36  ;;  %v1813_v44 = vld [vmem:[%s2390_s8 + $0x48] sm:$0xff]  ;;  %v1814_v45 = vld [vmem:[%s2390_s8 + $0x50] sm:$0xff]  ;;  %v2484_v46 = vpack.c.bf16 %v639_v43, %v638_v42  ;;  %v1815_v50 = vld [vmem:[%s2390_s8 + $0x60] sm:$0xff] }
  0x80   : > { %v2486_v47 = vpack.c.bf16 %v1814_v45, %v1813_v44  ;;  %v640_v48 = vld [vmem:[%s2390_s8 + $0x4a] sm:$0xff]  ;;  %v641_v49 = vld [vmem:[%s2390_s8 + $0x52] sm:$0xff]  ;;  %v642_v54 = vld [vmem:[%s2390_s8 + $0x62] sm:$0xff] }
  0x81   : > { %v1816_v51 = vld [vmem:[%s2390_s8 + $0x68] sm:$0xff]  ;;  %v2500_v52 = vpack.c.bf16 %v641_v49, %v640_v48  ;;  %v1817_v56 = vld [vmem:[%s2390_s8 + $0x78] sm:$0xff]  ;;  %v1818_v57 = vld [vmem:[%s2390_s8 + $0x80] sm:$0xff] }
  0x82   : > { %v2502_v53 = vpack.c.bf16 %v1816_v51, %v1815_v50  ;;  %v643_v55 = vld [vmem:[%s2390_s8 + $0x6a] sm:$0xff]  ;;  %v2518_v59 = vpack.c.bf16 %v1818_v57, %v1817_v56  ;;  %v644_v61 = vld [vmem:[%s2390_s8 + $0x7a] sm:$0xff]  ;;  %v645_v62 = vld [vmem:[%s2390_s8 + $0x82] sm:$0xff] }
  0x83   : > { %v2516_v58 = vpack.c.bf16 %v643_v55, %v642_v54  ;;  %v1819_v63 = vld [vmem:[%s2390_s8 + $0x90] sm:$0xff]  ;;  %v1820_v2 = vld [vmem:[%s2390_s8 + $0x98] sm:$0xff]  ;;  %v2532_v3 = vpack.c.bf16 %v645_v62, %v644_v61  ;;  %v1821_v7 = vld [vmem:[%s2390_s8 + $0xa8] sm:$0xff] }
  0x84   : > { %v2534_v4 = vpack.c.bf16 %v1820_v2, %v1819_v63  ;;  %v646_v5 = vld [vmem:[%s2390_s8 + $0x92] sm:$0xff]  ;;  %v647_v6 = vld [vmem:[%s2390_s8 + $0x9a] sm:$0xff]  ;;  %v648_v17 = vld [vmem:[%s2390_s8 + $0xaa] sm:$0xff] }
  0x85   : > { %v1822_v8 = vld [vmem:[%s2390_s8 + $0xb0] sm:$0xff]  ;;  %v2550_v10 = vpack.c.bf16 %v647_v6, %v646_v5  ;;  %v1823_v19 = vld [vmem:[%s2390_s8 + $0xc0] sm:$0xff]  ;;  %v1824_v20 = vld [vmem:[%s2390_s8 + $0xc8] sm:$0xff] }
  0x86   : > { %v2552_v11 = vpack.c.bf16 %v1822_v8, %v1821_v7  ;;  %v649_v18 = vld [vmem:[%s2390_s8 + $0xb2] sm:$0xff]  ;;  %v1848_v21 = vld [vmem:[%s2390_s8 + $0xc1] sm:$0xff]  ;;  %v1849_v22 = vld [vmem:[%s2390_s8 + $0xc9] sm:$0xff]  ;;  %v2582_v30 = vpack.c.bf16 %v1824_v20, %v1823_v19 }
  0x87   : > { %v2580_v29 = vpack.c.bf16 %v649_v18, %v648_v17  ;;  %v2584_v31 = vpack.c.bf16 %v1849_v22, %v1848_v21 }
  0x88   : > { %1785 = vmatmul.msk.bf16.gmra.mxu1 %vm480_vm4, %v2442_v23 }
  0x89   : > { %1787 = vmatmul.msk.bf16.gmra.mxu2 %vm480_vm4, %v2444_v24  ;;  %1789 = vmatmul.msk.bf16.gmra.mxu3 %vm480_vm4, %v2446_v25 }
  0x8a   : > { %1783 = vmatmul.msk.bf16.gmra.mxu0 %vm480_vm4, %v471_v26 }
  0x98   : > { %1790 = vmatmul.msk.bf16.vlgmr.msrb.gmra.mxu1 %vm480_vm4, %v445_v33 }
  0x99   : > { %1799 = vmatmul.msk.bf16.vlgmr.msrb.gmra.mxu2 %vm480_vm4, %v650_v34  ;;  %1826 = vmatmul.msk.bf16.vlgmr.msrb.gmra.mxu3 %vm480_vm4, %v771_v35 }
  0x9a   : > { %1851 = vmatmul.msk.bf16.vlgmr.msrb.gmra.mxu0 %vm480_vm4, %v471_v26 }
  0xa8   : > { %1791 = vmatmul.msk.bf16.gmra.mxu1 %vm480_vm4, %v771_v35 }
  0xa9   : > { %1800 = vmatmul.msk.bf16.gmra.mxu2 %vm480_vm4, %v2469_v40  ;;  %1827 = vmatmul.msk.bf16.gmra.mxu3 %vm480_vm4, %v2471_v41 }
  0xaa   : > { %1852 = vmatmul.msk.bf16.gmra.mxu0 %vm480_vm4, %v2396_v60 }
  0xb8   : > { %1792 = vmatmul.msk.bf16.gmra.mxu1 %vm480_vm4, %v2471_v41 }
  0xb9   : > { %1801 = vmatmul.msk.bf16.gmra.mxu2 %vm480_vm4, %v2484_v46  ;;  %1828 = vmatmul.msk.bf16.gmra.mxu3 %vm480_vm4, %v2486_v47 }
  0xba   : > { %1853 = vmatmul.msk.bf16.gmra.mxu0 %vm480_vm4, %v2442_v23 }
  0xc8   : > { %1793 = vmatmul.msk.bf16.gmra.mxu1 %vm480_vm4, %v2486_v47 }
  0xc9   : > { %1802 = vmatmul.msk.bf16.gmra.mxu2 %vm480_vm4, %v2500_v52  ;;  %1829 = vmatmul.msk.bf16.gmra.mxu3 %vm480_vm4, %v2502_v53 }
  0xca   : > { %1854 = vmatmul.msk.bf16.gmra.mxu0 %vm480_vm4, %v2401_v0 }
  0xd8   : > { %1794 = vmatmul.msk.bf16.gmra.mxu1 %vm480_vm4, %v2502_v53 }
  0xd9   : > { %1803 = vmatmul.msk.bf16.gmra.mxu2 %vm480_vm4, %v2516_v58  ;;  %1830 = vmatmul.msk.bf16.gmra.mxu3 %vm480_vm4, %v2518_v59 }
  0xda   : > { %1855 = vmatmul.msk.bf16.gmra.mxu0 %vm480_vm4, %v2444_v24 }
  0xe8   : > { %1795 = vmatmul.msk.bf16.gmra.mxu1 %vm480_vm4, %v2518_v59 }
  0xe9   : > { %1804 = vmatmul.msk.bf16.gmra.mxu2 %vm480_vm4, %v2532_v3  ;;  %1831 = vmatmul.msk.bf16.gmra.mxu3 %vm480_vm4, %v2534_v4 }
  0xea   : > { %1856 = vmatmul.msk.bf16.gmra.mxu0 %vm480_vm4, %v2403_v1 }
  0xf5   : > { %v2548_v9 = vpop.f32.mrf.mxu1 }
  0xf7   : > { %v518_v12 = vpop.f32.mrf.mxu0 }
  0xf8   : > { %1796 = vmatmul.msk.bf16.gmra.mxu1 %vm480_vm4, %v2534_v4 }
  0xf9   : > { %1805 = vmatmul.msk.bf16.gmra.mxu2 %vm480_vm4, %v2550_v10  ;;  %1832 = vmatmul.msk.bf16.gmra.mxu3 %vm480_vm4, %v2552_v11 }
  0xfa   : > { %1857 = vmatmul.msk.bf16.gmra.mxu0 %vm480_vm4, %v2446_v25 }
  0xfc   : > { %v2562_v13 = vpop.f32.mrf.mxu2  ;;  %v2564_v14 = vpop.f32.mrf.mxu3 }
  0xfd   : > { %v2566_v15 = vpop.f32.mrf.mxu1 }
  0xff   : > { %v520_v16 = vpop.f32.mrf.mxu0 }
 0x104   : > { %v2574_v26 = vpop.f32.mrf.mxu2  ;;  %v2576_v27 = vpop.f32.mrf.mxu3 }
 0x105   : > { %v2578_v28 = vpop.f32.mrf.mxu1 }
 0x107   : > { %v523_v32 = vpop.f32.mrf.mxu0 }
 0x108   : > { %1797 = vmatmul.msk.bf16.gmra.mxu1 %vm480_vm4, %v2552_v11 }
 0x109   : > { %1806 = vmatmul.msk.bf16.gmra.mxu2 %vm480_vm4, %v2580_v29  ;;  %1833 = vmatmul.msk.bf16.gmra.mxu3 %vm480_vm4, %v2582_v30 }
 0x10a   : > { %1858 = vmatmul.msk.bf16.gmra.mxu0 %vm480_vm4, %v2584_v31 }
 0x10c   : > { %v2594_v33 = vpop.f32.mrf.mxu2  ;;  %v2596_v34 = vpop.f32.mrf.mxu3 }
 0x10d   : > { %v2598_v35 = vpop.f32.mrf.mxu1 }
 0x10f   : > { %v525_v36 = vpop.f32.mrf.mxu0 }
 0x114   : > { %v2600_v37 = vpop.f32.mrf.mxu2  ;;  %v2602_v38 = vpop.f32.mrf.mxu3 }
 0x115   : > { %v594_v39 = vpop.f32.mrf.mxu1 }
 0x116   : > { %v595_v42 = vadd.f32 %v594_v39, %v518_v12 }
 0x117   : > { %v935_v43 = vpop.f32.mrf.mxu0 }
 0x118   : > { %1876 = vmatmul.msk.bf16.vlgmr.msra.gmra.mxu1 %vm480_vm4, %v2469_v40 }
 0x119   : > { %1903 = vmatmul.msk.bf16.vlgmr.msra.gmra.mxu2 %vm480_vm4, %v2471_v41  ;;  %1928 = vmatmul.msk.bf16.vlgmr.msra.gmra.mxu3 %vm480_vm4, %v2396_v60 }
 0x11a   : > { %1953 = vmatmul.msk.bf16.vlgmr.msra.gmra.mxu0 %vm480_vm4, %v2484_v46 }
 0x11c   : > { %v696_v44 = vpop.f32.mrf.mxu2  ;;  %v817_v45 = vpop.f32.mrf.mxu3 }
 0x11d   : > { %v736_v48 = vadd.f32 %v696_v44, %v595_v42  ;;  %v596_v49 = vpop.f32.mrf.mxu1 }
 0x11e   : > { %v597_v50 = vadd.f32 %v596_v49, %v520_v16 }
 0x11f   : > { %v857_v51 = vadd.f32 %v817_v45, %v736_v48  ;;  %v937_v54 = vpop.f32.mrf.mxu0 }
 0x121   : > { %v2612_v55 = vadd.f32 %v935_v43, %v857_v51 }
 0x124   : > { %v698_v56 = vpop.f32.mrf.mxu2  ;;  %v819_v40 = vpop.f32.mrf.mxu3 }
 0x125   : > { %v737_v57 = vadd.f32 %v698_v56, %v597_v50  ;;  %v599_v61 = vpop.f32.mrf.mxu1 }
 0x126   : > { %v600_v41 = vadd.f32 %v599_v61, %v523_v32 }
 0x127   : > { %v858_v62 = vadd.f32 %v819_v40, %v737_v57  ;;  %v940_v63 = vpop.f32.mrf.mxu0 }
 0x128   : > { %1877 = vmatmul.msk.bf16.gmra.mxu1 %vm480_vm4, %v2484_v46 }
 0x129   : > { %1904 = vmatmul.msk.bf16.gmra.mxu2 %vm480_vm4, %v2486_v47  ;;  %1929 = vmatmul.msk.bf16.gmra.mxu3 %vm480_vm4, %v2442_v23  ;;  %v2620_v60 = vadd.f32 %v937_v54, %v858_v62 }
 0x12a   : > { %1954 = vmatmul.msk.bf16.gmra.mxu0 %vm480_vm4, %v2500_v52 }
 0x12c   : > { %v701_v2 = vpop.f32.mrf.mxu2  ;;  %v822_v5 = vpop.f32.mrf.mxu3 }
 0x12d   : > { %v738_v6 = vadd.f32 %v701_v2, %v600_v41  ;;  %v601_v7 = vpop.f32.mrf.mxu1 }
 0x12e   : > { %v602_v8 = vadd.f32 %v601_v7, %v525_v36 }
 0x12f   : > { %v859_v12 = vadd.f32 %v822_v5, %v738_v6  ;;  %v942_v16 = vpop.f32.mrf.mxu0 }
 0x131   : > { %v2624_v17 = vadd.f32 %v940_v63, %v859_v12 }
 0x134   : > { %v703_v46 = vpop.f32.mrf.mxu2  ;;  %v824_v18 = vpop.f32.mrf.mxu3 }
 0x135   : > { %v739_v47 = vadd.f32 %v703_v46, %v602_v8  ;;  %v604_v19 = vpop.f32.mrf.mxu1 }
 0x136   : > { %v605_v23 = vadd.f32 %v604_v19, %v2548_v9 }
 0x137   : > { %v860_v20 = vadd.f32 %v824_v18, %v739_v47  ;;  %v945_v21 = vpop.f32.mrf.mxu0 }
 0x138   : > { %1878 = vmatmul.msk.bf16.gmra.mxu1 %vm480_vm4, %v2500_v52 }
 0x139   : > { %1905 = vmatmul.msk.bf16.gmra.mxu2 %vm480_vm4, %v2502_v53  ;;  %1930 = vmatmul.msk.bf16.gmra.mxu3 %vm480_vm4, %v2401_v0  ;;  %v2633_v22 = vadd.f32 %v942_v16, %v860_v20 }
 0x13a   : > { %1955 = vmatmul.msk.bf16.gmra.mxu0 %vm480_vm4, %v2516_v58 }
 0x13c   : > { %v706_v32 = vpop.f32.mrf.mxu2  ;;  %v827_v36 = vpop.f32.mrf.mxu3 }
 0x13d   : > { %v740_v39 = vadd.f32 %v706_v32, %v605_v23  ;;  %v606_v9 = vpop.f32.mrf.mxu1 }
 0x13e   : > { %v607_v42 = vadd.f32 %v606_v9, %v2566_v15 }
 0x13f   : > { %v861_v43 = vadd.f32 %v827_v36, %v740_v39  ;;  %v947_v44 = vpop.f32.mrf.mxu0 }
 0x141   : > { %v2638_v52 = vadd.f32 %v945_v21, %v861_v43 }
 0x144   : > { %v708_v45 = vpop.f32.mrf.mxu2  ;;  %v829_v53 = vpop.f32.mrf.mxu3 }
 0x145   : > { %v741_v48 = vadd.f32 %v708_v45, %v607_v42  ;;  %v609_v49 = vpop.f32.mrf.mxu1  ;;  %v1949_v45 = vld [vmem:[%s2390_s8 + $0xca] sm:$0xff] }
 0x146   : > { %v610_v0 = vadd.f32 %v609_v49, %v2578_v28 }
 0x147   : > { %v862_v50 = vadd.f32 %v829_v53, %v741_v48  ;;  %v950_v51 = vpop.f32.mrf.mxu0 }
 0x148   : > { %1879 = vmatmul.msk.bf16.gmra.mxu1 %vm480_vm4, %v2516_v58 }
 0x149   : > { %1906 = vmatmul.msk.bf16.gmra.mxu2 %vm480_vm4, %v2518_v59  ;;  %1931 = vmatmul.msk.bf16.gmra.mxu3 %vm480_vm4, %v2444_v24  ;;  %v2647_v15 = vadd.f32 %v947_v44, %v862_v50  ;;  %v1948_v44 = vld [vmem:[%s2390_s8 + $0xc2] sm:$0xff] }
 0x14a   : > { %1956 = vmatmul.msk.bf16.gmra.mxu0 %vm480_vm4, %v2532_v3 }
 0x14c   : > { %v711_v54 = vpop.f32.mrf.mxu2  ;;  %v832_v56 = vpop.f32.mrf.mxu3 }
 0x14d   : > { %v742_v40 = vadd.f32 %v711_v54, %v610_v0  ;;  %v611_v28 = vpop.f32.mrf.mxu1  ;;  %v1370_v0 = vpack.c.bf16 %v1949_v45, %v1948_v44 }
 0x14e   : > { %v612_v57 = vadd.f32 %v611_v28, %v2598_v35 }
 0x14f   : > { %v863_v61 = vadd.f32 %v832_v56, %v742_v40  ;;  %v952_v41 = vpop.f32.mrf.mxu0 }
 0x151   : > { %v2652_v58 = vadd.f32 %v950_v51, %v863_v61  ;;  %v1900_v61 = vld [vmem:[%s2390_s8 + $0xd8] sm:$0xff] }
 0x154   : > { %v713_v62 = vpop.f32.mrf.mxu2  ;;  %v834_v59 = vpop.f32.mrf.mxu3 }
 0x155   : > { %v743_v63 = vadd.f32 %v713_v62, %v612_v57  ;;  %v614_v2 = vpop.f32.mrf.mxu1  ;;  %v1925_v62 = vld [vmem:[%s2390_s8 + $0xd9] sm:$0xff] }
 0x156   : > { %v615_v6 = vadd.f32 %v614_v2, %v2562_v13  ;;  %v1951_v2 = vld [vmem:[%s2390_s8 + $0xe2] sm:$0xff] }
 0x157   : > { %v864_v24 = vadd.f32 %v834_v59, %v743_v63  ;;  %v955_v5 = vpop.f32.mrf.mxu0  ;;  %v1950_v63 = vld [vmem:[%s2390_s8 + $0xda] sm:$0xff] }
 0x158   : > { %1880 = vmatmul.msk.bf16.gmra.mxu1 %vm480_vm4, %v2532_v3 }
 0x159   : > { %1907 = vmatmul.msk.bf16.gmra.mxu2 %vm480_vm4, %v2534_v4  ;;  %1932 = vmatmul.msk.bf16.gmra.mxu3 %vm480_vm4, %v2403_v1  ;;  %v2660_v35 = vadd.f32 %v952_v41, %v864_v24 }
 0x15a   : > { %1957 = vmatmul.msk.bf16.gmra.mxu0 %vm480_vm4, %v2550_v10 }
 0x15c   : > { %v716_v7 = vpop.f32.mrf.mxu2  ;;  %v837_v8 = vpop.f32.mrf.mxu3 }
 0x15d   : > { %v744_v12 = vadd.f32 %v716_v7, %v615_v6  ;;  %v616_v16 = vpop.f32.mrf.mxu1 }
 0x15e   : > { %v617_v4 = vadd.f32 %v616_v16, %v2574_v26 }
 0x15f   : > { %v865_v46 = vadd.f32 %v837_v8, %v744_v12  ;;  %v957_v18 = vpop.f32.mrf.mxu0  ;;  %v1371_v12 = vpack.c.bf16 %v1951_v2, %v1950_v63 }
 0x161   : > { %v2665_v3 = vadd.f32 %v955_v5, %v865_v46 }
 0x164   : > { %v718_v47 = vpop.f32.mrf.mxu2  ;;  %v839_v19 = vpop.f32.mrf.mxu3 }
 0x165   : > { %v745_v1 = vadd.f32 %v718_v47, %v617_v4  ;;  %v619_v23 = vpop.f32.mrf.mxu1 }
 0x166   : > { %v620_v26 = vadd.f32 %v619_v23, %v2594_v33 }
 0x167   : > { %v866_v20 = vadd.f32 %v839_v19, %v745_v1  ;;  %v960_v21 = vpop.f32.mrf.mxu0 }
 0x168   : > { %1881 = vmatmul.msk.bf16.gmra.mxu1 %vm480_vm4, %v2550_v10 }
 0x169   : > { %1908 = vmatmul.msk.bf16.gmra.mxu2 %vm480_vm4, %v2552_v11  ;;  %1933 = vmatmul.msk.bf16.gmra.mxu3 %vm480_vm4, %v2446_v25  ;;  %v2674_v13 = vadd.f32 %v957_v18, %v866_v20 }
 0x16a   : > { %1958 = vmatmul.msk.bf16.gmra.mxu0 %vm480_vm4, %v2580_v29 }
 0x16c   : > { %v721_v32 = vpop.f32.mrf.mxu2  ;;  %v842_v36 = vpop.f32.mrf.mxu3 }
 0x16d   : > { %v746_v39 = vadd.f32 %v721_v32, %v620_v26  ;;  %v621_v9 = vpop.f32.mrf.mxu1 }
 0x16e   : > { %v622_v11 = vadd.f32 %v621_v9, %v2600_v37 }
 0x16f   : > { %v867_v42 = vadd.f32 %v842_v36, %v746_v39  ;;  %v962_v43 = vpop.f32.mrf.mxu0 }
 0x171   : > { %v2679_v10 = vadd.f32 %v960_v21, %v867_v42 }
 0x174   : > { %v723_v25 = vpop.f32.mrf.mxu2  ;;  %v844_v53 = vpop.f32.mrf.mxu3 }
 0x175   : > { %v747_v48 = vadd.f32 %v723_v25, %v622_v11  ;;  %v624_v49 = vpop.f32.mrf.mxu1 }
 0x176   : > { %v625_v51 = vadd.f32 %v624_v49, %v2564_v14 }
 0x177   : > { %v868_v50 = vadd.f32 %v844_v53, %v747_v48  ;;  %v965_v33 = vpop.f32.mrf.mxu0 }
 0x178   : > { %1882 = vmatmul.msk.bf16.gmra.mxu1 %vm480_vm4, %v2580_v29 }
 0x179   : > { %1909 = vmatmul.msk.bf16.gmra.mxu2 %vm480_vm4, %v2582_v30  ;;  %1934 = vmatmul.msk.bf16.gmra.mxu3 %vm480_vm4, %v2584_v31  ;;  %v2690_v37 = vadd.f32 %v962_v43, %v868_v50  ;;  %v1901_v30 = vld [vmem:[%s2390_s8 + $0xe0] sm:$0xff] }
 0x17a   : > { %1959 = vmatmul.msk.bf16.gmra.mxu0 %vm480_vm4, %v1370_v0  ;;  %v1926_v31 = vld [vmem:[%s2390_s8 + $0xe1] sm:$0xff]  ;;  %v1135_v7 = vpack.c.bf16 %v1901_v30, %v1900_v61 }
 0x17b   : > { %v1253_v8 = vpack.c.bf16 %v1926_v31, %v1925_v62 }
 0x17c   : > { %v726_v54 = vpop.f32.mrf.mxu2  ;;  %v847_v56 = vpop.f32.mrf.mxu3 }
 0x17d   : > { %v748_v40 = vadd.f32 %v726_v54, %v625_v51  ;;  %v626_v28 = vpop.f32.mrf.mxu1 }
 0x17e   : > { %v627_v59 = vadd.f32 %v626_v28, %v2576_v27 }
 0x17f   : > { %v869_v29 = vadd.f32 %v847_v56, %v748_v40  ;;  %v967_v57 = vpop.f32.mrf.mxu0 }
 0x181   : > { %v2695_v41 = vadd.f32 %v965_v33, %v869_v29 }
 0x184   : > { %v728_v24 = vpop.f32.mrf.mxu2  ;;  %v849_v5 = vpop.f32.mrf.mxu3 }
 0x185   : > { %v749_v6 = vadd.f32 %v728_v24, %v627_v59  ;;  %v629_v14 = vpop.f32.mrf.mxu1 }
 0x186   : > { %v630_v27 = vadd.f32 %v629_v14, %v2596_v34 }
 0x187   : > { %v870_v16 = vadd.f32 %v849_v5, %v749_v6  ;;  %v970_v46 = vpop.f32.mrf.mxu0 }
 0x188   : > { %1883 = vmatmul.msk.bf16.gmra.mxu1 %vm480_vm4, %v1370_v0 }
 0x189   : > { %1910 = vmatmul.msk.bf16.gmra.mxu2 %vm480_vm4, %v1135_v7  ;;  %1935 = vmatmul.msk.bf16.gmra.mxu3 %vm480_vm4, %v1253_v8  ;;  %v2706_v18 = vadd.f32 %v967_v57, %v870_v16 }
 0x18a   : > { %1960 = vmatmul.msk.bf16.gmra.mxu0 %vm480_vm4, %v1371_v12 }
 0x18c   : > { %v731_v4 = vpop.f32.mrf.mxu2  ;;  %v852_v47 = vpop.f32.mrf.mxu3 }
 0x18d   : > { %v750_v19 = vadd.f32 %v731_v4, %v630_v27  ;;  %v631_v1 = vpop.f32.mrf.mxu1 }
 0x18e   : > { %v632_v26 = vadd.f32 %v631_v1, %v2602_v38  ;;  %v2719_v38 = vld [vmem:[%s2844_s2] ss:$0 sm:$0xff] }
 0x18f   : > { %v871_v23 = vadd.f32 %v852_v47, %v750_v19  ;;  %v972_v20 = vpop.f32.mrf.mxu0 }
 0x191   : > { %v2710_v21 = vadd.f32 %v970_v46, %v871_v23 }
 0x194   : > { %v733_v32 = vpop.f32.mrf.mxu2  ;;  %v854_v36 = vpop.f32.mrf.mxu3 }
 0x195   : > { %v751_v39 = vadd.f32 %v733_v32, %v632_v26  ;;  %v1053_v9 = vpop.f32.mrf.mxu1 }
 0x196   : > { %v1093_v34 = vadd.f32 %v1053_v9, %v2612_v55 }
 0x197   : > { %v872_v42 = vadd.f32 %v854_v36, %v751_v39  ;;  %v1410_v43 = vpop.f32.mrf.mxu0 }
 0x199   : > { %v2713_v11 = vadd.f32 %v972_v20, %v872_v42 }
 0x19c   : > { %v1174_v44 = vpop.f32.mrf.mxu2  ;;  %v1292_v45 = vpop.f32.mrf.mxu3 }
 0x19d   : > { %v1214_v25 = vadd.f32 %v1174_v44, %v1093_v34  ;;  %v1055_v53 = vpop.f32.mrf.mxu1 }
 0x19e   : > { %v1094_v33 = vadd.f32 %v1055_v53, %v2620_v60 }
 0x19f   : > { %v1332_v48 = vadd.f32 %v1292_v45, %v1214_v25  ;;  %v1412_v49 = vpop.f32.mrf.mxu0 }
 0x1a1   : > { %v1450_v0 = vadd.f32 %v1410_v43, %v1332_v48 }
 0x1a3   : > { %v1470_v50 = vadd.f32 %v2719_v38, %v1450_v0 }
 0x1a4   : > { %v1176_v51 = vpop.f32.mrf.mxu2  ;;  %v1294_v55 = vpop.f32.mrf.mxu3 }
 0x1a5   : > { %v1486_v54 = vpack.c.bf16 %v1470_v50, %v1470_v50  ;;  %v1215_v56 = vadd.f32 %v1176_v51, %v1094_v33  ;;  %v1058_v40 = vpop.f32.mrf.mxu1  ;;  %v1561_v61 = vmul.f32 %v1470_v50, %v1470_v50  ;;  %v1520_v31 = vsel %vm480_vm4, %v1470_v50, 0.0 }
 0x1a6   : > { %v1095_v62 = vadd.f32 %v1058_v40, %v2624_v17 }
 0x1a7   : > { %1503 = vst.msk [vmem:[%s2209_s13] sm:$0xf] %vm1502_vm5, %v1486_v54  ;;  %v1333_v28 = vadd.f32 %v1294_v55, %v1215_v56  ;;  %v1415_v29 = vpop.f32.mrf.mxu0  ;;  %v1577_v7 = vsel %vm480_vm4, %v1561_v61, 0.0 }
 0x1a9   : > { %v1451_v57 = vadd.f32 %v1412_v49, %v1333_v28 }
 0x1ab   : > { %v1471_v30 = vadd.f32 %v2719_v38, %v1451_v57 }
 0x1ac   : > { %v1179_v60 = vpop.f32.mrf.mxu2  ;;  %v1297_v59 = vpop.f32.mrf.mxu3 }
 0x1ad   : > { %v1487_v63 = vpack.c.bf16 %v1471_v30, %v1471_v30  ;;  %v1521_v2 = vsel %vm480_vm4, %v1471_v30, 0.0  ;;  %v1562_v24 = vmul.f32 %v1471_v30, %v1471_v30  ;;  %v1216_v5 = vadd.f32 %v1179_v60, %v1095_v62  ;;  %v1060_v6 = vpop.f32.mrf.mxu1 }
 0x1ae   : > { %v1522_v14 = vadd.f32 %v1521_v2, %v1520_v31  ;;  %v1096_v4 = vadd.f32 %v1060_v6, %v2633_v22 }
 0x1af   : > { %1504 = vst.msk [vmem:[%s2209_s13 + $0x4] sm:$0xf] %vm1502_vm5, %v1487_v63  ;;  %v1578_v8 = vsel %vm480_vm4, %v1562_v24, 0.0  ;;  %v1334_v12 = vadd.f32 %v1297_v59, %v1216_v5  ;;  %v1417_v17 = vpop.f32.mrf.mxu0 }
 0x1b0   : > { %v1579_v16 = vadd.f32 %v1578_v8, %v1577_v7 }
 0x1b1   : > { %v1452_v46 = vadd.f32 %v1415_v29, %v1334_v12 }
 0x1b3   : > { %v1472_v27 = vadd.f32 %v2719_v38, %v1452_v46 }
 0x1b4   : > { %v1181_v47 = vpop.f32.mrf.mxu2  ;;  %v1299_v19 = vpop.f32.mrf.mxu3 }
 0x1b5   : > { %v1488_v1 = vpack.c.bf16 %v1472_v27, %v1472_v27  ;;  %v1523_v23 = vsel %vm480_vm4, %v1472_v27, 0.0  ;;  %v1563_v20 = vmul.f32 %v1472_v27, %v1472_v27  ;;  %v1217_v26 = vadd.f32 %v1181_v47, %v1096_v4  ;;  %v1063_v32 = vpop.f32.mrf.mxu1 }
 0x1b6   : > { %v1524_v36 = vadd.f32 %v1523_v23, %v1522_v14  ;;  %v1097_v44 = vadd.f32 %v1063_v32, %v2638_v52 }
 0x1b7   : > { %1505 = vst.msk [vmem:[%s2209_s13 + $0x8] sm:$0xf] %vm1502_vm5, %v1488_v1  ;;  %v1580_v39 = vsel %vm480_vm4, %v1563_v20, 0.0  ;;  %v1335_v9 = vadd.f32 %v1299_v19, %v1217_v26  ;;  %v1420_v42 = vpop.f32.mrf.mxu0 }
 0x1b8   : > { %v1581_v43 = vadd.f32 %v1580_v39, %v1579_v16 }
 0x1b9   : > { %v1453_v34 = vadd.f32 %v1417_v17, %v1335_v9 }
 0x1bb   : > { %v1473_v22 = vadd.f32 %v2719_v38, %v1453_v34 }
 0x1bc   : > { %v1184_v45 = vpop.f32.mrf.mxu2  ;;  %v1302_v25 = vpop.f32.mrf.mxu3 }
 0x1bd   : > { %v1489_v53 = vpack.c.bf16 %v1473_v22, %v1473_v22  ;;  %v1525_v48 = vsel %vm480_vm4, %v1473_v22, 0.0  ;;  %v1564_v49 = vmul.f32 %v1473_v22, %v1473_v22  ;;  %v1218_v0 = vadd.f32 %v1184_v45, %v1097_v44  ;;  %v1065_v50 = vpop.f32.mrf.mxu1 }
 0x1be   : > { %v1526_v33 = vadd.f32 %v1525_v48, %v1524_v36  ;;  %v1098_v28 = vadd.f32 %v1065_v50, %v2647_v15 }
 0x1bf   : > { %1506 = vst.msk [vmem:[%s2209_s13 + $0xc] sm:$0xf] %vm1502_vm5, %v1489_v53  ;;  %v1582_v51 = vsel %vm480_vm4, %v1564_v49, 0.0  ;;  %v1336_v55 = vadd.f32 %v1302_v25, %v1218_v0  ;;  %v1422_v54 = vpop.f32.mrf.mxu0 }
 0x1c0   : > { %v1583_v56 = vadd.f32 %v1582_v51, %v1581_v43 }
 0x1c1   : > { %v1454_v40 = vadd.f32 %v1420_v42, %v1336_v55 }
 0x1c3   : > { %v1474_v52 = vadd.f32 %v2719_v38, %v1454_v40 }
 0x1c4   : > { %v1186_v29 = vpop.f32.mrf.mxu2  ;;  %v1304_v57 = vpop.f32.mrf.mxu3 }
 0x1c5   : > { %v1490_v61 = vpack.c.bf16 %v1474_v52, %v1474_v52  ;;  %v1527_v30 = vsel %vm480_vm4, %v1474_v52, 0.0  ;;  %v1565_v62 = vmul.f32 %v1474_v52, %v1474_v52  ;;  %v1219_v31 = vadd.f32 %v1186_v29, %v1098_v28  ;;  %v1068_v60 = vpop.f32.mrf.mxu1 }
 0x1c6   : > { %v1528_v59 = vadd.f32 %v1527_v30, %v1526_v33  ;;  %v1099_v14 = vadd.f32 %v1068_v60, %v2652_v58 }
 0x1c7   : > { %1507 = vst.msk [vmem:[%s2209_s13 + $0x10] sm:$0xf] %vm1502_vm5, %v1490_v61  ;;  %v1584_v63 = vsel %vm480_vm4, %v1565_v62, 0.0  ;;  %v1337_v2 = vadd.f32 %v1304_v57, %v1219_v31  ;;  %v1425_v24 = vpop.f32.mrf.mxu0 }
 0x1c8   : > { %v1585_v5 = vadd.f32 %v1584_v63, %v1583_v56 }
 0x1c9   : > { %v1455_v6 = vadd.f32 %v1422_v54, %v1337_v2 }
 0x1cb   : > { %v1475_v15 = vadd.f32 %v2719_v38, %v1455_v6 }
 0x1cc   : > { %v1189_v7 = vpop.f32.mrf.mxu2  ;;  %v1307_v8 = vpop.f32.mrf.mxu3 }
 0x1cd   : > { %v1491_v12 = vpack.c.bf16 %v1475_v15, %v1475_v15  ;;  %v1529_v17 = vsel %vm480_vm4, %v1475_v15, 0.0  ;;  %v1566_v16 = vmul.f32 %v1475_v15, %v1475_v15  ;;  %v1220_v46 = vadd.f32 %v1189_v7, %v1099_v14  ;;  %v1070_v27 = vpop.f32.mrf.mxu1 }
 0x1ce   : > { %v1530_v4 = vadd.f32 %v1529_v17, %v1528_v59  ;;  %v1100_v26 = vadd.f32 %v1070_v27, %v2660_v35 }
 0x1cf   : > { %1508 = vst.msk [vmem:[%s2209_s13 + $0x14] sm:$0xf] %vm1502_vm5, %v1491_v12  ;;  %v1586_v47 = vsel %vm480_vm4, %v1566_v16, 0.0  ;;  %v1338_v19 = vadd.f32 %v1307_v8, %v1220_v46  ;;  %v1427_v1 = vpop.f32.mrf.mxu0 }
 0x1d0   : > { %v1587_v23 = vadd.f32 %v1586_v47, %v1585_v5 }
 0x1d1   : > { %v1456_v20 = vadd.f32 %v1425_v24, %v1338_v19 }
 0x1d3   : > { %v1476_v58 = vadd.f32 %v2719_v38, %v1456_v20 }
 0x1d4   : > { %v1191_v32 = vpop.f32.mrf.mxu2  ;;  %v1309_v36 = vpop.f32.mrf.mxu3 }
 0x1d5   : > { %v1492_v39 = vpack.c.bf16 %v1476_v58, %v1476_v58  ;;  %v1531_v9 = vsel %vm480_vm4, %v1476_v58, 0.0  ;;  %v1567_v42 = vmul.f32 %v1476_v58, %v1476_v58  ;;  %v1221_v43 = vadd.f32 %v1191_v32, %v1100_v26  ;;  %v1073_v34 = vpop.f32.mrf.mxu1 }
 0x1d6   : > { %v1532_v22 = vadd.f32 %v1531_v9, %v1530_v4  ;;  %v1101_v49 = vadd.f32 %v1073_v34, %v2665_v3 }
 0x1d7   : > { %1509 = vst.msk [vmem:[%s2209_s13 + $0x18] sm:$0xf] %vm1502_vm5, %v1492_v39  ;;  %v1588_v44 = vsel %vm480_vm4, %v1567_v42, 0.0  ;;  %v1339_v45 = vadd.f32 %v1309_v36, %v1221_v43  ;;  %v1430_v25 = vpop.f32.mrf.mxu0 }
 0x1d8   : > { %v1589_v53 = vadd.f32 %v1588_v44, %v1587_v23 }
 0x1d9   : > { %v1457_v48 = vadd.f32 %v1427_v1, %v1339_v45 }
 0x1db   : > { %v1477_v35 = vadd.f32 %v2719_v38, %v1457_v48 }
 0x1dc   : > { %v1194_v0 = vpop.f32.mrf.mxu2  ;;  %v1312_v50 = vpop.f32.mrf.mxu3 }
 0x1dd   : > { %v1493_v33 = vpack.c.bf16 %v1477_v35, %v1477_v35  ;;  %v1533_v51 = vsel %vm480_vm4, %v1477_v35, 0.0  ;;  %v1568_v55 = vmul.f32 %v1477_v35, %v1477_v35  ;;  %v1222_v54 = vadd.f32 %v1194_v0, %v1101_v49  ;;  %v1075_v56 = vpop.f32.mrf.mxu1 }
 0x1de   : > { %v1534_v40 = vadd.f32 %v1533_v51, %v1532_v22  ;;  %v1102_v30 = vadd.f32 %v1075_v56, %v2674_v13 }
 0x1df   : > { %1510 = vst.msk [vmem:[%s2209_s13 + $0x1c] sm:$0xf] %vm1502_vm5, %v1493_v33  ;;  %v1590_v52 = vsel %vm480_vm4, %v1568_v55, 0.0  ;;  %v1340_v28 = vadd.f32 %v1312_v50, %v1222_v54  ;;  %v1432_v29 = vpop.f32.mrf.mxu0 }
 0x1e0   : > { %v1591_v57 = vadd.f32 %v1590_v52, %v1589_v53 }
 0x1e1   : > { %v1458_v61 = vadd.f32 %v1430_v25, %v1340_v28 }
 0x1e3   : > { %v1478_v3 = vadd.f32 %v2719_v38, %v1458_v61 }
 0x1e4   : > { %v1196_v62 = vpop.f32.mrf.mxu2  ;;  %v1314_v31 = vpop.f32.mrf.mxu3 }
 0x1e5   : > { %v1494_v60 = vpack.c.bf16 %v1478_v3, %v1478_v3  ;;  %v1535_v59 = vsel %vm480_vm4, %v1478_v3, 0.0  ;;  %v1569_v63 = vmul.f32 %v1478_v3, %v1478_v3  ;;  %v1223_v2 = vadd.f32 %v1196_v62, %v1102_v30  ;;  %v1078_v24 = vpop.f32.mrf.mxu1 }
 0x1e6   : > { %v1536_v5 = vadd.f32 %v1535_v59, %v1534_v40  ;;  %v1103_v12 = vadd.f32 %v1078_v24, %v2679_v10 }
 0x1e7   : > { %1511 = vst.msk [vmem:[%s2209_s13 + $0x20] sm:$0xf] %vm1502_vm5, %v1494_v60  ;;  %v1592_v6 = vsel %vm480_vm4, %v1569_v63, 0.0  ;;  %v1341_v15 = vadd.f32 %v1314_v31, %v1223_v2  ;;  %v1435_v14 = vpop.f32.mrf.mxu0 }
 0x1e8   : > { %v1593_v7 = vadd.f32 %v1592_v6, %v1591_v57 }
 0x1e9   : > { %v1459_v8 = vadd.f32 %v1432_v29, %v1341_v15 }
 0x1eb   : > { %v1479_v13 = vadd.f32 %v2719_v38, %v1459_v8 }
 0x1ec   : > { %v1199_v17 = vpop.f32.mrf.mxu2  ;;  %v1317_v16 = vpop.f32.mrf.mxu3 }
 0x1ed   : > { %v1495_v46 = vpack.c.bf16 %v1479_v13, %v1479_v13  ;;  %v1537_v27 = vsel %vm480_vm4, %v1479_v13, 0.0  ;;  %v1570_v4 = vmul.f32 %v1479_v13, %v1479_v13  ;;  %v1224_v47 = vadd.f32 %v1199_v17, %v1103_v12  ;;  %v1080_v19 = vpop.f32.mrf.mxu1 }
 0x1ee   : > { %v1538_v1 = vadd.f32 %v1537_v27, %v1536_v5  ;;  %v1104_v36 = vadd.f32 %v1080_v19, %v2690_v37 }
 0x1ef   : > { %1512 = vst.msk [vmem:[%s2209_s13 + $0x24] sm:$0xf] %vm1502_vm5, %v1495_v46  ;;  %v1594_v23 = vsel %vm480_vm4, %v1570_v4, 0.0  ;;  %v1342_v20 = vadd.f32 %v1317_v16, %v1224_v47  ;;  %v1437_v58 = vpop.f32.mrf.mxu0 }
 0x1f0   : > { %v1595_v26 = vadd.f32 %v1594_v23, %v1593_v7 }
 0x1f1   : > { %v1460_v32 = vadd.f32 %v1435_v14, %v1342_v20 }
 0x1f3   : > { %v1480_v10 = vadd.f32 %v2719_v38, %v1460_v32 }
 0x1f4   : > { %v1201_v39 = vpop.f32.mrf.mxu2  ;;  %v1319_v9 = vpop.f32.mrf.mxu3 }
 0x1f5   : > { %v1496_v42 = vpack.c.bf16 %v1480_v10, %v1480_v10  ;;  %v1539_v43 = vsel %vm480_vm4, %v1480_v10, 0.0  ;;  %v1571_v34 = vmul.f32 %v1480_v10, %v1480_v10  ;;  %v1225_v22 = vadd.f32 %v1201_v39, %v1104_v36  ;;  %v1083_v44 = vpop.f32.mrf.mxu1 }
 0x1f6   : > { %v1540_v45 = vadd.f32 %v1539_v43, %v1538_v1  ;;  %v1105_v0 = vadd.f32 %v1083_v44, %v2695_v41 }
 0x1f7   : > { %1513 = vst.msk [vmem:[%s2209_s13 + $0x28] sm:$0xf] %vm1502_vm5, %v1496_v42  ;;  %v1596_v25 = vsel %vm480_vm4, %v1571_v34, 0.0  ;;  %v1343_v53 = vadd.f32 %v1319_v9, %v1225_v22  ;;  %v1440_v49 = vpop.f32.mrf.mxu0 }
 0x1f8   : > { %v1597_v48 = vadd.f32 %v1596_v25, %v1595_v26 }
 0x1f9   : > { %v1461_v35 = vadd.f32 %v1437_v58, %v1343_v53 }
 0x1fb   : > { %v1481_v37 = vadd.f32 %v2719_v38, %v1461_v35 }
 0x1fc   : > { %v1204_v50 = vpop.f32.mrf.mxu2  ;;  %v1322_v33 = vpop.f32.mrf.mxu3 }
 0x1fd   : > { %v1497_v51 = vpack.c.bf16 %v1481_v37, %v1481_v37  ;;  %v1541_v55 = vsel %vm480_vm4, %v1481_v37, 0.0  ;;  %v1572_v54 = vmul.f32 %v1481_v37, %v1481_v37  ;;  %v1226_v56 = vadd.f32 %v1204_v50, %v1105_v0  ;;  %v1085_v40 = vpop.f32.mrf.mxu1 }
 0x1fe   : > { %v1542_v52 = vadd.f32 %v1541_v55, %v1540_v45  ;;  %v1106_v41 = vadd.f32 %v1085_v40, %v2706_v18 }
 0x1ff   : > { %1514 = vst.msk [vmem:[%s2209_s13 + $0x2c] sm:$0xf] %vm1502_vm5, %v1497_v51  ;;  %v1598_v28 = vsel %vm480_vm4, %v1572_v54, 0.0  ;;  %v1344_v29 = vadd.f32 %v1322_v33, %v1226_v56  ;;  %v1442_v30 = vpop.f32.mrf.mxu0 }
 0x200   : > { %v1599_v57 = vadd.f32 %v1598_v28, %v1597_v48 }
 0x201   : > { %v1462_v61 = vadd.f32 %v1440_v49, %v1344_v29 }
 0x203   : > { %v1482_v3 = vadd.f32 %v2719_v38, %v1462_v61  ;;  %v1560_v61 = vld [vmem:[#allocation4] sm:$0x1] }
 0x204   : > { %v1206_v62 = vpop.f32.mrf.mxu2  ;;  %v1324_v31 = vpop.f32.mrf.mxu3 }
 0x205   : > { %v1498_v60 = vpack.c.bf16 %v1482_v3, %v1482_v3  ;;  %v1543_v59 = vsel %vm480_vm4, %v1482_v3, 0.0  ;;  %v1573_v63 = vmul.f32 %v1482_v3, %v1482_v3  ;;  %v1227_v2 = vadd.f32 %v1206_v62, %v1106_v41  ;;  %v1088_v5 = vpop.f32.mrf.mxu1 }
 0x206   : > { %v1544_v24 = vadd.f32 %v1543_v59, %v1542_v52  ;;  %v1107_v8 = vadd.f32 %v1088_v5, %v2710_v21 }
 0x207   : > { %1515 = vst.msk [vmem:[%s2209_s13 + $0x30] sm:$0xf] %vm1502_vm5, %v1498_v60  ;;  %v1600_v6 = vsel %vm480_vm4, %v1573_v63, 0.0  ;;  %v1345_v15 = vadd.f32 %v1324_v31, %v1227_v2  ;;  %v1445_v47 = vpop.f32.mrf.mxu0 }
 0x208   : > { %v1601_v14 = vadd.f32 %v1600_v6, %v1599_v57 }
 0x209   : > { %v1463_v7 = vadd.f32 %v1442_v30, %v1345_v15 }
 0x20b   : > { %v1483_v18 = vadd.f32 %v2719_v38, %v1463_v7 }
 0x20c   : > { %v1209_v13 = vpop.f32.mrf.mxu2  ;;  %v1327_v12 = vpop.f32.mrf.mxu3 }
 0x20d   : > { %v1499_v17 = vpack.c.bf16 %v1483_v18, %v1483_v18  ;;  %v1545_v16 = vsel %vm480_vm4, %v1483_v18, 0.0  ;;  %v1574_v46 = vmul.f32 %v1483_v18, %v1483_v18  ;;  %v1228_v27 = vadd.f32 %v1209_v13, %v1107_v8  ;;  %v1090_v20 = vpop.f32.mrf.mxu1 }
 0x20e   : > { %v1546_v4 = vadd.f32 %v1545_v16, %v1544_v24  ;;  %v1108_v26 = vadd.f32 %v1090_v20, %v2713_v11 }
 0x20f   : > { %1516 = vst.msk [vmem:[%s2209_s13 + $0x34] sm:$0xf] %vm1502_vm5, %v1499_v17  ;;  %v1602_v19 = vsel %vm480_vm4, %v1574_v46, 0.0  ;;  %v1346_v1 = vadd.f32 %v1327_v12, %v1228_v27  ;;  %v1447_v45 = vpop.f32.mrf.mxu0 }
 0x210   : > { %v1603_v23 = vadd.f32 %v1602_v19, %v1601_v14 }
 0x211   : > { %v1464_v58 = vadd.f32 %v1445_v47, %v1346_v1 }
 0x213   : > { %v1484_v21 = vadd.f32 %v2719_v38, %v1464_v58 }
 0x214   : > { %v1211_v32 = vpop.f32.mrf.mxu2  ;;  %v1329_v43 = vpop.f32.mrf.mxu3 }
 0x215   : > { %v1500_v10 = vpack.c.bf16 %v1484_v21, %v1484_v21  ;;  %v1547_v36 = vsel %vm480_vm4, %v1484_v21, 0.0  ;;  %v1575_v39 = vmul.f32 %v1484_v21, %v1484_v21  ;;  %v1229_v9 = vadd.f32 %v1211_v32, %v1108_v26 }
 0x216   : > { %v1548_v42 = vadd.f32 %v1547_v36, %v1546_v4 }
 0x217   : > { %1517 = vst.msk [vmem:[%s2209_s13 + $0x38] sm:$0xf] %vm1502_vm5, %v1500_v10  ;;  %v1604_v34 = vsel %vm480_vm4, %v1575_v39, 0.0  ;;  %v1347_v22 = vadd.f32 %v1329_v43, %v1229_v9 }
 0x218   : > { %v1605_v44 = vadd.f32 %v1604_v34, %v1603_v23 }
 0x219   : > { %v1465_v25 = vadd.f32 %v1447_v45, %v1347_v22 }
 0x21b   : > { %v1485_v53 = vadd.f32 %v2719_v38, %v1465_v25  ;;  %v1519_v38 = vld [vmem:[#allocation3] sm:$0x1] }
 0x21d   : > { %v1501_v11 = vpack.c.bf16 %v1485_v53, %v1485_v53  ;;  %v1549_v48 = vsel %vm480_vm4, %v1485_v53, 0.0  ;;  %v1576_v35 = vmul.f32 %v1485_v53, %v1485_v53 }
 0x21e   : > { %v1550_v49 = vadd.f32 %v1549_v48, %v1548_v42 }
 0x21f   : > { %1518 = vst.msk [vmem:[%s2209_s13 + $0x3c] sm:$0xf] %vm1502_vm5, %v1501_v11  ;;  %v1606_v37 = vsel %vm480_vm4, %v1576_v35, 0.0 }
 0x220   : > { %v1551_v0 = vrot.slane %v1550_v49, 4  ;;  %v1607_v50 = vadd.f32 %v1606_v37, %v1605_v44 }
 0x222   : > { %v1552_v33 = vadd.f32 %v1551_v0, %v1550_v49  ;;  %v1608_v51 = vrot.slane %v1607_v50, 4 }
 0x224   : > { %v1553_v55 = vrot.slane %v1552_v33, 2  ;;  %v1609_v54 = vadd.f32 %v1608_v51, %v1607_v50 }
 0x226   : > { %v1554_v56 = vadd.f32 %v1553_v55, %v1552_v33  ;;  %v1610_v40 = vrot.slane %v1609_v54, 2 }
 0x228   : > { %v1555_v52 = vrot.slane %v1554_v56, 1  ;;  %v1611_v28 = vadd.f32 %v1610_v40, %v1609_v54 }
 0x22a   : > { %v1556_v29 = vadd.f32 %v1555_v52, %v1554_v56  ;;  %v1612_v57 = vrot.slane %v1611_v28, 1 }
 0x22c   : > { %v1557_v3 = vadd.f32 %v1556_v29, %v1519_v38  ;;  %v1613_v41 = vadd.f32 %v1612_v57, %v1611_v28  ;;  %1619 = sbr.rel (%p1961_p8) target bundleno = 569 (0x239), region = 40 }
 0x22e   : > { %1559 = vst.msk [vmem:[#allocation3] sm:$0x1] %vm1558_vm6, %v1557_v3  ;;  %v1614_v30 = vadd.f32 %v1613_v41, %v1560_v61 }
 0x230   : > { %1615 = vst.msk [vmem:[#allocation4] sm:$0x1] %vm1558_vm6, %v1614_v30 }
 0x235   : > { %v1620_v62 = vld [vmem:[#allocation3] sm:$0x1] }
 0x236   : > { %1621 = vst.msk [vmem:[%s261_s10] sm:$0x1] %vm1558_vm6, %v1620_v62 }
 0x237   : > { %v1622_v31 = vld [vmem:[#allocation4] sm:$0x1] }
 0x238   : > { %1623 = vst.msk [vmem:[%s264_s16] sm:$0x1] %vm1558_vm6, %v1622_v31 }
 0x239 PF: > { %s16_s22 = sadd.s32 1, %s2127_s22   ;;  %s2848_s18 = smov %s2119_s20 }
 0x23a   : > { %p13_p9 = scmp.ge.s32.totalorder %s16_s22, 6   ;;  %s2849_s19 = smov %s2123_s21 }
 0x23b   : > { %s2850_s20 = smov %s2853_s23  ;;  %s2851_s21 = smov %s2857_s24 }
 0x23c   :  { %15 = sbr.rel (!%p13_p9) target bundleno = 3 (0x3), region = 106 }

// kernel: fold_conv_aspp_forward.6
= control target key start
LH: loop header
LB: loop body
LE: loop exit
PB: predicated region body
PF: predicated region fallthrough
CT: control target
= control target key end

     0   :  { %s905_s27 = smov 0   ;;  %s907_s28 = smov 0   ;;  %s1021_s0 = inlined_call_operand.vmem [shape: bf16[2,64,32], index: 0, kind: input, shape index: {}]   ;;  %s1022_s1 = inlined_call_operand.vmem [shape: f32[1,32], index: 1, kind: input, shape index: {}]   ;;  %s1023_s2 = inlined_call_operand.vmem [shape: f32[1,32], index: 2, kind: input, shape index: {}]   ;;  %s1024_s3 = inlined_call_operand.vmem [shape: f32[1,32], index: 3, kind: input, shape index: {}]   ;;  %s1025_s4 = inlined_call_operand.vmem [shape: bf16[32,16], index: 4, kind: input, shape index: {}]   ;;  %s1026_s5 = inlined_call_operand.vmem [shape: f32[2,1,16], index: 5, kind: input, shape index: {}]   ;;  %s1027_s6 = inlined_call_operand.vmem [shape: bf16[2,64,16], index: 6, kind: output, shape index: {0}]   ;;  %s1028_s7 = inlined_call_operand.vmem [shape: f32[2,1,16], index: 7, kind: output, shape index: {1}]   ;;  %s1029_s8 = inlined_call_operand.vmem [shape: f32[2,1,16], index: 8, kind: output, shape index: {2}]  }
   0x1   :  { %s909_s29 = smov 0  }
   0x2 LB: > { %s31_s30 = sadd.s32 1, %s853_s28  ;;  %p758_p0 = scmp.ge.s32.totalorder %s857_s29, 1  ;;  %s857_s29 = sphi %s909_s29, %s19_s29   ;;  %s853_s28 = sphi %s907_s28, %s1031_s28   ;;  %s849_s27 = sphi %s905_s27, %s1030_s27  }
   0x3   : > { %p33_p1 = scmp.ge.s32.totalorder %s31_s30, 2  ;;  %p296_p2 = scmp.lt.s32.totalorder %s857_s29, 3 }
   0x5   : > { %s1033_s30 = smov (%p33_p1, %s31_s30), 0  ;;  %p297_p3 = pnand %p758_p0, %p296_p2 }
   0x6   : > { %p348_p4 = scmp.lt.s32.totalorder (!%p297_p3), %s849_s27, 1 }
   0x7   : > { %300 = sbr.rel (%p297_p3) target bundleno = 207 (0xcf), region = 44 }
   0xc   : > { %v780_v0 = vld [vmem:[%s1025_s4 + $0x8] sm:$0xff]  ;;  %v779_v1 = vld [vmem:[%s1025_s4] sm:$0xff]  ;;  %s1035_s27 = smov (!%p348_p4, %s849_s27), 1  ;;  %vm484_vm0 = vcmask 261120   ;;  %vm381_vm1 = vcmask 122880   ;;  %vm534_vm2 = vcmask 125952  }
   0xd   : > { %503 = vmatpush.bf16.msra.mxu0 %v780_v0  ;;  %800 = vmatpush.bf16.msra.mxu1 %v780_v0  ;;  %s777_s13 = sshll.u32 %s1035_s27, 5  ;;  %v831_v2 = vld [vmem:[%s1022_s1] ss:$0 sm:$0xff]  ;;  %s359_s21 = scalar_lea.vmem %s1026_s5, %s1035_s27  ;;  %vm544_vm3 = vcmask 130048  }
   0xe   : > { %801 = vmatpush.bf16.msra.mxu2 %v780_v0  ;;  %802 = vmatpush.bf16.msra.mxu3 %v780_v0  ;;  %s355_s16 = scalar_lea.vmem %s1021_s0, %s777_s13  ;;  %v832_v8 = vld [vmem:[%s1023_s2] ss:$0 sm:$0xff]  ;;  %s966_s12 = scalar_lea.vmem %s1027_s6, %s777_s13 }
   0xf   : > { %v782_v3 = vld [vmem:[%s355_s16] sm:$0xff]   ;;  %v797_v4 = vld [vmem:[%s355_s16 + $0x8] sm:$0xff]   ;;  %v798_v5 = vld [vmem:[%s355_s16 + $0x10] sm:$0xff]   ;;  %s372_s15 = scalar_lea.vmem %s1028_s7, %s1035_s27  ;;  %s375_s18 = scalar_lea.vmem %s1029_s8, %s1035_s27 }
  0x10   : > { %v783_v6 = vunpack.c.l.bf16 %v782_v3  ;;  %v784_v7 = vunpack.c.h.bf16 %v782_v3  ;;  %v787_v9 = vunpack.c.l.bf16 %v797_v4  ;;  %v788_v10 = vunpack.c.h.bf16 %v797_v4  ;;  %v799_v11 = vld [vmem:[%s355_s16 + $0x18] sm:$0xff]   ;;  %v833_v26 = vld [vmem:[%s1024_s3] ss:$0 sm:$0xff] }
  0x11   : > { %504 = vmatpush.bf16.msra.mxu0 %v779_v1  ;;  %803 = vmatpush.bf16.msra.mxu1 %v779_v1  ;;  %v791_v12 = vunpack.c.l.bf16 %v798_v5  ;;  %v792_v13 = vunpack.c.h.bf16 %v798_v5  ;;  %v795_v14 = vunpack.c.l.bf16 %v799_v11  ;;  %v796_v15 = vunpack.c.h.bf16 %v799_v11 }
  0x12   : > { %804 = vmatpush.bf16.msra.mxu2 %v779_v1  ;;  %805 = vmatpush.bf16.msra.mxu3 %v779_v1  ;;  %v404_v16 = vmul.f32 %v831_v2, %v783_v6  ;;  %v405_v17 = vmul.f32 %v831_v2, %v784_v7  ;;  %v406_v18 = vmul.f32 %v831_v2, %v787_v9  ;;  %v859_v5 = vmov 0.0   ;;  %v834_v6 = vld [vmem:[%s359_s21] ss:$0 sm:$0xff] }
  0x13   : > { %v407_v19 = vmul.f32 %v831_v2, %v788_v10  ;;  %v408_v20 = vmul.f32 %v831_v2, %v791_v12  ;;  %v409_v21 = vmul.f32 %v831_v2, %v792_v13  ;;  %v410_v22 = vmul.f32 %v831_v2, %v795_v14  ;;  %382 = vst.msk [vmem:[#allocation2] sm:$0x1] %vm381_vm1, %v859_v5 }
  0x14   : > { %v411_v23 = vmul.f32 %v831_v2, %v796_v15  ;;  %v416_v24 = vadd.f32 %v832_v8, %v404_v16  ;;  %v417_v25 = vadd.f32 %v832_v8, %v405_v17  ;;  %v418_v27 = vadd.f32 %v832_v8, %v406_v18  ;;  %383 = vst.msk [vmem:[#allocation3] sm:$0x1] %vm381_vm1, %v859_v5 }
  0x15   : > { %v419_v28 = vadd.f32 %v832_v8, %v407_v19  ;;  %v420_v29 = vadd.f32 %v832_v8, %v408_v20  ;;  %v421_v30 = vadd.f32 %v832_v8, %v409_v21  ;;  %v422_v31 = vadd.f32 %v832_v8, %v410_v22 }
  0x16   : > { %v423_v32 = vadd.f32 %v832_v8, %v411_v23  ;;  %v425_v33 = vmax.f32 %v416_v24, 0.0  ;;  %v426_v34 = vmax.f32 %v417_v25, 0.0  ;;  %v433_v35 = vmin.f32 %v416_v24, 0.0 }
  0x17   : > { %v434_v36 = vmin.f32 %v417_v25, 0.0  ;;  %v427_v37 = vmax.f32 %v418_v27, 0.0  ;;  %v428_v38 = vmax.f32 %v419_v28, 0.0  ;;  %v435_v39 = vmin.f32 %v418_v27, 0.0 }
  0x18   : > { %v436_v40 = vmin.f32 %v419_v28, 0.0  ;;  %v444_v41 = vmul.f32 %v833_v26, %v433_v35  ;;  %v429_v43 = vmax.f32 %v420_v29, 0.0  ;;  %v430_v44 = vmax.f32 %v421_v30, 0.0 }
  0x19   : > { %v445_v42 = vmul.f32 %v833_v26, %v434_v36  ;;  %v446_v45 = vmul.f32 %v833_v26, %v435_v39  ;;  %v437_v47 = vmin.f32 %v420_v29, 0.0  ;;  %v438_v48 = vmin.f32 %v421_v30, 0.0 }
  0x1a   : > { %v447_v46 = vmul.f32 %v833_v26, %v436_v40  ;;  %v452_v49 = vadd.f32 %v444_v41, %v425_v33  ;;  %v431_v51 = vmax.f32 %v422_v31, 0.0  ;;  %v432_v57 = vmax.f32 %v423_v32, 0.0 }
  0x1b   : > { %v453_v50 = vadd.f32 %v445_v42, %v426_v34  ;;  %v454_v52 = vadd.f32 %v446_v45, %v427_v37  ;;  %v448_v54 = vmul.f32 %v833_v26, %v437_v47  ;;  %v449_v55 = vmul.f32 %v833_v26, %v438_v48 }
  0x1c   : > { %v455_v53 = vadd.f32 %v447_v46, %v428_v38  ;;  %v439_v58 = vmin.f32 %v422_v31, 0.0  ;;  %v440_v59 = vmin.f32 %v423_v32, 0.0 }
  0x1d   : > { %v460_v56 = vpack.c.bf16 %v453_v50, %v452_v49  ;;  %v456_v61 = vadd.f32 %v448_v54, %v429_v43  ;;  %v457_v62 = vadd.f32 %v449_v55, %v430_v44 }
  0x1e   : > { %v461_v60 = vpack.c.bf16 %v455_v53, %v454_v52  ;;  %v450_v63 = vmul.f32 %v833_v26, %v439_v58  ;;  %v451_v0 = vmul.f32 %v833_v26, %v440_v59 }
  0x1f   : > { %771 = vmatmul.msk.bf16.vlgmr.msra.gmra.mxu0 %vm484_vm0, %v460_v56  ;;  %v462_v1 = vpack.c.bf16 %v457_v62, %v456_v61 }
  0x20   : > { %772 = vmatmul.msk.bf16.vlgmr.msra.gmra.mxu1 %vm484_vm0, %v461_v60  ;;  %v458_v2 = vadd.f32 %v450_v63, %v431_v51  ;;  %v459_v3 = vadd.f32 %v451_v0, %v432_v57 }
  0x21   : > { %773 = vmatmul.msk.bf16.vlgmr.msra.gmra.mxu2 %vm484_vm0, %v462_v1 }
  0x22   : > { %v463_v4 = vpack.c.bf16 %v459_v3, %v458_v2 }
  0x24   : > { %774 = vmatmul.msk.bf16.vlgmr.msra.gmra.mxu3 %vm484_vm0, %v463_v4 }
  0x9c   : > { %v506_v7 = vpop.f32.mrf.mxu0 }
  0x9d   : > { %v507_v8 = vadd.f32 %v834_v6, %v506_v7  ;;  %v511_v9 = vpop.f32.mrf.mxu1 }
  0x9e   : > { %v512_v10 = vadd.f32 %v834_v6, %v511_v9 }
  0x9f   : > { %v526_v11 = vpack.c.bf16 %v507_v8, %v507_v8  ;;  %v570_v14 = vmul.f32 %v507_v8, %v507_v8  ;;  %v545_v18 = vsel %vm544_vm3, %v507_v8, 0.0 }
  0xa0   : > { %v528_v12 = vpack.c.bf16 %v512_v10, %v512_v10  ;;  %v572_v21 = vmul.f32 %v512_v10, %v512_v10  ;;  %v548_v25 = vsel %vm544_vm3, %v512_v10, 0.0 }
  0xa1   : > { %535 = vst.msk [vmem:[%s966_s12] sm:$0xf] %vm534_vm2, %v526_v11  ;;  %v578_v29 = vsel %vm544_vm3, %v570_v14, 0.0  ;;  %v543_v14 = vld [vmem:[#allocation2] sm:$0x1] }
  0xa2   : > { %537 = vst.msk [vmem:[%s966_s12 + $0x8] sm:$0xf] %vm534_vm2, %v528_v12  ;;  %v581_v36 = vsel %vm544_vm3, %v572_v21, 0.0 }
  0xa4   : > { %v508_v13 = vpop.f32.mrf.mxu0  ;;  %v516_v15 = vpop.f32.mrf.mxu2 }
  0xa5   : > { %v509_v16 = vadd.f32 %v834_v6, %v508_v13  ;;  %v513_v17 = vpop.f32.mrf.mxu1  ;;  %v517_v19 = vadd.f32 %v834_v6, %v516_v15 }
  0xa6   : > { %v514_v20 = vadd.f32 %v834_v6, %v513_v17  ;;  %v569_v17 = vld [vmem:[#allocation3] sm:$0x1] }
  0xa7   : > { %v527_v22 = vpack.c.bf16 %v509_v16, %v509_v16  ;;  %v546_v23 = vsel %vm544_vm3, %v509_v16, 0.0  ;;  %v571_v24 = vmul.f32 %v509_v16, %v509_v16  ;;  %v530_v26 = vpack.c.bf16 %v517_v19, %v517_v19  ;;  %v521_v27 = vpop.f32.mrf.mxu3 }
  0xa8   : > { %v547_v28 = vadd.f32 %v546_v23, %v545_v18  ;;  %v522_v30 = vadd.f32 %v834_v6, %v521_v27  ;;  %v529_v32 = vpack.c.bf16 %v514_v20, %v514_v20  ;;  %v573_v35 = vmul.f32 %v514_v20, %v514_v20 }
  0xa9   : > { %536 = vst.msk [vmem:[%s966_s12 + $0x4] sm:$0xf] %vm534_vm2, %v527_v22  ;;  %v579_v31 = vsel %vm544_vm3, %v571_v24, 0.0  ;;  %v574_v37 = vmul.f32 %v517_v19, %v517_v19  ;;  %v550_v39 = vsel %vm544_vm3, %v514_v20, 0.0  ;;  %v552_v42 = vsel %vm544_vm3, %v517_v19, 0.0 }
  0xaa   : > { %539 = vst.msk [vmem:[%s966_s12 + $0x10] sm:$0xf] %vm534_vm2, %v530_v26  ;;  %v580_v33 = vadd.f32 %v579_v31, %v578_v29  ;;  %v549_v34 = vadd.f32 %v548_v25, %v547_v28  ;;  %v532_v38 = vpack.c.bf16 %v522_v30, %v522_v30  ;;  %v583_v43 = vsel %vm544_vm3, %v573_v35, 0.0 }
  0xab   : > { %538 = vst.msk [vmem:[%s966_s12 + $0xc] sm:$0xf] %vm534_vm2, %v529_v32  ;;  %v585_v48 = vsel %vm544_vm3, %v574_v37, 0.0  ;;  %v576_v49 = vmul.f32 %v522_v30, %v522_v30  ;;  %v556_v57 = vsel %vm544_vm3, %v522_v30, 0.0 }
  0xac   : > { %v551_v40 = vadd.f32 %v550_v39, %v549_v34  ;;  %v582_v41 = vadd.f32 %v581_v36, %v580_v33  ;;  %541 = vst.msk [vmem:[%s966_s12 + $0x18] sm:$0xf] %vm534_vm2, %v532_v38  ;;  %v518_v44 = vpop.f32.mrf.mxu2 }
  0xad   : > { %v519_v46 = vadd.f32 %v834_v6, %v518_v44  ;;  %v589_v62 = vsel %vm544_vm3, %v576_v49, 0.0 }
  0xae   : > { %v584_v45 = vadd.f32 %v583_v43, %v582_v41  ;;  %v553_v47 = vadd.f32 %v552_v42, %v551_v40 }
  0xaf   : > { %v531_v50 = vpack.c.bf16 %v519_v46, %v519_v46  ;;  %v554_v51 = vsel %vm544_vm3, %v519_v46, 0.0  ;;  %v575_v52 = vmul.f32 %v519_v46, %v519_v46  ;;  %v523_v54 = vpop.f32.mrf.mxu3 }
  0xb0   : > { %v586_v53 = vadd.f32 %v585_v48, %v584_v45  ;;  %v555_v55 = vadd.f32 %v554_v51, %v553_v47  ;;  %v524_v56 = vadd.f32 %v834_v6, %v523_v54 }
  0xb1   : > { %540 = vst.msk [vmem:[%s966_s12 + $0x14] sm:$0xf] %vm534_vm2, %v531_v50  ;;  %v587_v58 = vsel %vm544_vm3, %v575_v52, 0.0 }
  0xb2   : > { %v588_v59 = vadd.f32 %v587_v58, %v586_v53  ;;  %v533_v60 = vpack.c.bf16 %v524_v56, %v524_v56  ;;  %v557_v61 = vadd.f32 %v556_v57, %v555_v55  ;;  %v558_v63 = vsel %vm544_vm3, %v524_v56, 0.0 }
  0xb3   : > { %v577_v0 = vmul.f32 %v524_v56, %v524_v56 }
  0xb4   : > { %542 = vst.msk [vmem:[%s966_s12 + $0x1c] sm:$0xf] %vm534_vm2, %v533_v60  ;;  %v559_v1 = vadd.f32 %v558_v63, %v557_v61  ;;  %v590_v2 = vadd.f32 %v589_v62, %v588_v59 }
  0xb5   : > { %v591_v3 = vsel %vm544_vm3, %v577_v0, 0.0 }
  0xb6   : > { %v560_v4 = vrot.slane %v559_v1, 4  ;;  %v592_v5 = vadd.f32 %v591_v3, %v590_v2 }
  0xb8   : > { %v561_v6 = vadd.f32 %v560_v4, %v559_v1  ;;  %v593_v7 = vrot.slane %v592_v5, 4 }
  0xba   : > { %v562_v8 = vrot.slane %v561_v6, 2  ;;  %v594_v9 = vadd.f32 %v593_v7, %v592_v5 }
  0xbc   : > { %v563_v10 = vadd.f32 %v562_v8, %v561_v6  ;;  %v595_v11 = vrot.slane %v594_v9, 2 }
  0xbe   : > { %v564_v12 = vrot.slane %v563_v10, 1  ;;  %v596_v13 = vadd.f32 %v595_v11, %v594_v9 }
  0xc0   : > { %v565_v15 = vadd.f32 %v564_v12, %v563_v10  ;;  %v597_v16 = vrot.slane %v596_v13, 1 }
  0xc2   : > { %v566_v18 = vadd.f32 %v565_v15, %v543_v14  ;;  %v598_v19 = vadd.f32 %v597_v16, %v596_v13 }
  0xc4   : > { %568 = vst.msk [vmem:[#allocation2] sm:$0x1] %vm381_vm1, %v566_v18  ;;  %v599_v20 = vadd.f32 %v598_v19, %v569_v17 }
  0xc6   : > { %600 = vst.msk [vmem:[#allocation3] sm:$0x1] %vm381_vm1, %v599_v20 }
  0xcb   : > { %v604_v21 = vld [vmem:[#allocation2] sm:$0x1] }
  0xcc   : > { %605 = vst.msk [vmem:[%s372_s15] sm:$0x1] %vm381_vm1, %v604_v21 }
  0xcd   : > { %v606_v22 = vld [vmem:[#allocation3] sm:$0x1] }
  0xce   : > { %607 = vst.msk [vmem:[%s375_s18] sm:$0x1] %vm381_vm1, %v606_v22 }
  0xcf PF: > { %s19_s29 = sadd.s32 1, %s857_s29   ;;  %s1030_s27 = smov %s853_s28 }
  0xd0   : > { %p16_p5 = scmp.ge.s32.totalorder %s19_s29, 4   ;;  %s1031_s28 = smov %s1033_s30 }
  0xd2   :  { %18 = sbr.rel (!%p16_p5) target bundleno = 2 (0x2), region = 109 }

// kernel: fold_conv_aspp_forward.5
= control target key start
LH: loop header
LB: loop body
LE: loop exit
PB: predicated region body
PF: predicated region fallthrough
CT: control target
= control target key end

     0   :  { %s2992_s18 = smov 0   ;;  %s2994_s19 = smov 0   ;;  %s3719_s0 = inlined_call_operand.vmem [shape: bf16[2,8,8,16], index: 0, kind: input, shape index: {}]   ;;  %s3720_s1 = inlined_call_operand.vmem [shape: f32[1,16], index: 1, kind: input, shape index: {}]   ;;  %s3721_s2 = inlined_call_operand.vmem [shape: f32[1,16], index: 2, kind: input, shape index: {}]   ;;  %s3722_s3 = inlined_call_operand.vmem [shape: f32[1,16], index: 3, kind: input, shape index: {}]   ;;  %s3723_s4 = inlined_call_operand.vmem [shape: bf16[16,8], index: 4, kind: input, shape index: {}]   ;;  %s3724_s5 = inlined_call_operand.vmem [shape: f32[1,8], index: 5, kind: input, shape index: {}]   ;;  %s3725_s6 = inlined_call_operand.vmem [shape: bf16[9,16,8], index: 6, kind: input, shape index: {}]   ;;  %s3726_s7 = inlined_call_operand.vmem [shape: f32[1,8], index: 7, kind: input, shape index: {}]   ;;  %s3727_s8 = inlined_call_operand.vmem [shape: bf16[9,16,8], index: 8, kind: input, shape index: {}]   ;;  %s3728_s9 = inlined_call_operand.vmem [shape: f32[1,8], index: 9, kind: input, shape index: {}]   ;;  %s3729_s10 = inlined_call_operand.vmem [shape: bf16[9,16,8], index: 10, kind: input, shape index: {}]   ;;  %s3730_s11 = inlined_call_operand.vmem [shape: f32[1,8], index: 11, kind: input, shape index: {}]   ;;  %s3731_s12 = inlined_call_operand.vmem [shape: bf16[2,64,32], index: 12, kind: output, shape index: {0}]   ;;  %s3732_s13 = inlined_call_operand.vmem [shape: f32[2,1,32], index: 13, kind: output, shape index: {1}]   ;;  %s3733_s14 = inlined_call_operand.vmem [shape: f32[2,1,32], index: 14, kind: output, shape index: {2}]   ;;  %s3734_s15 = inlined_call_operand.vmem [shape: f32[2,1,16], index: 15, kind: output, shape index: {3}]  }
   0x1   :  { %3740 = sst [smem:[#allocation11_spill]] %s3724_s5  ;;  %s2996_s20 = smov 0  }
   0x2   :  { %3741 = sst [smem:[#allocation12_spill]] %s3726_s7  ;;  %s2998_s21 = smov 0  }
   0x3   :  { %3742 = sst [smem:[#allocation13_spill]] %s3727_s8  ;;  %s3000_s22 = smov 0  }
   0x4   :  { %3743 = sst [smem:[#allocation14_spill]] %s3728_s9 }
   0x5   :  { %3744 = sst [smem:[#allocation15_spill]] %s3729_s10 }
   0x6   :  { %3745 = sst [smem:[#allocation16_spill]] %s3730_s11 }
   0x7 LB: > { %3746 = sst [smem:[#allocation6_spill]] %s2898_s20  ;;  %s35_s23 = sadd.s32 1, %s2898_s20  ;;  %s2906_s22 = sphi %s3000_s22, %s26_s22   ;;  %s2902_s21 = sphi %s2998_s21, %s3762_s21   ;;  %s2898_s20 = sphi %s2996_s20, %s3761_s20   ;;  %s2894_s19 = sphi %s2994_s19, %s3760_s19   ;;  %s2890_s18 = sphi %s2992_s18, %s3759_s18  }
   0x8   : > { %3747 = sst [smem:[#allocation7_spill]] %s2902_s21  ;;  %s38_s24 = sadd.s32 1, %s2902_s21 }
   0x9   : > { %3748 = sst [smem:[#allocation8_spill]] %s2906_s22  ;;  %p36_p0 = scmp.ge.s32.totalorder %s35_s23, 2 }
   0xa   : > { %p2429_p1 = scmp.ge.s32.totalorder %s2906_s22, 1  ;;  %p458_p2 = scmp.lt.s32.totalorder %s2906_s22, 5 }
   0xb   : > { %s3764_s23 = smov (%p36_p0, %s35_s23), 0  ;;  %s3766_s24 = smov (!%p36_p0, %s38_s24), %s2902_s21 }
   0xc   : > { %3749 = sst [smem:[#allocation9_spill]] %s3764_s23  ;;  %p459_p3 = pnand %p2429_p1, %p458_p2 }
   0xd   : > { %p40_p4 = scmp.ge.s32.totalorder %s3766_s24, 2  ;;  %p519_p5 = scmp.lt.s32.totalorder (!%p459_p3), %s2894_s19, 1 }
   0xe   : > { %462 = sbr.rel (%p459_p3) target bundleno = 608 (0x260), region = 68  ;;  %s2432_s25 = sshll.u32 (!%p459_p3), %s2890_s18, 2 }
   0xf   : > { %s3768_s24 = smov (%p40_p4, %s3766_s24), 0  ;;  %p527_p6 = scmp.lt.s32.totalorder (!%p459_p3), %s2432_s25, 7 }
  0x10   : > { %3750 = sst [smem:[#allocation10_spill]] %s3768_s24  ;;  %p2435_p7 = scmp.ne.s32.totalorder (!%p459_p3), %s2890_s18, 0 }
  0x13   : > { %s3770_s19 = smov (!%p519_p5, %s2894_s19), 1  ;;  %s3772_s25 = smov (!%p527_p6, %s2432_s25), 7 }
  0x14   : > { %s2769_s26 = sshll.u32 %s3770_s19, 5  ;;  %s2433_s27 = sshll.u32 %s3770_s19, 3 }
  0x15   : > { %s3032_s30 = scalar_lea.vmem %s3719_s0, %s2769_s26  ;;  %s530_s16 = sadd.s32 %s2433_s27, %s3772_s25 }
  0x16   : > { %s2434_s17 = sshll.u32 %s530_s16, 2  ;;  %s536_s21 = scalar_lea.vmem %s3732_s13, %s3770_s19 }
  0x17   : > { %s3041_s11 = scalar_lea.vmem %s3731_s12, %s2434_s17  ;;  %s539_s5 = scalar_lea.vmem %s3733_s14, %s3770_s19 }
  0x18   : > { %s542_s26 = scalar_lea.vmem %s3734_s15, %s3770_s19  ;;  %547 = sbr.rel (%p2435_p7) target bundleno = 101 (0x65), region = 72 }
  0x1d   : > { %vm548_vm0 = vcmask 130048   ;;  %v2799_v0 = vld [vmem:[%s3032_s30] sm:$0xff]   ;;  %v2814_v1 = vld [vmem:[%s3032_s30 + $0x8] sm:$0xff]   ;;  %v2908_v2 = vmov 0.0   ;;  %v2815_v8 = vld [vmem:[%s3032_s30 + $0x10] sm:$0xff]   ;;  %vm551_vm1 = vcmask 125952  }
  0x1e   : > { %568 = vst.msk [vmem:[#allocation2 + $0x90] sm:$0xff] %vm548_vm0, %v2908_v2  ;;  %v2800_v3 = vunpack.c.l.bf16 %v2799_v0  ;;  %v3059_v4 = vld [vmem:[%s3720_s1] ss:$0 sm:$0xff]  ;;  %v2801_v5 = vunpack.c.h.bf16 %v2799_v0  ;;  %v2804_v6 = vunpack.c.l.bf16 %v2814_v1  ;;  %v2805_v7 = vunpack.c.h.bf16 %v2814_v1  ;;  %v2816_v22 = vld [vmem:[%s3032_s30 + $0x18] sm:$0xff]  }
  0x1f   : > { %549 = vst.msk [vmem:[#allocation2] sm:$0xff] %vm548_vm0, %v2908_v2  ;;  %v3067_v9 = vld [vmem:[%s3721_s2] ss:$0 sm:$0xff]  ;;  %v2808_v10 = vunpack.c.l.bf16 %v2815_v8  ;;  %v2809_v16 = vunpack.c.h.bf16 %v2815_v8  ;;  %v2812_v32 = vunpack.c.l.bf16 %v2816_v22  ;;  %v2813_v46 = vunpack.c.h.bf16 %v2816_v22 }
  0x20   : > { %550 = vst.msk [vmem:[#allocation2 + $0x8] sm:$0xff] %vm548_vm0, %v2908_v2  ;;  %v630_v11 = vmul.f32 %v3059_v4, %v2800_v3  ;;  %v631_v12 = vmul.f32 %v3059_v4, %v2801_v5  ;;  %v632_v13 = vmul.f32 %v3059_v4, %v2804_v6  ;;  %v633_v14 = vmul.f32 %v3059_v4, %v2805_v7  ;;  %v3084_v18 = vld [vmem:[%s3722_s3] ss:$0 sm:$0xff] }
  0x21   : > { %553 = vst.msk [vmem:[#allocation2 + $0x18] sm:$0xff] %vm548_vm0, %v2908_v2  ;;  %v634_v15 = vmul.f32 %v3059_v4, %v2808_v10  ;;  %v635_v28 = vmul.f32 %v3059_v4, %v2809_v16  ;;  %v636_v42 = vmul.f32 %v3059_v4, %v2812_v32  ;;  %v637_v54 = vmul.f32 %v3059_v4, %v2813_v46 }
  0x22   : > { %554 = vst.msk [vmem:[#allocation2 + $0x20] sm:$0xff] %vm548_vm0, %v2908_v2  ;;  %v642_v17 = vadd.f32 %v3067_v9, %v630_v11  ;;  %v643_v19 = vadd.f32 %v3067_v9, %v631_v12  ;;  %v644_v20 = vadd.f32 %v3067_v9, %v632_v13  ;;  %v645_v21 = vadd.f32 %v3067_v9, %v633_v14 }
  0x23   : > { %556 = vst.msk [vmem:[#allocation2 + $0x30] sm:$0xff] %vm548_vm0, %v2908_v2  ;;  %v646_v31 = vadd.f32 %v3067_v9, %v634_v15  ;;  %v647_v38 = vadd.f32 %v3067_v9, %v635_v28  ;;  %v648_v53 = vadd.f32 %v3067_v9, %v636_v42  ;;  %v649_v61 = vadd.f32 %v3067_v9, %v637_v54 }
  0x24   : > { %557 = vst.msk [vmem:[#allocation2 + $0x38] sm:$0xff] %vm548_vm0, %v2908_v2  ;;  %v651_v23 = vmax.f32 %v642_v17, 0.0  ;;  %v659_v24 = vmin.f32 %v642_v17, 0.0  ;;  %v652_v25 = vmax.f32 %v643_v19, 0.0  ;;  %v660_v26 = vmin.f32 %v643_v19, 0.0 }
  0x25   : > { %559 = vst.msk [vmem:[#allocation2 + $0x48] sm:$0xff] %vm548_vm0, %v2908_v2  ;;  %v661_v27 = vmin.f32 %v644_v20, 0.0  ;;  %v662_v30 = vmin.f32 %v645_v21, 0.0  ;;  %v653_v34 = vmax.f32 %v644_v20, 0.0  ;;  %v654_v39 = vmax.f32 %v645_v21, 0.0 }
  0x26   : > { %560 = vst.msk [vmem:[#allocation2 + $0x50] sm:$0xff] %vm548_vm0, %v2908_v2  ;;  %v670_v29 = vmul.f32 %v3084_v18, %v659_v24  ;;  %v671_v33 = vmul.f32 %v3084_v18, %v660_v26  ;;  %v663_v41 = vmin.f32 %v646_v31, 0.0  ;;  %v655_v48 = vmax.f32 %v646_v31, 0.0 }
  0x27   : > { %562 = vst.msk [vmem:[#allocation2 + $0x60] sm:$0xff] %vm548_vm0, %v2908_v2  ;;  %v672_v35 = vmul.f32 %v3084_v18, %v661_v27  ;;  %v673_v40 = vmul.f32 %v3084_v18, %v662_v30  ;;  %v664_v50 = vmin.f32 %v647_v38, 0.0  ;;  %v656_v56 = vmax.f32 %v647_v38, 0.0 }
  0x28   : > { %563 = vst.msk [vmem:[#allocation2 + $0x68] sm:$0xff] %vm548_vm0, %v2908_v2  ;;  %v3107_v36 = vadd.f32 %v670_v29, %v651_v23  ;;  %v3111_v37 = vadd.f32 %v671_v33, %v652_v25  ;;  %v674_v49 = vmul.f32 %v3084_v18, %v663_v41  ;;  %v665_v60 = vmin.f32 %v648_v53, 0.0 }
  0x29   : > { %565 = vst.msk [vmem:[#allocation2 + $0x78] sm:$0xff] %vm548_vm0, %v2908_v2  ;;  %v3124_v45 = vadd.f32 %v672_v35, %v653_v34  ;;  %v3137_v52 = vadd.f32 %v673_v40, %v654_v39  ;;  %v675_v57 = vmul.f32 %v3084_v18, %v664_v50  ;;  %v657_v1 = vmax.f32 %v648_v53, 0.0 }
  0x2a   : > { %566 = vst.msk [vmem:[#allocation2 + $0x80] sm:$0xff] %vm548_vm0, %v2908_v2  ;;  %v695_v43 = vsel %vm548_vm0, %v3107_v36, 0.0  ;;  %v696_v44 = vsel %vm548_vm0, %v3111_v37, 0.0  ;;  %v3152_v59 = vadd.f32 %v674_v49, %v655_v48  ;;  %v676_v3 = vmul.f32 %v3084_v18, %v665_v60 }
  0x2b   : > { %569 = vst.msk [vmem:[#allocation2 + $0x98] sm:$0xff] %vm548_vm0, %v2908_v2  ;;  %v697_v47 = vadd.f32 %v696_v44, %v695_v43  ;;  %v698_v51 = vsel %vm548_vm0, %v3124_v45, 0.0  ;;  %v700_v58 = vsel %vm548_vm0, %v3137_v52, 0.0  ;;  %v3161_v63 = vadd.f32 %v675_v57, %v656_v56 }
  0x2c   : > { %571 = vst.msk [vmem:[#allocation2 + $0xa8] sm:$0xff] %vm548_vm0, %v2908_v2  ;;  %v702_v0 = vsel %vm548_vm0, %v3152_v59, 0.0  ;;  %v666_v4 = vmin.f32 %v649_v61, 0.0  ;;  %v684_v7 = vadd.f32 %v676_v3, %v657_v1  ;;  %v658_v8 = vmax.f32 %v649_v61, 0.0 }
  0x2d   : > { %572 = vst.msk [vmem:[#allocation2 + $0xb0] sm:$0xff] %vm548_vm0, %v2908_v2  ;;  %v699_v55 = vadd.f32 %v698_v51, %v697_v47  ;;  %v704_v6 = vsel %vm548_vm0, %v3161_v63, 0.0  ;;  %vm716_vm2 = vcmask 122880   ;;  %vm718_vm3 = vcmask 253952  }
  0x2e   : > { %574 = vst.msk [vmem:[#allocation2 + $0xc0] sm:$0xff] %vm548_vm0, %v2908_v2  ;;  %v677_v9 = vmul.f32 %v3084_v18, %v666_v4  ;;  %v706_v11 = vsel %vm548_vm0, %v684_v7, 0.0 }
  0x2f   : > { %575 = vst.msk [vmem:[#allocation2 + $0xc8] sm:$0xff] %vm548_vm0, %v2908_v2  ;;  %v701_v62 = vadd.f32 %v700_v58, %v699_v55 }
  0x30   : > { %577 = vst.msk [vmem:[#allocation2 + $0xd8] sm:$0xff] %vm548_vm0, %v2908_v2  ;;  %v685_v12 = vadd.f32 %v677_v9, %v658_v8 }
  0x31   : > { %578 = vst.msk [vmem:[#allocation2 + $0xe0] sm:$0xff] %vm548_vm0, %v2908_v2  ;;  %v703_v5 = vadd.f32 %v702_v0, %v701_v62 }
  0x32   : > { %580 = vst.msk [vmem:[#allocation2 + $0xf0] sm:$0xff] %vm548_vm0, %v2908_v2  ;;  %v708_v14 = vsel %vm548_vm0, %v685_v12, 0.0 }
  0x33   : > { %581 = vst.msk [vmem:[#allocation2 + $0xf8] sm:$0xff] %vm548_vm0, %v2908_v2  ;;  %v705_v10 = vadd.f32 %v704_v6, %v703_v5 }
  0x34   : > { %583 = vst.msk [vmem:[#allocation2 + $0x108] sm:$0xff] %vm548_vm0, %v2908_v2 }
  0x35   : > { %584 = vst.msk [vmem:[#allocation2 + $0x110] sm:$0xff] %vm548_vm0, %v2908_v2  ;;  %v707_v13 = vadd.f32 %v706_v11, %v705_v10 }
  0x36   : > { %586 = vst.msk [vmem:[#allocation2 + $0x120] sm:$0xff] %vm548_vm0, %v2908_v2 }
  0x37   : > { %587 = vst.msk [vmem:[#allocation2 + $0x128] sm:$0xff] %vm548_vm0, %v2908_v2  ;;  %v709_v15 = vadd.f32 %v708_v14, %v707_v13 }
  0x38   : > { %589 = vst.msk [vmem:[#allocation2 + $0x138] sm:$0xff] %vm548_vm0, %v2908_v2 }
  0x39   : > { %590 = vst.msk [vmem:[#allocation2 + $0x140] sm:$0xff] %vm548_vm0, %v2908_v2  ;;  %v710_v16 = vrot.slane %v709_v15, 4 }
  0x3a   : > { %592 = vst.msk [vmem:[#allocation2 + $0x150] sm:$0xff] %vm548_vm0, %v2908_v2 }
  0x3b   : > { %593 = vst.msk [vmem:[#allocation2 + $0x158] sm:$0xff] %vm548_vm0, %v2908_v2  ;;  %v711_v17 = vadd.f32 %v710_v16, %v709_v15 }
  0x3c   : > { %595 = vst.msk [vmem:[#allocation2 + $0x168] sm:$0xff] %vm548_vm0, %v2908_v2 }
  0x3d   : > { %596 = vst.msk [vmem:[#allocation2 + $0x170] sm:$0xff] %vm548_vm0, %v2908_v2  ;;  %v712_v18 = vrot.slane %v711_v17, 2 }
  0x3e   : > { %598 = vst.msk [vmem:[#allocation2 + $0x180] sm:$0xff] %vm548_vm0, %v2908_v2 }
  0x3f   : > { %599 = vst.msk [vmem:[#allocation2 + $0x188] sm:$0xff] %vm548_vm0, %v2908_v2  ;;  %v713_v19 = vadd.f32 %v712_v18, %v711_v17 }
  0x40   : > { %601 = vst.msk [vmem:[#allocation2 + $0x198] sm:$0xff] %vm548_vm0, %v2908_v2 }
  0x41   : > { %602 = vst.msk [vmem:[#allocation2 + $0x1a0] sm:$0xff] %vm548_vm0, %v2908_v2  ;;  %v714_v20 = vrot.slane %v713_v19, 1 }
  0x42   : > { %604 = vst.msk [vmem:[#allocation2 + $0x1b0] sm:$0xff] %vm548_vm0, %v2908_v2 }
  0x43   : > { %605 = vst.msk [vmem:[#allocation2 + $0x1b8] sm:$0xff] %vm548_vm0, %v2908_v2  ;;  %v715_v21 = vadd.f32 %v714_v20, %v713_v19 }
  0x44   : > { %607 = vst.msk [vmem:[#allocation2 + $0x1c8] sm:$0xff] %vm548_vm0, %v2908_v2 }
  0x45   : > { %608 = vst.msk [vmem:[#allocation2 + $0x1d0] sm:$0xff] %vm548_vm0, %v2908_v2 }
  0x46   : > { %552 = vst.msk [vmem:[#allocation2 + $0x10] sm:$0xf] %vm551_vm1, %v2908_v2 }
  0x47   : > { %555 = vst.msk [vmem:[#allocation2 + $0x28] sm:$0xf] %vm551_vm1, %v2908_v2 }
  0x48   : > { %558 = vst.msk [vmem:[#allocation2 + $0x40] sm:$0xf] %vm551_vm1, %v2908_v2 }
  0x49   : > { %561 = vst.msk [vmem:[#allocation2 + $0x58] sm:$0xf] %vm551_vm1, %v2908_v2 }
  0x4a   : > { %564 = vst.msk [vmem:[#allocation2 + $0x70] sm:$0xf] %vm551_vm1, %v2908_v2 }
  0x4b   : > { %567 = vst.msk [vmem:[#allocation2 + $0x88] sm:$0xf] %vm551_vm1, %v2908_v2 }
  0x4c   : > { %570 = vst.msk [vmem:[#allocation2 + $0xa0] sm:$0xf] %vm551_vm1, %v2908_v2 }
  0x4d   : > { %573 = vst.msk [vmem:[#allocation2 + $0xb8] sm:$0xf] %vm551_vm1, %v2908_v2 }
  0x4e   : > { %576 = vst.msk [vmem:[#allocation2 + $0xd0] sm:$0xf] %vm551_vm1, %v2908_v2 }
  0x4f   : > { %579 = vst.msk [vmem:[#allocation2 + $0xe8] sm:$0xf] %vm551_vm1, %v2908_v2 }
  0x50   : > { %582 = vst.msk [vmem:[#allocation2 + $0x100] sm:$0xf] %vm551_vm1, %v2908_v2 }
  0x51   : > { %585 = vst.msk [vmem:[#allocation2 + $0x118] sm:$0xf] %vm551_vm1, %v2908_v2 }
  0x52   : > { %588 = vst.msk [vmem:[#allocation2 + $0x130] sm:$0xf] %vm551_vm1, %v2908_v2 }
  0x53   : > { %591 = vst.msk [vmem:[#allocation2 + $0x148] sm:$0xf] %vm551_vm1, %v2908_v2 }
  0x54   : > { %594 = vst.msk [vmem:[#allocation2 + $0x160] sm:$0xf] %vm551_vm1, %v2908_v2 }
  0x55   : > { %597 = vst.msk [vmem:[#allocation2 + $0x178] sm:$0xf] %vm551_vm1, %v2908_v2 }
  0x56   : > { %600 = vst.msk [vmem:[#allocation2 + $0x190] sm:$0xf] %vm551_vm1, %v2908_v2 }
  0x57   : > { %603 = vst.msk [vmem:[#allocation2 + $0x1a8] sm:$0xf] %vm551_vm1, %v2908_v2 }
  0x58   : > { %606 = vst.msk [vmem:[#allocation2 + $0x1c0] sm:$0xf] %vm551_vm1, %v2908_v2 }
  0x59   : > { %609 = vst.msk [vmem:[#allocation2 + $0x1d8] sm:$0xf] %vm551_vm1, %v2908_v2 }
  0x5a   : > { %687 = vst.msk [vmem:[#allocation2 + $0x96] sm:$0xff] %vm548_vm0, %v3107_v36 }
  0x5b   : > { %688 = vst.msk [vmem:[#allocation2 + $0xae] sm:$0xff] %vm548_vm0, %v3111_v37 }
  0x5c   : > { %689 = vst.msk [vmem:[#allocation2 + $0xc6] sm:$0xff] %vm548_vm0, %v3124_v45 }
  0x5d   : > { %690 = vst.msk [vmem:[#allocation2 + $0xde] sm:$0xff] %vm548_vm0, %v3137_v52 }
  0x5e   : > { %691 = vst.msk [vmem:[#allocation2 + $0xf6] sm:$0xff] %vm548_vm0, %v3152_v59 }
  0x5f   : > { %692 = vst.msk [vmem:[#allocation2 + $0x10e] sm:$0xff] %vm548_vm0, %v3161_v63 }
  0x60   : > { %693 = vst.msk [vmem:[#allocation2 + $0x126] sm:$0xff] %vm548_vm0, %v684_v7 }
  0x61   : > { %694 = vst.msk [vmem:[#allocation2 + $0x13e] sm:$0xff] %vm548_vm0, %v685_v12 }
  0x62   : > { %717 = vst.msk [vmem:[#allocation5] sm:$0x1] %vm716_vm2, %v715_v21 }
  0x63   : > { %719 = vst.msk [vmem:[#allocation3] sm:$0x1] %vm718_vm3, %v2908_v2 }
  0x64   : > { %720 = vst.msk [vmem:[#allocation4] sm:$0x1] %vm718_vm3, %v2908_v2 }
  0x65 PF: > { %v2770_v22 = vld [vmem:[%s3723_s4] sm:$0xff]  ;;  %v2772_v23 = vld [vmem:[%s3725_s6 + $0x8] sm:$0xff]  ;;  %s2438_s30 = smul.u32 96, %s2890_s18  ;;  %v2773_v25 = vld [vmem:[%s3725_s6 + $0x10] sm:$0xff]  ;;  %vm743_vm4 = vcmask 130048   ;;  %s3751_s29 = sld [smem:[#allocation13_spill]] }
  0x66   : > { %v2771_v24 = vld [vmem:[%s3725_s6] sm:$0xff]  ;;  %v2776_v2 = vld [vmem:[%s3725_s6 + $0x28] sm:$0xff]  ;;  %v2774_v26 = vld [vmem:[%s3725_s6 + $0x18] sm:$0xff]  ;;  %757 = vmatpush.bf16.msra.mxu0 %v2770_v22  ;;  %855 = vmatpush.bf16.msra.mxu1 %v2772_v23  ;;  %s3752_s20 = sld [smem:[#allocation15_spill]]  ;;  %vm773_vm5 = vcmask 60416   ;;  %vm779_vm6 = vcmask 64512  }
  0x67   : > { %v2777_v27 = vld [vmem:[%s3725_s6 + $0x30] sm:$0xff]  ;;  %v2775_v28 = vld [vmem:[%s3725_s6 + $0x20] sm:$0xff]  ;;  %886 = vmatpush.bf16.msra.mxu2 %v2771_v24  ;;  %926 = vmatpush.bf16.msra.mxu3 %v2773_v25  ;;  %s3282_s25 = scalar_lea.vmem [#allocation2], %s2438_s30  ;;  %v2778_v41 = vld [vmem:[%s3725_s6 + $0x38] sm:$0xff]  ;;  %s3754_s22 = sld [smem:[#allocation11_spill]]  ;;  %vm794_vm7 = vcmask 57344  }
  0x68   : > { %v2439_v29 = vld [vmem:[%s3282_s25 + $0x96] sm:$0xff]  ;;  %v2440_v30 = vld [vmem:[%s3282_s25 + $0xae] sm:$0xff]  ;;  %v3287_v31 = vld [vmem:[%s3282_s25 + $0x7e] sm:$0xff]  ;;  %s3756_s27 = sld [smem:[#allocation14_spill]]  ;;  %s2910_s28 = smov 16   ;;  %vm1237_vm8 = vcmask 126016  }
  0x69   : > { %v3289_v32 = vpack.c.bf16 %v2440_v30, %v2439_v29  ;;  %v831_v33 = vpack.c.bf16 %v2439_v29, %v3287_v31  ;;  %v2451_v34 = vld [vmem:[%s3282_s25 + $0x7d] sm:$0xff]  ;;  %v2452_v35 = vld [vmem:[%s3282_s25 + $0x95] sm:$0xff]  ;;  %v2441_v44 = vld [vmem:[%s3282_s25 + $0xc6] sm:$0xff]  ;;  %s3757_s17 = sld [smem:[#allocation16_spill]]  ;;  %s2911_s7 = smov 24   ;;  %vm1261_vm9 = vcmask 122944  }
  0x6a   : > { %v2473_v36 = vld [vmem:[%s3282_s25 + $0x7f] sm:$0xff]  ;;  %970 = vmatpush.bf16.msrb.mxu0 %v2774_v26  ;;  %v823_v37 = vpack.c.bf16 %v2452_v35, %v2451_v34  ;;  %v2474_v38 = vld [vmem:[%s3282_s25 + $0x97] sm:$0xff]  ;;  %1014 = vmatpush.bf16.msrb.mxu1 %v2775_v28  ;;  %v2453_v46 = vld [vmem:[%s3282_s25 + $0xad] sm:$0xff]  ;;  %v832_v51 = vpack.c.bf16 %v2441_v44, %v2440_v30  ;;  %vm1708_vm10 = vcmask 191616   ;;  %vm1732_vm11 = vcmask 188544   ;;  %p2766_p8 = scmp.ne.s32.totalorder %s2890_s18, 1 }
  0x6b   : > { %1058 = vmatpush.bf16.msrb.mxu2 %v2776_v2  ;;  %1105 = vmatpush.bf16.msrb.mxu3 %v2777_v27  ;;  %v902_v39 = vpack.c.bf16 %v2474_v38, %v2473_v36  ;;  %v2781_v40 = vld [vmem:[%s3751_s29 + $0x8] sm:$0xff]  ;;  %v2780_v42 = vld [vmem:[%s3751_s29] sm:$0xff]  ;;  %v946_v54 = vpack.c.bf16 %v2453_v46, %v2452_v35  ;;  %v2782_v57 = vld [vmem:[%s3751_s29 + $0x10] sm:$0xff]  ;;  %vm2178_vm12 = vcmask 257216   ;;  %vm2202_vm13 = vcmask 254144  }
  0x6c   : > { %2447 = vmatmul.msk.bf16.vlgmr.msra.gmra.mxu0 %vm743_vm4, %v3289_v32  ;;  %2465 = vmatmul.msk.bf16.vlgmr.msra.gmra.mxu1 %vm743_vm4, %v831_v33  ;;  %v2779_v43 = vld [vmem:[%s3725_s6 + $0x40] sm:$0xff]  ;;  %v2475_v48 = vld [vmem:[%s3282_s25 + $0xaf] sm:$0xff]  ;;  %v2783_v59 = vld [vmem:[%s3751_s29 + $0x18] sm:$0xff]  ;;  %s3753_s23 = smov %s3752_s20 }
  0x6d   : > { %2471 = vmatmul.msk.bf16.vlgmr.msra.gmra.mxu2 %vm743_vm4, %v823_v37  ;;  %2483 = vmatmul.msk.bf16.vlgmr.msra.gmra.mxu3 %vm743_vm4, %v902_v39  ;;  %v3315_v45 = vld [vmem:[%s3282_s25 + $0xde] sm:$0xff]  ;;  %v2476_v49 = vld [vmem:[%s3282_s25 + $0xc7] sm:$0xff]  ;;  %v1034_v55 = vpack.c.bf16 %v2475_v48, %v2474_v38  ;;  %v2526_v62 = vld [vmem:[%s3282_s25 + $0xf5] sm:$0xff] }
  0x6e   : > { %1149 = vmatpush.bf16.msra.mxu0 %v2778_v41  ;;  %1193 = vmatpush.bf16.msra.mxu1 %v2779_v43  ;;  %v2454_v47 = vld [vmem:[%s3282_s25 + $0xc5] sm:$0xff]  ;;  %v3322_v50 = vpack.c.bf16 %v3315_v45, %v2441_v44  ;;  %v903_v53 = vpack.c.bf16 %v2476_v49, %v2475_v48  ;;  %v2488_v60 = vld [vmem:[%s3282_s25 + $0xdd] sm:$0xff]  ;;  %v2566_v4 = vld [vmem:[%s3282_s25 + $0x4e] sm:$0xff] }
  0x6f   : > { %1326 = vmatpush.bf16.msra.mxu2 %v2781_v40  ;;  %1357 = vmatpush.bf16.msra.mxu3 %v2780_v42  ;;  %v824_v52 = vpack.c.bf16 %v2454_v47, %v2453_v46  ;;  %v2784_v56 = vld [vmem:[%s3751_s29 + $0x20] sm:$0xff]  ;;  %v2785_v58 = vld [vmem:[%s3751_s29 + $0x28] sm:$0xff]  ;;  %v947_v63 = vpack.c.bf16 %v2488_v60, %v2454_v47  ;;  %v1082_v1 = vpack.c.bf16 %v2526_v62, %v2488_v60  ;;  %v2565_v3 = vld [vmem:[%s3282_s25 + $0x36] sm:$0xff] }
  0x70   : > { %v2512_v61 = vld [vmem:[%s3282_s25 + $0xdf] sm:$0xff]  ;;  %v2561_v5 = vld [vmem:[%s3282_s25 + $0x32] sm:$0xff]  ;;  %v2562_v6 = vld [vmem:[%s3282_s25 + $0x4a] sm:$0xff]  ;;  %v3358_v7 = vpack.c.bf16 %v2566_v4, %v2565_v3 }
  0x71   : > { %v1035_v0 = vpack.c.bf16 %v2512_v61, %v2476_v49  ;;  %v1294_v8 = vpack.c.bf16 %v2562_v6, %v2561_v5  ;;  %v2788_v9 = vld [vmem:[%s3751_s29 + $0x40] sm:$0xff]  ;;  %v2786_v10 = vld [vmem:[%s3751_s29 + $0x30] sm:$0xff]  ;;  %v2790_v11 = vld [vmem:[%s3752_s20 + $0x8] sm:$0xff]  ;;  %s3755_s20 = sld [smem:[#allocation12_spill]] }
  0x72   : > { %v2787_v12 = vld [vmem:[%s3751_s29 + $0x38] sm:$0xff]  ;;  %v2567_v15 = vld [vmem:[%s3282_s25 + $0x66] sm:$0xff]  ;;  %v2791_v34 = vld [vmem:[%s3753_s23 + $0x10] sm:$0xff] }
  0x73   : > { %v3378_v13 = vld [vmem:[%s3282_s25 + $0xf6] sm:$0xff]  ;;  %v2563_v16 = vld [vmem:[%s3282_s25 + $0x62] sm:$0xff]  ;;  %v1303_v20 = vpack.c.bf16 %v3287_v31, %v2567_v15  ;;  %v2596_v25 = vld [vmem:[%s3282_s25 + $0xaa] sm:$0xff] }
  0x74   : > { %v2550_v14 = vld [vmem:[%s3282_s25 + $0xf7] sm:$0xff]  ;;  %v1126_v18 = vpack.c.bf16 %v3378_v13, %v3315_v45  ;;  %v2789_v31 = vld [vmem:[%s3753_s23] sm:$0xff]  ;;  %v2585_v35 = vld [vmem:[%s3282_s25 + $0x6a] sm:$0xff] }
  0x75   : > { %v2564_v17 = vld [vmem:[%s3282_s25 + $0x7a] sm:$0xff]  ;;  %v1170_v19 = vpack.c.bf16 %v2550_v14, %v2512_v61  ;;  %v2584_v23 = vld [vmem:[%s3282_s25 + $0x52] sm:$0xff]  ;;  %v2586_v36 = vld [vmem:[%s3282_s25 + $0x82] sm:$0xff] }
  0x76   : > { %v1295_v21 = vpack.c.bf16 %v2564_v17, %v2563_v16  ;;  %v2583_v22 = vld [vmem:[%s3282_s25 + $0x3a] sm:$0xff]  ;;  %v2595_v24 = vld [vmem:[%s3282_s25 + $0x92] sm:$0xff]  ;;  %v2597_v37 = vld [vmem:[%s3282_s25 + $0xc2] sm:$0xff]  ;;  %v1374_v41 = vpack.c.bf16 %v2586_v36, %v2585_v35 }
  0x77   : > { %v2619_v2 = vld [vmem:[%s3282_s25 + $0x9a] sm:$0xff]  ;;  %v2620_v26 = vld [vmem:[%s3282_s25 + $0xb2] sm:$0xff]  ;;  %v1373_v27 = vpack.c.bf16 %v2584_v23, %v2583_v22  ;;  %v1417_v28 = vpack.c.bf16 %v2596_v25, %v2595_v24  ;;  %v2621_v39 = vld [vmem:[%s3282_s25 + $0xca] sm:$0xff] }
  0x78   : > { %v1505_v29 = vpack.c.bf16 %v2620_v26, %v2619_v2  ;;  %v2792_v30 = vld [vmem:[%s3753_s23 + $0x18] sm:$0xff]  ;;  %v2793_v33 = vld [vmem:[%s3753_s23 + $0x20] sm:$0xff]  ;;  %v2634_v45 = vld [vmem:[%s3282_s25 + $0x10a] sm:$0xff] }
  0x79   : > { %v2598_v38 = vld [vmem:[%s3282_s25 + $0xda] sm:$0xff]  ;;  %v2622_v40 = vld [vmem:[%s3282_s25 + $0xe2] sm:$0xff]  ;;  %v2633_v44 = vld [vmem:[%s3282_s25 + $0xf2] sm:$0xff] }
  0x7a   : > { %v1418_v42 = vpack.c.bf16 %v2598_v38, %v2597_v37  ;;  %v1506_v43 = vpack.c.bf16 %v2622_v40, %v2621_v39  ;;  %v2646_v46 = vld [vmem:[%s3282_s25 + $0x10e] sm:$0xff]  ;;  %v3431_v47 = vld [vmem:[%s3754_s22] ss:$0 sm:$0xff]  ;;  %v2796_v3 = vld [vmem:[%s3753_s23 + $0x38] sm:$0xff]  ;;  %s2909_s22 = smov 8  }
  0x7b   : > { %v2657_v48 = vld [vmem:[%s3282_s25 + $0xfa] sm:$0xff]  ;;  %v2658_v49 = vld [vmem:[%s3282_s25 + $0x112] sm:$0xff]  ;;  %v2794_v4 = vld [vmem:[%s3753_s23 + $0x28] sm:$0xff] }
  0x7c   : > { %2448 = vmatmul.msk.bf16.gmra.mxu0 %vm743_vm4, %v3322_v50  ;;  %2466 = vmatmul.msk.bf16.gmra.mxu1 %vm743_vm4, %v832_v51  ;;  %v2797_v5 = vld [vmem:[%s3753_s23 + $0x40] sm:$0xff] }
  0x7d   : > { %2472 = vmatmul.msk.bf16.gmra.mxu2 %vm743_vm4, %v824_v52  ;;  %2484 = vmatmul.msk.bf16.gmra.mxu3 %vm743_vm4, %v903_v53  ;;  %v2635_v6 = vld [vmem:[%s3282_s25 + $0x122] sm:$0xff] }
  0x7e   : > { %v2660_v14 = vld [vmem:[%s3282_s25 + $0x142] sm:$0xff] }
  0x8c   : > { %2495 = vmatmul.msk.bf16.vlgmr.msrb.gmra.mxu0 %vm743_vm4, %v946_v54  ;;  %2507 = vmatmul.msk.bf16.vlgmr.msrb.gmra.mxu1 %vm743_vm4, %v3289_v32  ;;  %v1596_v54 = vpack.c.bf16 %v2646_v46, %v3378_v13  ;;  %v2659_v13 = vld [vmem:[%s3282_s25 + $0x12a] sm:$0xff]  ;;  %v1761_v46 = vld [vmem:[%s3282_s25 + $0x18] sm:$0xff] }
  0x8d   : > { %2519 = vmatmul.msk.bf16.vlgmr.msrb.gmra.mxu2 %vm743_vm4, %v1034_v55  ;;  %2533 = vmatmul.msk.bf16.vlgmr.msrb.gmra.mxu3 %vm743_vm4, %v824_v52  ;;  %v1769_v52 = vld [vmem:[%s3282_s25 + $0x1e] sm:$0xff] }
  0x8e   : > { %1485 = vmatpush.bf16.msrb.mxu2 %v2784_v56  ;;  %1397 = vmatpush.bf16.msrb.mxu0 %v2782_v57  ;;  %v1640_v57 = vpack.c.bf16 %v2658_v49, %v2657_v48  ;;  %v1839_v48 = vld [vmem:[%s3282_s25 + $0xc] sm:$0xff]  ;;  %v1840_v49 = vld [vmem:[%s3282_s25 + $0x24] sm:$0xff] }
  0x8f   : > { %1529 = vmatpush.bf16.msrb.mxu3 %v2785_v58  ;;  %1441 = vmatpush.bf16.msrb.mxu1 %v2783_v59 }
  0x9c   : > { %2496 = vmatmul.msk.bf16.gmra.mxu0 %vm743_vm4, %v947_v63  ;;  %2508 = vmatmul.msk.bf16.gmra.mxu1 %vm743_vm4, %v3322_v50 }
  0x9d   : > { %2520 = vmatmul.msk.bf16.gmra.mxu2 %vm743_vm4, %v1035_v0  ;;  %2534 = vmatmul.msk.bf16.gmra.mxu3 %vm743_vm4, %v1082_v1 }
  0xac   : > { %2545 = vmatmul.msk.bf16.vlgmr.msra.gmra.mxu0 %vm743_vm4, %v832_v51  ;;  %2557 = vmatmul.msk.bf16.vlgmr.msra.gmra.mxu1 %vm743_vm4, %v903_v53  ;;  %v1768_v51 = vld [vmem:[%s3282_s25 + $0x6] sm:$0xff]  ;;  %v1552_v53 = vpack.c.bf16 %v2634_v45, %v2633_v44 }
  0xad   : > { %2575 = vmatmul.msk.bf16.vlgmr.msra.gmra.mxu2 %vm743_vm4, %v3358_v7  ;;  %2581 = vmatmul.msk.bf16.vlgmr.msra.gmra.mxu3 %vm743_vm4, %v1294_v8  ;;  %v1772_v59 = vpack.c.bf16 %v1769_v52, %v1768_v51  ;;  %v2795_v8 = vld [vmem:[%s3753_s23 + $0x30] sm:$0xff] }
  0xae   : > { %1664 = vmatpush.bf16.msra.mxu2 %v2788_v9  ;;  %1576 = vmatpush.bf16.msra.mxu0 %v2786_v10  ;;  %v2636_v10 = vld [vmem:[%s3282_s25 + $0x13a] sm:$0xff]  ;;  %v2692_v52 = vld [vmem:[%s3282_s25 + $0x90] sm:$0xff] }
  0xaf   : > { %1796 = vmatpush.bf16.msra.mxu3 %v2790_v11  ;;  %1620 = vmatpush.bf16.msra.mxu1 %v2787_v12  ;;  %v2647_v11 = vld [vmem:[%s3282_s25 + $0x126] sm:$0xff]  ;;  %v2648_v12 = vld [vmem:[%s3282_s25 + $0x13e] sm:$0xff]  ;;  %v1553_v16 = vpack.c.bf16 %v2636_v10, %v2635_v6 }
  0xb0   : > { %v3476_v17 = vpack.c.bf16 %v2648_v12, %v2647_v11  ;;  %v778_v12 = vld [vmem:[#allocation3] sm:$0x1] }
  0xbc   : > { %2546 = vmatmul.msk.bf16.gmra.mxu0 %vm743_vm4, %v1126_v18  ;;  %2558 = vmatmul.msk.bf16.gmra.mxu1 %vm743_vm4, %v1170_v19 }
  0xbd   : > { %2576 = vmatmul.msk.bf16.gmra.mxu2 %vm743_vm4, %v1303_v20  ;;  %2582 = vmatmul.msk.bf16.gmra.mxu3 %vm743_vm4, %v1295_v21  ;;  %v1641_v20 = vpack.c.bf16 %v2660_v14, %v2659_v13 }
  0xcc   : > { %2593 = vmatmul.msk.bf16.vlgmr.msrb.gmra.mxu0 %vm743_vm4, %v1373_v27  ;;  %2605 = vmatmul.msk.bf16.vlgmr.msrb.gmra.mxu1 %vm743_vm4, %v1417_v28 }
  0xcd   : > { %2617 = vmatmul.msk.bf16.vlgmr.msrb.gmra.mxu2 %vm743_vm4, %v3289_v32  ;;  %2629 = vmatmul.msk.bf16.vlgmr.msrb.gmra.mxu3 %vm743_vm4, %v1505_v29 }
  0xce   : > { %1911 = vmatpush.bf16.msrb.mxu2 %v2792_v30  ;;  %1827 = vmatpush.bf16.msrb.mxu0 %v2789_v31 }
  0xcf   : > { %1955 = vmatpush.bf16.msrb.mxu3 %v2793_v33  ;;  %1867 = vmatpush.bf16.msrb.mxu1 %v2791_v34 }
  0xdc   : > { %2594 = vmatmul.msk.bf16.gmra.mxu0 %vm743_vm4, %v1374_v41  ;;  %2606 = vmatmul.msk.bf16.gmra.mxu1 %vm743_vm4, %v1418_v42  ;;  %v1760_v42 = vld [vmem:[%s3282_s25] sm:$0xff] }
  0xdd   : > { %2618 = vmatmul.msk.bf16.gmra.mxu2 %vm743_vm4, %v3322_v50  ;;  %2630 = vmatmul.msk.bf16.gmra.mxu3 %vm743_vm4, %v1506_v43 }
  0xe9   : > { %v759_v55 = vpop.f32.mrf.mxu0  ;;  %v3438_v56 = vpop.f32.mrf.mxu1 }
  0xea   : > { %v760_v58 = vadd.f32 %v3431_v47, %v759_v55 }
  0xec   : > { %v769_v60 = vpack.c.bf16 %v760_v58, %v760_v58  ;;  %2643 = vmatmul.msk.bf16.vlgmr.msra.gmra.mxu0 %vm743_vm4, %v1552_v53  ;;  %2655 = vmatmul.msk.bf16.vlgmr.msra.gmra.mxu1 %vm743_vm4, %v1596_v54  ;;  %v797_v25 = vmul.f32 %v760_v58, %v760_v58  ;;  %v780_v27 = vsel %vm779_vm6, %v760_v58, 0.0  ;;  %v2693_v53 = vld [vmem:[%s3282_s25 + $0xa8] sm:$0xff]  ;;  %v1843_v58 = vpack.c.bf16 %v1840_v49, %v1839_v48 }
  0xed   : > { %2667 = vmatmul.msk.bf16.vlgmr.msra.gmra.mxu2 %vm743_vm4, %v1640_v57  ;;  %2676 = vmatmul.msk.bf16.vlgmr.msra.gmra.mxu3 %vm743_vm4, %v1772_v59  ;;  %v1764_v57 = vpack.c.bf16 %v1761_v46, %v1760_v42 }
  0xee   : > { %774 = vst.msk [vmem:[%s3041_s11] sm:$0xf] %vm773_vm5, %v769_v60  ;;  %2090 = vmatpush.bf16.msra.mxu2 %v2796_v3  ;;  %1999 = vmatpush.bf16.msra.mxu0 %v2794_v4  ;;  %v1887_v3 = vpack.c.bf16 %v2693_v53, %v2692_v52  ;;  %v2717_v52 = vld [vmem:[%s3282_s25 + $0xb4] sm:$0xff]  ;;  %v2730_v53 = vld [vmem:[%s3282_s25 + $0x120] sm:$0xff] }
  0xef   : > { %2134 = vmatpush.bf16.msra.mxu3 %v2797_v5  ;;  %2046 = vmatpush.bf16.msra.mxu1 %v2795_v8 }
  0xf0   : > { %v3447_v61 = vpop.f32.mrf.mxu2  ;;  %v3449_v62 = vpop.f32.mrf.mxu3 }
  0xf1   : > { %v761_v63 = vpop.f32.mrf.mxu0  ;;  %v3452_v1 = vpop.f32.mrf.mxu1 }
  0xf2   : > { %v762_v0 = vadd.f32 %v3431_v47, %v761_v63 }
  0xf4   : > { %v770_v9 = vpack.c.bf16 %v762_v0, %v762_v0  ;;  %v798_v23 = vmul.f32 %v762_v0, %v762_v0  ;;  %v781_v2 = vsel %vm779_vm6, %v762_v0, 0.0 }
  0xf5   : > { %v782_v31 = vadd.f32 %v781_v2, %v780_v27  ;;  %v1762_v2 = vld [vmem:[%s3282_s25 + $0x30] sm:$0xff] }
  0xf6   : > { %775 = vst.msk [vmem:[%s3041_s11 + $0x4] sm:$0xf] %vm773_vm5, %v770_v9  ;;  %v802_v28 = vsel %vm779_vm6, %v798_v23, 0.0  ;;  %v796_v23 = vld [vmem:[#allocation4] sm:$0x1]  ;;  %v1842_v27 = vld [vmem:[%s3282_s25 + $0x54] sm:$0xff] }
  0xf8   : > { %v3474_v15 = vpop.f32.mrf.mxu2  ;;  %v3478_v18 = vpop.f32.mrf.mxu3 }
  0xf9   : > { %v764_v19 = vpop.f32.mrf.mxu0  ;;  %v3481_v22 = vpop.f32.mrf.mxu1 }
  0xfa   : > { %v765_v21 = vadd.f32 %v3431_v47, %v764_v19 }
  0xfc   : > { %v771_v24 = vpack.c.bf16 %v765_v21, %v765_v21  ;;  %2644 = vmatmul.msk.bf16.gmra.mxu0 %vm743_vm4, %v1553_v16  ;;  %2656 = vmatmul.msk.bf16.gmra.mxu1 %vm743_vm4, %v3476_v17  ;;  %v799_v26 = vmul.f32 %v765_v21, %v765_v21  ;;  %v783_v29 = vsel %vm779_vm6, %v765_v21, 0.0 }
  0xfd   : > { %2668 = vmatmul.msk.bf16.gmra.mxu2 %vm743_vm4, %v1641_v20  ;;  %2677 = vmatmul.msk.bf16.gmra.mxu3 %vm743_vm4, %v3358_v7  ;;  %v801_v7 = vsel %vm779_vm6, %v797_v25, 0.0  ;;  %v784_v39 = vadd.f32 %v783_v29, %v782_v31  ;;  %v2694_v29 = vld [vmem:[%s3282_s25 + $0xc0] sm:$0xff]  ;;  %v2695_v31 = vld [vmem:[%s3282_s25 + $0xd8] sm:$0xff] }
  0xfe   : > { %776 = vst.msk [vmem:[%s3041_s11 + $0x8] sm:$0xf] %vm773_vm5, %v771_v24  ;;  %v804_v35 = vsel %vm779_vm6, %v799_v26, 0.0  ;;  %v803_v38 = vadd.f32 %v802_v28, %v801_v7  ;;  %v1763_v26 = vld [vmem:[%s3282_s25 + $0x48] sm:$0xff] }
 0x100   : > { %v3495_v30 = vpop.f32.mrf.mxu2  ;;  %v3497_v33 = vpop.f32.mrf.mxu3  ;;  %v805_v44 = vadd.f32 %v804_v35, %v803_v38  ;;  %v1765_v35 = vpack.c.bf16 %v1763_v26, %v1762_v2  ;;  %v2732_v2 = vld [vmem:[%s3282_s25 + $0x150] sm:$0xff]  ;;  %v2733_v26 = vld [vmem:[%s3282_s25 + $0x168] sm:$0xff] }
 0x101   : > { %v766_v34 = vpop.f32.mrf.mxu0  ;;  %v3502_v37 = vpop.f32.mrf.mxu1 }
 0x102   : > { %v767_v36 = vadd.f32 %v3431_v47, %v766_v34  ;;  %v889_v34 = vadd.f32 %v3447_v61, %v3438_v56  ;;  %v891_v61 = vadd.f32 %v3474_v15, %v3452_v1 }
 0x104   : > { %v785_v40 = vsel %vm779_vm6, %v767_v36, 0.0  ;;  %v800_v41 = vmul.f32 %v767_v36, %v767_v36  ;;  %v772_v43 = vpack.c.bf16 %v767_v36, %v767_v36  ;;  %v938_v42 = vadd.f32 %v3449_v62, %v889_v34  ;;  %v2757_v34 = vld [vmem:[%s3282_s25 + $0x174] sm:$0xff] }
 0x105   : > { %v786_v45 = vadd.f32 %v785_v40, %v784_v39  ;;  %v1888_v40 = vpack.c.bf16 %v2695_v31, %v2694_v29  ;;  %v939_v48 = vadd.f32 %v3478_v18, %v891_v61  ;;  %v2745_v29 = vld [vmem:[%s3282_s25 + $0x16e] sm:$0xff]  ;;  %v2756_v31 = vld [vmem:[%s3282_s25 + $0x15c] sm:$0xff] }
 0x106   : > { %v806_v51 = vsel %vm779_vm6, %v800_v41, 0.0  ;;  %777 = vst.msk [vmem:[%s3041_s11 + $0xc] sm:$0xf] %vm773_vm5, %v772_v43 }
 0x107   : > { %v787_v47 = vrot.slane %v786_v45, 4  ;;  %v807_v54 = vadd.f32 %v806_v51, %v805_v44  ;;  %v2716_v51 = vld [vmem:[%s3282_s25 + $0x9c] sm:$0xff] }
 0x108   : > { %v3514_v55 = vpop.f32.mrf.mxu2  ;;  %v3516_v63 = vpop.f32.mrf.mxu3 }
 0x109   : > { %v788_v59 = vadd.f32 %v787_v47, %v786_v45  ;;  %v808_v60 = vrot.slane %v807_v54, 4  ;;  %v972_v0 = vpop.f32.mrf.mxu0  ;;  %v1016_v4 = vpop.f32.mrf.mxu1  ;;  %v2731_v47 = vld [vmem:[%s3282_s25 + $0x138] sm:$0xff] }
 0x10a   : > { %v982_v56 = vadd.f32 %v972_v0, %v938_v42 }
 0x10b   : > { %v789_v5 = vrot.slane %v788_v59, 2  ;;  %v809_v6 = vadd.f32 %v808_v60, %v807_v54  ;;  %v2022_v60 = vpack.c.bf16 %v2731_v47, %v2730_v53 }
 0x10c   : > { %2682 = vmatmul.msk.bf16.vlgmr.msrb.gmra.mxu0 %vm743_vm4, %v1764_v57  ;;  %2690 = vmatmul.msk.bf16.vlgmr.msrb.gmra.mxu1 %vm743_vm4, %v1843_v58  ;;  %v1026_v45 = vadd.f32 %v1016_v4, %v982_v56  ;;  %v2754_v57 = vld [vmem:[%s3282_s25 + $0x12c] sm:$0xff]  ;;  %v2755_v58 = vld [vmem:[%s3282_s25 + $0x144] sm:$0xff] }
 0x10d   : > { %v790_v8 = vadd.f32 %v789_v5, %v788_v59  ;;  %v810_v9 = vrot.slane %v809_v6, 2  ;;  %2702 = vmatmul.msk.bf16.vlgmr.msrb.gmra.mxu2 %vm743_vm4, %v1887_v3  ;;  %2714 = vmatmul.msk.bf16.vlgmr.msrb.gmra.mxu3 %vm743_vm4, %v3289_v32  ;;  %v1841_v32 = vld [vmem:[%s3282_s25 + $0x3c] sm:$0xff]  ;;  %v1975_v59 = vpack.c.bf16 %v2717_v52, %v2716_v51 }
 0x10e   : > { %v1844_v36 = vpack.c.bf16 %v1842_v27, %v1841_v32 }
 0x10f   : > { %v791_v10 = vrot.slane %v790_v8, 1  ;;  %v811_v11 = vadd.f32 %v810_v9, %v809_v6  ;;  %v3553_v6 = vld [vmem:[%s3755_s20] ss:$0 sm:$0xff] }
 0x110   : > { %v1060_v13 = vpop.f32.mrf.mxu2  ;;  %v1107_v19 = vpop.f32.mrf.mxu3 }
 0x111   : > { %v792_v14 = vadd.f32 %v791_v10, %v790_v8  ;;  %v812_v16 = vrot.slane %v811_v11, 1  ;;  %v974_v20 = vpop.f32.mrf.mxu0  ;;  %v1018_v21 = vpop.f32.mrf.mxu1  ;;  %v1070_v49 = vadd.f32 %v1060_v13, %v1026_v45  ;;  %v2110_v8 = vpack.c.bf16 %v2755_v58, %v2754_v57 }
 0x112   : > { %v983_v54 = vadd.f32 %v974_v20, %v939_v48 }
 0x113   : > { %v793_v24 = vadd.f32 %v792_v14, %v778_v12  ;;  %v813_v25 = vadd.f32 %v812_v16, %v811_v11  ;;  %v1117_v1 = vadd.f32 %v1107_v19, %v1070_v49  ;;  %v896_v12 = vadd.f32 %v3514_v55, %v3502_v37 }
 0x114   : > { %v1027_v4 = vadd.f32 %v1018_v21, %v983_v54 }
 0x115   : > { %795 = vst.msk [vmem:[#allocation3] sm:$0x1] %vm794_vm7, %v793_v24  ;;  %v814_v28 = vadd.f32 %v813_v25, %v796_v23  ;;  %v941_v37 = vadd.f32 %v3516_v63, %v896_v12  ;;  %v2718_v24 = vld [vmem:[%s3282_s25 + $0xcc] sm:$0xff]  ;;  %v2719_v25 = vld [vmem:[%s3282_s25 + $0xe4] sm:$0xff] }
 0x117   : > { %815 = vst.msk [vmem:[#allocation4] sm:$0x1] %vm794_vm7, %v814_v28  ;;  %v2744_v28 = vld [vmem:[%s3282_s25 + $0x156] sm:$0xff] }
 0x118   : > { %v1062_v7 = vpop.f32.mrf.mxu2  ;;  %v1109_v38 = vpop.f32.mrf.mxu3 }
 0x119   : > { %v977_v39 = vpop.f32.mrf.mxu0  ;;  %v1021_v41 = vpop.f32.mrf.mxu1  ;;  %v1071_v10 = vadd.f32 %v1062_v7, %v1027_v4 }
 0x11c   : > { %2683 = vmatmul.msk.bf16.gmra.mxu0 %vm743_vm4, %v1765_v35  ;;  %2691 = vmatmul.msk.bf16.gmra.mxu1 %vm743_vm4, %v1844_v36 }
 0x11d   : > { %2703 = vmatmul.msk.bf16.gmra.mxu2 %vm743_vm4, %v1888_v40  ;;  %2715 = vmatmul.msk.bf16.gmra.mxu3 %vm743_vm4, %v3322_v50  ;;  %v894_v50 = vadd.f32 %v3495_v30, %v3481_v22 }
 0x11f   : > { %v940_v9 = vadd.f32 %v3497_v33, %v894_v50  ;;  %v1118_v33 = vadd.f32 %v1109_v38, %v1071_v10  ;;  %v1976_v38 = vpack.c.bf16 %v2719_v25, %v2718_v24 }
 0x120   : > { %v1065_v43 = vpop.f32.mrf.mxu2  ;;  %v1112_v44 = vpop.f32.mrf.mxu3 }
 0x121   : > { %v979_v62 = vpop.f32.mrf.mxu0  ;;  %v3539_v46 = vpop.f32.mrf.mxu1  ;;  %v984_v22 = vadd.f32 %v977_v39, %v940_v9  ;;  %v2023_v39 = vpack.c.bf16 %v2733_v26, %v2732_v2 }
 0x122   : > { %v985_v32 = vadd.f32 %v979_v62, %v941_v37 }
 0x123   : > { %v1028_v19 = vadd.f32 %v1021_v41, %v984_v22  ;;  %v2067_v41 = vpack.c.bf16 %v2745_v29, %v2744_v28 }
 0x124   : > { %v1029_v42 = vadd.f32 %v3539_v46, %v985_v32 }
 0x125   : > { %v1072_v55 = vadd.f32 %v1065_v43, %v1028_v19  ;;  %v2111_v43 = vpack.c.bf16 %v2757_v34, %v2756_v31 }
 0x127   : > { %v1119_v7 = vadd.f32 %v1112_v44, %v1072_v55 }
 0x128   : > { %v1067_v15 = vpop.f32.mrf.mxu2  ;;  %v1114_v0 = vpop.f32.mrf.mxu3 }
 0x129   : > { %v1151_v3 = vpop.f32.mrf.mxu0  ;;  %v1195_v18 = vpop.f32.mrf.mxu1  ;;  %v1073_v62 = vadd.f32 %v1067_v15, %v1029_v42 }
 0x12a   : > { %v1161_v5 = vadd.f32 %v1151_v3, %v1117_v1 }
 0x12b   : > { %v1120_v48 = vadd.f32 %v1114_v0, %v1073_v62 }
 0x12c   : > { %v1205_v11 = vadd.f32 %v1195_v18, %v1161_v5  ;;  %2726 = vmatmul.msk.bf16.vlgmr.msra.gmra.mxu0 %vm743_vm4, %v1975_v59  ;;  %2740 = vmatmul.msk.bf16.vlgmr.msra.gmra.mxu1 %vm743_vm4, %v2022_v60 }
 0x12d   : > { %2752 = vmatmul.msk.bf16.vlgmr.msra.gmra.mxu2 %vm743_vm4, %v3476_v17  ;;  %2764 = vmatmul.msk.bf16.vlgmr.msra.gmra.mxu3 %vm743_vm4, %v2110_v8 }
 0x12e   : > { %v1213_v30 = vadd.f32 %v3553_v6, %v1205_v11 }
 0x130   : > { %v3564_v13 = vpop.f32.mrf.mxu2  ;;  %v1217_v14 = vpack.c.bf16 %v1213_v30, %v1213_v30  ;;  %v3566_v16 = vpop.f32.mrf.mxu3  ;;  %v1264_v47 = vmul.f32 %v1213_v30, %v1213_v30  ;;  %v1243_v1 = vsel %vm779_vm6, %v1213_v30, 0.0 }
 0x131   : > { %v1153_v17 = vpop.f32.mrf.mxu0  ;;  %v1197_v21 = vpop.f32.mrf.mxu1 }
 0x132   : > { %v1162_v20 = vadd.f32 %v1153_v17, %v1118_v33  ;;  %1225 = vrot.lane.b32.xlu2 %v1217_v14, %s2909_s22  ;;  %v1268_v3 = vsel %vm779_vm6, %v1264_v47, 0.0 }
 0x134   : > { %v1206_v23 = vadd.f32 %v1197_v21, %v1162_v20 }
 0x136   : > { %v1214_v27 = vadd.f32 %v3553_v6, %v1206_v23 }
 0x138   : > { %v3579_v35 = vpop.f32.mrf.mxu2  ;;  %v1218_v36 = vpack.c.bf16 %v1214_v27, %v1214_v27  ;;  %v3581_v63 = vpop.f32.mrf.mxu3  ;;  %v1265_v49 = vmul.f32 %v1214_v27, %v1214_v27  ;;  %v1244_v54 = vsel %vm779_vm6, %v1214_v27, 0.0 }
 0x139   : > { %v1156_v40 = vpop.f32.mrf.mxu0  ;;  %v1200_v61 = vpop.f32.mrf.mxu1  ;;  %v1245_v0 = vadd.f32 %v1244_v54, %v1243_v1 }
 0x13a   : > { %v1163_v56 = vadd.f32 %v1156_v40, %v1119_v7  ;;  %1227 = vrot.lane.b32.xlu2 %v1218_v36, %s2909_s22  ;;  %v1269_v15 = vsel %vm779_vm6, %v1265_v49, 0.0  ;;  %v1360_v40 = vadd.f32 %v3566_v16, %v3564_v13 }
 0x13b   : > { %v1270_v18 = vadd.f32 %v1269_v15, %v1268_v3 }
 0x13c   : > { %v1207_v45 = vadd.f32 %v1200_v61, %v1163_v56  ;;  %2727 = vmatmul.msk.bf16.gmra.mxu0 %vm743_vm4, %v1976_v38  ;;  %2741 = vmatmul.msk.bf16.gmra.mxu1 %vm743_vm4, %v2023_v39 }
 0x13d   : > { %2753 = vmatmul.msk.bf16.gmra.mxu2 %vm743_vm4, %v2067_v41  ;;  %2765 = vmatmul.msk.bf16.gmra.mxu3 %vm743_vm4, %v2111_v43 }
 0x13e   : > { %v1215_v44 = vadd.f32 %v3553_v6, %v1207_v45 }
 0x140   : > { %v3590_v46 = vpop.f32.mrf.mxu2  ;;  %v1219_v51 = vpack.c.bf16 %v1215_v44, %v1215_v44  ;;  %v3592_v52 = vpop.f32.mrf.mxu3  ;;  %v1266_v57 = vmul.f32 %v1215_v44, %v1215_v44  ;;  %v1246_v59 = vsel %vm779_vm6, %v1215_v44, 0.0  ;;  %v1362_v44 = vadd.f32 %v3581_v63, %v3579_v35 }
 0x141   : > { %v1158_v53 = vpop.f32.mrf.mxu0  ;;  %v1202_v50 = vpop.f32.mrf.mxu1  ;;  %v1247_v8 = vadd.f32 %v1246_v59, %v1245_v0  ;;  %v2866_v59 = vld [vmem:[%s3756_s27] ss:$0 sm:$0xff] }
 0x142   : > { %v1164_v58 = vadd.f32 %v1158_v53, %v1120_v48  ;;  %1229 = vrot.lane.b32.xlu0 %v1219_v51, %s2909_s22  ;;  %v1271_v4 = vsel %vm779_vm6, %v1266_v57, 0.0 }
 0x143   : > { %v1272_v30 = vadd.f32 %v1271_v4, %v1270_v18 }
 0x144   : > { %v1208_v60 = vadd.f32 %v1202_v50, %v1164_v58  ;;  %v1365_v58 = vadd.f32 %v3592_v52, %v3590_v46 }
 0x146   : > { %v1216_v5 = vadd.f32 %v3553_v6, %v1208_v60 }
 0x148   : > { %v1248_v9 = vsel %vm779_vm6, %v1216_v5, 0.0  ;;  %v1267_v10 = vmul.f32 %v1216_v5, %v1216_v5  ;;  %v3603_v11 = vpop.f32.mrf.mxu2  ;;  %v1220_v22 = vpack.c.bf16 %v1216_v5, %v1216_v5  ;;  %v1366_v33 = vpop.f32.mrf.mxu3 }
 0x149   : > { %v1249_v12 = vadd.f32 %v1248_v9, %v1247_v8  ;;  %v1399_v14 = vpop.f32.mrf.mxu0  ;;  %v1443_v19 = vpop.f32.mrf.mxu1  ;;  %v1367_v9 = vadd.f32 %v1366_v33, %v3603_v11 }
 0x14a   : > { %v1273_v17 = vsel %vm779_vm6, %v1267_v10, 0.0  ;;  %1231 = vrot.lane.b32.xlu1 %v1220_v22, %s2909_s22  ;;  %v1409_v42 = vadd.f32 %v1399_v14, %v1360_v40 }
 0x14b   : > { %v1250_v20 = vrot.slane %v1249_v12, 4  ;;  %v1274_v21 = vadd.f32 %v1273_v17, %v1272_v30 }
 0x14c   : > { %v1453_v45 = vadd.f32 %v1443_v19, %v1409_v42 }
 0x14d   : > { %v1251_v6 = vadd.f32 %v1250_v20, %v1249_v12  ;;  %v1275_v37 = vrot.slane %v1274_v21, 4 }
 0x14f   : > { %v1252_v55 = vrot.slane %v1251_v6, 2  ;;  %v1276_v23 = vadd.f32 %v1275_v37, %v1274_v21 }
 0x150   : > { %v1487_v24 = vpop.f32.mrf.mxu2  ;;  %v1531_v25 = vpop.f32.mrf.mxu3 }
 0x151   : > { %v1401_v2 = vpop.f32.mrf.mxu0  ;;  %v1253_v26 = vadd.f32 %v1252_v55, %v1251_v6  ;;  %v1277_v32 = vrot.slane %v1276_v23, 2  ;;  %v1445_v27 = vpop.f32.mrf.mxu1  ;;  %v1497_v48 = vadd.f32 %v1487_v24, %v1453_v45 }
 0x152   : > { %v1410_v49 = vadd.f32 %v1401_v2, %v1362_v44 }
 0x153   : > { %v1254_v28 = vrot.slane %v1253_v26, 1  ;;  %v1278_v31 = vadd.f32 %v1277_v32, %v1276_v23  ;;  %v1541_v53 = vadd.f32 %v1531_v25, %v1497_v48 }
 0x154   : > { %v1454_v13 = vadd.f32 %v1445_v27, %v1410_v49 }
 0x155   : > { %v1255_v29 = vadd.f32 %v1254_v28, %v1253_v26  ;;  %v1279_v38 = vrot.slane %v1278_v31, 1 }
 0x157   : > { %1257 = vrot.lane.b32.xlu0 %v1255_v29, %s2909_s22  ;;  %v1280_v41 = vadd.f32 %v1279_v38, %v1278_v31 }
 0x158   : > { %v1489_v34 = vpop.f32.mrf.mxu2  ;;  %v1533_v7 = vpop.f32.mrf.mxu3 }
 0x159   : > { %v1404_v36 = vpop.f32.mrf.mxu0  ;;  %v1448_v39 = vpop.f32.mrf.mxu1  ;;  %v1498_v50 = vadd.f32 %v1489_v34, %v1454_v13 }
 0x15a   : > { %v1411_v1 = vadd.f32 %v1404_v36, %v1365_v58 }
 0x15b   : > { %v1542_v63 = vadd.f32 %v1533_v7, %v1498_v50 }
 0x15c   : > { %v1455_v5 = vadd.f32 %v1448_v39, %v1411_v1 }
 0x15f   : > { %1282 = vrot.lane.b32.xlu0 %v1280_v41, %s2909_s22 }
 0x160   : > { %v1492_v56 = vpop.f32.mrf.mxu2  ;;  %v1536_v61 = vpop.f32.mrf.mxu3 }
 0x161   : > { %v1406_v43 = vpop.f32.mrf.mxu0  ;;  %v1450_v62 = vpop.f32.mrf.mxu1  ;;  %v1499_v46 = vadd.f32 %v1492_v56, %v1455_v5 }
 0x162   : > { %v1412_v10 = vadd.f32 %v1406_v43, %v1367_v9 }
 0x163   : > { %v1543_v12 = vadd.f32 %v1536_v61, %v1499_v46 }
 0x164   : > { %v1456_v21 = vadd.f32 %v1450_v62, %v1412_v10 }
 0x168   : > { %v1494_v51 = vpop.f32.mrf.mxu2  ;;  %v1538_v47 = vpop.f32.mrf.mxu3 }
 0x169   : > { %v1578_v54 = vpop.f32.mrf.mxu0  ;;  %v1622_v57 = vpop.f32.mrf.mxu1  ;;  %v1500_v55 = vadd.f32 %v1494_v51, %v1456_v21 }
 0x16a   : > { %v1588_v16 = vadd.f32 %v1578_v54, %v1541_v53 }
 0x16b   : > { %v1544_v24 = vadd.f32 %v1538_v47, %v1500_v55 }
 0x16c   : > { %v1632_v15 = vadd.f32 %v1622_v57, %v1588_v16 }
 0x170   : > { %v1666_v35 = vpop.f32.mrf.mxu2  ;;  %v3618_v0 = vpop.f32.mrf.mxu3 }
 0x171   : > { %v1676_v60 = vadd.f32 %v1666_v35, %v1632_v15  ;;  %v1580_v3 = vpop.f32.mrf.mxu0  ;;  %v1624_v4 = vpop.f32.mrf.mxu1 }
 0x172   : > { %v1589_v8 = vadd.f32 %v1580_v3, %v1542_v63 }
 0x173   : > { %v1684_v18 = vadd.f32 %v2866_v59, %v1676_v60 }
 0x174   : > { %v1633_v22 = vadd.f32 %v1624_v4, %v1589_v8 }
 0x175   : > { %v1688_v52 = vpack.c.bf16 %v1684_v18, %v1684_v18  ;;  %v1735_v34 = vmul.f32 %v1684_v18, %v1684_v18  ;;  %v1714_v40 = vsel %vm779_vm6, %v1684_v18, 0.0 }
 0x177   : > { %1696 = vrot.lane.b32.xlu1 %v1688_v52, %s2910_s28  ;;  %v1739_v44 = vsel %vm779_vm6, %v1735_v34, 0.0 }
 0x178   : > { %v1668_v30 = vpop.f32.mrf.mxu2  ;;  %v3622_v17 = vpop.f32.mrf.mxu3 }
 0x179   : > { %v1677_v14 = vadd.f32 %v1668_v30, %v1633_v22  ;;  %v1583_v19 = vpop.f32.mrf.mxu0  ;;  %v1627_v20 = vpop.f32.mrf.mxu1 }
 0x17a   : > { %v1590_v37 = vadd.f32 %v1583_v19, %v1543_v12 }
 0x17b   : > { %v1685_v6 = vadd.f32 %v2866_v59, %v1677_v14 }
 0x17c   : > { %v1634_v11 = vadd.f32 %v1627_v20, %v1590_v37 }
 0x17d   : > { %v1689_v23 = vpack.c.bf16 %v1685_v6, %v1685_v6  ;;  %v1736_v29 = vmul.f32 %v1685_v6, %v1685_v6  ;;  %v1715_v7 = vsel %vm779_vm6, %v1685_v6, 0.0 }
 0x17e   : > { %v1716_v62 = vadd.f32 %v1715_v7, %v1714_v40 }
 0x17f   : > { %1698 = vrot.lane.b32.xlu2 %v1689_v23, %s2910_s28  ;;  %v1740_v41 = vsel %vm779_vm6, %v1736_v29, 0.0 }
 0x180   : > { %v1671_v33 = vpop.f32.mrf.mxu2  ;;  %v3625_v2 = vpop.f32.mrf.mxu3  ;;  %v1741_v51 = vadd.f32 %v1740_v41, %v1739_v44 }
 0x181   : > { %v1678_v25 = vadd.f32 %v1671_v33, %v1634_v11  ;;  %v1585_v26 = vpop.f32.mrf.mxu0  ;;  %v1629_v32 = vpop.f32.mrf.mxu1 }
 0x182   : > { %v1591_v28 = vadd.f32 %v1585_v26, %v1544_v24 }
 0x183   : > { %v1686_v27 = vadd.f32 %v2866_v59, %v1678_v25 }
 0x184   : > { %v1635_v38 = vadd.f32 %v1629_v32, %v1591_v28 }
 0x185   : > { %v1690_v31 = vpack.c.bf16 %v1686_v27, %v1686_v27  ;;  %v1737_v36 = vmul.f32 %v1686_v27, %v1686_v27  ;;  %v1717_v42 = vsel %vm779_vm6, %v1686_v27, 0.0 }
 0x186   : > { %v1718_v53 = vadd.f32 %v1717_v42, %v1716_v62 }
 0x187   : > { %1700 = vrot.lane.b32.xlu0 %v1690_v31, %s2910_s28  ;;  %v1742_v48 = vsel %vm779_vm6, %v1737_v36, 0.0 }
 0x188   : > { %v1673_v39 = vpop.f32.mrf.mxu2  ;;  %v3632_v61 = vpop.f32.mrf.mxu3  ;;  %v1743_v13 = vadd.f32 %v1742_v48, %v1741_v51 }
 0x189   : > { %v1679_v56 = vadd.f32 %v1673_v39, %v1635_v38  ;;  %v1829_v43 = vpop.f32.mrf.mxu0  ;;  %v1869_v45 = vpop.f32.mrf.mxu1 }
 0x18a   : > { %v1830_v20 = vadd.f32 %v1829_v43, %v3618_v0 }
 0x18b   : > { %v1687_v49 = vadd.f32 %v2866_v59, %v1679_v56 }
 0x18c   : > { %v1226_v47 = vpop.permute.xlu2 %1225  ;;  %v1879_v11 = vadd.f32 %v1869_v45, %v1830_v20 }
 0x18d   : > { %v1719_v54 = vsel %vm779_vm6, %v1687_v49, 0.0  ;;  %v1738_v57 = vmul.f32 %v1687_v49, %v1687_v49  ;;  %1238 = vst.msk [vmem:[%s3041_s11] sm:$0xf] %vm1237_vm8, %v1226_v47  ;;  %v1691_v29 = vpack.c.bf16 %v1687_v49, %v1687_v49 }
 0x18e   : > { %v1720_v16 = vadd.f32 %v1719_v54, %v1718_v53 }
 0x18f   : > { %v1744_v58 = vsel %vm779_vm6, %v1738_v57, 0.0 }
 0x190   : > { %v1913_v50 = vpop.f32.mrf.mxu2  ;;  %v1721_v1 = vrot.slane %v1720_v16, 4  ;;  %v1745_v15 = vadd.f32 %v1744_v58, %v1743_v13  ;;  %v1957_v35 = vpop.f32.mrf.mxu3 }
 0x191   : > { %v1831_v63 = vpop.f32.mrf.mxu0  ;;  %v1871_v60 = vpop.f32.mrf.mxu1  ;;  %v1923_v33 = vadd.f32 %v1913_v50, %v1879_v11 }
 0x192   : > { %v1722_v59 = vadd.f32 %v1721_v1, %v1720_v16  ;;  %v1746_v3 = vrot.slane %v1745_v15, 4  ;;  %v1832_v26 = vadd.f32 %v1831_v63, %v3622_v17  ;;  %v2867_v17 = vld [vmem:[%s3757_s17] ss:$0 sm:$0xff] }
 0x193   : > { %v1967_v25 = vadd.f32 %v1957_v35, %v1923_v33 }
 0x194   : > { %v1228_v4 = vpop.permute.xlu2 %1227  ;;  %v1723_v5 = vrot.slane %v1722_v59, 2  ;;  %v1747_v18 = vadd.f32 %v1746_v3, %v1745_v15  ;;  %v1880_v0 = vadd.f32 %v1871_v60, %v1832_v26 }
 0x195   : > { %1239 = vst.msk [vmem:[%s3041_s11 + $0x4] sm:$0xf] %vm1237_vm8, %v1228_v4 }
 0x196   : > { %v1724_v8 = vadd.f32 %v1723_v5, %v1722_v59  ;;  %v1748_v9 = vrot.slane %v1747_v18, 2 }
 0x198   : > { %v1915_v46 = vpop.f32.mrf.mxu2  ;;  %v1725_v52 = vrot.slane %v1724_v8, 1  ;;  %v1959_v10 = vpop.f32.mrf.mxu3  ;;  %v1749_v14 = vadd.f32 %v1748_v9, %v1747_v18 }
 0x199   : > { %v1834_v22 = vpop.f32.mrf.mxu0  ;;  %v1874_v30 = vpop.f32.mrf.mxu1  ;;  %v1924_v34 = vadd.f32 %v1915_v46, %v1880_v0 }
 0x19a   : > { %v1726_v12 = vadd.f32 %v1725_v52, %v1724_v8  ;;  %v1750_v19 = vrot.slane %v1749_v14, 1  ;;  %v1835_v7 = vadd.f32 %v1834_v22, %v3625_v2 }
 0x19b   : > { %v1968_v56 = vadd.f32 %v1959_v10, %v1924_v34 }
 0x19c   : > { %1728 = vrot.lane.b32.xlu1 %v1726_v12, %s2910_s28  ;;  %v1751_v23 = vadd.f32 %v1750_v19, %v1749_v14  ;;  %v1881_v43 = vadd.f32 %v1874_v30, %v1835_v7 }
 0x1a0   : > { %v1918_v21 = vpop.f32.mrf.mxu2  ;;  %v1962_v6 = vpop.f32.mrf.mxu3 }
 0x1a1   : > { %v1836_v37 = vpop.f32.mrf.mxu0  ;;  %v1876_v55 = vpop.f32.mrf.mxu1  ;;  %v1925_v44 = vadd.f32 %v1918_v21, %v1881_v43 }
 0x1a2   : > { %v1837_v2 = vadd.f32 %v1836_v37, %v3632_v61  ;;  %v1242_v37 = vld [vmem:[#allocation3] sm:$0x1] }
 0x1a3   : > { %v1969_v47 = vadd.f32 %v1962_v6, %v1925_v44 }
 0x1a4   : > { %1753 = vrot.lane.b32.xlu1 %v1751_v23, %s2910_s28  ;;  %v1882_v16 = vadd.f32 %v1876_v55, %v1837_v2 }
 0x1a8   : > { %v1920_v24 = vpop.f32.mrf.mxu2  ;;  %v1964_v32 = vpop.f32.mrf.mxu3 }
 0x1a9   : > { %v2001_v27 = vpop.f32.mrf.mxu0  ;;  %v2048_v28 = vpop.f32.mrf.mxu1  ;;  %v1926_v35 = vadd.f32 %v1920_v24, %v1882_v16 }
 0x1aa   : > { %v2011_v31 = vadd.f32 %v2001_v27, %v1967_v25 }
 0x1ab   : > { %v1970_v59 = vadd.f32 %v1964_v32, %v1926_v35 }
 0x1ac   : > { %1702 = vrot.lane.b32.xlu1 %v1691_v29, %s2910_s28  ;;  %v2058_v36 = vadd.f32 %v2048_v28, %v2011_v31 }
 0x1b0   : > { %v2092_v38 = vpop.f32.mrf.mxu2  ;;  %v2136_v40 = vpop.f32.mrf.mxu3 }
 0x1b1   : > { %v2102_v39 = vadd.f32 %v2092_v38, %v2058_v36  ;;  %v2003_v41 = vpop.f32.mrf.mxu0  ;;  %v2050_v42 = vpop.f32.mrf.mxu1 }
 0x1b2   : > { %v2012_v49 = vadd.f32 %v2003_v41, %v1968_v56 }
 0x1b3   : > { %v2146_v62 = vadd.f32 %v2136_v40, %v2102_v39  ;;  %v1263_v40 = vld [vmem:[#allocation4] sm:$0x1] }
 0x1b4   : > { %v1230_v45 = vpop.permute.xlu0 %1229  ;;  %v2059_v54 = vadd.f32 %v2050_v42, %v2012_v49 }
 0x1b5   : > { %v2154_v48 = vadd.f32 %v2867_v17, %v2146_v62  ;;  %1240 = vst.msk [vmem:[%s3041_s11 + $0x8] sm:$0xf] %vm1237_vm8, %v1230_v45 }
 0x1b7   : > { %v2158_v51 = vpack.c.bf16 %v2154_v48, %v2154_v48  ;;  %v2205_v14 = vmul.f32 %v2154_v48, %v2154_v48  ;;  %v2184_v11 = vsel %vm779_vm6, %v2154_v48, 0.0 }
 0x1b8   : > { %v2094_v53 = vpop.f32.mrf.mxu2  ;;  %v2138_v57 = vpop.f32.mrf.mxu3 }
 0x1b9   : > { %2166 = vrot.lane.b32.xlu2 %v2158_v51, %s2911_s7  ;;  %v2006_v13 = vpop.f32.mrf.mxu0  ;;  %v2103_v58 = vadd.f32 %v2094_v53, %v2059_v54  ;;  %v2053_v1 = vpop.f32.mrf.mxu1  ;;  %v2209_v32 = vsel %vm779_vm6, %v2205_v14, 0.0 }
 0x1ba   : > { %v2013_v50 = vadd.f32 %v2006_v13, %v1969_v47 }
 0x1bb   : > { %v2147_v63 = vadd.f32 %v2138_v57, %v2103_v58 }
 0x1bc   : > { %v1232_v15 = vpop.permute.xlu1 %1231  ;;  %v2060_v60 = vadd.f32 %v2053_v1, %v2013_v50 }
 0x1bd   : > { %1241 = vst.msk [vmem:[%s3041_s11 + $0xc] sm:$0xf] %vm1237_vm8, %v1232_v15  ;;  %v2155_v18 = vadd.f32 %v2867_v17, %v2147_v63 }
 0x1bf   : > { %v2206_v10 = vmul.f32 %v2155_v18, %v2155_v18  ;;  %v2185_v19 = vsel %vm779_vm6, %v2155_v18, 0.0  ;;  %v2159_v13 = vpack.c.bf16 %v2155_v18, %v2155_v18 }
 0x1c0   : > { %v2097_v61 = vpop.f32.mrf.mxu2  ;;  %v2141_v4 = vpop.f32.mrf.mxu3  ;;  %v2186_v26 = vadd.f32 %v2185_v19, %v2184_v11 }
 0x1c1   : > { %v2104_v3 = vadd.f32 %v2097_v61, %v2060_v60  ;;  %v2008_v5 = vpop.f32.mrf.mxu0  ;;  %v2055_v52 = vpop.f32.mrf.mxu1  ;;  %v2210_v33 = vsel %vm779_vm6, %v2206_v10, 0.0 }
 0x1c2   : > { %v2014_v9 = vadd.f32 %v2008_v5, %v1970_v59  ;;  %v2211_v29 = vadd.f32 %v2210_v33, %v2209_v32 }
 0x1c3   : > { %v2148_v8 = vadd.f32 %v2141_v4, %v2104_v3 }
 0x1c4   : > { %v2061_v22 = vadd.f32 %v2055_v52, %v2014_v9 }
 0x1c5   : > { %v2156_v46 = vadd.f32 %v2867_v17, %v2148_v8 }
 0x1c7   : > { %v2160_v30 = vpack.c.bf16 %v2156_v46, %v2156_v46  ;;  %v2207_v20 = vmul.f32 %v2156_v46, %v2156_v46  ;;  %v2187_v24 = vsel %vm779_vm6, %v2156_v46, 0.0 }
 0x1c8   : > { %v2099_v12 = vpop.f32.mrf.mxu2  ;;  %v2143_v55 = vpop.f32.mrf.mxu3  ;;  %v2188_v31 = vadd.f32 %v2187_v24, %v2186_v26 }
 0x1c9   : > { %v2105_v21 = vadd.f32 %v2099_v12, %v2061_v22  ;;  %2170 = vrot.lane.b32.xlu1 %v2160_v30, %s2911_s7  ;;  %v1258_v6 = vpop.permute.xlu0 %1257  ;;  %v2212_v27 = vsel %vm779_vm6, %v2207_v20, 0.0 }
 0x1ca   : > { %v1260_v23 = vadd.f32 %v1258_v6, %v1242_v37  ;;  %v2213_v7 = vadd.f32 %v2212_v27, %v2211_v29 }
 0x1cb   : > { %v2149_v25 = vadd.f32 %v2143_v55, %v2105_v21 }
 0x1cc   : > { %1262 = vst.msk [vmem:[#allocation3] sm:$0x1] %vm1261_vm9, %v1260_v23 }
 0x1cd   : > { %v2157_v28 = vadd.f32 %v2867_v17, %v2149_v25 }
 0x1cf   : > { %v2189_v0 = vsel %vm779_vm6, %v2157_v28, 0.0  ;;  %v2208_v34 = vmul.f32 %v2157_v28, %v2157_v28  ;;  %v2161_v57 = vpack.c.bf16 %v2157_v28, %v2157_v28 }
 0x1d0   : > { %v2190_v36 = vadd.f32 %v2189_v0, %v2188_v31 }
 0x1d1   : > { %v2214_v38 = vsel %vm779_vm6, %v2208_v34, 0.0  ;;  %v1283_v39 = vpop.permute.xlu0 %1282 }
 0x1d2   : > { %v1285_v41 = vadd.f32 %v1283_v39, %v1263_v40  ;;  %v2191_v42 = vrot.slane %v2190_v36, 4  ;;  %v2215_v56 = vadd.f32 %v2214_v38, %v2213_v7 }
 0x1d3   : > { %v1713_v1 = vld [vmem:[#allocation3] sm:$0x1] }
 0x1d4   : > { %1286 = vst.msk [vmem:[#allocation4] sm:$0x1] %vm1261_vm9, %v1285_v41  ;;  %v2192_v43 = vadd.f32 %v2191_v42, %v2190_v36  ;;  %v2216_v62 = vrot.slane %v2215_v56, 4 }
 0x1d6   : > { %v2193_v17 = vrot.slane %v2192_v43, 2  ;;  %v2217_v45 = vadd.f32 %v2216_v62, %v2215_v56 }
 0x1d8   : > { %v2194_v44 = vadd.f32 %v2193_v17, %v2192_v43  ;;  %v2218_v48 = vrot.slane %v2217_v45, 2 }
 0x1d9   : > { %v1699_v49 = vpop.permute.xlu2 %1698 }
 0x1da   : > { %1710 = vst.msk [vmem:[%s3041_s11 + $0x4] sm:$0xf] %vm1708_vm10, %v1699_v49  ;;  %v2195_v2 = vrot.slane %v2194_v44, 1  ;;  %v2219_v51 = vadd.f32 %v2218_v48, %v2217_v45 }
 0x1db   : > { %v1734_v60 = vld [vmem:[#allocation4] sm:$0x1] }
 0x1dc   : > { %v2196_v53 = vadd.f32 %v2195_v2, %v2194_v44  ;;  %v2220_v47 = vrot.slane %v2219_v51, 1 }
 0x1de   : > { %2198 = vrot.lane.b32.xlu2 %v2196_v53, %s2911_s7  ;;  %v2221_v54 = vadd.f32 %v2220_v47, %v2219_v51 }
 0x1e0   : > { %2223 = vrot.lane.b32.xlu0 %v2221_v54, %s2911_s7 }
 0x1e6   : > { %2172 = vrot.lane.b32.xlu2 %v2161_v57, %s2911_s7 }
 0x1e8   : > { %2168 = vrot.lane.b32.xlu0 %v2159_v13, %s2911_s7 }
 0x1e9   : > { %v1697_v16 = vpop.permute.xlu1 %1696 }
 0x1ea   : > { %1709 = vst.msk [vmem:[%s3041_s11] sm:$0xf] %vm1708_vm10, %v1697_v16 }
 0x1f9   : > { %v1701_v58 = vpop.permute.xlu0 %1700 }
 0x1fa   : > { %1711 = vst.msk [vmem:[%s3041_s11 + $0x8] sm:$0xf] %vm1708_vm10, %v1701_v58 }
 0x20e   : > { %v1729_v50 = vpop.permute.xlu1 %1728 }
 0x20f   : > { %v1731_v15 = vadd.f32 %v1729_v50, %v1713_v1 }
 0x211   : > { %1733 = vst.msk [vmem:[#allocation3] sm:$0x1] %vm1732_vm11, %v1731_v15 }
 0x213   : > { %v2167_v35 = vpop.permute.xlu2 %2166 }
 0x214   : > { %2179 = vst.msk [vmem:[%s3041_s11] sm:$0xf] %vm2178_vm12, %v2167_v35 }
 0x216   : > { %v1754_v63 = vpop.permute.xlu1 %1753 }
 0x217   : > { %v1756_v61 = vadd.f32 %v1754_v63, %v1734_v60 }
 0x218   : > { %v2183_v4 = vld [vmem:[#allocation3] sm:$0x1] }
 0x219   : > { %1757 = vst.msk [vmem:[#allocation4] sm:$0x1] %vm1732_vm11, %v1756_v61 }
 0x21e   : > { %v1703_v59 = vpop.permute.xlu1 %1702 }
 0x21f   : > { %1712 = vst.msk [vmem:[%s3041_s11 + $0xc] sm:$0xf] %vm1708_vm10, %v1703_v59 }
 0x220   : > { %v2204_v46 = vld [vmem:[#allocation4] sm:$0x1] }
 0x238   : > { %v2199_v3 = vpop.permute.xlu2 %2198 }
 0x239   : > { %v2201_v5 = vadd.f32 %v2199_v3, %v2183_v4 }
 0x23b   : > { %2203 = vst.msk [vmem:[#allocation3] sm:$0x1] %vm2202_vm13, %v2201_v5  ;;  %v2171_v18 = vpop.permute.xlu1 %2170 }
 0x23c   : > { %2181 = vst.msk [vmem:[%s3041_s11 + $0x8] sm:$0xf] %vm2178_vm12, %v2171_v18 }
 0x240   : > { %v2173_v8 = vpop.permute.xlu2 %2172 }
 0x241   : > { %2182 = vst.msk [vmem:[%s3041_s11 + $0xc] sm:$0xf] %vm2178_vm12, %v2173_v8 }
 0x252   : > { %v2224_v9 = vpop.permute.xlu0 %2223 }
 0x253   : > { %v2226_v52 = vadd.f32 %v2224_v9, %v2204_v46 }
 0x255   : > { %2227 = vst.msk [vmem:[#allocation4] sm:$0x1] %vm2202_vm13, %v2226_v52 }
 0x257   : > { %2231 = sbr.rel (%p2766_p8) target bundleno = 608 (0x260), region = 76 }
 0x25a   : > { %v2169_v10 = vpop.permute.xlu0 %2168 }
 0x25b   : > { %2180 = vst.msk [vmem:[%s3041_s11 + $0x4] sm:$0xf] %vm2178_vm12, %v2169_v10 }
 0x25c   : > { %v2232_v22 = vld [vmem:[#allocation3] sm:$0x1]  ;;  %vm2233_vm14 = vcmask 253952   ;;  %v2235_v30 = vld [vmem:[#allocation4] sm:$0x1]  ;;  %vm2238_vm15 = vcmask 122880  }
 0x25d   : > { %2234 = vst.msk [vmem:[%s536_s21] sm:$0x1] %vm2233_vm14, %v2232_v22  ;;  %v2237_v12 = vld [vmem:[#allocation5] sm:$0x1] }
 0x25e   : > { %2236 = vst.msk [vmem:[%s539_s5] sm:$0x1] %vm2233_vm14, %v2235_v30 }
 0x25f   : > { %2239 = vst.msk [vmem:[%s542_s26] sm:$0x1] %vm2238_vm15, %v2237_v12 }
 0x260 PF: > { %s3758_s22 = sld [smem:[#allocation8_spill]] }
 0x261   : > { %s3759_s18 = sld [smem:[#allocation6_spill]] }
 0x262   : > { %s3760_s19 = sld [smem:[#allocation7_spill]] }
 0x263   : > { %s3761_s20 = sld [smem:[#allocation9_spill]] }
 0x264   : > { %s3762_s21 = sld [smem:[#allocation10_spill]] }
 0x266   : > { %s26_s22 = sadd.s32 1, %s3758_s22  }
 0x267   : > { %p23_p9 = scmp.ge.s32.totalorder %s26_s22, 6  }
 0x269   :  { %25 = sbr.rel (!%p23_p9) target bundleno = 7 (0x7), region = 174 }

// kernel: fold_conv_aspp_forward.7
= control target key start
LH: loop header
LB: loop body
LE: loop exit
PB: predicated region body
PF: predicated region fallthrough
CT: control target
= control target key end

     0   :  { %s1006_s10 = smov 124   ;;  %s1007_s11 = smov 120   ;;  %vm250_vm0 = vcmask 1041408   ;;  %vm225_vm1 = vcmask 31744   ;;  %vm319_vm2 = vcmask 27648   ;;  %vm513_vm3 = vcmask 60448   ;;  %s1642_s0 = inlined_call_operand.vmem [shape: bf16[128,16], index: 0, kind: input, shape index: {}]   ;;  %s1643_s1 = inlined_call_operand.vmem [shape: f32[1,16], index: 1, kind: input, shape index: {}]   ;;  %s1644_s2 = inlined_call_operand.vmem [shape: f32[1,16], index: 2, kind: input, shape index: {}]   ;;  %s1645_s3 = inlined_call_operand.vmem [shape: f32[1,16], index: 3, kind: input, shape index: {}]   ;;  %s1646_s4 = inlined_call_operand.vmem [shape: bf16[4,4], index: 4, kind: input, shape index: {}]   ;;  %s1647_s5 = inlined_call_operand.vmem [shape: f32[1,4], index: 5, kind: input, shape index: {}]   ;;  %s1648_s6 = inlined_call_operand.vmem [shape: bf16[128,16], index: 6, kind: output, shape index: {}]  }
   0x1   :  { %v955_v0 = vld [vmem:[%s1642_s0] sm:$0xff]   ;;  %v986_v5 = vld [vmem:[%s1642_s0 + $0x8] sm:$0xff]   ;;  %v987_v6 = vld [vmem:[%s1642_s0 + $0x10] sm:$0xff]   ;;  %s1008_s14 = smov 116   ;;  %s1009_s29 = smov 4   ;;  %vm707_vm4 = vcmask 93248  }
   0x2   :  { %v1053_v1 = vld [vmem:[%s1643_s1] ss:$0 sm:$0xff]  ;;  %v956_v2 = vunpack.c.l.bf16 %v955_v0  ;;  %v957_v3 = vunpack.c.h.bf16 %v955_v0  ;;  %v960_v9 = vunpack.c.l.bf16 %v986_v5  ;;  %v961_v10 = vunpack.c.h.bf16 %v986_v5  ;;  %v988_v11 = vld [vmem:[%s1642_s0 + $0x18] sm:$0xff]   ;;  %s1010_s30 = smov 8  }
   0x3   :  { %v1058_v4 = vld [vmem:[%s1644_s2] ss:$0 sm:$0xff]  ;;  %v964_v12 = vunpack.c.l.bf16 %v987_v6  ;;  %v965_v13 = vunpack.c.h.bf16 %v987_v6  ;;  %v968_v14 = vunpack.c.l.bf16 %v988_v11  ;;  %v969_v15 = vunpack.c.h.bf16 %v988_v11  ;;  %s1011_s2 = smov 12  }
   0x4   :  { %v60_v7 = vmul.f32 %v1053_v1, %v956_v2  ;;  %v61_v8 = vmul.f32 %v1053_v1, %v957_v3  ;;  %v1076_v18 = vld [vmem:[%s1645_s3] ss:$0 sm:$0xff]  ;;  %v62_v19 = vmul.f32 %v1053_v1, %v960_v9  ;;  %v63_v20 = vmul.f32 %v1053_v1, %v961_v10 }
   0x5   :  { %v64_v21 = vmul.f32 %v1053_v1, %v964_v12  ;;  %v65_v22 = vmul.f32 %v1053_v1, %v965_v13  ;;  %v66_v23 = vmul.f32 %v1053_v1, %v968_v14  ;;  %v67_v24 = vmul.f32 %v1053_v1, %v969_v15  ;;  %v989_v55 = vld [vmem:[%s1642_s0 + $0x20] sm:$0xff]  }
   0x6   :  { %v80_v16 = vadd.f32 %v1058_v4, %v60_v7  ;;  %v81_v17 = vadd.f32 %v1058_v4, %v61_v8  ;;  %v82_v29 = vadd.f32 %v1058_v4, %v62_v19  ;;  %v83_v30 = vadd.f32 %v1058_v4, %v63_v20  ;;  %v990_v8 = vld [vmem:[%s1642_s0 + $0x28] sm:$0xff]  }
   0x7   :  { %v84_v31 = vadd.f32 %v1058_v4, %v64_v21  ;;  %v85_v32 = vadd.f32 %v1058_v4, %v65_v22  ;;  %v86_v41 = vadd.f32 %v1058_v4, %v66_v23  ;;  %v87_v42 = vadd.f32 %v1058_v4, %v67_v24 }
   0x8   :  { %v97_v25 = vmax.f32 %v80_v16, 0.0  ;;  %v98_v26 = vmax.f32 %v81_v17, 0.0  ;;  %v113_v27 = vmin.f32 %v80_v16, 0.0  ;;  %v114_v28 = vmin.f32 %v81_v17, 0.0 }
   0x9   :  { %v99_v35 = vmax.f32 %v82_v29, 0.0  ;;  %v100_v36 = vmax.f32 %v83_v30, 0.0  ;;  %v115_v37 = vmin.f32 %v82_v29, 0.0  ;;  %v116_v38 = vmin.f32 %v83_v30, 0.0  ;;  %v991_v30 = vld [vmem:[%s1642_s0 + $0x30] sm:$0xff]  }
   0xa   :  { %v132_v33 = vmul.f32 %v1076_v18, %v113_v27  ;;  %v133_v34 = vmul.f32 %v1076_v18, %v114_v28  ;;  %v117_v45 = vmin.f32 %v84_v31, 0.0  ;;  %v118_v46 = vmin.f32 %v85_v32, 0.0 }
   0xb   :  { %v134_v43 = vmul.f32 %v1076_v18, %v115_v37  ;;  %v135_v44 = vmul.f32 %v1076_v18, %v116_v38  ;;  %v101_v49 = vmax.f32 %v84_v31, 0.0  ;;  %v102_v50 = vmax.f32 %v85_v32, 0.0 }
   0xc   :  { %v148_v39 = vadd.f32 %v132_v33, %v97_v25  ;;  %v149_v40 = vadd.f32 %v133_v34, %v98_v26  ;;  %v136_v53 = vmul.f32 %v1076_v18, %v117_v45  ;;  %v137_v54 = vmul.f32 %v1076_v18, %v118_v46 }
   0xd   :  { %v150_v51 = vadd.f32 %v134_v43, %v99_v35  ;;  %v151_v52 = vadd.f32 %v135_v44, %v100_v36  ;;  %v119_v61 = vmin.f32 %v86_v41, 0.0  ;;  %v120_v62 = vmin.f32 %v87_v42, 0.0 }
   0xe   :  { %v164_v47 = vpack.c.bf16 %v148_v39, %v148_v39  ;;  %v165_v48 = vpack.c.bf16 %v149_v40, %v149_v40  ;;  %v972_v63 = vunpack.c.l.bf16 %v989_v55  ;;  %v152_v3 = vadd.f32 %v136_v53, %v101_v49  ;;  %v530_v53 = vld [vmem:[%s1646_s4] sm:$0x3] }
   0xf   :  { %v166_v58 = vpack.c.bf16 %v150_v51, %v150_v51  ;;  %v167_v59 = vpack.c.bf16 %v151_v52, %v151_v52  ;;  %v153_v5 = vadd.f32 %v137_v54, %v102_v50  ;;  %v973_v6 = vunpack.c.h.bf16 %v989_v55  ;;  %v336_v50 = vld [vmem:[%s1646_s4] sm:$0x3]  ;;  %v992_v54 = vld [vmem:[%s1642_s0 + $0x38] sm:$0xff]  }
  0x10   :  { %v201_v56 = vunpack.c.l.b16 %v164_v47  ;;  %v202_v57 = vunpack.c.l.b16 %v165_v48  ;;  %v68_v7 = vmul.f32 %v1053_v1, %v972_v63  ;;  %v103_v10 = vmax.f32 %v86_v41, 0.0 }
  0x11   :  { %v203_v0 = vunpack.c.l.b16 %v166_v58  ;;  %v204_v2 = vunpack.c.l.b16 %v167_v59  ;;  %v104_v11 = vmax.f32 %v87_v42, 0.0  ;;  %v138_v12 = vmul.f32 %v1076_v18, %v119_v61 }
  0x12   :  { %v1099_v60 = vpack.c.b16 %v202_v57, %v201_v56  ;;  %v69_v13 = vmul.f32 %v1053_v1, %v973_v6  ;;  %v976_v14 = vunpack.c.l.bf16 %v990_v8  ;;  %v168_v15 = vpack.c.bf16 %v152_v3, %v152_v3 }
  0x13   :  { %v1109_v9 = vpack.c.b16 %v204_v2, %v203_v0  ;;  %v169_v16 = vpack.c.bf16 %v153_v5, %v153_v5  ;;  %v139_v17 = vmul.f32 %v1076_v18, %v120_v62  ;;  %v977_v19 = vunpack.c.h.bf16 %v990_v8 }
  0x14   :  { %341 = vrot.lane.b32.xlu1 %v1099_v60, %s1006_s10  ;;  %535 = vrot.lane.b32.xlu0 %v1099_v60, %s1007_s11  ;;  %v88_v20 = vadd.f32 %v1058_v4, %v68_v7  ;;  %v89_v21 = vadd.f32 %v1058_v4, %v69_v13  ;;  %v154_v22 = vadd.f32 %v138_v12, %v103_v10  ;;  %v205_v25 = vunpack.c.l.b16 %v168_v15 }
  0x15   :  { %731 = vrot.lane.b32.xlu2 %v1109_v9, %s1008_s14  ;;  %v70_v23 = vmul.f32 %v1053_v1, %v976_v14  ;;  %v71_v24 = vmul.f32 %v1053_v1, %v977_v19  ;;  %v206_v26 = vunpack.c.l.b16 %v169_v16  ;;  %v155_v27 = vadd.f32 %v139_v17, %v104_v11 }
  0x16   :  { %v121_v28 = vmin.f32 %v88_v20, 0.0  ;;  %v122_v29 = vmin.f32 %v89_v21, 0.0  ;;  %v170_v31 = vpack.c.bf16 %v154_v22, %v154_v22  ;;  %v980_v36 = vunpack.c.l.bf16 %v991_v30 }
  0x17   :  { %v90_v32 = vadd.f32 %v1058_v4, %v70_v23  ;;  %v91_v33 = vadd.f32 %v1058_v4, %v71_v24  ;;  %v1129_v34 = vpack.c.b16 %v206_v26, %v205_v25  ;;  %v171_v35 = vpack.c.bf16 %v155_v27, %v155_v27 }
  0x18   :  { %v981_v37 = vunpack.c.h.bf16 %v991_v30  ;;  %v105_v38 = vmax.f32 %v88_v20, 0.0  ;;  %v106_v39 = vmax.f32 %v89_v21, 0.0  ;;  %v140_v40 = vmul.f32 %v1076_v18, %v121_v28 }
  0x19   :  { %v141_v41 = vmul.f32 %v1076_v18, %v122_v29  ;;  %v123_v42 = vmin.f32 %v90_v32, 0.0  ;;  %v124_v43 = vmin.f32 %v91_v33, 0.0  ;;  %v207_v44 = vunpack.c.l.b16 %v170_v31 }
  0x1a   :  { %v208_v45 = vunpack.c.l.b16 %v171_v35  ;;  %v72_v46 = vmul.f32 %v1053_v1, %v980_v36  ;;  %v73_v47 = vmul.f32 %v1053_v1, %v981_v37  ;;  %v156_v48 = vadd.f32 %v140_v40, %v105_v38 }
  0x1b   :  { %v157_v49 = vadd.f32 %v141_v41, %v106_v39  ;;  %v107_v51 = vmax.f32 %v90_v32, 0.0  ;;  %v108_v52 = vmax.f32 %v91_v33, 0.0  ;;  %v142_v55 = vmul.f32 %v1076_v18, %v123_v42 }
  0x1c   :  { %729 = vrot.lane.b32.xlu0 %v1099_v60, %s1008_s14  ;;  %537 = vrot.lane.b32.xlu1 %v1109_v9, %s1007_s11  ;;  %v143_v56 = vmul.f32 %v1076_v18, %v124_v43  ;;  %v382_v57 = vsel %vm250_vm0, %v336_v50, 0  ;;  %v576_v58 = vsel %vm250_vm0, %v530_v53, 0  ;;  %v1154_v59 = vpack.c.b16 %v208_v45, %v207_v44  ;;  %v724_v45 = vld [vmem:[%s1646_s4] sm:$0x3] }
  0x1d   :  { %343 = vrot.lane.b32.xlu2 %v1109_v9, %s1006_s10  ;;  %v92_v61 = vadd.f32 %v1058_v4, %v72_v46  ;;  %v93_v62 = vadd.f32 %v1058_v4, %v73_v47  ;;  %391 = vmatpush.bf16.msra.mxu1 %v382_v57  ;;  %v172_v63 = vpack.c.bf16 %v156_v48, %v156_v48  ;;  %v984_v2 = vunpack.c.l.bf16 %v992_v54 }
  0x1e   :  { %v173_v0 = vpack.c.bf16 %v157_v49, %v157_v49  ;;  %585 = vmatpush.bf16.msra.mxu2 %v576_v58  ;;  %v985_v3 = vunpack.c.h.bf16 %v992_v54  ;;  %v158_v5 = vadd.f32 %v142_v55, %v107_v51  ;;  %v159_v6 = vadd.f32 %v143_v56, %v108_v52 }
  0x1f   :  { %v125_v7 = vmin.f32 %v92_v61, 0.0  ;;  %v126_v8 = vmin.f32 %v93_v62, 0.0  ;;  %v209_v10 = vunpack.c.l.b16 %v172_v63  ;;  %v74_v12 = vmul.f32 %v1053_v1, %v984_v2  ;;  %v180_v63 = vld [vmem:[%s1646_s4] sm:$0x3] }
  0x20   :  { %v210_v11 = vunpack.c.l.b16 %v173_v0  ;;  %v75_v13 = vmul.f32 %v1053_v1, %v985_v3  ;;  %v174_v14 = vpack.c.bf16 %v158_v5, %v158_v5  ;;  %v175_v15 = vpack.c.bf16 %v159_v6, %v159_v6 }
  0x21   :  { %v109_v16 = vmax.f32 %v92_v61, 0.0  ;;  %v110_v17 = vmax.f32 %v93_v62, 0.0  ;;  %v144_v19 = vmul.f32 %v1076_v18, %v125_v7  ;;  %v145_v20 = vmul.f32 %v1076_v18, %v126_v8 }
  0x22   :  { %v1170_v21 = vpack.c.b16 %v210_v11, %v209_v10  ;;  %v94_v22 = vadd.f32 %v1058_v4, %v74_v12  ;;  %v95_v23 = vadd.f32 %v1058_v4, %v75_v13  ;;  %v211_v24 = vunpack.c.l.b16 %v174_v14  ;;  %v1249_v12 = vld [vmem:[%s1647_s5] ss:$0 sm:$0xff] }
  0x23   :  { %v212_v25 = vunpack.c.l.b16 %v175_v15  ;;  %v160_v1 = vadd.f32 %v144_v19, %v109_v16  ;;  %v161_v26 = vadd.f32 %v145_v20, %v110_v17  ;;  %v770_v46 = vsel %vm250_vm0, %v724_v45, 0  ;;  %v1255_v15 = vld [vmem:[%s1647_s5] ss:$0 sm:$0xff] }
  0x24   :  { %539 = vrot.lane.b32.xlu0 %v1129_v34, %s1007_s11  ;;  %733 = vrot.lane.b32.xlu1 %v1129_v34, %s1008_s14  ;;  %v127_v27 = vmin.f32 %v94_v22, 0.0  ;;  %v128_v28 = vmin.f32 %v95_v23, 0.0  ;;  %v111_v4 = vmax.f32 %v94_v22, 0.0  ;;  %v112_v32 = vmax.f32 %v95_v23, 0.0  ;;  %v1265_v20 = vld [vmem:[%s1647_s5] ss:$0 sm:$0xff] }
  0x25   :  { %345 = vrot.lane.b32.xlu2 %v1129_v34, %s1006_s10  ;;  %v1178_v29 = vpack.c.b16 %v212_v25, %v211_v24  ;;  %v176_v30 = vpack.c.bf16 %v160_v1, %v160_v1  ;;  %v177_v31 = vpack.c.bf16 %v161_v26, %v161_v26  ;;  %779 = vmatpush.bf16.msra.mxu3 %v770_v46  ;;  %v252_v0 = vsel %vm250_vm0, %v180_v63, 0 }
  0x26   :  { %v146_v33 = vmul.f32 %v1076_v18, %v127_v27  ;;  %v147_v35 = vmul.f32 %v1076_v18, %v128_v28  ;;  %261 = vmatpush.bf16.msra.mxu0 %v252_v0  ;;  %vm901_vm5 = vcmask 126048  }
  0x27   :  { %v213_v36 = vunpack.c.l.b16 %v176_v30  ;;  %v214_v37 = vunpack.c.l.b16 %v177_v31 }
  0x28   :  { %v162_v38 = vadd.f32 %v146_v33, %v111_v4  ;;  %v163_v39 = vadd.f32 %v147_v35, %v112_v32 }
  0x29   :  { %v1190_v40 = vpack.c.b16 %v214_v37, %v213_v36  ;;  %922 = vmatmul.msk.bf16.vlgmr.msra.gmra.mxu0 %vm225_vm1, %v1099_v60 }
  0x2a   :  { %v178_v41 = vpack.c.bf16 %v162_v38, %v162_v38  ;;  %v179_v42 = vpack.c.bf16 %v163_v39, %v163_v39 }
  0x2c   :  { %541 = vrot.lane.b32.xlu0 %v1154_v59, %s1007_s11  ;;  %735 = vrot.lane.b32.xlu1 %v1154_v59, %s1008_s14  ;;  %v215_v18 = vunpack.c.l.b16 %v178_v41  ;;  %v216_v43 = vunpack.c.l.b16 %v179_v42 }
  0x2d   :  { %347 = vrot.lane.b32.xlu2 %v1154_v59, %s1006_s10 }
  0x2e   :  { %v1198_v44 = vpack.c.b16 %v216_v43, %v215_v18 }
  0x34   :  { %543 = vrot.lane.b32.xlu0 %v1170_v21, %s1007_s11  ;;  %737 = vrot.lane.b32.xlu1 %v1170_v21, %s1008_s14 }
  0x35   :  { %349 = vrot.lane.b32.xlu2 %v1170_v21, %s1006_s10 }
  0x39   :  { %923 = vmatmul.msk.bf16.gmra.mxu0 %vm225_vm1, %v1109_v9 }
  0x3c   :  { %545 = vrot.lane.b32.xlu0 %v1178_v29, %s1007_s11  ;;  %739 = vrot.lane.b32.xlu1 %v1178_v29, %s1008_s14 }
  0x3d   :  { %351 = vrot.lane.b32.xlu2 %v1178_v29, %s1006_s10 }
  0x44   :  { %547 = vrot.lane.b32.xlu0 %v1190_v40, %s1007_s11  ;;  %741 = vrot.lane.b32.xlu1 %v1190_v40, %s1008_s14 }
  0x45   :  { %353 = vrot.lane.b32.xlu2 %v1190_v40, %s1006_s10 }
  0x49   :  { %924 = vmatmul.msk.bf16.gmra.mxu0 %vm225_vm1, %v1129_v34 }
  0x4c   :  { %549 = vrot.lane.b32.xlu0 %v1198_v44, %s1007_s11  ;;  %743 = vrot.lane.b32.xlu1 %v1198_v44, %s1008_s14 }
  0x4d   :  { %355 = vrot.lane.b32.xlu2 %v1198_v44, %s1006_s10 }
  0x59   :  { %925 = vmatmul.msk.bf16.gmra.mxu0 %vm225_vm1, %v1154_v59 }
  0x69   :  { %926 = vmatmul.msk.bf16.gmra.mxu0 %vm225_vm1, %v1170_v21 }
  0x6f   :  { %v732_v49 = vpop.permute.xlu2 %731 }
  0x77   :  { %v344_v51 = vpop.permute.xlu2 %343 }
  0x79   :  { %927 = vmatmul.msk.bf16.gmra.mxu0 %vm225_vm1, %v1178_v29 }
  0x7f   :  { %v346_v53 = vpop.permute.xlu2 %345 }
  0x86   :  { %v342_v47 = vpop.permute.xlu1 %341  ;;  %v536_v48 = vpop.permute.xlu0 %535 }
  0x87   :  { %930 = vmatmul.msk.bf16.vlgmr.msra.gmra.mxu1 %vm225_vm1, %v342_v47  ;;  %938 = vmatmul.msk.bf16.vlgmr.msra.gmra.mxu2 %vm225_vm1, %v536_v48  ;;  %v348_v56 = vpop.permute.xlu2 %347 }
  0x89   :  { %928 = vmatmul.msk.bf16.gmra.mxu0 %vm225_vm1, %v1190_v40 }
  0x8e   :  { %v730_v50 = vpop.permute.xlu0 %729  ;;  %v538_v52 = vpop.permute.xlu1 %537 }
  0x8f   :  { %946 = vmatmul.msk.bf16.vlgmr.msra.gmra.mxu3 %vm225_vm1, %v730_v50  ;;  %v350_v61 = vpop.permute.xlu2 %349 }
  0x96   :  { %v540_v54 = vpop.permute.xlu0 %539  ;;  %v734_v55 = vpop.permute.xlu1 %733 }
  0x97   :  { %931 = vmatmul.msk.bf16.gmra.mxu1 %vm225_vm1, %v344_v51  ;;  %939 = vmatmul.msk.bf16.gmra.mxu2 %vm225_vm1, %v538_v52  ;;  %v352_v3 = vpop.permute.xlu2 %351 }
  0x99   :  { %929 = vmatmul.msk.bf16.gmra.mxu0 %vm225_vm1, %v1198_v44 }
  0x9e   :  { %v542_v57 = vpop.permute.xlu0 %541  ;;  %v736_v58 = vpop.permute.xlu1 %735 }
  0x9f   :  { %947 = vmatmul.msk.bf16.gmra.mxu3 %vm225_vm1, %v732_v49  ;;  %v354_v7 = vpop.permute.xlu2 %353 }
  0xa6   :  { %v544_v62 = vpop.permute.xlu0 %543  ;;  %v738_v2 = vpop.permute.xlu1 %737 }
  0xa7   :  { %932 = vmatmul.msk.bf16.gmra.mxu1 %vm225_vm1, %v346_v53  ;;  %940 = vmatmul.msk.bf16.gmra.mxu2 %vm225_vm1, %v540_v54  ;;  %v356_v10 = vpop.permute.xlu2 %355 }
  0xae   :  { %v546_v5 = vpop.permute.xlu0 %545  ;;  %v740_v6 = vpop.permute.xlu1 %739 }
  0xaf   :  { %948 = vmatmul.msk.bf16.gmra.mxu3 %vm225_vm1, %v734_v55 }
  0xb6   :  { %v548_v8 = vpop.permute.xlu0 %547  ;;  %v742_v60 = vpop.permute.xlu1 %741 }
  0xb7   :  { %933 = vmatmul.msk.bf16.gmra.mxu1 %vm225_vm1, %v348_v56  ;;  %941 = vmatmul.msk.bf16.gmra.mxu2 %vm225_vm1, %v542_v57 }
  0xbe   :  { %v550_v11 = vpop.permute.xlu0 %549  ;;  %v744_v9 = vpop.permute.xlu1 %743 }
  0xbf   :  { %949 = vmatmul.msk.bf16.gmra.mxu3 %vm225_vm1, %v736_v58 }
  0xc7   :  { %934 = vmatmul.msk.bf16.gmra.mxu1 %vm225_vm1, %v350_v61  ;;  %942 = vmatmul.msk.bf16.gmra.mxu2 %vm225_vm1, %v544_v62 }
  0xcf   :  { %950 = vmatmul.msk.bf16.gmra.mxu3 %vm225_vm1, %v738_v2 }
  0xd7   :  { %935 = vmatmul.msk.bf16.gmra.mxu1 %vm225_vm1, %v352_v3  ;;  %943 = vmatmul.msk.bf16.gmra.mxu2 %vm225_vm1, %v546_v5 }
  0xdf   :  { %951 = vmatmul.msk.bf16.gmra.mxu3 %vm225_vm1, %v740_v6 }
  0xe7   :  { %936 = vmatmul.msk.bf16.gmra.mxu1 %vm225_vm1, %v354_v7  ;;  %944 = vmatmul.msk.bf16.gmra.mxu2 %vm225_vm1, %v548_v8 }
  0xef   :  { %952 = vmatmul.msk.bf16.gmra.mxu3 %vm225_vm1, %v742_v60 }
  0xf7   :  { %937 = vmatmul.msk.bf16.gmra.mxu1 %vm225_vm1, %v356_v10  ;;  %945 = vmatmul.msk.bf16.gmra.mxu2 %vm225_vm1, %v550_v11 }
  0xff   :  { %953 = vmatmul.msk.bf16.gmra.mxu3 %vm225_vm1, %v744_v9 }
 0x104   :  { %v393_v34 = vpop.f32.mrf.mxu1 }
 0x105   :  { %v394_v13 = vadd.f32 %v1249_v12, %v393_v34 }
 0x107   :  { %v433_v14 = vpack.c.bf16 %v394_v13, %v394_v13 }
 0x109   :  { %465 = vrot.lane.b32.xlu0 %v433_v14, %s1009_s29 }
 0x10a   :  { %v587_v59 = vpop.f32.mrf.mxu2 }
 0x10b   :  { %v588_v16 = vadd.f32 %v1255_v15, %v587_v59 }
 0x10c   :  { %v395_v17 = vpop.f32.mrf.mxu1 }
 0x10d   :  { %v627_v19 = vpack.c.bf16 %v588_v16, %v588_v16  ;;  %v396_v22 = vadd.f32 %v1249_v12, %v395_v17 }
 0x10f   :  { %659 = vrot.lane.b32.xlu1 %v627_v19, %s1010_s30  ;;  %v434_v26 = vpack.c.bf16 %v396_v22, %v396_v22 }
 0x112   :  { %v589_v23 = vpop.f32.mrf.mxu2  ;;  %v781_v24 = vpop.f32.mrf.mxu3 }
 0x113   :  { %v782_v25 = vadd.f32 %v1265_v20, %v781_v24  ;;  %v590_v21 = vadd.f32 %v1255_v15, %v589_v23 }
 0x114   :  { %v398_v1 = vpop.f32.mrf.mxu1 }
 0x115   :  { %v821_v27 = vpack.c.bf16 %v782_v25, %v782_v25  ;;  %v628_v32 = vpack.c.bf16 %v590_v21, %v590_v21  ;;  %v399_v36 = vadd.f32 %v1249_v12, %v398_v1  ;;  %v263_v21 = vpop.f32.mrf.mxu0 }
 0x117   :  { %467 = vrot.lane.b32.xlu1 %v434_v26, %s1009_s29  ;;  %853 = vrot.lane.b32.xlu2 %v821_v27, %s1011_s2  ;;  %v435_v43 = vpack.c.bf16 %v399_v36, %v399_v36  ;;  %v1317_v27 = vld [vmem:[%s1647_s5] ss:$0 sm:$0xff] }
 0x11a   :  { %v592_v28 = vpop.f32.mrf.mxu2  ;;  %v783_v30 = vpop.f32.mrf.mxu3 }
 0x11b   :  { %v784_v31 = vadd.f32 %v1265_v20, %v783_v30  ;;  %v593_v35 = vadd.f32 %v1255_v15, %v592_v28  ;;  %v264_v30 = vadd.f32 %v1317_v27, %v263_v21 }
 0x11c   :  { %v400_v4 = vpop.f32.mrf.mxu1 }
 0x11d   :  { %v822_v33 = vpack.c.bf16 %v784_v31, %v784_v31  ;;  %v629_v42 = vpack.c.bf16 %v593_v35, %v593_v35  ;;  %v401_v29 = vadd.f32 %v1249_v12, %v400_v4  ;;  %v303_v4 = vpack.c.bf16 %v264_v30, %v264_v30 }
 0x11f   :  { %855 = vrot.lane.b32.xlu0 %v822_v33, %s1011_s2  ;;  %661 = vrot.lane.b32.xlu2 %v628_v32, %s1010_s30  ;;  %v436_v50 = vpack.c.bf16 %v401_v29, %v401_v29  ;;  %320 = vst.msk [vmem:[%s1648_s6] sm:$0xf] %vm319_vm2, %v303_v4 }
 0x122   :  { %v594_v37 = vpop.f32.mrf.mxu2  ;;  %v786_v38 = vpop.f32.mrf.mxu3 }
 0x123   :  { %v787_v39 = vadd.f32 %v1265_v20, %v786_v38  ;;  %v595_v45 = vadd.f32 %v1255_v15, %v594_v37 }
 0x124   :  { %v403_v41 = vpop.f32.mrf.mxu1 }
 0x125   :  { %v823_v18 = vpack.c.bf16 %v787_v39, %v787_v39  ;;  %v630_v51 = vpack.c.bf16 %v595_v45, %v595_v45  ;;  %v404_v53 = vadd.f32 %v1249_v12, %v403_v41  ;;  %v265_v41 = vpop.f32.mrf.mxu0 }
 0x127   :  { %857 = vrot.lane.b32.xlu1 %v823_v18, %s1011_s2  ;;  %663 = vrot.lane.b32.xlu0 %v629_v42, %s1010_s30  ;;  %v437_v61 = vpack.c.bf16 %v404_v53, %v404_v53  ;;  %v266_v18 = vadd.f32 %v1317_v27, %v265_v41 }
 0x128   :  { %469 = vrot.lane.b32.xlu2 %v435_v43, %s1009_s29 }
 0x129   :  { %v304_v43 = vpack.c.bf16 %v266_v18, %v266_v18 }
 0x12a   :  { %v597_v46 = vpop.f32.mrf.mxu2  ;;  %v788_v47 = vpop.f32.mrf.mxu3 }
 0x12b   :  { %v789_v48 = vadd.f32 %v1265_v20, %v788_v47  ;;  %v598_v54 = vadd.f32 %v1255_v15, %v597_v46  ;;  %321 = vst.msk [vmem:[%s1648_s6 + $0x4] sm:$0xf] %vm319_vm2, %v304_v43 }
 0x12c   :  { %v405_v49 = vpop.f32.mrf.mxu1 }
 0x12d   :  { %v824_v52 = vpack.c.bf16 %v789_v48, %v789_v48  ;;  %v631_v62 = vpack.c.bf16 %v598_v54, %v598_v54  ;;  %v406_v0 = vadd.f32 %v1249_v12, %v405_v49  ;;  %v268_v53 = vpop.f32.mrf.mxu0 }
 0x12e   :  { %v269_v54 = vadd.f32 %v1317_v27, %v268_v53 }
 0x12f   :  { %665 = vrot.lane.b32.xlu1 %v630_v51, %s1010_s30  ;;  %471 = vrot.lane.b32.xlu0 %v436_v50, %s1009_s29  ;;  %v438_v60 = vpack.c.bf16 %v406_v0, %v406_v0 }
 0x130   :  { %859 = vrot.lane.b32.xlu2 %v824_v52, %s1011_s2 }
 0x132   :  { %v599_v55 = vpop.f32.mrf.mxu2  ;;  %v791_v56 = vpop.f32.mrf.mxu3 }
 0x133   :  { %v792_v57 = vadd.f32 %v1265_v20, %v791_v56  ;;  %v600_v63 = vadd.f32 %v1255_v15, %v599_v55  ;;  %v305_v55 = vpack.c.bf16 %v269_v54, %v269_v54 }
 0x134   :  { %v408_v58 = vpop.f32.mrf.mxu1 }
 0x135   :  { %v825_v40 = vpack.c.bf16 %v792_v57, %v792_v57  ;;  %v632_v7 = vpack.c.bf16 %v600_v63, %v600_v63  ;;  %v409_v10 = vadd.f32 %v1249_v12, %v408_v58  ;;  %322 = vst.msk [vmem:[%s1648_s6 + $0x8] sm:$0xf] %vm319_vm2, %v305_v55 }
 0x137   :  { %473 = vrot.lane.b32.xlu1 %v437_v61, %s1009_s29  ;;  %861 = vrot.lane.b32.xlu0 %v825_v40, %s1011_s2  ;;  %v439_v59 = vpack.c.bf16 %v409_v10, %v409_v10 }
 0x138   :  { %667 = vrot.lane.b32.xlu2 %v631_v62, %s1010_s30 }
 0x13a   :  { %v602_v2 = vpop.f32.mrf.mxu2  ;;  %v793_v3 = vpop.f32.mrf.mxu3 }
 0x13b   :  { %v794_v5 = vadd.f32 %v1265_v20, %v793_v3  ;;  %v603_v11 = vadd.f32 %v1255_v15, %v602_v2  ;;  %v270_v3 = vpop.f32.mrf.mxu0 }
 0x13c   :  { %v410_v6 = vpop.f32.mrf.mxu1 }
 0x13d   :  { %v826_v8 = vpack.c.bf16 %v794_v5, %v794_v5  ;;  %v633_v44 = vpack.c.bf16 %v603_v11, %v603_v11  ;;  %v411_v17 = vadd.f32 %v1249_v12, %v410_v6  ;;  %v271_v5 = vadd.f32 %v1317_v27, %v270_v3 }
 0x13f   :  { %863 = vrot.lane.b32.xlu1 %v826_v8, %s1011_s2  ;;  %669 = vrot.lane.b32.xlu0 %v632_v7, %s1010_s30  ;;  %v440_v1 = vpack.c.bf16 %v411_v17, %v411_v17  ;;  %v306_v7 = vpack.c.bf16 %v271_v5, %v271_v5 }
 0x140   :  { %475 = vrot.lane.b32.xlu2 %v438_v60, %s1009_s29 }
 0x141   :  { %323 = vst.msk [vmem:[%s1648_s6 + $0xc] sm:$0xf] %vm319_vm2, %v306_v7 }
 0x142   :  { %v604_v9 = vpop.f32.mrf.mxu2  ;;  %v796_v34 = vpop.f32.mrf.mxu3 }
 0x143   :  { %v797_v13 = vadd.f32 %v1265_v20, %v796_v34  ;;  %v605_v19 = vadd.f32 %v1255_v15, %v604_v9 }
 0x144   :  { %v413_v14 = vpop.f32.mrf.mxu1 }
 0x145   :  { %v827_v16 = vpack.c.bf16 %v797_v13, %v797_v13  ;;  %v634_v28 = vpack.c.bf16 %v605_v19, %v605_v19  ;;  %v414_v32 = vadd.f32 %v1249_v12, %v413_v14 }
 0x147   :  { %477 = vrot.lane.b32.xlu0 %v439_v59, %s1009_s29  ;;  %671 = vrot.lane.b32.xlu1 %v633_v44, %s1010_s30  ;;  %v441_v42 = vpack.c.bf16 %v414_v32, %v414_v32  ;;  %v273_v59 = vpop.f32.mrf.mxu0 }
 0x148   :  { %865 = vrot.lane.b32.xlu2 %v827_v16, %s1011_s2  ;;  %v274_v44 = vadd.f32 %v1317_v27, %v273_v59 }
 0x14a   :  { %v607_v22 = vpop.f32.mrf.mxu2  ;;  %v798_v23 = vpop.f32.mrf.mxu3 }
 0x14b   :  { %v799_v24 = vadd.f32 %v1265_v20, %v798_v23  ;;  %v608_v31 = vadd.f32 %v1255_v15, %v607_v22  ;;  %v307_v22 = vpack.c.bf16 %v274_v44, %v274_v44 }
 0x14c   :  { %v415_v25 = vpop.f32.mrf.mxu1 }
 0x14d   :  { %v828_v26 = vpack.c.bf16 %v799_v24, %v799_v24  ;;  %v635_v38 = vpack.c.bf16 %v608_v31, %v608_v31  ;;  %v416_v29 = vadd.f32 %v1249_v12, %v415_v25  ;;  %324 = vst.msk [vmem:[%s1648_s6 + $0x10] sm:$0xf] %vm319_vm2, %v307_v22 }
 0x14f   :  { %867 = vrot.lane.b32.xlu0 %v828_v26, %s1011_s2  ;;  %479 = vrot.lane.b32.xlu1 %v440_v1, %s1009_s29  ;;  %v442_v50 = vpack.c.bf16 %v416_v29, %v416_v29  ;;  %v275_v30 = vpop.f32.mrf.mxu0 }
 0x150   :  { %673 = vrot.lane.b32.xlu2 %v634_v28, %s1010_s30  ;;  %v276_v31 = vadd.f32 %v1317_v27, %v275_v30 }
 0x152   :  { %v609_v33 = vpop.f32.mrf.mxu2  ;;  %v801_v35 = vpop.f32.mrf.mxu3 }
 0x153   :  { %v802_v36 = vadd.f32 %v1265_v20, %v801_v35  ;;  %v610_v45 = vadd.f32 %v1255_v15, %v609_v33  ;;  %v308_v33 = vpack.c.bf16 %v276_v31, %v276_v31 }
 0x154   :  { %v418_v37 = vpop.f32.mrf.mxu1 }
 0x155   :  { %v829_v39 = vpack.c.bf16 %v802_v36, %v802_v36  ;;  %v636_v51 = vpack.c.bf16 %v610_v45, %v610_v45  ;;  %v419_v56 = vadd.f32 %v1249_v12, %v418_v37  ;;  %325 = vst.msk [vmem:[%s1648_s6 + $0x14] sm:$0xf] %vm319_vm2, %v308_v33 }
 0x157   :  { %869 = vrot.lane.b32.xlu1 %v829_v39, %s1011_s2  ;;  %675 = vrot.lane.b32.xlu0 %v635_v38, %s1010_s30  ;;  %v443_v63 = vpack.c.bf16 %v419_v56, %v419_v56  ;;  %v278_v29 = vpop.f32.mrf.mxu0 }
 0x158   :  { %481 = vrot.lane.b32.xlu2 %v441_v42, %s1009_s29  ;;  %v279_v45 = vadd.f32 %v1317_v27, %v278_v29 }
 0x15a   :  { %v612_v46 = vpop.f32.mrf.mxu2  ;;  %v803_v47 = vpop.f32.mrf.mxu3 }
 0x15b   :  { %v804_v48 = vadd.f32 %v1265_v20, %v803_v47  ;;  %v613_v57 = vadd.f32 %v1255_v15, %v612_v46 }
 0x15c   :  { %v420_v49 = vpop.f32.mrf.mxu1 }
 0x15d   :  { %v830_v52 = vpack.c.bf16 %v804_v48, %v804_v48  ;;  %v637_v2 = vpack.c.bf16 %v613_v57, %v613_v57  ;;  %v421_v8 = vadd.f32 %v1249_v12, %v420_v49  ;;  %v309_v48 = vpack.c.bf16 %v279_v45, %v279_v45 }
 0x15f   :  { %677 = vrot.lane.b32.xlu1 %v636_v51, %s1010_s30  ;;  %483 = vrot.lane.b32.xlu0 %v442_v50, %s1009_s29  ;;  %v444_v14 = vpack.c.bf16 %v421_v8, %v421_v8  ;;  %326 = vst.msk [vmem:[%s1648_s6 + $0x18] sm:$0xf] %vm319_vm2, %v309_v48  ;;  %v280_v56 = vpop.f32.mrf.mxu0 }
 0x160   :  { %871 = vrot.lane.b32.xlu2 %v830_v52, %s1011_s2 }
 0x162   :  { %v614_v58 = vpop.f32.mrf.mxu2  ;;  %v806_v61 = vpop.f32.mrf.mxu3 }
 0x163   :  { %v807_v40 = vadd.f32 %v1265_v20, %v806_v61  ;;  %v615_v6 = vadd.f32 %v1255_v15, %v614_v58 }
 0x164   :  { %v423_v62 = vpop.f32.mrf.mxu1 }
 0x165   :  { %v831_v0 = vpack.c.bf16 %v807_v40, %v807_v40  ;;  %v638_v34 = vpack.c.bf16 %v615_v6, %v615_v6  ;;  %v424_v16 = vadd.f32 %v1249_v12, %v423_v62 }
 0x167   :  { %485 = vrot.lane.b32.xlu1 %v443_v63, %s1009_s29  ;;  %873 = vrot.lane.b32.xlu0 %v831_v0, %s1011_s2  ;;  %v445_v26 = vpack.c.bf16 %v424_v16, %v424_v16  ;;  %v283_v6 = vpop.f32.mrf.mxu0 }
 0x168   :  { %679 = vrot.lane.b32.xlu2 %v637_v2, %s1010_s30  ;;  %v284_v7 = vadd.f32 %v1317_v27, %v283_v6 }
 0x16a   :  { %v617_v60 = vpop.f32.mrf.mxu2  ;;  %v808_v10 = vpop.f32.mrf.mxu3 }
 0x16b   :  { %v809_v11 = vadd.f32 %v1265_v20, %v808_v10  ;;  %v618_v17 = vadd.f32 %v1255_v15, %v617_v60  ;;  %v311_v60 = vpack.c.bf16 %v284_v7, %v284_v7 }
 0x16c   :  { %v425_v9 = vpop.f32.mrf.mxu1 }
 0x16d   :  { %v832_v13 = vpack.c.bf16 %v809_v11, %v809_v11  ;;  %v639_v21 = vpack.c.bf16 %v618_v17, %v618_v17  ;;  %v426_v4 = vadd.f32 %v1249_v12, %v425_v9  ;;  %328 = vst.msk [vmem:[%s1648_s6 + $0x20] sm:$0xf] %vm319_vm2, %v311_v60 }
 0x16f   :  { %875 = vrot.lane.b32.xlu1 %v832_v13, %s1011_s2  ;;  %681 = vrot.lane.b32.xlu0 %v638_v34, %s1010_s30  ;;  %v446_v41 = vpack.c.bf16 %v426_v4, %v426_v4 }
 0x170   :  { %487 = vrot.lane.b32.xlu2 %v444_v14, %s1009_s29 }
 0x171   :  { %v854_v19 = vpop.permute.xlu2 %853 }
 0x172   :  { %v619_v23 = vpop.f32.mrf.mxu2  ;;  %v811_v24 = vpop.f32.mrf.mxu3 }
 0x173   :  { %v812_v25 = vadd.f32 %v1265_v20, %v811_v24  ;;  %v620_v35 = vadd.f32 %v1255_v15, %v619_v23 }
 0x174   :  { %v428_v1 = vpop.f32.mrf.mxu1 }
 0x175   :  { %v833_v28 = vpack.c.bf16 %v812_v25, %v812_v25  ;;  %v640_v18 = vpack.c.bf16 %v620_v35, %v620_v35  ;;  %v429_v49 = vadd.f32 %v1249_v12, %v428_v1 }
 0x177   :  { %489 = vrot.lane.b32.xlu0 %v445_v26, %s1009_s29  ;;  %683 = vrot.lane.b32.xlu1 %v639_v21, %s1010_s30  ;;  %v447_v55 = vpack.c.bf16 %v429_v49, %v429_v49 }
 0x178   :  { %877 = vrot.lane.b32.xlu2 %v833_v28, %s1011_s2 }
 0x179   :  { %v662_v32 = vpop.permute.xlu2 %661 }
 0x17a   :  { %v622_v36 = vpop.f32.mrf.mxu2  ;;  %v813_v37 = vpop.f32.mrf.mxu3 }
 0x17b   :  { %v623_v38 = vadd.f32 %v1255_v15, %v622_v36  ;;  %v466_v39 = vpop.permute.xlu0 %465  ;;  %v814_v58 = vadd.f32 %v1265_v20, %v813_v37 }
 0x17c   :  { %514 = vst.msk [vmem:[%s1648_s6] sm:$0xf] %vm513_vm3, %v466_v39  ;;  %v430_v43 = vpop.f32.mrf.mxu1 }
 0x17d   :  { %v641_v42 = vpack.c.bf16 %v623_v38, %v623_v38  ;;  %v431_v46 = vadd.f32 %v1249_v12, %v430_v43  ;;  %v834_v3 = vpack.c.bf16 %v814_v58, %v814_v58 }
 0x17f   :  { %491 = vrot.lane.b32.xlu1 %v446_v41, %s1009_s29  ;;  %687 = vrot.lane.b32.xlu0 %v641_v42, %s1010_s30  ;;  %v448_v12 = vpack.c.bf16 %v431_v46, %v431_v46 }
 0x180   :  { %685 = vrot.lane.b32.xlu2 %v640_v18, %s1010_s30 }
 0x181   :  { %v660_v47 = vpop.permute.xlu1 %659 }
 0x182   :  { %708 = vst.msk [vmem:[%s1648_s6] sm:$0xf] %vm707_vm4, %v660_v47  ;;  %v470_v50 = vpop.permute.xlu2 %469  ;;  %v624_v51 = vpop.f32.mrf.mxu2 }
 0x183   :  { %902 = vst.msk [vmem:[%s1648_s6] sm:$0xf] %vm901_vm5, %v854_v19  ;;  %v625_v52 = vadd.f32 %v1255_v15, %v624_v51  ;;  %v816_v53 = vpop.f32.mrf.mxu3  ;;  %v281_v15 = vadd.f32 %v1317_v27, %v280_v56 }
 0x184   :  { %516 = vst.msk [vmem:[%s1648_s6 + $0x8] sm:$0xf] %vm513_vm3, %v470_v50  ;;  %v817_v57 = vadd.f32 %v1265_v20, %v816_v53 }
 0x185   :  { %v642_v54 = vpack.c.bf16 %v625_v52, %v625_v52  ;;  %v310_v40 = vpack.c.bf16 %v281_v15, %v281_v15 }
 0x186   :  { %v835_v63 = vpack.c.bf16 %v817_v57, %v817_v57 }
 0x187   :  { %689 = vrot.lane.b32.xlu1 %v642_v54, %s1010_s30  ;;  %495 = vrot.lane.b32.xlu0 %v448_v12, %s1009_s29  ;;  %327 = vst.msk [vmem:[%s1648_s6 + $0x1c] sm:$0xf] %vm319_vm2, %v310_v40 }
 0x188   :  { %493 = vrot.lane.b32.xlu2 %v447_v55, %s1009_s29 }
 0x189   :  { %v468_v61 = vpop.permute.xlu1 %467 }
 0x18a   :  { %515 = vst.msk [vmem:[%s1648_s6 + $0x4] sm:$0xf] %vm513_vm3, %v468_v61  ;;  %v860_v62 = vpop.permute.xlu2 %859 }
 0x18b   :  { %709 = vst.msk [vmem:[%s1648_s6 + $0x4] sm:$0xf] %vm707_vm4, %v662_v32  ;;  %v818_v0 = vpop.f32.mrf.mxu3 }
 0x18c   :  { %v819_v2 = vadd.f32 %v1265_v20, %v818_v0  ;;  %v285_v20 = vpop.f32.mrf.mxu0 }
 0x18d   :  { %v286_v11 = vadd.f32 %v1317_v27, %v285_v20 }
 0x18e   :  { %v836_v5 = vpack.c.bf16 %v819_v2, %v819_v2 }
 0x18f   :  { %881 = vrot.lane.b32.xlu1 %v835_v63, %s1011_s2  ;;  %879 = vrot.lane.b32.xlu0 %v834_v3, %s1011_s2  ;;  %v312_v13 = vpack.c.bf16 %v286_v11, %v286_v11 }
 0x190   :  { %883 = vrot.lane.b32.xlu2 %v836_v5, %s1011_s2 }
 0x191   :  { %v856_v8 = vpop.permute.xlu0 %855  ;;  %329 = vst.msk [vmem:[%s1648_s6 + $0x24] sm:$0xf] %vm319_vm2, %v312_v13 }
 0x192   :  { %v668_v10 = vpop.permute.xlu2 %667  ;;  %903 = vst.msk [vmem:[%s1648_s6 + $0x4] sm:$0xf] %vm901_vm5, %v856_v8 }
 0x194   :  { %v288_v59 = vpop.f32.mrf.mxu0 }
 0x195   :  { %v289_v44 = vadd.f32 %v1317_v27, %v288_v59 }
 0x197   :  { %v313_v19 = vpack.c.bf16 %v289_v44, %v289_v44 }
 0x199   :  { %v858_v9 = vpop.permute.xlu1 %857  ;;  %v664_v34 = vpop.permute.xlu0 %663  ;;  %330 = vst.msk [vmem:[%s1648_s6 + $0x28] sm:$0xf] %vm319_vm2, %v313_v19 }
 0x19a   :  { %v476_v14 = vpop.permute.xlu2 %475  ;;  %710 = vst.msk [vmem:[%s1648_s6 + $0x8] sm:$0xf] %vm707_vm4, %v664_v34 }
 0x19b   :  { %519 = vst.msk [vmem:[%s1648_s6 + $0x14] sm:$0xf] %vm513_vm3, %v476_v14 }
 0x19c   :  { %904 = vst.msk [vmem:[%s1648_s6 + $0x8] sm:$0xf] %vm901_vm5, %v858_v9  ;;  %v290_v23 = vpop.f32.mrf.mxu0 }
 0x19d   :  { %v291_v24 = vadd.f32 %v1317_v27, %v290_v23 }
 0x19f   :  { %v314_v26 = vpack.c.bf16 %v291_v24, %v291_v24 }
 0x1a1   :  { %v666_v16 = vpop.permute.xlu1 %665  ;;  %v472_v17 = vpop.permute.xlu0 %471  ;;  %331 = vst.msk [vmem:[%s1648_s6 + $0x2c] sm:$0xf] %vm319_vm2, %v314_v26 }
 0x1a2   :  { %v866_v22 = vpop.permute.xlu2 %865  ;;  %517 = vst.msk [vmem:[%s1648_s6 + $0xc] sm:$0xf] %vm513_vm3, %v472_v17 }
 0x1a3   :  { %711 = vst.msk [vmem:[%s1648_s6 + $0xc] sm:$0xf] %vm707_vm4, %v666_v16 }
 0x1a4   :  { %905 = vst.msk [vmem:[%s1648_s6 + $0xc] sm:$0xf] %vm901_vm5, %v860_v62  ;;  %v293_v28 = vpop.f32.mrf.mxu0 }
 0x1a5   :  { %v294_v30 = vadd.f32 %v1317_v27, %v293_v28 }
 0x1a7   :  { %v315_v32 = vpack.c.bf16 %v294_v30, %v294_v30 }
 0x1a9   :  { %v474_v25 = vpop.permute.xlu1 %473  ;;  %v862_v1 = vpop.permute.xlu0 %861  ;;  %332 = vst.msk [vmem:[%s1648_s6 + $0x30] sm:$0xf] %vm319_vm2, %v315_v32 }
 0x1aa   :  { %518 = vst.msk [vmem:[%s1648_s6 + $0x10] sm:$0xf] %vm513_vm3, %v474_v25  ;;  %v674_v21 = vpop.permute.xlu2 %673 }
 0x1ab   :  { %712 = vst.msk [vmem:[%s1648_s6 + $0x10] sm:$0xf] %vm707_vm4, %v668_v10 }
 0x1ac   :  { %906 = vst.msk [vmem:[%s1648_s6 + $0x10] sm:$0xf] %vm901_vm5, %v862_v1  ;;  %v295_v35 = vpop.f32.mrf.mxu0 }
 0x1ad   :  { %v296_v36 = vadd.f32 %v1317_v27, %v295_v35 }
 0x1af   :  { %v316_v39 = vpack.c.bf16 %v296_v36, %v296_v36 }
 0x1b1   :  { %v864_v31 = vpop.permute.xlu1 %863  ;;  %v670_v4 = vpop.permute.xlu0 %669  ;;  %333 = vst.msk [vmem:[%s1648_s6 + $0x34] sm:$0xf] %vm319_vm2, %v316_v39 }
 0x1b2   :  { %v482_v33 = vpop.permute.xlu2 %481  ;;  %713 = vst.msk [vmem:[%s1648_s6 + $0x14] sm:$0xf] %vm707_vm4, %v670_v4 }
 0x1b3   :  { %522 = vst.msk [vmem:[%s1648_s6 + $0x20] sm:$0xf] %vm513_vm3, %v482_v33 }
 0x1b4   :  { %907 = vst.msk [vmem:[%s1648_s6 + $0x14] sm:$0xf] %vm901_vm5, %v864_v31  ;;  %v298_v42 = vpop.f32.mrf.mxu0 }
 0x1b5   :  { %v299_v18 = vadd.f32 %v1317_v27, %v298_v42 }
 0x1b7   :  { %v317_v45 = vpack.c.bf16 %v299_v18, %v299_v18 }
 0x1b9   :  { %v672_v37 = vpop.permute.xlu1 %671  ;;  %v478_v38 = vpop.permute.xlu0 %477  ;;  %334 = vst.msk [vmem:[%s1648_s6 + $0x38] sm:$0xf] %vm319_vm2, %v317_v45 }
 0x1ba   :  { %v872_v41 = vpop.permute.xlu2 %871  ;;  %520 = vst.msk [vmem:[%s1648_s6 + $0x18] sm:$0xf] %vm513_vm3, %v478_v38 }
 0x1bb   :  { %714 = vst.msk [vmem:[%s1648_s6 + $0x18] sm:$0xf] %vm707_vm4, %v672_v37 }
 0x1bc   :  { %908 = vst.msk [vmem:[%s1648_s6 + $0x18] sm:$0xf] %vm901_vm5, %v866_v22  ;;  %v300_v53 = vpop.f32.mrf.mxu0 }
 0x1bd   :  { %v301_v12 = vadd.f32 %v1317_v27, %v300_v53 }
 0x1bf   :  { %v318_v54 = vpack.c.bf16 %v301_v12, %v301_v12 }
 0x1c1   :  { %v480_v43 = vpop.permute.xlu1 %479  ;;  %v868_v29 = vpop.permute.xlu0 %867  ;;  %335 = vst.msk [vmem:[%s1648_s6 + $0x3c] sm:$0xf] %vm319_vm2, %v318_v54 }
 0x1c2   :  { %521 = vst.msk [vmem:[%s1648_s6 + $0x1c] sm:$0xf] %vm513_vm3, %v480_v43  ;;  %v680_v46 = vpop.permute.xlu2 %679 }
 0x1c3   :  { %715 = vst.msk [vmem:[%s1648_s6 + $0x1c] sm:$0xf] %vm707_vm4, %v674_v21 }
 0x1c4   :  { %909 = vst.msk [vmem:[%s1648_s6 + $0x1c] sm:$0xf] %vm901_vm5, %v868_v29 }
 0x1c9   :  { %v870_v47 = vpop.permute.xlu1 %869  ;;  %v676_v48 = vpop.permute.xlu0 %675 }
 0x1ca   :  { %v488_v49 = vpop.permute.xlu2 %487  ;;  %716 = vst.msk [vmem:[%s1648_s6 + $0x20] sm:$0xf] %vm707_vm4, %v676_v48 }
 0x1cb   :  { %525 = vst.msk [vmem:[%s1648_s6 + $0x2c] sm:$0xf] %vm513_vm3, %v488_v49 }
 0x1cc   :  { %910 = vst.msk [vmem:[%s1648_s6 + $0x20] sm:$0xf] %vm901_vm5, %v870_v47 }
 0x1d1   :  { %v678_v50 = vpop.permute.xlu1 %677  ;;  %v484_v51 = vpop.permute.xlu0 %483 }
 0x1d2   :  { %v878_v52 = vpop.permute.xlu2 %877  ;;  %523 = vst.msk [vmem:[%s1648_s6 + $0x24] sm:$0xf] %vm513_vm3, %v484_v51 }
 0x1d3   :  { %717 = vst.msk [vmem:[%s1648_s6 + $0x24] sm:$0xf] %vm707_vm4, %v678_v50 }
 0x1d4   :  { %911 = vst.msk [vmem:[%s1648_s6 + $0x24] sm:$0xf] %vm901_vm5, %v872_v41 }
 0x1d9   :  { %v486_v55 = vpop.permute.xlu1 %485  ;;  %v874_v56 = vpop.permute.xlu0 %873 }
 0x1da   :  { %524 = vst.msk [vmem:[%s1648_s6 + $0x28] sm:$0xf] %vm513_vm3, %v486_v55  ;;  %v686_v57 = vpop.permute.xlu2 %685 }
 0x1db   :  { %718 = vst.msk [vmem:[%s1648_s6 + $0x28] sm:$0xf] %vm707_vm4, %v680_v46 }
 0x1dc   :  { %912 = vst.msk [vmem:[%s1648_s6 + $0x28] sm:$0xf] %vm901_vm5, %v874_v56 }
 0x1e1   :  { %v876_v27 = vpop.permute.xlu1 %875  ;;  %v682_v15 = vpop.permute.xlu0 %681 }
 0x1e2   :  { %v494_v58 = vpop.permute.xlu2 %493  ;;  %719 = vst.msk [vmem:[%s1648_s6 + $0x2c] sm:$0xf] %vm707_vm4, %v682_v15 }
 0x1e3   :  { %528 = vst.msk [vmem:[%s1648_s6 + $0x38] sm:$0xf] %vm513_vm3, %v494_v58 }
 0x1e4   :  { %913 = vst.msk [vmem:[%s1648_s6 + $0x2c] sm:$0xf] %vm901_vm5, %v876_v27 }
 0x1e9   :  { %v684_v61 = vpop.permute.xlu1 %683  ;;  %v490_v40 = vpop.permute.xlu0 %489 }
 0x1ea   :  { %526 = vst.msk [vmem:[%s1648_s6 + $0x30] sm:$0xf] %vm513_vm3, %v490_v40  ;;  %v884_v3 = vpop.permute.xlu2 %883 }
 0x1eb   :  { %720 = vst.msk [vmem:[%s1648_s6 + $0x30] sm:$0xf] %vm707_vm4, %v684_v61 }
 0x1ec   :  { %914 = vst.msk [vmem:[%s1648_s6 + $0x30] sm:$0xf] %vm901_vm5, %v878_v52 }
 0x1f1   :  { %v492_v62 = vpop.permute.xlu1 %491  ;;  %v688_v63 = vpop.permute.xlu0 %687 }
 0x1f2   :  { %527 = vst.msk [vmem:[%s1648_s6 + $0x34] sm:$0xf] %vm513_vm3, %v492_v62 }
 0x1f3   :  { %721 = vst.msk [vmem:[%s1648_s6 + $0x34] sm:$0xf] %vm707_vm4, %v686_v57 }
 0x1f4   :  { %722 = vst.msk [vmem:[%s1648_s6 + $0x38] sm:$0xf] %vm707_vm4, %v688_v63 }
 0x1f9   :  { %v690_v0 = vpop.permute.xlu1 %689  ;;  %v496_v2 = vpop.permute.xlu0 %495 }
 0x1fa   :  { %529 = vst.msk [vmem:[%s1648_s6 + $0x3c] sm:$0xf] %vm513_vm3, %v496_v2 }
 0x1fb   :  { %723 = vst.msk [vmem:[%s1648_s6 + $0x3c] sm:$0xf] %vm707_vm4, %v690_v0 }
 0x1fc   :  { %917 = vst.msk [vmem:[%s1648_s6 + $0x3c] sm:$0xf] %vm901_vm5, %v884_v3 }
 0x201   :  { %v882_v5 = vpop.permute.xlu1 %881  ;;  %v880_v6 = vpop.permute.xlu0 %879 }
 0x202   :  { %916 = vst.msk [vmem:[%s1648_s6 + $0x38] sm:$0xf] %vm901_vm5, %v882_v5 }
 0x203   :  { %915 = vst.msk [vmem:[%s1648_s6 + $0x34] sm:$0xf] %vm901_vm5, %v880_v6 }

</bundles_post_ra>
